<compile_context>
chip_gen: v7x
topology: tpu7x:2x2x1
jax: 0.10.0
libtpu: 0.0.40
codegen_flags: <defaults>
</compile_context>

<pallas_src>
import jax
import jax.numpy as jnp
from jax.experimental import pallas as pl
from jax.experimental.pallas import tpu as pltpu


# ---------------------------------------------------------------------------
# Kernel 1: conv1 as a lane-dense GEMM.
#   x_ref : [R, 36]    R = batch_tile*169; each row packs 4 consecutive 3x3 patches
#   w_ref : [36, 128]  block-diagonal: 4 copies of the [9,32] conv1 matrix
#   b_ref : [1, 128]   conv1 bias tiled 4x
#   o_ref : [R, 128]   reinterpreted by the wrapper as [B, 26, 26, 32] (same bytes)
# ---------------------------------------------------------------------------
def _conv1_kernel(x_ref, w_ref, b_ref, o_ref):
    y = jnp.dot(x_ref[...], w_ref[...], preferred_element_type=jnp.float32)
    o_ref[...] = jnp.maximum(y + b_ref[...], 0.0)


def conv1_gemm(patches, w_bd, b_tiled, *, batch_tile):
    rows, k = patches.shape
    n = w_bd.shape[1]
    row_blk = batch_tile * 169
    flops = 2 * rows * k * n
    bytes_accessed = 4 * (rows * k + k * n + n + rows * n)
    return pl.pallas_call(
        _conv1_kernel,
        out_shape=jax.ShapeDtypeStruct((rows, n), jnp.float32),
        grid=(rows // row_blk,),
        in_specs=[
            pl.BlockSpec((row_blk, k), lambda i: (i, 0)),
            pl.BlockSpec((k, n), lambda i: (0, 0)),
            pl.BlockSpec((1, n), lambda i: (0, 0)),
        ],
        out_specs=pl.BlockSpec((row_blk, n), lambda i: (i, 0)),
        compiler_params=pltpu.CompilerParams(dimension_semantics=("parallel",)),
        cost_estimate=pl.CostEstimate(flops=flops, transcendentals=0,
                                      bytes_accessed=bytes_accessed),
    )(patches, w_bd, b_tiled)


# ---------------------------------------------------------------------------
# Kernel 2: conv2 + bias + ReLU + 2x2 max-pool, fused.  Gridded over batch tiles.
#   h1_ref : [BT, 26, 26, 32]  conv1 activations (VMEM tile)
#   w2_ref : [9, 32, 64]       one [Cin, Cout] slab per (kh, kw)
#   b2_ref : [1, 64]
#   out_ref: [BT*144, 64]      pooled activations; row = (b, h_out, w_out), lanes = channels
#   hp_ref : [288, 64]         scratch: H-pooled rows of one sample, (h_out, w) order
# ---------------------------------------------------------------------------
def _conv2_pool_kernel(h1_ref, w2_ref, b2_ref, out_ref, hp_ref):
    bt = h1_ref.shape[0]
    b2 = b2_ref[...]

    def per_sample(t, carry):
        # conv2 as 9 shifted GEMM accumulations (no im2col buffer), split by the parity
        # of the output row so the 2x2 pool over H is a single elementwise max.
        def row_band(parity):
            acc = jnp.zeros((288, 64), jnp.float32)
            for k in range(9):
                kh, kw = divmod(k, 3)
                # output rows i = parity, parity+2, ..., parity+22  ->  h1 rows i+kh
                win = h1_ref[t, pl.ds(kh + parity, 12, 2), kw:kw + 24, :]   # [12,24,32]
                acc = acc + jnp.dot(win.reshape(288, 32), w2_ref[k],
                                    preferred_element_type=jnp.float32)
            return jnp.maximum(acc + b2, 0.0)            # bias + ReLU, [288, 64]

        hp_ref[...] = row_band(0)                        # even output rows
        hp_ref[...] = jnp.maximum(hp_ref[...], row_band(1))   # max-pool over H
        # max-pool over W via stride-2 VMEM reads -> [144, 64], rows = (h_out, w_out)
        pooled = jnp.maximum(hp_ref[pl.ds(0, 144, 2), :],
                             hp_ref[pl.ds(1, 144, 2), :])
        row0 = pl.multiple_of(t * 144, 8)
        out_ref[pl.ds(row0, 144), :] = pooled
        return carry

    jax.lax.fori_loop(0, bt, per_sample, 0)


def conv2_pool(h1, w2, b2, *, batch_tile):
    b_pad = h1.shape[0]
    flops = 2 * b_pad * 9 * 576 * 32 * 64
    bytes_accessed = 4 * (b_pad * 676 * 32 + 9 * 32 * 64 + 64 + b_pad * 144 * 64)
    return pl.pallas_call(
        _conv2_pool_kernel,
        out_shape=jax.ShapeDtypeStruct((b_pad * 144, 64), jnp.float32),
        grid=(b_pad // batch_tile,),
        in_specs=[
            pl.BlockSpec((batch_tile, 26, 26, 32), lambda i: (i, 0, 0, 0)),
            pl.BlockSpec((9, 32, 64), lambda i: (0, 0, 0)),
            pl.BlockSpec((1, 64), lambda i: (0, 0)),
        ],
        out_specs=pl.BlockSpec((batch_tile * 144, 64), lambda i: (i, 0)),
        scratch_shapes=[pltpu.VMEM((288, 64), jnp.float32)],
        compiler_params=pltpu.CompilerParams(
            dimension_semantics=("parallel",),
            vmem_limit_bytes=32 * 1024 * 1024),
        cost_estimate=pl.CostEstimate(flops=flops, transcendentals=0,
                                      bytes_accessed=bytes_accessed),
    )(h1, w2, b2)


# ---------------------------------------------------------------------------
# Kernel 3: fc1 + ReLU + fc2, fused.  Activations are tiny; weights stay VMEM-resident.
# TODO(synk): row-tile this call for very large batch sizes (>~500) to stay within VMEM.
# ---------------------------------------------------------------------------
def _fc_kernel(x_ref, w1_ref, b1_ref, w2_ref, b2_ref, o_ref):
    h = jnp.dot(x_ref[...], w1_ref[...], preferred_element_type=jnp.float32)
    h = jnp.maximum(h + b1_ref[...], 0.0)
    o_ref[...] = jnp.dot(h, w2_ref[...], preferred_element_type=jnp.float32) + b2_ref[...]


def fc_head(flat, wf1, bf1, wf2, bf2):
    b_pad = flat.shape[0]
    vmem = pl.BlockSpec(memory_space=pltpu.MemorySpace.VMEM)
    flops = 2 * b_pad * (9216 * 128 + 128 * 10)
    bytes_accessed = 4 * (b_pad * 9216 + 9216 * 128 + 128 + 128 * 10 + 10 + b_pad * 10)
    return pl.pallas_call(
        _fc_kernel,
        out_shape=jax.ShapeDtypeStruct((b_pad, 10), jnp.float32),
        in_specs=[vmem] * 5,
        out_specs=vmem,
        cost_estimate=pl.CostEstimate(flops=flops, transcendentals=0,
                                      bytes_accessed=bytes_accessed),
    )(flat, wf1, bf1, wf2, bf2)


# ---------------------------------------------------------------------------
# Parameters (PyTorch shape conventions) + one-time layout preparation.
# ---------------------------------------------------------------------------
def init_params(key):
    ks = jax.random.split(key, 8)

    def u(k, shape, fan_in):
        bound = 1.0 / jnp.sqrt(float(fan_in))
        return jax.random.uniform(k, shape, jnp.float32, -bound, bound)

    return {
        "conv1_w": u(ks[0], (32, 1, 3, 3), 1 * 3 * 3),
        "conv1_b": u(ks[1], (32,), 1 * 3 * 3),
        "conv2_w": u(ks[2], (64, 32, 3, 3), 32 * 3 * 3),
        "conv2_b": u(ks[3], (64,), 32 * 3 * 3),
        "fc1_w": u(ks[4], (128, 12 * 12 * 64), 12 * 12 * 64),
        "fc1_b": u(ks[5], (128,), 12 * 12 * 64),
        "fc2_w": u(ks[6], (10, 128), 128),
        "fc2_b": u(ks[7], (10,), 128),
    }


def prepare_params(params):
    """One-time weight layout transforms (hoisted out of the per-forward path)."""
    # conv1: (co,ci,kh,kw) -> [9, 32] with k = kh*3+kw, then 4x block-diagonal -> [36, 128]
    w1 = params["conv1_w"].transpose(2, 3, 1, 0).reshape(9, 32)
    w1_bd = jnp.zeros((36, 128), jnp.float32)
    for r in range(4):
        w1_bd = w1_bd.at[r * 9:(r + 1) * 9, r * 32:(r + 1) * 32].set(w1)
    b1 = jnp.tile(params["conv1_b"].reshape(1, 32), (1, 4))            # [1, 128]
    # conv2: one [Cin, Cout] slab per (kh, kw)
    w2 = params["conv2_w"].transpose(2, 3, 1, 0).reshape(9, 32, 64)
    b2 = params["conv2_b"].reshape(1, 64)
    # fc1: permute the input axis from PyTorch (C,H,W) flatten order to our (H,W,C) order
    wf1 = (params["fc1_w"].reshape(128, 64, 12, 12)
           .transpose(2, 3, 1, 0).reshape(12 * 12 * 64, 128))
    bf1 = params["fc1_b"].reshape(1, 128)
    wf2 = params["fc2_w"].T                                            # [128, 10]
    bf2 = params["fc2_b"].reshape(1, 10)
    return {"w1_bd": w1_bd, "b1": b1, "w2": w2, "b2": b2,
            "wf1": wf1, "bf1": bf1, "wf2": wf2, "bf2": bf2}


# ---------------------------------------------------------------------------
# Forward pass.
# ---------------------------------------------------------------------------
def _batch_tile(batch):
    # Even tile <= 8 so every row-block stays sublane(8)-aligned (or covers the full array).
    return 8 if batch >= 8 else batch + (batch % 2)


@jax.jit
def simple_cnn_forward(x_nchw, prep):
    B = x_nchw.shape[0]
    bt = _batch_tile(B)
    b_pad = ((B + bt - 1) // bt) * bt

    x = x_nchw.reshape(B, 28, 28)                       # C=1 squeeze (free)
    if b_pad != B:
        x = jnp.pad(x, ((0, b_pad - B), (0, 0), (0, 0)))

    # 3x3 'valid' patches of the raw input (tiny: 36 B per output pixel).  Four consecutive
    # patches share one 36-wide row so the conv1 GEMM output is lane-dense (last dim 128).
    cols = [x[:, kh:kh + 26, kw:kw + 26] for kh in range(3) for kw in range(3)]
    patches = jnp.stack(cols, axis=-1).reshape(b_pad * 169, 36)

    h1 = conv1_gemm(patches, prep["w1_bd"], prep["b1"], batch_tile=bt)  # [b*169, 128]
    h1 = h1.reshape(b_pad, 26, 26, 32)                  # same bytes, free reshape

    pooled = conv2_pool(h1, prep["w2"], prep["b2"], batch_tile=bt)      # [b*144, 64]
    flat = pooled.reshape(b_pad, 12 * 12 * 64)          # (h,w,c) order; free reshape

    logits = fc_head(flat, prep["wf1"], prep["bf1"], prep["wf2"], prep["bf2"])
    return logits[:B]


if __name__ == "__main__":
    key = jax.random.PRNGKey(0)
    k_x, k_p = jax.random.split(key)

    # Input spatial size must be 28x28 so that fc1's 12*12*64 flatten is valid.
    x = jax.random.normal(k_x, (2, 1, 28, 28), dtype=jnp.float32)
    params = init_params(k_p)
    prep = prepare_params(params)

    logits = simple_cnn_forward(x, prep)
    jax.block_until_ready(logits)
    assert logits.shape == (2, 10) and logits.dtype == jnp.float32
    print("KERNEL_OK")
</pallas_src>

<mosaic_0001>
module attributes {stable_mosaic.version = 11 : i64} {
  func.func @_conv1_kernel(%arg0: i32, %arg1: memref<338x36xf32, #tpu.memory_space<vmem>>, %arg2: memref<36x128xf32, #tpu.memory_space<vmem>>, %arg3: memref<1x128xf32, #tpu.memory_space<vmem>>, %arg4: memref<338x128xf32, #tpu.memory_space<vmem>>) attributes {dimension_semantics = [#tpu.dimension_semantics<parallel>], iteration_bounds = array<i64: 1>, scalar_prefetch = 0 : i64, scratch_operands = 0 : i64, tpu.core_type = #tpu.core_type<tc>, window_params = [{transform_indices = @transform_0, window_bounds = array<i64: 338, 36>}, {pipeline_mode = #tpu.pipeline_mode<synchronous>, transform_indices = @transform_1, window_bounds = array<i64: 36, 128>}, {pipeline_mode = #tpu.pipeline_mode<synchronous>, transform_indices = @transform_2, window_bounds = array<i64: 1, 128>}, {transform_indices = @transform_3, window_bounds = array<i64: 338, 128>}]} {
    %c0 = arith.constant 0 : index
    %c0_0 = arith.constant 0 : index
    %0 = vector.load %arg1[%c0, %c0_0] : memref<338x36xf32, #tpu.memory_space<vmem>>, vector<338x36xf32>
    %c0_1 = arith.constant 0 : index
    %c0_2 = arith.constant 0 : index
    %1 = vector.load %arg2[%c0_1, %c0_2] : memref<36x128xf32, #tpu.memory_space<vmem>>, vector<36x128xf32>
    %cst = arith.constant dense<0.000000e+00> : vector<338x128xf32>
    %2 = tpu.matmul %0, %1, %cst {dimension_numbers = #tpu.dot_dimension_numbers<[1], [0], [0], [1], [0, 0, 1, 1], [], []>} : vector<338x36xf32>, vector<36x128xf32>, vector<338x128xf32> -> vector<338x128xf32>
    %c0_3 = arith.constant 0 : index
    %c0_4 = arith.constant 0 : index
    %3 = vector.load %arg3[%c0_3, %c0_4] : memref<1x128xf32, #tpu.memory_space<vmem>>, vector<1x128xf32>
    %4 = vector.broadcast %3 : vector<1x128xf32> to vector<338x128xf32>
    %5 = arith.addf %2, %4 : vector<338x128xf32>
    %cst_5 = arith.constant 0.000000e+00 : f32
    %6 = vector.broadcast %cst_5 : f32 to vector<338x128xf32>
    %7 = arith.maximumf %5, %6 : vector<338x128xf32>
    %c0_6 = arith.constant 0 : index
    %c0_7 = arith.constant 0 : index
    %8 = vector.load %arg4[%c0_6, %c0_7] : memref<338x128xf32, #tpu.memory_space<vmem>>, vector<338x128xf32>
    tpu.vector_store %arg4[%c0_6, %c0_7], %7 {strides = array<i32>} : memref<338x128xf32, #tpu.memory_space<vmem>>, vector<338x128xf32>,
    return
  }
  func.func @transform_0(%arg0: i32) -> (i32, i32) {
    %c0_i32 = arith.constant 0 : i32
    %c0_i32_0 = arith.constant 0 : i32
    return %arg0, %c0_i32 : i32, i32
  }
  func.func @transform_1(%arg0: i32) -> (i32, i32) {
    %c0_i32 = arith.constant 0 : i32
    %c0_i32_0 = arith.constant 0 : i32
    %c0_i32_1 = arith.constant 0 : i32
    return %c0_i32, %c0_i32_0 : i32, i32
  }
  func.func @transform_2(%arg0: i32) -> (i32, i32) {
    %c0_i32 = arith.constant 0 : i32
    %c0_i32_0 = arith.constant 0 : i32
    %c0_i32_1 = arith.constant 0 : i32
    return %c0_i32, %c0_i32_0 : i32, i32
  }
  func.func @transform_3(%arg0: i32) -> (i32, i32) {
    %c0_i32 = arith.constant 0 : i32
    %c0_i32_0 = arith.constant 0 : i32
    return %arg0, %c0_i32 : i32, i32
  }
}

module attributes {stable_mosaic.version = 11 : i64} {
  func.func @_conv2_pool_kernel(%arg0: i32, %arg1: memref<2x26x26x32xf32, #tpu.memory_space<vmem>>, %arg2: memref<9x32x64xf32, #tpu.memory_space<vmem>>, %arg3: memref<1x64xf32, #tpu.memory_space<vmem>>, %arg4: memref<288x64xf32, #tpu.memory_space<vmem>>, %arg5: memref<288x64xf32, #tpu.memory_space<vmem>>) attributes {dimension_semantics = [#tpu.dimension_semantics<parallel>], iteration_bounds = array<i64: 1>, scalar_prefetch = 0 : i64, scratch_operands = 1 : i64, tpu.core_type = #tpu.core_type<tc>, window_params = [{transform_indices = @transform_0, window_bounds = array<i64: 2, 26, 26, 32>}, {pipeline_mode = #tpu.pipeline_mode<synchronous>, transform_indices = @transform_1, window_bounds = array<i64: 9, 32, 64>}, {pipeline_mode = #tpu.pipeline_mode<synchronous>, transform_indices = @transform_2, window_bounds = array<i64: 1, 64>}, {transform_indices = @transform_3, window_bounds = array<i64: 288, 64>}]} {
    %c0 = arith.constant 0 : index
    %c0_0 = arith.constant 0 : index
    %0 = vector.load %arg3[%c0, %c0_0] : memref<1x64xf32, #tpu.memory_space<vmem>>, vector<1x64xf32>
    %c0_i32 = arith.constant 0 : i32
    %c2_i32 = arith.constant 2 : i32
    %1 = arith.addi %c0_i32, %c2_i32 : i32
    %c1_i32 = arith.constant 1 : i32
    scf.for %arg6 = %c0_i32 to %1 step %c1_i32  : i32 {
      %cst = arith.constant 0.000000e+00 : f32
      %2 = vector.broadcast %cst : f32 to vector<288x64xf32>
      %3 = arith.index_cast %arg6 : i32 to index
      %c0_2 = arith.constant 0 : index
      %c0_3 = arith.constant 0 : index
      %c0_4 = arith.constant 0 : index
      %4 = tpu.strided_load %arg1[%3, %c0_2, %c0_3, %c0_4] {strides = array<i32: 1, 2, 1, 1>} : memref<2x26x26x32xf32, #tpu.memory_space<vmem>>, vector<1x12x24x32xf32>
      %5 = vector.shape_cast %4 : vector<1x12x24x32xf32> to vector<12x24x32xf32>
      %6 = vector.shape_cast %5 : vector<12x24x32xf32> to vector<288x32xf32>
      %c0_5 = arith.constant 0 : index
      %c0_6 = arith.constant 0 : index
      %c0_7 = arith.constant 0 : index
      %7 = vector.load %arg2[%c0_5, %c0_6, %c0_7] : memref<9x32x64xf32, #tpu.memory_space<vmem>>, vector<1x32x64xf32>
      %8 = vector.shape_cast %7 : vector<1x32x64xf32> to vector<32x64xf32>
      %cst_8 = arith.constant dense<0.000000e+00> : vector<288x64xf32>
      %9 = tpu.matmul %6, %8, %cst_8 {dimension_numbers = #tpu.dot_dimension_numbers<[1], [0], [0], [1], [0, 0, 1, 1], [], []>} : vector<288x32xf32>, vector<32x64xf32>, vector<288x64xf32> -> vector<288x64xf32>
      %10 = arith.addf %2, %9 : vector<288x64xf32>
      %11 = arith.index_cast %arg6 : i32 to index
      %c0_9 = arith.constant 0 : index
      %c1 = arith.constant 1 : index
      %c0_10 = arith.constant 0 : index
      %12 = tpu.strided_load %arg1[%11, %c0_9, %c1, %c0_10] {strides = array<i32: 1, 2, 1, 1>} : memref<2x26x26x32xf32, #tpu.memory_space<vmem>>, vector<1x12x24x32xf32>
      %13 = vector.shape_cast %12 : vector<1x12x24x32xf32> to vector<12x24x32xf32>
      %14 = vector.shape_cast %13 : vector<12x24x32xf32> to vector<288x32xf32>
      %c1_11 = arith.constant 1 : index
      %c0_12 = arith.constant 0 : index
      %c0_13 = arith.constant 0 : index
      %15 = vector.load %arg2[%c1_11, %c0_12, %c0_13] : memref<9x32x64xf32, #tpu.memory_space<vmem>>, vector<1x32x64xf32>
      %16 = vector.shape_cast %15 : vector<1x32x64xf32> to vector<32x64xf32>
      %cst_14 = arith.constant dense<0.000000e+00> : vector<288x64xf32>
      %17 = tpu.matmul %14, %16, %cst_14 {dimension_numbers = #tpu.dot_dimension_numbers<[1], [0], [0], [1], [0, 0, 1, 1], [], []>} : vector<288x32xf32>, vector<32x64xf32>, vector<288x64xf32> -> vector<288x64xf32>
      %18 = arith.addf %10, %17 : vector<288x64xf32>
      %19 = arith.index_cast %arg6 : i32 to index
      %c0_15 = arith.constant 0 : index
      %c2 = arith.constant 2 : index
      %c0_16 = arith.constant 0 : index
      %20 = tpu.strided_load %arg1[%19, %c0_15, %c2, %c0_16] {strides = array<i32: 1, 2, 1, 1>} : memref<2x26x26x32xf32, #tpu.memory_space<vmem>>, vector<1x12x24x32xf32>
      %21 = vector.shape_cast %20 : vector<1x12x24x32xf32> to vector<12x24x32xf32>
      %22 = vector.shape_cast %21 : vector<12x24x32xf32> to vector<288x32xf32>
      %c2_17 = arith.constant 2 : index
      %c0_18 = arith.constant 0 : index
      %c0_19 = arith.constant 0 : index
      %23 = vector.load %arg2[%c2_17, %c0_18, %c0_19] : memref<9x32x64xf32, #tpu.memory_space<vmem>>, vector<1x32x64xf32>
      %24 = vector.shape_cast %23 : vector<1x32x64xf32> to vector<32x64xf32>
      %cst_20 = arith.constant dense<0.000000e+00> : vector<288x64xf32>
      %25 = tpu.matmul %22, %24, %cst_20 {dimension_numbers = #tpu.dot_dimension_numbers<[1], [0], [0], [1], [0, 0, 1, 1], [], []>} : vector<288x32xf32>, vector<32x64xf32>, vector<288x64xf32> -> vector<288x64xf32>
      %26 = arith.addf %18, %25 : vector<288x64xf32>
      %27 = arith.index_cast %arg6 : i32 to index
      %c1_21 = arith.constant 1 : index
      %c0_22 = arith.constant 0 : index
      %c0_23 = arith.constant 0 : index
      %28 = tpu.strided_load %arg1[%27, %c1_21, %c0_22, %c0_23] {strides = array<i32: 1, 2, 1, 1>} : memref<2x26x26x32xf32, #tpu.memory_space<vmem>>, vector<1x12x24x32xf32>
      %29 = vector.shape_cast %28 : vector<1x12x24x32xf32> to vector<12x24x32xf32>
      %30 = vector.shape_cast %29 : vector<12x24x32xf32> to vector<288x32xf32>
      %c3 = arith.constant 3 : index
      %c0_24 = arith.constant 0 : index
      %c0_25 = arith.constant 0 : index
      %31 = vector.load %arg2[%c3, %c0_24, %c0_25] : memref<9x32x64xf32, #tpu.memory_space<vmem>>, vector<1x32x64xf32>
      %32 = vector.shape_cast %31 : vector<1x32x64xf32> to vector<32x64xf32>
      %cst_26 = arith.constant dense<0.000000e+00> : vector<288x64xf32>
      %33 = tpu.matmul %30, %32, %cst_26 {dimension_numbers = #tpu.dot_dimension_numbers<[1], [0], [0], [1], [0, 0, 1, 1], [], []>} : vector<288x32xf32>, vector<32x64xf32>, vector<288x64xf32> -> vector<288x64xf32>
      %34 = arith.addf %26, %33 : vector<288x64xf32>
      %35 = arith.index_cast %arg6 : i32 to index
      %c1_27 = arith.constant 1 : index
      %c1_28 = arith.constant 1 : index
      %c0_29 = arith.constant 0 : index
      %36 = tpu.strided_load %arg1[%35, %c1_27, %c1_28, %c0_29] {strides = array<i32: 1, 2, 1, 1>} : memref<2x26x26x32xf32, #tpu.memory_space<vmem>>, vector<1x12x24x32xf32>
      %37 = vector.shape_cast %36 : vector<1x12x24x32xf32> to vector<12x24x32xf32>
      %38 = vector.shape_cast %37 : vector<12x24x32xf32> to vector<288x32xf32>
      %c4 = arith.constant 4 : index
      %c0_30 = arith.constant 0 : index
      %c0_31 = arith.constant 0 : index
      %39 = vector.load %arg2[%c4, %c0_30, %c0_31] : memref<9x32x64xf32, #tpu.memory_space<vmem>>, vector<1x32x64xf32>
      %40 = vector.shape_cast %39 : vector<1x32x64xf32> to vector<32x64xf32>
      %cst_32 = arith.constant dense<0.000000e+00> : vector<288x64xf32>
      %41 = tpu.matmul %38, %40, %cst_32 {dimension_numbers = #tpu.dot_dimension_numbers<[1], [0], [0], [1], [0, 0, 1, 1], [], []>} : vector<288x32xf32>, vector<32x64xf32>, vector<288x64xf32> -> vector<288x64xf32>
      %42 = arith.addf %34, %41 : vector<288x64xf32>
      %43 = arith.index_cast %arg6 : i32 to index
      %c1_33 = arith.constant 1 : index
      %c2_34 = arith.constant 2 : index
      %c0_35 = arith.constant 0 : index
      %44 = tpu.strided_load %arg1[%43, %c1_33, %c2_34, %c0_35] {strides = array<i32: 1, 2, 1, 1>} : memref<2x26x26x32xf32, #tpu.memory_space<vmem>>, vector<1x12x24x32xf32>
      %45 = vector.shape_cast %44 : vector<1x12x24x32xf32> to vector<12x24x32xf32>
      %46 = vector.shape_cast %45 : vector<12x24x32xf32> to vector<288x32xf32>
      %c5 = arith.constant 5 : index
      %c0_36 = arith.constant 0 : index
      %c0_37 = arith.constant 0 : index
      %47 = vector.load %arg2[%c5, %c0_36, %c0_37] : memref<9x32x64xf32, #tpu.memory_space<vmem>>, vector<1x32x64xf32>
      %48 = vector.shape_cast %47 : vector<1x32x64xf32> to vector<32x64xf32>
      %cst_38 = arith.constant dense<0.000000e+00> : vector<288x64xf32>
      %49 = tpu.matmul %46, %48, %cst_38 {dimension_numbers = #tpu.dot_dimension_numbers<[1], [0], [0], [1], [0, 0, 1, 1], [], []>} : vector<288x32xf32>, vector<32x64xf32>, vector<288x64xf32> -> vector<288x64xf32>
      %50 = arith.addf %42, %49 : vector<288x64xf32>
      %51 = arith.index_cast %arg6 : i32 to index
      %c2_39 = arith.constant 2 : index
      %c0_40 = arith.constant 0 : index
      %c0_41 = arith.constant 0 : index
      %52 = tpu.strided_load %arg1[%51, %c2_39, %c0_40, %c0_41] {strides = array<i32: 1, 2, 1, 1>} : memref<2x26x26x32xf32, #tpu.memory_space<vmem>>, vector<1x12x24x32xf32>
      %53 = vector.shape_cast %52 : vector<1x12x24x32xf32> to vector<12x24x32xf32>
      %54 = vector.shape_cast %53 : vector<12x24x32xf32> to vector<288x32xf32>
      %c6 = arith.constant 6 : index
      %c0_42 = arith.constant 0 : index
      %c0_43 = arith.constant 0 : index
      %55 = vector.load %arg2[%c6, %c0_42, %c0_43] : memref<9x32x64xf32, #tpu.memory_space<vmem>>, vector<1x32x64xf32>
      %56 = vector.shape_cast %55 : vector<1x32x64xf32> to vector<32x64xf32>
      %cst_44 = arith.constant dense<0.000000e+00> : vector<288x64xf32>
      %57 = tpu.matmul %54, %56, %cst_44 {dimension_numbers = #tpu.dot_dimension_numbers<[1], [0], [0], [1], [0, 0, 1, 1], [], []>} : vector<288x32xf32>, vector<32x64xf32>, vector<288x64xf32> -> vector<288x64xf32>
      %58 = arith.addf %50, %57 : vector<288x64xf32>
      %59 = arith.index_cast %arg6 : i32 to index
      %c2_45 = arith.constant 2 : index
      %c1_46 = arith.constant 1 : index
      %c0_47 = arith.constant 0 : index
      %60 = tpu.strided_load %arg1[%59, %c2_45, %c1_46, %c0_47] {strides = array<i32: 1, 2, 1, 1>} : memref<2x26x26x32xf32, #tpu.memory_space<vmem>>, vector<1x12x24x32xf32>
      %61 = vector.shape_cast %60 : vector<1x12x24x32xf32> to vector<12x24x32xf32>
      %62 = vector.shape_cast %61 : vector<12x24x32xf32> to vector<288x32xf32>
      %c7 = arith.constant 7 : index
      %c0_48 = arith.constant 0 : index
      %c0_49 = arith.constant 0 : index
      %63 = vector.load %arg2[%c7, %c0_48, %c0_49] : memref<9x32x64xf32, #tpu.memory_space<vmem>>, vector<1x32x64xf32>
      %64 = vector.shape_cast %63 : vector<1x32x64xf32> to vector<32x64xf32>
      %cst_50 = arith.constant dense<0.000000e+00> : vector<288x64xf32>
      %65 = tpu.matmul %62, %64, %cst_50 {dimension_numbers = #tpu.dot_dimension_numbers<[1], [0], [0], [1], [0, 0, 1, 1], [], []>} : vector<288x32xf32>, vector<32x64xf32>, vector<288x64xf32> -> vector<288x64xf32>
      %66 = arith.addf %58, %65 : vector<288x64xf32>
      %67 = arith.index_cast %arg6 : i32 to index
      %c2_51 = arith.constant 2 : index
      %c2_52 = arith.constant 2 : index
      %c0_53 = arith.constant 0 : index
      %68 = tpu.strided_load %arg1[%67, %c2_51, %c2_52, %c0_53] {strides = array<i32: 1, 2, 1, 1>} : memref<2x26x26x32xf32, #tpu.memory_space<vmem>>, vector<1x12x24x32xf32>
      %69 = vector.shape_cast %68 : vector<1x12x24x32xf32> to vector<12x24x32xf32>
      %70 = vector.shape_cast %69 : vector<12x24x32xf32> to vector<288x32xf32>
      %c8 = arith.constant 8 : index
      %c0_54 = arith.constant 0 : index
      %c0_55 = arith.constant 0 : index
      %71 = vector.load %arg2[%c8, %c0_54, %c0_55] : memref<9x32x64xf32, #tpu.memory_space<vmem>>, vector<1x32x64xf32>
      %72 = vector.shape_cast %71 : vector<1x32x64xf32> to vector<32x64xf32>
      %cst_56 = arith.constant dense<0.000000e+00> : vector<288x64xf32>
      %73 = tpu.matmul %70, %72, %cst_56 {dimension_numbers = #tpu.dot_dimension_numbers<[1], [0], [0], [1], [0, 0, 1, 1], [], []>} : vector<288x32xf32>, vector<32x64xf32>, vector<288x64xf32> -> vector<288x64xf32>
      %74 = arith.addf %66, %73 : vector<288x64xf32>
      %75 = vector.broadcast %0 : vector<1x64xf32> to vector<288x64xf32>
      %76 = arith.addf %74, %75 : vector<288x64xf32>
      %cst_57 = arith.constant 0.000000e+00 : f32
      %77 = vector.broadcast %cst_57 : f32 to vector<288x64xf32>
      %78 = arith.maximumf %76, %77 : vector<288x64xf32>
      %c0_58 = arith.constant 0 : index
      %c0_59 = arith.constant 0 : index
      %79 = vector.load %arg5[%c0_58, %c0_59] : memref<288x64xf32, #tpu.memory_space<vmem>>, vector<288x64xf32>
      tpu.vector_store %arg5[%c0_58, %c0_59], %78 {strides = array<i32>} : memref<288x64xf32, #tpu.memory_space<vmem>>, vector<288x64xf32>,
      %c0_60 = arith.constant 0 : index
      %c0_61 = arith.constant 0 : index
      %80 = vector.load %arg5[%c0_60, %c0_61] : memref<288x64xf32, #tpu.memory_space<vmem>>, vector<288x64xf32>
      %cst_62 = arith.constant 0.000000e+00 : f32
      %81 = vector.broadcast %cst_62 : f32 to vector<288x64xf32>
      %82 = arith.index_cast %arg6 : i32 to index
      %c1_63 = arith.constant 1 : index
      %c0_64 = arith.constant 0 : index
      %c0_65 = arith.constant 0 : index
      %83 = tpu.strided_load %arg1[%82, %c1_63, %c0_64, %c0_65] {strides = array<i32: 1, 2, 1, 1>} : memref<2x26x26x32xf32, #tpu.memory_space<vmem>>, vector<1x12x24x32xf32>
      %84 = vector.shape_cast %83 : vector<1x12x24x32xf32> to vector<12x24x32xf32>
      %85 = vector.shape_cast %84 : vector<12x24x32xf32> to vector<288x32xf32>
      %c0_66 = arith.constant 0 : index
      %c0_67 = arith.constant 0 : index
      %c0_68 = arith.constant 0 : index
      %86 = vector.load %arg2[%c0_66, %c0_67, %c0_68] : memref<9x32x64xf32, #tpu.memory_space<vmem>>, vector<1x32x64xf32>
      %87 = vector.shape_cast %86 : vector<1x32x64xf32> to vector<32x64xf32>
      %cst_69 = arith.constant dense<0.000000e+00> : vector<288x64xf32>
      %88 = tpu.matmul %85, %87, %cst_69 {dimension_numbers = #tpu.dot_dimension_numbers<[1], [0], [0], [1], [0, 0, 1, 1], [], []>} : vector<288x32xf32>, vector<32x64xf32>, vector<288x64xf32> -> vector<288x64xf32>
      %89 = arith.addf %81, %88 : vector<288x64xf32>
      %90 = arith.index_cast %arg6 : i32 to index
      %c1_70 = arith.constant 1 : index
      %c1_71 = arith.constant 1 : index
      %c0_72 = arith.constant 0 : index
      %91 = tpu.strided_load %arg1[%90, %c1_70, %c1_71, %c0_72] {strides = array<i32: 1, 2, 1, 1>} : memref<2x26x26x32xf32, #tpu.memory_space<vmem>>, vector<1x12x24x32xf32>
      %92 = vector.shape_cast %91 : vector<1x12x24x32xf32> to vector<12x24x32xf32>
      %93 = vector.shape_cast %92 : vector<12x24x32xf32> to vector<288x32xf32>
      %c1_73 = arith.constant 1 : index
      %c0_74 = arith.constant 0 : index
      %c0_75 = arith.constant 0 : index
      %94 = vector.load %arg2[%c1_73, %c0_74, %c0_75] : memref<9x32x64xf32, #tpu.memory_space<vmem>>, vector<1x32x64xf32>
      %95 = vector.shape_cast %94 : vector<1x32x64xf32> to vector<32x64xf32>
      %cst_76 = arith.constant dense<0.000000e+00> : vector<288x64xf32>
      %96 = tpu.matmul %93, %95, %cst_76 {dimension_numbers = #tpu.dot_dimension_numbers<[1], [0], [0], [1], [0, 0, 1, 1], [], []>} : vector<288x32xf32>, vector<32x64xf32>, vector<288x64xf32> -> vector<288x64xf32>
      %97 = arith.addf %89, %96 : vector<288x64xf32>
      %98 = arith.index_cast %arg6 : i32 to index
      %c1_77 = arith.constant 1 : index
      %c2_78 = arith.constant 2 : index
      %c0_79 = arith.constant 0 : index
      %99 = tpu.strided_load %arg1[%98, %c1_77, %c2_78, %c0_79] {strides = array<i32: 1, 2, 1, 1>} : memref<2x26x26x32xf32, #tpu.memory_space<vmem>>, vector<1x12x24x32xf32>
      %100 = vector.shape_cast %99 : vector<1x12x24x32xf32> to vector<12x24x32xf32>
      %101 = vector.shape_cast %100 : vector<12x24x32xf32> to vector<288x32xf32>
      %c2_80 = arith.constant 2 : index
      %c0_81 = arith.constant 0 : index
      %c0_82 = arith.constant 0 : index
      %102 = vector.load %arg2[%c2_80, %c0_81, %c0_82] : memref<9x32x64xf32, #tpu.memory_space<vmem>>, vector<1x32x64xf32>
      %103 = vector.shape_cast %102 : vector<1x32x64xf32> to vector<32x64xf32>
      %cst_83 = arith.constant dense<0.000000e+00> : vector<288x64xf32>
      %104 = tpu.matmul %101, %103, %cst_83 {dimension_numbers = #tpu.dot_dimension_numbers<[1], [0], [0], [1], [0, 0, 1, 1], [], []>} : vector<288x32xf32>, vector<32x64xf32>, vector<288x64xf32> -> vector<288x64xf32>
      %105 = arith.addf %97, %104 : vector<288x64xf32>
      %106 = arith.index_cast %arg6 : i32 to index
      %c2_84 = arith.constant 2 : index
      %c0_85 = arith.constant 0 : index
      %c0_86 = arith.constant 0 : index
      %107 = tpu.strided_load %arg1[%106, %c2_84, %c0_85, %c0_86] {strides = array<i32: 1, 2, 1, 1>} : memref<2x26x26x32xf32, #tpu.memory_space<vmem>>, vector<1x12x24x32xf32>
      %108 = vector.shape_cast %107 : vector<1x12x24x32xf32> to vector<12x24x32xf32>
      %109 = vector.shape_cast %108 : vector<12x24x32xf32> to vector<288x32xf32>
      %c3_87 = arith.constant 3 : index
      %c0_88 = arith.constant 0 : index
      %c0_89 = arith.constant 0 : index
      %110 = vector.load %arg2[%c3_87, %c0_88, %c0_89] : memref<9x32x64xf32, #tpu.memory_space<vmem>>, vector<1x32x64xf32>
      %111 = vector.shape_cast %110 : vector<1x32x64xf32> to vector<32x64xf32>
      %cst_90 = arith.constant dense<0.000000e+00> : vector<288x64xf32>
      %112 = tpu.matmul %109, %111, %cst_90 {dimension_numbers = #tpu.dot_dimension_numbers<[1], [0], [0], [1], [0, 0, 1, 1], [], []>} : vector<288x32xf32>, vector<32x64xf32>, vector<288x64xf32> -> vector<288x64xf32>
      %113 = arith.addf %105, %112 : vector<288x64xf32>
      %114 = arith.index_cast %arg6 : i32 to index
      %c2_91 = arith.constant 2 : index
      %c1_92 = arith.constant 1 : index
      %c0_93 = arith.constant 0 : index
      %115 = tpu.strided_load %arg1[%114, %c2_91, %c1_92, %c0_93] {strides = array<i32: 1, 2, 1, 1>} : memref<2x26x26x32xf32, #tpu.memory_space<vmem>>, vector<1x12x24x32xf32>
      %116 = vector.shape_cast %115 : vector<1x12x24x32xf32> to vector<12x24x32xf32>
      %117 = vector.shape_cast %116 : vector<12x24x32xf32> to vector<288x32xf32>
      %c4_94 = arith.constant 4 : index
      %c0_95 = arith.constant 0 : index
      %c0_96 = arith.constant 0 : index
      %118 = vector.load %arg2[%c4_94, %c0_95, %c0_96] : memref<9x32x64xf32, #tpu.memory_space<vmem>>, vector<1x32x64xf32>
      %119 = vector.shape_cast %118 : vector<1x32x64xf32> to vector<32x64xf32>
      %cst_97 = arith.constant dense<0.000000e+00> : vector<288x64xf32>
      %120 = tpu.matmul %117, %119, %cst_97 {dimension_numbers = #tpu.dot_dimension_numbers<[1], [0], [0], [1], [0, 0, 1, 1], [], []>} : vector<288x32xf32>, vector<32x64xf32>, vector<288x64xf32> -> vector<288x64xf32>
      %121 = arith.addf %113, %120 : vector<288x64xf32>
      %122 = arith.index_cast %arg6 : i32 to index
      %c2_98 = arith.constant 2 : index
      %c2_99 = arith.constant 2 : index
      %c0_100 = arith.constant 0 : index
      %123 = tpu.strided_load %arg1[%122, %c2_98, %c2_99, %c0_100] {strides = array<i32: 1, 2, 1, 1>} : memref<2x26x26x32xf32, #tpu.memory_space<vmem>>, vector<1x12x24x32xf32>
      %124 = vector.shape_cast %123 : vector<1x12x24x32xf32> to vector<12x24x32xf32>
      %125 = vector.shape_cast %124 : vector<12x24x32xf32> to vector<288x32xf32>
      %c5_101 = arith.constant 5 : index
      %c0_102 = arith.constant 0 : index
      %c0_103 = arith.constant 0 : index
      %126 = vector.load %arg2[%c5_101, %c0_102, %c0_103] : memref<9x32x64xf32, #tpu.memory_space<vmem>>, vector<1x32x64xf32>
      %127 = vector.shape_cast %126 : vector<1x32x64xf32> to vector<32x64xf32>
      %cst_104 = arith.constant dense<0.000000e+00> : vector<288x64xf32>
      %128 = tpu.matmul %125, %127, %cst_104 {dimension_numbers = #tpu.dot_dimension_numbers<[1], [0], [0], [1], [0, 0, 1, 1], [], []>} : vector<288x32xf32>, vector<32x64xf32>, vector<288x64xf32> -> vector<288x64xf32>
      %129 = arith.addf %121, %128 : vector<288x64xf32>
      %130 = arith.index_cast %arg6 : i32 to index
      %c3_105 = arith.constant 3 : index
      %c0_106 = arith.constant 0 : index
      %c0_107 = arith.constant 0 : index
      %131 = tpu.strided_load %arg1[%130, %c3_105, %c0_106, %c0_107] {strides = array<i32: 1, 2, 1, 1>} : memref<2x26x26x32xf32, #tpu.memory_space<vmem>>, vector<1x12x24x32xf32>
      %132 = vector.shape_cast %131 : vector<1x12x24x32xf32> to vector<12x24x32xf32>
      %133 = vector.shape_cast %132 : vector<12x24x32xf32> to vector<288x32xf32>
      %c6_108 = arith.constant 6 : index
      %c0_109 = arith.constant 0 : index
      %c0_110 = arith.constant 0 : index
      %134 = vector.load %arg2[%c6_108, %c0_109, %c0_110] : memref<9x32x64xf32, #tpu.memory_space<vmem>>, vector<1x32x64xf32>
      %135 = vector.shape_cast %134 : vector<1x32x64xf32> to vector<32x64xf32>
      %cst_111 = arith.constant dense<0.000000e+00> : vector<288x64xf32>
      %136 = tpu.matmul %133, %135, %cst_111 {dimension_numbers = #tpu.dot_dimension_numbers<[1], [0], [0], [1], [0, 0, 1, 1], [], []>} : vector<288x32xf32>, vector<32x64xf32>, vector<288x64xf32> -> vector<288x64xf32>
      %137 = arith.addf %129, %136 : vector<288x64xf32>
      %138 = arith.index_cast %arg6 : i32 to index
      %c3_112 = arith.constant 3 : index
      %c1_113 = arith.constant 1 : index
      %c0_114 = arith.constant 0 : index
      %139 = tpu.strided_load %arg1[%138, %c3_112, %c1_113, %c0_114] {strides = array<i32: 1, 2, 1, 1>} : memref<2x26x26x32xf32, #tpu.memory_space<vmem>>, vector<1x12x24x32xf32>
      %140 = vector.shape_cast %139 : vector<1x12x24x32xf32> to vector<12x24x32xf32>
      %141 = vector.shape_cast %140 : vector<12x24x32xf32> to vector<288x32xf32>
      %c7_115 = arith.constant 7 : index
      %c0_116 = arith.constant 0 : index
      %c0_117 = arith.constant 0 : index
      %142 = vector.load %arg2[%c7_115, %c0_116, %c0_117] : memref<9x32x64xf32, #tpu.memory_space<vmem>>, vector<1x32x64xf32>
      %143 = vector.shape_cast %142 : vector<1x32x64xf32> to vector<32x64xf32>
      %cst_118 = arith.constant dense<0.000000e+00> : vector<288x64xf32>
      %144 = tpu.matmul %141, %143, %cst_118 {dimension_numbers = #tpu.dot_dimension_numbers<[1], [0], [0], [1], [0, 0, 1, 1], [], []>} : vector<288x32xf32>, vector<32x64xf32>, vector<288x64xf32> -> vector<288x64xf32>
      %145 = arith.addf %137, %144 : vector<288x64xf32>
      %146 = arith.index_cast %arg6 : i32 to index
      %c3_119 = arith.constant 3 : index
      %c2_120 = arith.constant 2 : index
      %c0_121 = arith.constant 0 : index
      %147 = tpu.strided_load %arg1[%146, %c3_119, %c2_120, %c0_121] {strides = array<i32: 1, 2, 1, 1>} : memref<2x26x26x32xf32, #tpu.memory_space<vmem>>, vector<1x12x24x32xf32>
      %148 = vector.shape_cast %147 : vector<1x12x24x32xf32> to vector<12x24x32xf32>
      %149 = vector.shape_cast %148 : vector<12x24x32xf32> to vector<288x32xf32>
      %c8_122 = arith.constant 8 : index
      %c0_123 = arith.constant 0 : index
      %c0_124 = arith.constant 0 : index
      %150 = vector.load %arg2[%c8_122, %c0_123, %c0_124] : memref<9x32x64xf32, #tpu.memory_space<vmem>>, vector<1x32x64xf32>
      %151 = vector.shape_cast %150 : vector<1x32x64xf32> to vector<32x64xf32>
      %cst_125 = arith.constant dense<0.000000e+00> : vector<288x64xf32>
      %152 = tpu.matmul %149, %151, %cst_125 {dimension_numbers = #tpu.dot_dimension_numbers<[1], [0], [0], [1], [0, 0, 1, 1], [], []>} : vector<288x32xf32>, vector<32x64xf32>, vector<288x64xf32> -> vector<288x64xf32>
      %153 = arith.addf %145, %152 : vector<288x64xf32>
      %154 = vector.broadcast %0 : vector<1x64xf32> to vector<288x64xf32>
      %155 = arith.addf %153, %154 : vector<288x64xf32>
      %cst_126 = arith.constant 0.000000e+00 : f32
      %156 = vector.broadcast %cst_126 : f32 to vector<288x64xf32>
      %157 = arith.maximumf %155, %156 : vector<288x64xf32>
      %158 = arith.maximumf %80, %157 : vector<288x64xf32>
      %c0_127 = arith.constant 0 : index
      %c0_128 = arith.constant 0 : index
      %159 = vector.load %arg5[%c0_127, %c0_128] : memref<288x64xf32, #tpu.memory_space<vmem>>, vector<288x64xf32>
      tpu.vector_store %arg5[%c0_127, %c0_128], %158 {strides = array<i32>} : memref<288x64xf32, #tpu.memory_space<vmem>>, vector<288x64xf32>,
      %c0_129 = arith.constant 0 : index
      %c0_130 = arith.constant 0 : index
      %160 = tpu.strided_load %arg5[%c0_129, %c0_130] {strides = array<i32: 2, 1>} : memref<288x64xf32, #tpu.memory_space<vmem>>, vector<144x64xf32>
      %c1_131 = arith.constant 1 : index
      %c0_132 = arith.constant 0 : index
      %161 = tpu.strided_load %arg5[%c1_131, %c0_132] {strides = array<i32: 2, 1>} : memref<288x64xf32, #tpu.memory_space<vmem>>, vector<144x64xf32>
      %162 = arith.maximumf %160, %161 : vector<144x64xf32>
      %c144_i32 = arith.constant 144 : i32
      %163 = arith.muli %arg6, %c144_i32 : i32
      %164 = tpu.assume_multiple %163, 8 : i32
      %165 = arith.index_cast %164 : i32 to index
      %c0_133 = arith.constant 0 : index
      %166 = vector.load %arg4[%165, %c0_133] : memref<288x64xf32, #tpu.memory_space<vmem>>, vector<144x64xf32>
      tpu.vector_store %arg4[%165, %c0_133], %162 {strides = array<i32>} : memref<288x64xf32, #tpu.memory_space<vmem>>, vector<144x64xf32>,
    }
    %c2_i32_1 = arith.constant 2 : i32
    return
  }
  func.func @transform_0(%arg0: i32) -> (i32, i32, i32, i32) {
    %c0_i32 = arith.constant 0 : i32
    %c0_i32_0 = arith.constant 0 : i32
    %c0_i32_1 = arith.constant 0 : i32
    %c0_i32_2 = arith.constant 0 : i32
    return %arg0, %c0_i32, %c0_i32_0, %c0_i32_1 : i32, i32, i32, i32
  }
  func.func @transform_1(%arg0: i32) -> (i32, i32, i32) {
    %c0_i32 = arith.constant 0 : i32
    %c0_i32_0 = arith.constant 0 : i32
    %c0_i32_1 = arith.constant 0 : i32
    %c0_i32_2 = arith.constant 0 : i32
    return %c0_i32, %c0_i32_0, %c0_i32_1 : i32, i32, i32
  }
  func.func @transform_2(%arg0: i32) -> (i32, i32) {
    %c0_i32 = arith.constant 0 : i32
    %c0_i32_0 = arith.constant 0 : i32
    %c0_i32_1 = arith.constant 0 : i32
    return %c0_i32, %c0_i32_0 : i32, i32
  }
  func.func @transform_3(%arg0: i32) -> (i32, i32) {
    %c0_i32 = arith.constant 0 : i32
    %c0_i32_0 = arith.constant 0 : i32
    return %arg0, %c0_i32 : i32, i32
  }
}

module attributes {stable_mosaic.version = 11 : i64} {
  func.func @_fc_kernel(%arg0: memref<2x9216xf32, #tpu.memory_space<vmem>>, %arg1: memref<9216x128xf32, #tpu.memory_space<vmem>>, %arg2: memref<1x128xf32, #tpu.memory_space<vmem>>, %arg3: memref<128x10xf32, #tpu.memory_space<vmem>>, %arg4: memref<1x10xf32, #tpu.memory_space<vmem>>, %arg5: memref<2x10xf32, #tpu.memory_space<vmem>>) attributes {dimension_semantics = [], scalar_prefetch = 0 : i64, scratch_operands = 0 : i64, tpu.core_type = #tpu.core_type<tc>} {
    %c0 = arith.constant 0 : index
    %c0_0 = arith.constant 0 : index
    %0 = vector.load %arg0[%c0, %c0_0] : memref<2x9216xf32, #tpu.memory_space<vmem>>, vector<2x9216xf32>
    %c0_1 = arith.constant 0 : index
    %c0_2 = arith.constant 0 : index
    %1 = vector.load %arg1[%c0_1, %c0_2] : memref<9216x128xf32, #tpu.memory_space<vmem>>, vector<9216x128xf32>
    %cst = arith.constant dense<0.000000e+00> : vector<2x128xf32>
    %2 = tpu.matmul %0, %1, %cst {dimension_numbers = #tpu.dot_dimension_numbers<[1], [0], [0], [1], [0, 0, 1, 1], [], []>} : vector<2x9216xf32>, vector<9216x128xf32>, vector<2x128xf32> -> vector<2x128xf32>
    %c0_3 = arith.constant 0 : index
    %c0_4 = arith.constant 0 : index
    %3 = vector.load %arg2[%c0_3, %c0_4] : memref<1x128xf32, #tpu.memory_space<vmem>>, vector<1x128xf32>
    %4 = vector.broadcast %3 : vector<1x128xf32> to vector<2x128xf32>
    %5 = arith.addf %2, %4 : vector<2x128xf32>
    %cst_5 = arith.constant 0.000000e+00 : f32
    %6 = vector.broadcast %cst_5 : f32 to vector<2x128xf32>
    %7 = arith.maximumf %5, %6 : vector<2x128xf32>
    %c0_6 = arith.constant 0 : index
    %c0_7 = arith.constant 0 : index
    %8 = vector.load %arg3[%c0_6, %c0_7] : memref<128x10xf32, #tpu.memory_space<vmem>>, vector<128x10xf32>
    %cst_8 = arith.constant dense<0.000000e+00> : vector<2x10xf32>
    %9 = tpu.matmul %7, %8, %cst_8 {dimension_numbers = #tpu.dot_dimension_numbers<[1], [0], [0], [1], [0, 0, 1, 1], [], []>} : vector<2x128xf32>, vector<128x10xf32>, vector<2x10xf32> -> vector<2x10xf32>
    %c0_9 = arith.constant 0 : index
    %c0_10 = arith.constant 0 : index
    %10 = vector.load %arg4[%c0_9, %c0_10] : memref<1x10xf32, #tpu.memory_space<vmem>>, vector<1x10xf32>
    %11 = vector.broadcast %10 : vector<1x10xf32> to vector<2x10xf32>
    %12 = arith.addf %9, %11 : vector<2x10xf32>
    %c0_11 = arith.constant 0 : index
    %c0_12 = arith.constant 0 : index
    %13 = vector.load %arg5[%c0_11, %c0_12] : memref<2x10xf32, #tpu.memory_space<vmem>>, vector<2x10xf32>
    tpu.vector_store %arg5[%c0_11, %c0_12], %12 {strides = array<i32>} : memref<2x10xf32, #tpu.memory_space<vmem>>, vector<2x10xf32>,
    return
  }
}

</mosaic_0001>

<bundles_post_ra>
// kernel: simple_cnn_forward.3
= control target key start
LH: loop header
LB: loop body
LE: loop exit
PB: predicated region body
PF: predicated region fallthrough
CT: control target
= control target key end

     0   :  { %8 = vsyncpa [#allocation3], 0  ;;  %s1385_s0 = inlined_call_operand.vmem [shape: f32[338,36], index: 0, kind: input, shape index: {}]   ;;  %s1386_s1 = inlined_call_operand.hbm [shape: f32[36,128], index: 1, kind: input, shape index: {}]   ;;  %s1387_s2 = inlined_call_operand.hbm [shape: f32[1,128], index: 2, kind: input, shape index: {}]   ;;  %s1388_s3 = inlined_call_operand.vmem [shape: f32[338,128], index: 3, kind: output, shape index: {}]  }
   0x1   :  { %9 = vsyncpa [#allocation5], 0  ;;  %s900_s12 = smov [#allocation2]   ;;  %s852_s16 = scalar_lea.hbm %s1386_s1, 640 }
   0x2   :  { %s17_s13 = sshll.u32 %s900_s12, 4  ;;  %p853_p0 = scmp.ne.s32.totalorder %s1386_s1, %s852_s16  ;;  %s18_s13 = int_to_ptr.vmem [resolvable:$true] %s17_s13 }
   0x3   :  { %p856_p1 = scmp.lt.u32.totalorder %s852_s16, %s1386_s1 }
   0x5   :  { %p858_p2 = pnand %p856_p1, %p853_p0 }
   0x7   :  { %861 = shalt.err (!%p858_p2)
}
   0x8   :  { %s862_s21 = scalar_lea.vmem %s18_s13, 640  ;;  %p867_p4 = scmp.lt.s32.totalorder %s18_s13, %s18_s13 }
   0x9   :  { %p863_p3 = scmp.ne.s32.totalorder %s18_s13, %s862_s21  ;;  %p868_p5 = scmp.lt.s32.totalorder %s862_s21, %s862_s21 }
   0xb   :  { %p869_p6 = por %p868_p5, %p867_p4 }
   0xd   :  { %p870_p7 = pnand %p869_p6, %p863_p3 }
   0xf   :  { %873 = shalt.err (!%p870_p7)
}
  0x10   :  { %s901_s22 = smov 128   ;;  %s902_s23 = smov 8  }
  0x11   :  { %23 = dma.hbm_to_vmem [thread:$0]  %s1386_s1, 640, %s18_s13, [#allocation3], %s901_s22, %s901_s22, %s902_s23  }
  0x12   :  { %s903_s26 = smov [#allocation4]   ;;  %s874_s30 = scalar_lea.hbm %s1387_s2, 16 }
  0x13   :  { %s30_s27 = sshll.u32 %s903_s26, 4  ;;  %p875_p8 = scmp.ne.s32.totalorder %s1387_s2, %s874_s30  ;;  %s31_s27 = int_to_ptr.vmem [resolvable:$true] %s30_s27 }
  0x14   :  { %p878_p9 = scmp.lt.u32.totalorder %s874_s30, %s1387_s2 }
  0x16   :  { %p880_p10 = pnand %p878_p9, %p875_p8 }
  0x18   :  { %883 = shalt.err (!%p880_p10)
}
  0x19   :  { %s884_s8 = scalar_lea.vmem %s31_s27, 16  ;;  %s888_s1 = scalar_lea.vmem %s31_s27, 32 }
  0x1a   :  { %p885_p11 = scmp.ne.s32.totalorder %s31_s27, %s884_s8  ;;  %p889_p12 = scmp.lt.s32.totalorder %s31_s27, %s31_s27 }
  0x1b   :  { %p890_p13 = scmp.lt.s32.totalorder %s888_s1, %s884_s8 }
  0x1d   :  { %p891_p0 = por %p890_p13, %p889_p12 }
  0x1f   :  { %p892_p1 = pnand %p891_p0, %p885_p11 }
  0x21   :  { %895 = shalt.err (!%p892_p1)
}
  0x22   :  { %33 = dma.hbm_to_vmem [thread:$0]  %s1387_s2, 16, %s31_s27, [#allocation5]  }
  0x23   :  { %896 = dma.done.wait [#allocation3], 640  }
  0x24   :  { %897 = vsyncadd [#allocation3], 4294966656 }
  0x25   :  { %898 = dma.done.wait [#allocation5], 16  }
  0x26   :  { %899 = vsyncadd [#allocation5], 4294967280  ;;  %v904_v0 = vmov 0.0|0.0   ;;  %vm905_vm0 = vmmov 0   ;;  %v906_v1 = vmov 0.0   ;;  %v83_v2 = vld [vmem:[#allocation2] sm:$0xff] }
  0x27   :  { %833 = vmatprep.subr.bf16.mxu0 %v904_v0  ;;  %839 = vmatprep.subr.bf16.mxu1 %v904_v0  ;;  %v84_v3 = vld [vmem:[#allocation2 + $0x8] sm:$0xff]  ;;  %v85_v4 = vld [vmem:[#allocation2 + $0x10] sm:$0xff]  ;;  %v86_v6 = vld [vmem:[#allocation2 + $0x18] sm:$0xff]  ;;  %vm225_vm1 = vcmask 1043456   ;;  %vm95_vm2 = vcmask 293888  }
  0x28   :  { %704 = vmatprep.mubr.msk.f32.mxu0 %vm905_vm0, %v906_v1  ;;  %770 = vmatprep.mubr.msk.f32.mxu1 %vm905_vm0, %v906_v1  ;;  %v834_v5 = vpack.c.bf16 %v84_v3, %v83_v2  ;;  %v837_v7 = vpack.c.bf16 %v86_v6, %v85_v4  ;;  %v87_v8 = vld [vmem:[#allocation2 + $0x20] sm:$0xf]  ;;  %v62_v10 = vld [vmem:[%s1385_s0 + $0xb0] sm:$0xff]  ;;  %v41_v11 = vld [vmem:[%s1385_s0 + $0x8] sm:$0xff] }
  0x29   :  { %v40_v9 = vld [vmem:[%s1385_s0] sm:$0xff]  ;;  %v63_v12 = vld [vmem:[%s1385_s0 + $0xb8] sm:$0xff]  ;;  %v42_v13 = vld [vmem:[%s1385_s0 + $0x10] sm:$0xff] }
  0x2a   :  { %835 = vmatpush3.bf16.msra.mxu0 %v834_v5  ;;  %842 = vmatpush3.bf16.msra.mxu1 %v834_v5  ;;  %v64_v14 = vld [vmem:[%s1385_s0 + $0xc0] sm:$0xff]  ;;  %v43_v15 = vld [vmem:[%s1385_s0 + $0x18] sm:$0xff]  ;;  %v65_v16 = vld [vmem:[%s1385_s0 + $0xc8] sm:$0xff] }
  0x2b   :  { %836 = vmatprep.subr.bf16.mxu0 %v904_v0  ;;  %840 = vmatprep.subr.bf16.mxu1 %v904_v0  ;;  %v44_v17 = vld [vmem:[%s1385_s0 + $0x20] sm:$0xff]  ;;  %v66_v18 = vld [vmem:[%s1385_s0 + $0xd0] sm:$0xff]  ;;  %v45_v19 = vld [vmem:[%s1385_s0 + $0x28] sm:$0xff] }
  0x2c   :  { %v67_v20 = vld [vmem:[%s1385_s0 + $0xd8] sm:$0xff]  ;;  %v46_v21 = vld [vmem:[%s1385_s0 + $0x30] sm:$0xff]  ;;  %v68_v22 = vld [vmem:[%s1385_s0 + $0xe0] sm:$0xff] }
  0x2d   :  { %v47_v23 = vld [vmem:[%s1385_s0 + $0x38] sm:$0xff]  ;;  %v69_v24 = vld [vmem:[%s1385_s0 + $0xe8] sm:$0xff]  ;;  %v48_v25 = vld [vmem:[%s1385_s0 + $0x40] sm:$0xff] }
  0x2e   :  { %838 = vmatpush3.bf16.msra.mxu0 %v837_v7  ;;  %843 = vmatpush3.bf16.msra.mxu1 %v837_v7  ;;  %v70_v26 = vld [vmem:[%s1385_s0 + $0xf0] sm:$0xff]  ;;  %v49_v27 = vld [vmem:[%s1385_s0 + $0x48] sm:$0xff]  ;;  %v71_v28 = vld [vmem:[%s1385_s0 + $0xf8] sm:$0xff] }
  0x2f   :  { %702 = vmatprep.subr.mxu0 %v906_v1  ;;  %841 = vmatprep.subr.mxu1 %v906_v1  ;;  %v50_v29 = vld [vmem:[%s1385_s0 + $0x50] sm:$0xff]  ;;  %v72_v30 = vld [vmem:[%s1385_s0 + $0x100] sm:$0xff]  ;;  %v51_v31 = vld [vmem:[%s1385_s0 + $0x58] sm:$0xff] }
  0x30   :  { %v73_v32 = vld [vmem:[%s1385_s0 + $0x108] sm:$0xff]  ;;  %v52_v33 = vld [vmem:[%s1385_s0 + $0x60] sm:$0xff]  ;;  %v74_v34 = vld [vmem:[%s1385_s0 + $0x110] sm:$0xff] }
  0x31   :  { %v53_v35 = vld [vmem:[%s1385_s0 + $0x68] sm:$0xff]  ;;  %v75_v36 = vld [vmem:[%s1385_s0 + $0x118] sm:$0xff]  ;;  %v54_v37 = vld [vmem:[%s1385_s0 + $0x70] sm:$0xff] }
  0x32   :  { %703 = vmatpush3.msk.msra.mxu0 %vm225_vm1, %v87_v8  ;;  %844 = vmatpush3.msk.msra.mxu1 %vm225_vm1, %v87_v8  ;;  %v76_v38 = vld [vmem:[%s1385_s0 + $0x120] sm:$0xff]  ;;  %v55_v39 = vld [vmem:[%s1385_s0 + $0x78] sm:$0xff]  ;;  %v77_v40 = vld [vmem:[%s1385_s0 + $0x128] sm:$0xff] }
  0x33   :  { %705 = vmatmul.mubr.msk.f32.vlgmr.msra.gmra.mrb[0].mxu0 %vm95_vm2, %v40_v9  ;;  %771 = vmatmul.mubr.msk.f32.vlgmr.msra.gmra.mrb[0].mxu1 %vm95_vm2, %v62_v10  ;;  %v56_v41 = vld [vmem:[%s1385_s0 + $0x80] sm:$0xff]  ;;  %v78_v42 = vld [vmem:[%s1385_s0 + $0x130] sm:$0xff]  ;;  %v57_v43 = vld [vmem:[%s1385_s0 + $0x88] sm:$0xff] }
  0x34   :  { %707 = vmatprep.mubr.msk.f32.mxu0 %vm905_vm0, %v906_v1  ;;  %773 = vmatprep.mubr.msk.f32.mxu1 %vm905_vm0, %v906_v1  ;;  %v79_v44 = vld [vmem:[%s1385_s0 + $0x138] sm:$0xff]  ;;  %v58_v45 = vld [vmem:[%s1385_s0 + $0x90] sm:$0xff]  ;;  %v80_v46 = vld [vmem:[%s1385_s0 + $0x140] sm:$0xff] }
  0x35   :  { %v59_v47 = vld [vmem:[%s1385_s0 + $0x98] sm:$0xff]  ;;  %v81_v48 = vld [vmem:[%s1385_s0 + $0x148] sm:$0xff]  ;;  %v60_v49 = vld [vmem:[%s1385_s0 + $0xa0] sm:$0xff] }
  0x36   :  { %v82_v50 = vld [vmem:[%s1385_s0 + $0x150] sm:$0x3]  ;;  %v61_v51 = vld [vmem:[%s1385_s0 + $0xa8] sm:$0xff] }
  0x37   :  { %708 = vmatmul.mubr.msk.f32.gmra.mrb[2].mxu0 %vm95_vm2, %v41_v11  ;;  %774 = vmatmul.mubr.msk.f32.gmra.mrb[2].mxu1 %vm95_vm2, %v63_v12  ;;  %v1211_v52 = vld [vmem:[#allocation4] ss:$0 sm:$0xff] }
  0x38   :  { %710 = vmatprep.mubr.msk.f32.mxu0 %vm905_vm0, %v906_v1  ;;  %776 = vmatprep.mubr.msk.f32.mxu1 %vm905_vm0, %v906_v1 }
  0x3b   :  { %711 = vmatmul.mubr.msk.f32.gmra.mrb[4].mxu0 %vm95_vm2, %v42_v13  ;;  %777 = vmatmul.mubr.msk.f32.gmra.mrb[4].mxu1 %vm95_vm2, %v64_v14 }
  0x3c   :  { %713 = vmatprep.mubr.msk.f32.mxu0 %vm905_vm0, %v906_v1  ;;  %779 = vmatprep.mubr.msk.f32.mxu1 %vm905_vm0, %v906_v1 }
  0x3f   :  { %714 = vmatmul.mubr.msk.f32.gmra.mrb[6].mxu0 %vm95_vm2, %v43_v15  ;;  %780 = vmatmul.mubr.msk.f32.gmra.mrb[6].mxu1 %vm95_vm2, %v65_v16 }
  0x40   :  { %716 = vmatprep.mubr.msk.f32.mxu0 %vm905_vm0, %v906_v1  ;;  %782 = vmatprep.mubr.msk.f32.mxu1 %vm905_vm0, %v906_v1 }
  0x43   :  { %717 = vmatmul.mubr.msk.f32.gmra.mrb[8].mxu0 %vm95_vm2, %v44_v17  ;;  %783 = vmatmul.mubr.msk.f32.gmra.mrb[8].mxu1 %vm95_vm2, %v66_v18 }
  0x44   :  { %719 = vmatprep.mubr.msk.f32.mxu0 %vm905_vm0, %v906_v1  ;;  %785 = vmatprep.mubr.msk.f32.mxu1 %vm905_vm0, %v906_v1 }
  0x47   :  { %720 = vmatmul.mubr.msk.f32.gmra.mrb[10].mxu0 %vm95_vm2, %v45_v19  ;;  %786 = vmatmul.mubr.msk.f32.gmra.mrb[10].mxu1 %vm95_vm2, %v67_v20 }
  0x48   :  { %722 = vmatprep.mubr.msk.f32.mxu0 %vm905_vm0, %v906_v1  ;;  %788 = vmatprep.mubr.msk.f32.mxu1 %vm905_vm0, %v906_v1 }
  0x4b   :  { %723 = vmatmul.mubr.msk.f32.gmra.mrb[12].mxu0 %vm95_vm2, %v46_v21  ;;  %789 = vmatmul.mubr.msk.f32.gmra.mrb[12].mxu1 %vm95_vm2, %v68_v22 }
  0x4c   :  { %725 = vmatprep.mubr.msk.f32.mxu0 %vm905_vm0, %v906_v1  ;;  %791 = vmatprep.mubr.msk.f32.mxu1 %vm905_vm0, %v906_v1 }
  0x4f   :  { %726 = vmatmul.mubr.msk.f32.gmra.mrb[14].mxu0 %vm95_vm2, %v47_v23  ;;  %792 = vmatmul.mubr.msk.f32.gmra.mrb[14].mxu1 %vm95_vm2, %v69_v24 }
  0x50   :  { %728 = vmatprep.mubr.msk.f32.mxu0 %vm905_vm0, %v906_v1  ;;  %794 = vmatprep.mubr.msk.f32.mxu1 %vm905_vm0, %v906_v1 }
  0x53   :  { %729 = vmatmul.mubr.msk.f32.gmra.mrb[16].mxu0 %vm95_vm2, %v48_v25  ;;  %795 = vmatmul.mubr.msk.f32.gmra.mrb[16].mxu1 %vm95_vm2, %v70_v26 }
  0x54   :  { %731 = vmatprep.mubr.msk.f32.mxu0 %vm905_vm0, %v906_v1  ;;  %797 = vmatprep.mubr.msk.f32.mxu1 %vm905_vm0, %v906_v1 }
  0x57   :  { %732 = vmatmul.mubr.msk.f32.gmra.mrb[18].mxu0 %vm95_vm2, %v49_v27  ;;  %798 = vmatmul.mubr.msk.f32.gmra.mrb[18].mxu1 %vm95_vm2, %v71_v28 }
  0x58   :  { %734 = vmatprep.mubr.msk.f32.mxu0 %vm905_vm0, %v906_v1  ;;  %800 = vmatprep.mubr.msk.f32.mxu1 %vm905_vm0, %v906_v1 }
  0x5b   :  { %735 = vmatmul.mubr.msk.f32.gmra.mrb[20].mxu0 %vm95_vm2, %v50_v29  ;;  %801 = vmatmul.mubr.msk.f32.gmra.mrb[20].mxu1 %vm95_vm2, %v72_v30 }
  0x5c   :  { %737 = vmatprep.mubr.msk.f32.mxu0 %vm905_vm0, %v906_v1  ;;  %803 = vmatprep.mubr.msk.f32.mxu1 %vm905_vm0, %v906_v1 }
  0x5f   :  { %738 = vmatmul.mubr.msk.f32.gmra.mrb[22].mxu0 %vm95_vm2, %v51_v31  ;;  %804 = vmatmul.mubr.msk.f32.gmra.mrb[22].mxu1 %vm95_vm2, %v73_v32 }
  0x60   :  { %740 = vmatprep.mubr.msk.f32.mxu0 %vm905_vm0, %v906_v1  ;;  %806 = vmatprep.mubr.msk.f32.mxu1 %vm905_vm0, %v906_v1 }
  0x63   :  { %741 = vmatmul.mubr.msk.f32.gmra.mrb[24].mxu0 %vm95_vm2, %v52_v33  ;;  %807 = vmatmul.mubr.msk.f32.gmra.mrb[24].mxu1 %vm95_vm2, %v74_v34 }
  0x64   :  { %743 = vmatprep.mubr.msk.f32.mxu0 %vm905_vm0, %v906_v1  ;;  %809 = vmatprep.mubr.msk.f32.mxu1 %vm905_vm0, %v906_v1 }
  0x67   :  { %744 = vmatmul.mubr.msk.f32.gmra.mrb[26].mxu0 %vm95_vm2, %v53_v35  ;;  %810 = vmatmul.mubr.msk.f32.gmra.mrb[26].mxu1 %vm95_vm2, %v75_v36 }
  0x68   :  { %746 = vmatprep.mubr.msk.f32.mxu0 %vm905_vm0, %v906_v1  ;;  %812 = vmatprep.mubr.msk.f32.mxu1 %vm905_vm0, %v906_v1 }
  0x6b   :  { %747 = vmatmul.mubr.msk.f32.gmra.mrb[28].mxu0 %vm95_vm2, %v54_v37  ;;  %813 = vmatmul.mubr.msk.f32.gmra.mrb[28].mxu1 %vm95_vm2, %v76_v38 }
  0x6c   :  { %749 = vmatprep.mubr.msk.f32.mxu0 %vm905_vm0, %v906_v1  ;;  %815 = vmatprep.mubr.msk.f32.mxu1 %vm905_vm0, %v906_v1 }
  0x6f   :  { %750 = vmatmul.mubr.msk.f32.gmra.mrb[30].mxu0 %vm95_vm2, %v55_v39  ;;  %816 = vmatmul.mubr.msk.f32.gmra.mrb[30].mxu1 %vm95_vm2, %v77_v40 }
  0x70   :  { %752 = vmatprep.mubr.msk.f32.mxu0 %vm905_vm0, %v906_v1  ;;  %818 = vmatprep.mubr.msk.f32.mxu1 %vm905_vm0, %v906_v1 }
  0x73   :  { %753 = vmatmul.mubr.msk.f32.gmra.mrb[32].mxu0 %vm95_vm2, %v56_v41  ;;  %819 = vmatmul.mubr.msk.f32.gmra.mrb[32].mxu1 %vm95_vm2, %v78_v42 }
  0x74   :  { %755 = vmatprep.mubr.msk.f32.mxu0 %vm905_vm0, %v906_v1  ;;  %821 = vmatprep.mubr.msk.f32.mxu1 %vm905_vm0, %v906_v1 }
  0x77   :  { %756 = vmatmul.mubr.msk.f32.gmra.mrb[34].mxu0 %vm95_vm2, %v57_v43  ;;  %822 = vmatmul.mubr.msk.f32.gmra.mrb[34].mxu1 %vm95_vm2, %v79_v44 }
  0x78   :  { %758 = vmatprep.mubr.msk.f32.mxu0 %vm905_vm0, %v906_v1  ;;  %824 = vmatprep.mubr.msk.f32.mxu1 %vm905_vm0, %v906_v1 }
  0x7b   :  { %759 = vmatmul.mubr.msk.f32.gmra.mrb[36].mxu0 %vm95_vm2, %v58_v45  ;;  %825 = vmatmul.mubr.msk.f32.gmra.mrb[36].mxu1 %vm95_vm2, %v80_v46 }
  0x7c   :  { %761 = vmatprep.mubr.msk.f32.mxu0 %vm905_vm0, %v906_v1  ;;  %827 = vmatprep.mubr.msk.f32.mxu1 %vm905_vm0, %v906_v1 }
  0x7f   :  { %762 = vmatmul.mubr.msk.f32.gmra.mrb[38].mxu0 %vm95_vm2, %v59_v47  ;;  %828 = vmatmul.mubr.msk.f32.gmra.mrb[38].mxu1 %vm95_vm2, %v81_v48 }
  0x80   :  { %764 = vmatprep.mubr.msk.f32.mxu0 %vm905_vm0, %v906_v1  ;;  %830 = vmatprep.mubr.msk.f32.mxu1 %vm905_vm0, %v906_v1 }
  0x83   :  { %765 = vmatmul.mubr.msk.f32.gmra.mrb[40].mxu0 %vm95_vm2, %v60_v49  ;;  %831 = vmatmul.mubr.msk.f32.gmra.mrb[40].mxu1 %vm95_vm2, %v82_v50 }
  0x84   :  { %767 = vmatprep.mubr.msk.f32.mxu0 %vm905_vm0, %v906_v1 }
  0x87   :  { %768 = vmatmul.mubr.msk.f32.gmra.mrb[42].mxu0 %vm95_vm2, %v61_v51 }
 0x106   :  { %v295_v53 = vpop.f32.mrb[0].mxu0  ;;  %v405_v54 = vpop.f32.mrb[0].mxu1 }
 0x107   :  { %v296_v55 = vadd.f32 %v1211_v52, %v295_v53  ;;  %v706_v56 = vpop.f32.mrb[1].mxu0  ;;  %v406_v57 = vadd.f32 %v1211_v52, %v405_v54  ;;  %v772_v58 = vpop.f32.mrb[1].mxu1 }
 0x109   :  { %v509_v59 = vmax.f32 %v296_v55, 0.0  ;;  %v531_v60 = vmax.f32 %v406_v57, 0.0 }
 0x10a   :  { %v300_v61 = vpop.f32.mrb[2].mxu0  ;;  %v410_v62 = vpop.f32.mrb[2].mxu1 }
 0x10b   :  { %552 = vst [vmem:[%s1388_s3] sm:$0xff] %v509_v59  ;;  %574 = vst [vmem:[%s1388_s3 + $0xb0] sm:$0xff] %v531_v60  ;;  %v301_v63 = vadd.f32 %v1211_v52, %v300_v61  ;;  %v709_v0 = vpop.f32.mrb[3].mxu0  ;;  %v411_v1 = vadd.f32 %v1211_v52, %v410_v62  ;;  %v775_v2 = vpop.f32.mrb[3].mxu1 }
 0x10d   :  { %v510_v3 = vmax.f32 %v301_v63, 0.0  ;;  %v532_v4 = vmax.f32 %v411_v1, 0.0 }
 0x10e   :  { %v305_v5 = vpop.f32.mrb[4].mxu0  ;;  %v415_v6 = vpop.f32.mrb[4].mxu1 }
 0x10f   :  { %553 = vst [vmem:[%s1388_s3 + $0x8] sm:$0xff] %v510_v3  ;;  %575 = vst [vmem:[%s1388_s3 + $0xb8] sm:$0xff] %v532_v4  ;;  %v306_v7 = vadd.f32 %v1211_v52, %v305_v5  ;;  %v712_v8 = vpop.f32.mrb[5].mxu0  ;;  %v416_v9 = vadd.f32 %v1211_v52, %v415_v6  ;;  %v778_v10 = vpop.f32.mrb[5].mxu1 }
 0x111   :  { %v511_v11 = vmax.f32 %v306_v7, 0.0  ;;  %v533_v12 = vmax.f32 %v416_v9, 0.0 }
 0x112   :  { %v310_v13 = vpop.f32.mrb[6].mxu0  ;;  %v420_v14 = vpop.f32.mrb[6].mxu1 }
 0x113   :  { %554 = vst [vmem:[%s1388_s3 + $0x10] sm:$0xff] %v511_v11  ;;  %576 = vst [vmem:[%s1388_s3 + $0xc0] sm:$0xff] %v533_v12  ;;  %v311_v15 = vadd.f32 %v1211_v52, %v310_v13  ;;  %v715_v16 = vpop.f32.mrb[7].mxu0  ;;  %v421_v17 = vadd.f32 %v1211_v52, %v420_v14  ;;  %v781_v18 = vpop.f32.mrb[7].mxu1 }
 0x115   :  { %v512_v19 = vmax.f32 %v311_v15, 0.0  ;;  %v534_v20 = vmax.f32 %v421_v17, 0.0 }
 0x116   :  { %v315_v21 = vpop.f32.mrb[8].mxu0  ;;  %v425_v22 = vpop.f32.mrb[8].mxu1 }
 0x117   :  { %555 = vst [vmem:[%s1388_s3 + $0x18] sm:$0xff] %v512_v19  ;;  %577 = vst [vmem:[%s1388_s3 + $0xc8] sm:$0xff] %v534_v20  ;;  %v316_v23 = vadd.f32 %v1211_v52, %v315_v21  ;;  %v718_v24 = vpop.f32.mrb[9].mxu0  ;;  %v426_v25 = vadd.f32 %v1211_v52, %v425_v22  ;;  %v784_v26 = vpop.f32.mrb[9].mxu1 }
 0x119   :  { %v513_v27 = vmax.f32 %v316_v23, 0.0  ;;  %v535_v28 = vmax.f32 %v426_v25, 0.0 }
 0x11a   :  { %v320_v29 = vpop.f32.mrb[10].mxu0  ;;  %v430_v30 = vpop.f32.mrb[10].mxu1 }
 0x11b   :  { %556 = vst [vmem:[%s1388_s3 + $0x20] sm:$0xff] %v513_v27  ;;  %578 = vst [vmem:[%s1388_s3 + $0xd0] sm:$0xff] %v535_v28  ;;  %v321_v31 = vadd.f32 %v1211_v52, %v320_v29  ;;  %v721_v32 = vpop.f32.mrb[11].mxu0  ;;  %v431_v33 = vadd.f32 %v1211_v52, %v430_v30  ;;  %v787_v34 = vpop.f32.mrb[11].mxu1 }
 0x11d   :  { %v514_v35 = vmax.f32 %v321_v31, 0.0  ;;  %v536_v36 = vmax.f32 %v431_v33, 0.0 }
 0x11e   :  { %v325_v37 = vpop.f32.mrb[12].mxu0  ;;  %v435_v38 = vpop.f32.mrb[12].mxu1 }
 0x11f   :  { %557 = vst [vmem:[%s1388_s3 + $0x28] sm:$0xff] %v514_v35  ;;  %579 = vst [vmem:[%s1388_s3 + $0xd8] sm:$0xff] %v536_v36  ;;  %v326_v39 = vadd.f32 %v1211_v52, %v325_v37  ;;  %v724_v40 = vpop.f32.mrb[13].mxu0  ;;  %v436_v41 = vadd.f32 %v1211_v52, %v435_v38  ;;  %v790_v42 = vpop.f32.mrb[13].mxu1 }
 0x121   :  { %v515_v43 = vmax.f32 %v326_v39, 0.0  ;;  %v537_v44 = vmax.f32 %v436_v41, 0.0 }
 0x122   :  { %v330_v45 = vpop.f32.mrb[14].mxu0  ;;  %v440_v46 = vpop.f32.mrb[14].mxu1 }
 0x123   :  { %558 = vst [vmem:[%s1388_s3 + $0x30] sm:$0xff] %v515_v43  ;;  %580 = vst [vmem:[%s1388_s3 + $0xe0] sm:$0xff] %v537_v44  ;;  %v331_v47 = vadd.f32 %v1211_v52, %v330_v45  ;;  %v727_v48 = vpop.f32.mrb[15].mxu0  ;;  %v441_v49 = vadd.f32 %v1211_v52, %v440_v46  ;;  %v793_v50 = vpop.f32.mrb[15].mxu1 }
 0x125   :  { %v516_v51 = vmax.f32 %v331_v47, 0.0  ;;  %v538_v53 = vmax.f32 %v441_v49, 0.0 }
 0x126   :  { %v335_v54 = vpop.f32.mrb[16].mxu0  ;;  %v445_v55 = vpop.f32.mrb[16].mxu1 }
 0x127   :  { %559 = vst [vmem:[%s1388_s3 + $0x38] sm:$0xff] %v516_v51  ;;  %581 = vst [vmem:[%s1388_s3 + $0xe8] sm:$0xff] %v538_v53  ;;  %v336_v56 = vadd.f32 %v1211_v52, %v335_v54  ;;  %v730_v57 = vpop.f32.mrb[17].mxu0  ;;  %v446_v58 = vadd.f32 %v1211_v52, %v445_v55  ;;  %v796_v59 = vpop.f32.mrb[17].mxu1 }
 0x129   :  { %v517_v60 = vmax.f32 %v336_v56, 0.0  ;;  %v539_v61 = vmax.f32 %v446_v58, 0.0 }
 0x12a   :  { %v340_v62 = vpop.f32.mrb[18].mxu0  ;;  %v450_v63 = vpop.f32.mrb[18].mxu1 }
 0x12b   :  { %560 = vst [vmem:[%s1388_s3 + $0x40] sm:$0xff] %v517_v60  ;;  %582 = vst [vmem:[%s1388_s3 + $0xf0] sm:$0xff] %v539_v61  ;;  %v341_v0 = vadd.f32 %v1211_v52, %v340_v62  ;;  %v733_v1 = vpop.f32.mrb[19].mxu0  ;;  %v451_v2 = vadd.f32 %v1211_v52, %v450_v63  ;;  %v799_v3 = vpop.f32.mrb[19].mxu1 }
 0x12d   :  { %v518_v4 = vmax.f32 %v341_v0, 0.0  ;;  %v540_v5 = vmax.f32 %v451_v2, 0.0 }
 0x12e   :  { %v345_v6 = vpop.f32.mrb[20].mxu0  ;;  %v455_v7 = vpop.f32.mrb[20].mxu1 }
 0x12f   :  { %561 = vst [vmem:[%s1388_s3 + $0x48] sm:$0xff] %v518_v4  ;;  %583 = vst [vmem:[%s1388_s3 + $0xf8] sm:$0xff] %v540_v5  ;;  %v346_v8 = vadd.f32 %v1211_v52, %v345_v6  ;;  %v736_v9 = vpop.f32.mrb[21].mxu0  ;;  %v456_v10 = vadd.f32 %v1211_v52, %v455_v7  ;;  %v802_v11 = vpop.f32.mrb[21].mxu1 }
 0x131   :  { %v519_v12 = vmax.f32 %v346_v8, 0.0  ;;  %v541_v13 = vmax.f32 %v456_v10, 0.0 }
 0x132   :  { %v350_v14 = vpop.f32.mrb[22].mxu0  ;;  %v460_v15 = vpop.f32.mrb[22].mxu1 }
 0x133   :  { %562 = vst [vmem:[%s1388_s3 + $0x50] sm:$0xff] %v519_v12  ;;  %584 = vst [vmem:[%s1388_s3 + $0x100] sm:$0xff] %v541_v13  ;;  %v351_v16 = vadd.f32 %v1211_v52, %v350_v14  ;;  %v739_v17 = vpop.f32.mrb[23].mxu0  ;;  %v461_v18 = vadd.f32 %v1211_v52, %v460_v15  ;;  %v805_v19 = vpop.f32.mrb[23].mxu1 }
 0x135   :  { %v520_v20 = vmax.f32 %v351_v16, 0.0  ;;  %v542_v21 = vmax.f32 %v461_v18, 0.0 }
 0x136   :  { %v355_v22 = vpop.f32.mrb[24].mxu0  ;;  %v465_v23 = vpop.f32.mrb[24].mxu1 }
 0x137   :  { %563 = vst [vmem:[%s1388_s3 + $0x58] sm:$0xff] %v520_v20  ;;  %585 = vst [vmem:[%s1388_s3 + $0x108] sm:$0xff] %v542_v21  ;;  %v356_v24 = vadd.f32 %v1211_v52, %v355_v22  ;;  %v742_v25 = vpop.f32.mrb[25].mxu0  ;;  %v466_v26 = vadd.f32 %v1211_v52, %v465_v23  ;;  %v808_v27 = vpop.f32.mrb[25].mxu1 }
 0x139   :  { %v521_v28 = vmax.f32 %v356_v24, 0.0  ;;  %v543_v29 = vmax.f32 %v466_v26, 0.0 }
 0x13a   :  { %v360_v30 = vpop.f32.mrb[26].mxu0  ;;  %v470_v31 = vpop.f32.mrb[26].mxu1 }
 0x13b   :  { %564 = vst [vmem:[%s1388_s3 + $0x60] sm:$0xff] %v521_v28  ;;  %586 = vst [vmem:[%s1388_s3 + $0x110] sm:$0xff] %v543_v29  ;;  %v361_v32 = vadd.f32 %v1211_v52, %v360_v30  ;;  %v745_v33 = vpop.f32.mrb[27].mxu0  ;;  %v471_v34 = vadd.f32 %v1211_v52, %v470_v31  ;;  %v811_v35 = vpop.f32.mrb[27].mxu1 }
 0x13d   :  { %v522_v36 = vmax.f32 %v361_v32, 0.0  ;;  %v544_v37 = vmax.f32 %v471_v34, 0.0 }
 0x13e   :  { %v365_v38 = vpop.f32.mrb[28].mxu0  ;;  %v475_v39 = vpop.f32.mrb[28].mxu1 }
 0x13f   :  { %565 = vst [vmem:[%s1388_s3 + $0x68] sm:$0xff] %v522_v36  ;;  %587 = vst [vmem:[%s1388_s3 + $0x118] sm:$0xff] %v544_v37  ;;  %v366_v40 = vadd.f32 %v1211_v52, %v365_v38  ;;  %v748_v41 = vpop.f32.mrb[29].mxu0  ;;  %v476_v42 = vadd.f32 %v1211_v52, %v475_v39  ;;  %v814_v43 = vpop.f32.mrb[29].mxu1 }
 0x141   :  { %v523_v44 = vmax.f32 %v366_v40, 0.0  ;;  %v545_v45 = vmax.f32 %v476_v42, 0.0 }
 0x142   :  { %v370_v46 = vpop.f32.mrb[30].mxu0  ;;  %v480_v47 = vpop.f32.mrb[30].mxu1 }
 0x143   :  { %566 = vst [vmem:[%s1388_s3 + $0x70] sm:$0xff] %v523_v44  ;;  %588 = vst [vmem:[%s1388_s3 + $0x120] sm:$0xff] %v545_v45  ;;  %v371_v48 = vadd.f32 %v1211_v52, %v370_v46  ;;  %v751_v49 = vpop.f32.mrb[31].mxu0  ;;  %v481_v50 = vadd.f32 %v1211_v52, %v480_v47  ;;  %v817_v51 = vpop.f32.mrb[31].mxu1 }
 0x145   :  { %v524_v53 = vmax.f32 %v371_v48, 0.0  ;;  %v546_v54 = vmax.f32 %v481_v50, 0.0 }
 0x146   :  { %v375_v55 = vpop.f32.mrb[32].mxu0  ;;  %v485_v56 = vpop.f32.mrb[32].mxu1 }
 0x147   :  { %567 = vst [vmem:[%s1388_s3 + $0x78] sm:$0xff] %v524_v53  ;;  %589 = vst [vmem:[%s1388_s3 + $0x128] sm:$0xff] %v546_v54  ;;  %v376_v57 = vadd.f32 %v1211_v52, %v375_v55  ;;  %v754_v58 = vpop.f32.mrb[33].mxu0  ;;  %v486_v59 = vadd.f32 %v1211_v52, %v485_v56  ;;  %v820_v60 = vpop.f32.mrb[33].mxu1 }
 0x149   :  { %v525_v61 = vmax.f32 %v376_v57, 0.0  ;;  %v547_v62 = vmax.f32 %v486_v59, 0.0 }
 0x14a   :  { %v380_v63 = vpop.f32.mrb[34].mxu0  ;;  %v490_v0 = vpop.f32.mrb[34].mxu1 }
 0x14b   :  { %568 = vst [vmem:[%s1388_s3 + $0x80] sm:$0xff] %v525_v61  ;;  %590 = vst [vmem:[%s1388_s3 + $0x130] sm:$0xff] %v547_v62  ;;  %v381_v1 = vadd.f32 %v1211_v52, %v380_v63  ;;  %v757_v2 = vpop.f32.mrb[35].mxu0  ;;  %v491_v3 = vadd.f32 %v1211_v52, %v490_v0  ;;  %v823_v4 = vpop.f32.mrb[35].mxu1 }
 0x14d   :  { %v526_v5 = vmax.f32 %v381_v1, 0.0  ;;  %v548_v6 = vmax.f32 %v491_v3, 0.0 }
 0x14e   :  { %v385_v7 = vpop.f32.mrb[36].mxu0  ;;  %v495_v8 = vpop.f32.mrb[36].mxu1 }
 0x14f   :  { %569 = vst [vmem:[%s1388_s3 + $0x88] sm:$0xff] %v526_v5  ;;  %591 = vst [vmem:[%s1388_s3 + $0x138] sm:$0xff] %v548_v6  ;;  %v386_v9 = vadd.f32 %v1211_v52, %v385_v7  ;;  %v760_v10 = vpop.f32.mrb[37].mxu0  ;;  %v496_v11 = vadd.f32 %v1211_v52, %v495_v8  ;;  %v826_v12 = vpop.f32.mrb[37].mxu1 }
 0x151   :  { %v527_v13 = vmax.f32 %v386_v9, 0.0  ;;  %v549_v14 = vmax.f32 %v496_v11, 0.0 }
 0x152   :  { %v390_v15 = vpop.f32.mrb[38].mxu0  ;;  %v500_v16 = vpop.f32.mrb[38].mxu1 }
 0x153   :  { %570 = vst [vmem:[%s1388_s3 + $0x90] sm:$0xff] %v527_v13  ;;  %592 = vst [vmem:[%s1388_s3 + $0x140] sm:$0xff] %v549_v14  ;;  %v391_v17 = vadd.f32 %v1211_v52, %v390_v15  ;;  %v763_v18 = vpop.f32.mrb[39].mxu0  ;;  %v501_v19 = vadd.f32 %v1211_v52, %v500_v16  ;;  %v829_v20 = vpop.f32.mrb[39].mxu1 }
 0x155   :  { %v528_v21 = vmax.f32 %v391_v17, 0.0  ;;  %v550_v22 = vmax.f32 %v501_v19, 0.0 }
 0x156   :  { %v395_v23 = vpop.f32.mrb[40].mxu0  ;;  %v505_v24 = vpop.f32.mrb[40].mxu1 }
 0x157   :  { %571 = vst [vmem:[%s1388_s3 + $0x98] sm:$0xff] %v528_v21  ;;  %593 = vst [vmem:[%s1388_s3 + $0x148] sm:$0xff] %v550_v22  ;;  %v396_v25 = vadd.f32 %v1211_v52, %v395_v23  ;;  %v766_v26 = vpop.f32.mrb[41].mxu0  ;;  %v506_v27 = vadd.f32 %v1211_v52, %v505_v24  ;;  %v832_v28 = vpop.f32.mrb[41].mxu1 }
 0x159   :  { %v529_v29 = vmax.f32 %v396_v25, 0.0  ;;  %v551_v30 = vmax.f32 %v506_v27, 0.0 }
 0x15a   :  { %v400_v31 = vpop.f32.mrb[42].mxu0 }
 0x15b   :  { %572 = vst [vmem:[%s1388_s3 + $0xa0] sm:$0xff] %v529_v29  ;;  %594 = vst [vmem:[%s1388_s3 + $0x150] sm:$0x3] %v551_v30  ;;  %v401_v32 = vadd.f32 %v1211_v52, %v400_v31  ;;  %v769_v33 = vpop.f32.mrb[43].mxu0 }
 0x15d   :  { %v530_v34 = vmax.f32 %v401_v32, 0.0 }
 0x15f   :  { %573 = vst [vmem:[%s1388_s3 + $0xa8] sm:$0xff] %v530_v34 }
 0x160   :  { %599 = vsyncpa [#allocation3], 1 }
 0x161   :  { %600 = vsyncpa [#allocation5], 1 }

// kernel: simple_cnn_forward.4
= control target key start
LH: loop header
LB: loop body
LE: loop exit
PB: predicated region body
PF: predicated region fallthrough
CT: control target
= control target key end

     0   :  { %8 = vsyncpa [#allocation4], 0  ;;  %s14110_s0 = inlined_call_operand.vmem [shape: f32[2,26,26,32], index: 0, kind: input, shape index: {}]   ;;  %s14111_s1 = inlined_call_operand.hbm [shape: f32[9,32,64], index: 1, kind: input, shape index: {}]   ;;  %s14112_s2 = inlined_call_operand.hbm [shape: f32[1,64], index: 2, kind: input, shape index: {}]   ;;  %s14113_s3 = inlined_call_operand.vmem [shape: f32[288,64], index: 3, kind: output, shape index: {}]  }
   0x1   :  { %9 = vsyncpa [#allocation6], 0  ;;  %s11883_s12 = smov [#allocation3]   ;;  %s11827_s16 = scalar_lea.hbm %s14111_s1, 4608 }
   0x2   :  { %s17_s13 = sshll.u32 %s11883_s12, 4  ;;  %p11828_p0 = scmp.ne.s32.totalorder %s14111_s1, %s11827_s16  ;;  %s18_s13 = int_to_ptr.vmem [resolvable:$true] %s17_s13 }
   0x3   :  { %p11831_p1 = scmp.lt.u32.totalorder %s11827_s16, %s14111_s1 }
   0x5   :  { %p11833_p2 = pnand %p11831_p1, %p11828_p0 }
   0x7   :  { %11836 = shalt.err (!%p11833_p2)
}
   0x8   :  { %s11837_s21 = scalar_lea.vmem %s18_s13, 4608  ;;  %p11842_p4 = scmp.lt.s32.totalorder %s18_s13, %s18_s13 }
   0x9   :  { %p11838_p3 = scmp.ne.s32.totalorder %s18_s13, %s11837_s21  ;;  %p11843_p5 = scmp.lt.s32.totalorder %s11837_s21, %s11837_s21 }
   0xb   :  { %p11844_p6 = por %p11843_p5, %p11842_p4 }
   0xd   :  { %p11845_p7 = pnand %p11844_p6, %p11838_p3 }
   0xf   :  { %11848 = shalt.err (!%p11845_p7)
}
  0x10   :  { %s11884_s22 = smov 128   ;;  %s11885_s23 = smov 8  }
  0x11   :  { %23 = dma.hbm_to_vmem [thread:$0]  %s14111_s1, 4608, %s18_s13, [#allocation4], %s11884_s22, %s11884_s22, %s11885_s23  }
  0x12   :  { %s11886_s26 = smov [#allocation5]   ;;  %s11849_s30 = scalar_lea.hbm %s14112_s2, 16 }
  0x13   :  { %s30_s27 = sshll.u32 %s11886_s26, 4  ;;  %p11850_p8 = scmp.ne.s32.totalorder %s14112_s2, %s11849_s30  ;;  %s31_s27 = int_to_ptr.vmem [resolvable:$true] %s30_s27 }
  0x14   :  { %p11853_p9 = scmp.lt.u32.totalorder %s11849_s30, %s14112_s2 }
  0x16   :  { %p11855_p10 = pnand %p11853_p9, %p11850_p8 }
  0x18   :  { %11858 = shalt.err (!%p11855_p10)
}
  0x19   :  { %s11859_s8 = scalar_lea.vmem %s31_s27, 16  ;;  %s11863_s1 = scalar_lea.vmem %s31_s27, 32 }
  0x1a   :  { %p11860_p11 = scmp.ne.s32.totalorder %s31_s27, %s11859_s8  ;;  %p11864_p12 = scmp.lt.s32.totalorder %s31_s27, %s31_s27 }
  0x1b   :  { %p11865_p13 = scmp.lt.s32.totalorder %s11863_s1, %s11859_s8 }
  0x1d   :  { %p11866_p0 = por %p11865_p13, %p11864_p12 }
  0x1f   :  { %p11867_p1 = pnand %p11866_p0, %p11860_p11 }
  0x21   :  { %11870 = shalt.err (!%p11867_p1)
}
  0x22   :  { %33 = dma.hbm_to_vmem [thread:$0]  %s14112_s2, 16, %s31_s27, [#allocation6]  }
  0x23   :  { %11875 = dma.done.wait [#allocation4], 4608  }
  0x24   :  { %11876 = vsyncadd [#allocation4], 4294962688 }
  0x25   :  { %11877 = dma.done.wait [#allocation6], 16  }
  0x26   :  { %11878 = vsyncadd [#allocation6], 4294967280  ;;  %v11931_v0 = vld [vmem:[#allocation5] ss:$0 sm:$0xff]  ;;  %s11933_s11 = smov 0  }
  0x27   :  { %14219 = vst [vmem:[#allocation9_spill] sm:$0xff] %v11931_v0 }
  0x28 LB: > { %v126_v1 = vld [vmem:[#allocation3 + $0x20] sm:$0xff]  ;;  %v127_v2 = vld [vmem:[#allocation3 + $0x28] sm:$0xff]  ;;  %v128_v3 = vld [vmem:[#allocation3 + $0x30] sm:$0xff]  ;;  %s47_s2 = smul.u32 832, %s11881_s11  ;;  %vm130_vm0 = vcmask 261120   ;;  %vm3929_vm1 = vcmask 523264   ;;  %s11881_s11 = sphi %s11933_s11, %s46_s11  }
  0x29   : > { %v11095_v4 = vpack.c.bf16 %v127_v2, %v126_v1  ;;  %v129_v5 = vld [vmem:[#allocation3 + $0x38] sm:$0xff]  ;;  %v85_v7 = vld [vmem:[#allocation3] sm:$0xff]  ;;  %v86_v8 = vld [vmem:[#allocation3 + $0x8] sm:$0xff]  ;;  %s8026_s15 = smul.u32 144, %s11881_s11  ;;  %s46_s11 = sadd.s32 1, %s11881_s11  }
  0x2a   : > { %v11099_v6 = vpack.c.bf16 %v129_v5, %v128_v3  ;;  %s11942_s14 = scalar_lea.vmem %s14110_s0, %s47_s2  ;;  %v11103_v11 = vpack.c.bf16 %v86_v8, %v85_v7  ;;  %v87_v12 = vld [vmem:[#allocation3 + $0x10] sm:$0xff]  ;;  %v88_v13 = vld [vmem:[#allocation3 + $0x18] sm:$0xff]  ;;  %v874_v19 = vld [vmem:[#allocation3 + $0x40] sm:$0xff]  ;;  %p43_p2 = scmp.ge.s32.totalorder %s46_s11, 2  }
  0x2b   : > { %11096 = vmatprep.subr.bf16.mxu0 %v11095_v4  ;;  %11168 = vmatprep.subr.bf16.mxu1 %v11095_v4  ;;  %v89_v9 = vld [vmem:[%s11942_s14 + $0x1] sm:$0xff]  ;;  %v90_v14 = vld [vmem:[%s11942_s14 + $0x9] sm:$0xff]  ;;  %v91_v16 = vld [vmem:[%s11942_s14 + $0x11] sm:$0xff]  ;;  %v11107_v18 = vpack.c.bf16 %v88_v13, %v87_v12  ;;  %s13959_s18 = scalar_lea.vmem %s14113_s3, %s8026_s15 }
  0x2c   : > { %11098 = vmatpush3.bf16.msra.mxu0 %v11095_v4  ;;  %11170 = vmatpush3.bf16.msra.mxu1 %v11095_v4  ;;  %v8647_v10 = vld [vmem:[%s11942_s14 + $0x21] sm:$0xff]  ;;  %v8648_v15 = vld [vmem:[%s11942_s14 + $0x29] sm:$0xff]  ;;  %v8649_v17 = vld [vmem:[%s11942_s14 + $0x31] sm:$0xff] }
  0x2d   : > { %11100 = vmatprep.subr.bf16.mxu0 %v11099_v6  ;;  %11172 = vmatprep.subr.bf16.mxu1 %v11099_v6  ;;  %v875_v20 = vld [vmem:[#allocation3 + $0x48] sm:$0xff]  ;;  %v94_v26 = vld [vmem:[%s11942_s14 + $0x51] sm:$0xff] }
  0x2e   : > { %9987 = vmatprep.mubr.msk.f32.mxu0 %vm130_vm0, %v89_v9  ;;  %10545 = vmatprep.mubr.msk.f32.mxu1 %vm130_vm0, %v8647_v10  ;;  %v92_v21 = vld [vmem:[%s11942_s14 + $0x41] sm:$0xff]  ;;  %v93_v23 = vld [vmem:[%s11942_s14 + $0x49] sm:$0xff]  ;;  %v11960_v25 = vpack.c.bf16 %v875_v20, %v874_v19  ;;  %v8652_v27 = vld [vmem:[%s11942_s14 + $0x71] sm:$0xff] }
  0x2f   : > { %v8650_v22 = vld [vmem:[%s11942_s14 + $0x61] sm:$0xff]  ;;  %v8651_v24 = vld [vmem:[%s11942_s14 + $0x69] sm:$0xff]  ;;  %v97_v32 = vld [vmem:[%s11942_s14 + $0x91] sm:$0xff] }
  0x30   : > { %11102 = vmatpush3.bf16.msra.mxu0 %v11099_v6  ;;  %11174 = vmatpush3.bf16.msra.mxu1 %v11099_v6  ;;  %v95_v28 = vld [vmem:[%s11942_s14 + $0x81] sm:$0xff]  ;;  %v96_v30 = vld [vmem:[%s11942_s14 + $0x89] sm:$0xff]  ;;  %v8655_v33 = vld [vmem:[%s11942_s14 + $0xb1] sm:$0xff] }
  0x31   : > { %11104 = vmatprep.subr.bf16.mxu0 %v11103_v11  ;;  %11176 = vmatprep.subr.bf16.mxu1 %v11103_v11  ;;  %v8653_v29 = vld [vmem:[%s11942_s14 + $0xa1] sm:$0xff]  ;;  %v8654_v31 = vld [vmem:[%s11942_s14 + $0xa9] sm:$0xff]  ;;  %v100_v38 = vld [vmem:[%s11942_s14 + $0xd1] sm:$0xff] }
  0x32   : > { %v98_v34 = vld [vmem:[%s11942_s14 + $0xc1] sm:$0xff]  ;;  %v99_v36 = vld [vmem:[%s11942_s14 + $0xc9] sm:$0xff]  ;;  %v8658_v39 = vld [vmem:[%s11942_s14 + $0xf1] sm:$0xff] }
  0x33   : > { %9988 = vmatmul.mubr.msk.f32.vlgmr.msra.gmra.mrb[0].mxu0 %vm130_vm0, %v90_v14  ;;  %10546 = vmatmul.mubr.msk.f32.vlgmr.msra.gmra.mrb[0].mxu1 %vm130_vm0, %v8648_v15  ;;  %v8656_v35 = vld [vmem:[%s11942_s14 + $0xe1] sm:$0xff]  ;;  %v8657_v37 = vld [vmem:[%s11942_s14 + $0xe9] sm:$0xff]  ;;  %v103_v44 = vld [vmem:[%s11942_s14 + $0x111] sm:$0xff] }
  0x34   : > { %11106 = vmatpush3.bf16.msra.mxu0 %v11103_v11  ;;  %9990 = vmatprep.mubr.msk.f32.mxu0 %vm130_vm0, %v91_v16  ;;  %v101_v40 = vld [vmem:[%s11942_s14 + $0x101] sm:$0xff]  ;;  %v102_v42 = vld [vmem:[%s11942_s14 + $0x109] sm:$0xff]  ;;  %v8661_v45 = vld [vmem:[%s11942_s14 + $0x131] sm:$0xff] }
  0x35   : > { %10548 = vmatprep.mubr.msk.f32.mxu1 %vm130_vm0, %v8649_v17  ;;  %11178 = vmatpush3.bf16.msra.mxu1 %v11103_v11  ;;  %v8659_v41 = vld [vmem:[%s11942_s14 + $0x121] sm:$0xff]  ;;  %v8660_v43 = vld [vmem:[%s11942_s14 + $0x129] sm:$0xff]  ;;  %v106_v50 = vld [vmem:[%s11942_s14 + $0x151] sm:$0xff] }
  0x36   : > { %11108 = vmatprep.subr.bf16.mxu0 %v11107_v18  ;;  %11180 = vmatprep.subr.bf16.mxu1 %v11107_v18  ;;  %v104_v46 = vld [vmem:[%s11942_s14 + $0x141] sm:$0xff]  ;;  %v105_v48 = vld [vmem:[%s11942_s14 + $0x149] sm:$0xff]  ;;  %v8664_v51 = vld [vmem:[%s11942_s14 + $0x171] sm:$0xff] }
  0x37   : > { %9991 = vmatmul.mubr.msk.f32.gmra.mrb[2].mxu0 %vm130_vm0, %v92_v21  ;;  %10549 = vmatmul.mubr.msk.f32.gmra.mrb[2].mxu1 %vm130_vm0, %v8650_v22  ;;  %v8662_v47 = vld [vmem:[%s11942_s14 + $0x161] sm:$0xff]  ;;  %v8663_v49 = vld [vmem:[%s11942_s14 + $0x169] sm:$0xff]  ;;  %v109_v56 = vld [vmem:[%s11942_s14 + $0x191] sm:$0xff] }
  0x38   : > { %9993 = vmatprep.mubr.msk.f32.mxu0 %vm130_vm0, %v93_v23  ;;  %10551 = vmatprep.mubr.msk.f32.mxu1 %vm130_vm0, %v8651_v24  ;;  %v107_v52 = vld [vmem:[%s11942_s14 + $0x181] sm:$0xff]  ;;  %v108_v54 = vld [vmem:[%s11942_s14 + $0x189] sm:$0xff]  ;;  %v8667_v57 = vld [vmem:[%s11942_s14 + $0x1b1] sm:$0xff] }
  0x39   : > { %11110 = vmatpush3.bf16.msra.mxu0 %v11107_v18  ;;  %11182 = vmatpush3.bf16.msra.mxu1 %v11107_v18  ;;  %v8665_v53 = vld [vmem:[%s11942_s14 + $0x1a1] sm:$0xff]  ;;  %v8666_v55 = vld [vmem:[%s11942_s14 + $0x1a9] sm:$0xff]  ;;  %v112_v62 = vld [vmem:[%s11942_s14 + $0x1d1] sm:$0xff] }
  0x3a   : > { %11112 = vmatprep.subr.bf16.mxu0 %v11960_v25  ;;  %11184 = vmatprep.subr.bf16.mxu1 %v11960_v25  ;;  %v110_v58 = vld [vmem:[%s11942_s14 + $0x1c1] sm:$0xff]  ;;  %v111_v60 = vld [vmem:[%s11942_s14 + $0x1c9] sm:$0xff]  ;;  %v8670_v63 = vld [vmem:[%s11942_s14 + $0x1f1] sm:$0xff] }
  0x3b   : > { %9994 = vmatmul.mubr.msk.f32.gmra.mrb[4].mxu0 %vm130_vm0, %v94_v26  ;;  %10552 = vmatmul.mubr.msk.f32.gmra.mrb[4].mxu1 %vm130_vm0, %v8652_v27  ;;  %v8668_v59 = vld [vmem:[%s11942_s14 + $0x1e1] sm:$0xff]  ;;  %v8669_v61 = vld [vmem:[%s11942_s14 + $0x1e9] sm:$0xff]  ;;  %v115_v5 = vld [vmem:[%s11942_s14 + $0x211] sm:$0xff] }
  0x3c   : > { %9996 = vmatprep.mubr.msk.f32.mxu0 %vm130_vm0, %v95_v28  ;;  %10554 = vmatprep.mubr.msk.f32.mxu1 %vm130_vm0, %v8653_v29  ;;  %v113_v1 = vld [vmem:[%s11942_s14 + $0x201] sm:$0xff]  ;;  %v114_v3 = vld [vmem:[%s11942_s14 + $0x209] sm:$0xff]  ;;  %v8673_v6 = vld [vmem:[%s11942_s14 + $0x231] sm:$0xff] }
  0x3d   : > { %v8671_v2 = vld [vmem:[%s11942_s14 + $0x221] sm:$0xff]  ;;  %v8672_v4 = vld [vmem:[%s11942_s14 + $0x229] sm:$0xff]  ;;  %v118_v11 = vld [vmem:[%s11942_s14 + $0x251] sm:$0xff] }
  0x3e   : > { %v116_v7 = vld [vmem:[%s11942_s14 + $0x241] sm:$0xff]  ;;  %v117_v9 = vld [vmem:[%s11942_s14 + $0x249] sm:$0xff]  ;;  %v8676_v12 = vld [vmem:[%s11942_s14 + $0x271] sm:$0xff] }
  0x3f   : > { %9997 = vmatmul.mubr.msk.f32.gmra.mrb[6].mxu0 %vm130_vm0, %v96_v30  ;;  %10555 = vmatmul.mubr.msk.f32.gmra.mrb[6].mxu1 %vm130_vm0, %v8654_v31  ;;  %v8674_v8 = vld [vmem:[%s11942_s14 + $0x261] sm:$0xff]  ;;  %v8675_v10 = vld [vmem:[%s11942_s14 + $0x269] sm:$0xff]  ;;  %v121_v17 = vld [vmem:[%s11942_s14 + $0x291] sm:$0xff] }
  0x40   : > { %9999 = vmatprep.mubr.msk.f32.mxu0 %vm130_vm0, %v97_v32  ;;  %10557 = vmatprep.mubr.msk.f32.mxu1 %vm130_vm0, %v8655_v33  ;;  %v119_v13 = vld [vmem:[%s11942_s14 + $0x281] sm:$0xff]  ;;  %v120_v15 = vld [vmem:[%s11942_s14 + $0x289] sm:$0xff]  ;;  %v8679_v18 = vld [vmem:[%s11942_s14 + $0x2b1] sm:$0xff] }
  0x41   : > { %v8677_v14 = vld [vmem:[%s11942_s14 + $0x2a1] sm:$0xff]  ;;  %v8678_v16 = vld [vmem:[%s11942_s14 + $0x2a9] sm:$0xff]  ;;  %v124_v23 = vld [vmem:[%s11942_s14 + $0x2d1] sm:$0xff] }
  0x42   : > { %v122_v19 = vld [vmem:[%s11942_s14 + $0x2c1] sm:$0xff]  ;;  %v123_v21 = vld [vmem:[%s11942_s14 + $0x2c9] sm:$0xff]  ;;  %v8682_v24 = vld [vmem:[%s11942_s14 + $0x2f1] sm:$0xff] }
  0x43   : > { %10000 = vmatmul.mubr.msk.f32.gmra.mrb[8].mxu0 %vm130_vm0, %v98_v34  ;;  %10558 = vmatmul.mubr.msk.f32.gmra.mrb[8].mxu1 %vm130_vm0, %v8656_v35  ;;  %v8680_v20 = vld [vmem:[%s11942_s14 + $0x2e1] sm:$0xff]  ;;  %v8681_v22 = vld [vmem:[%s11942_s14 + $0x2e9] sm:$0xff]  ;;  %v877_v29 = vld [vmem:[#allocation3 + $0x58] sm:$0xff] }
  0x44   : > { %10002 = vmatprep.mubr.msk.f32.mxu0 %vm130_vm0, %v99_v36  ;;  %10560 = vmatprep.mubr.msk.f32.mxu1 %vm130_vm0, %v8657_v37  ;;  %v49_v26 = vld [vmem:[%s11942_s14] sm:$0xff]  ;;  %v876_v28 = vld [vmem:[#allocation3 + $0x50] sm:$0xff]  ;;  %v50_v30 = vld [vmem:[%s11942_s14 + $0x8] sm:$0xff] }
  0x45   : > { %v12092_v27 = vld [vmem:[%s11942_s14 + $0x20] sm:$0xff]  ;;  %v12101_v31 = vld [vmem:[%s11942_s14 + $0x28] sm:$0xff]  ;;  %v51_v32 = vld [vmem:[%s11942_s14 + $0x10] sm:$0xff]  ;;  %v11115_v34 = vpack.c.bf16 %v877_v29, %v876_v28 }
  0x46   : > { %v12105_v33 = vld [vmem:[%s11942_s14 + $0x30] sm:$0xff]  ;;  %v1306_v35 = vld [vmem:[#allocation3 + $0x60] sm:$0xff]  ;;  %v1307_v36 = vld [vmem:[#allocation3 + $0x68] sm:$0xff] }
  0x47   : > { %10003 = vmatmul.mubr.msk.f32.gmra.mrb[10].mxu0 %vm130_vm0, %v100_v38  ;;  %10561 = vmatmul.mubr.msk.f32.gmra.mrb[10].mxu1 %vm130_vm0, %v8658_v39  ;;  %v12113_v37 = vld [vmem:[%s11942_s14 + $0x40] sm:$0xff]  ;;  %v12121_v39 = vld [vmem:[%s11942_s14 + $0x48] sm:$0xff]  ;;  %v12380_v28 = vld [vmem:[%s11942_s14 + $0x250] sm:$0xff] }
  0x48   : > { %10005 = vmatprep.mubr.msk.f32.mxu0 %vm130_vm0, %v101_v40  ;;  %10563 = vmatprep.mubr.msk.f32.mxu1 %vm130_vm0, %v8659_v41  ;;  %v12116_v38 = vld [vmem:[%s11942_s14 + $0x60] sm:$0xff]  ;;  %v12124_v40 = vld [vmem:[%s11942_s14 + $0x68] sm:$0xff]  ;;  %v12127_v41 = vpack.c.bf16 %v1307_v36, %v1306_v35  ;;  %14223 = vst [vmem:[#allocation13_spill] sm:$0xff] %v12380_v28  ;;  %v12383_v29 = vld [vmem:[%s11942_s14 + $0x270] sm:$0xff] }
  0x49   : > { %14224 = vst [vmem:[#allocation14_spill] sm:$0xff] %v12383_v29  ;;  %v12403_v35 = vld [vmem:[%s11942_s14 + $0x2a8] sm:$0xff]  ;;  %v12406_v36 = vld [vmem:[%s11942_s14 + $0x290] sm:$0xff] }
  0x4a   : > { %14228 = vst [vmem:[#allocation18_spill] sm:$0xff] %v12403_v35  ;;  %14229 = vst [vmem:[#allocation19_spill] sm:$0xff] %v12406_v36  ;;  %v12409_v0 = vld [vmem:[%s11942_s14 + $0x2b0] sm:$0xff] }
  0x4b   : > { %10006 = vmatmul.mubr.msk.f32.gmra.mrb[12].mxu0 %vm130_vm0, %v102_v42  ;;  %10564 = vmatmul.mubr.msk.f32.gmra.mrb[12].mxu1 %vm130_vm0, %v8660_v43  ;;  %v12141_v42 = vld [vmem:[%s11942_s14 + $0x70] sm:$0xff]  ;;  %v12144_v43 = vld [vmem:[%s11942_s14 + $0x80] sm:$0xff]  ;;  %14230 = vst [vmem:[#allocation20_spill] sm:$0xff] %v12409_v0 }
  0x4c   : > { %10008 = vmatprep.mubr.msk.f32.mxu0 %vm130_vm0, %v103_v44  ;;  %10566 = vmatprep.mubr.msk.f32.mxu1 %vm130_vm0, %v8661_v45  ;;  %v12147_v44 = vld [vmem:[%s11942_s14 + $0xa0] sm:$0xff]  ;;  %v12160_v45 = vld [vmem:[%s11942_s14 + $0x88] sm:$0xff] }
  0x4f   : > { %10009 = vmatmul.mubr.msk.f32.gmra.mrb[14].mxu0 %vm130_vm0, %v104_v46  ;;  %10567 = vmatmul.mubr.msk.f32.gmra.mrb[14].mxu1 %vm130_vm0, %v8662_v47  ;;  %v12163_v46 = vld [vmem:[%s11942_s14 + $0xa8] sm:$0xff]  ;;  %v12166_v47 = vld [vmem:[%s11942_s14 + $0x90] sm:$0xff] }
  0x50   : > { %10011 = vmatprep.mubr.msk.f32.mxu0 %vm130_vm0, %v105_v48  ;;  %10569 = vmatprep.mubr.msk.f32.mxu1 %vm130_vm0, %v8663_v49  ;;  %v12169_v48 = vld [vmem:[%s11942_s14 + $0xb0] sm:$0xff]  ;;  %v12180_v49 = vld [vmem:[%s11942_s14 + $0xc0] sm:$0xff] }
  0x53   : > { %10012 = vmatmul.mubr.msk.f32.gmra.mrb[16].mxu0 %vm130_vm0, %v106_v50  ;;  %10570 = vmatmul.mubr.msk.f32.gmra.mrb[16].mxu1 %vm130_vm0, %v8664_v51  ;;  %v12183_v50 = vld [vmem:[%s11942_s14 + $0xe0] sm:$0xff]  ;;  %v12186_v51 = vld [vmem:[%s11942_s14 + $0xc8] sm:$0xff] }
  0x54   : > { %10014 = vmatprep.mubr.msk.f32.mxu0 %vm130_vm0, %v107_v52  ;;  %10572 = vmatprep.mubr.msk.f32.mxu1 %vm130_vm0, %v8665_v53  ;;  %v12189_v52 = vld [vmem:[%s11942_s14 + $0xe8] sm:$0xff]  ;;  %v12200_v53 = vld [vmem:[%s11942_s14 + $0xd0] sm:$0xff] }
  0x57   : > { %10015 = vmatmul.mubr.msk.f32.gmra.mrb[18].mxu0 %vm130_vm0, %v108_v54  ;;  %10573 = vmatmul.mubr.msk.f32.gmra.mrb[18].mxu1 %vm130_vm0, %v8666_v55  ;;  %v12203_v54 = vld [vmem:[%s11942_s14 + $0xf0] sm:$0xff]  ;;  %v12206_v55 = vld [vmem:[%s11942_s14 + $0x100] sm:$0xff] }
  0x58   : > { %10017 = vmatprep.mubr.msk.f32.mxu0 %vm130_vm0, %v109_v56  ;;  %10575 = vmatprep.mubr.msk.f32.mxu1 %vm130_vm0, %v8667_v57  ;;  %v12209_v56 = vld [vmem:[%s11942_s14 + $0x120] sm:$0xff]  ;;  %v12220_v57 = vld [vmem:[%s11942_s14 + $0x108] sm:$0xff] }
  0x5b   : > { %10018 = vmatmul.mubr.msk.f32.gmra.mrb[20].mxu0 %vm130_vm0, %v110_v58  ;;  %10576 = vmatmul.mubr.msk.f32.gmra.mrb[20].mxu1 %vm130_vm0, %v8668_v59  ;;  %v12223_v58 = vld [vmem:[%s11942_s14 + $0x128] sm:$0xff]  ;;  %v12226_v59 = vld [vmem:[%s11942_s14 + $0x110] sm:$0xff] }
  0x5c   : > { %10020 = vmatprep.mubr.msk.f32.mxu0 %vm130_vm0, %v111_v60  ;;  %10578 = vmatprep.mubr.msk.f32.mxu1 %vm130_vm0, %v8669_v61  ;;  %v12229_v60 = vld [vmem:[%s11942_s14 + $0x130] sm:$0xff]  ;;  %v12240_v61 = vld [vmem:[%s11942_s14 + $0x140] sm:$0xff] }
  0x5f   : > { %10021 = vmatmul.mubr.msk.f32.gmra.mrb[22].mxu0 %vm130_vm0, %v112_v62  ;;  %10579 = vmatmul.mubr.msk.f32.gmra.mrb[22].mxu1 %vm130_vm0, %v8670_v63  ;;  %v12243_v62 = vld [vmem:[%s11942_s14 + $0x160] sm:$0xff]  ;;  %v12246_v63 = vld [vmem:[%s11942_s14 + $0x148] sm:$0xff] }
  0x60   : > { %10023 = vmatprep.mubr.msk.f32.mxu0 %vm130_vm0, %v113_v1  ;;  %10581 = vmatprep.mubr.msk.f32.mxu1 %vm130_vm0, %v8671_v2  ;;  %v12249_v1 = vld [vmem:[%s11942_s14 + $0x168] sm:$0xff]  ;;  %v12260_v2 = vld [vmem:[%s11942_s14 + $0x150] sm:$0xff] }
  0x63   : > { %10024 = vmatmul.mubr.msk.f32.gmra.mrb[24].mxu0 %vm130_vm0, %v114_v3  ;;  %10582 = vmatmul.mubr.msk.f32.gmra.mrb[24].mxu1 %vm130_vm0, %v8672_v4  ;;  %v12263_v3 = vld [vmem:[%s11942_s14 + $0x170] sm:$0xff]  ;;  %v12266_v4 = vld [vmem:[%s11942_s14 + $0x180] sm:$0xff] }
  0x64   : > { %10026 = vmatprep.mubr.msk.f32.mxu0 %vm130_vm0, %v115_v5  ;;  %10584 = vmatprep.mubr.msk.f32.mxu1 %vm130_vm0, %v8673_v6  ;;  %v12269_v5 = vld [vmem:[%s11942_s14 + $0x1a0] sm:$0xff]  ;;  %v12280_v6 = vld [vmem:[%s11942_s14 + $0x188] sm:$0xff] }
  0x67   : > { %10027 = vmatmul.mubr.msk.f32.gmra.mrb[26].mxu0 %vm130_vm0, %v116_v7  ;;  %10585 = vmatmul.mubr.msk.f32.gmra.mrb[26].mxu1 %vm130_vm0, %v8674_v8  ;;  %v12283_v7 = vld [vmem:[%s11942_s14 + $0x1a8] sm:$0xff]  ;;  %v12286_v8 = vld [vmem:[%s11942_s14 + $0x190] sm:$0xff] }
  0x68   : > { %10029 = vmatprep.mubr.msk.f32.mxu0 %vm130_vm0, %v117_v9  ;;  %10587 = vmatprep.mubr.msk.f32.mxu1 %vm130_vm0, %v8675_v10  ;;  %v12289_v9 = vld [vmem:[%s11942_s14 + $0x1b0] sm:$0xff]  ;;  %v12300_v10 = vld [vmem:[%s11942_s14 + $0x1c0] sm:$0xff] }
  0x6b   : > { %10030 = vmatmul.mubr.msk.f32.gmra.mrb[28].mxu0 %vm130_vm0, %v118_v11  ;;  %10588 = vmatmul.mubr.msk.f32.gmra.mrb[28].mxu1 %vm130_vm0, %v8676_v12  ;;  %v12303_v11 = vld [vmem:[%s11942_s14 + $0x1e0] sm:$0xff]  ;;  %v12306_v12 = vld [vmem:[%s11942_s14 + $0x1c8] sm:$0xff] }
  0x6c   : > { %10032 = vmatprep.mubr.msk.f32.mxu0 %vm130_vm0, %v119_v13  ;;  %10590 = vmatprep.mubr.msk.f32.mxu1 %vm130_vm0, %v8677_v14  ;;  %v12309_v13 = vld [vmem:[%s11942_s14 + $0x1e8] sm:$0xff]  ;;  %v12320_v14 = vld [vmem:[%s11942_s14 + $0x1d0] sm:$0xff] }
  0x6f   : > { %10033 = vmatmul.mubr.msk.f32.gmra.mrb[30].mxu0 %vm130_vm0, %v120_v15  ;;  %10591 = vmatmul.mubr.msk.f32.gmra.mrb[30].mxu1 %vm130_vm0, %v8678_v16  ;;  %v12323_v15 = vld [vmem:[%s11942_s14 + $0x1f0] sm:$0xff]  ;;  %v12326_v16 = vld [vmem:[%s11942_s14 + $0x200] sm:$0xff] }
  0x70   : > { %10035 = vmatprep.mubr.msk.f32.mxu0 %vm130_vm0, %v121_v17  ;;  %10593 = vmatprep.mubr.msk.f32.mxu1 %vm130_vm0, %v8679_v18  ;;  %v12329_v17 = vld [vmem:[%s11942_s14 + $0x220] sm:$0xff]  ;;  %v12340_v18 = vld [vmem:[%s11942_s14 + $0x208] sm:$0xff] }
  0x73   : > { %10036 = vmatmul.mubr.msk.f32.gmra.mrb[32].mxu0 %vm130_vm0, %v122_v19  ;;  %10594 = vmatmul.mubr.msk.f32.gmra.mrb[32].mxu1 %vm130_vm0, %v8680_v20  ;;  %v12343_v19 = vld [vmem:[%s11942_s14 + $0x228] sm:$0xff]  ;;  %v12346_v20 = vld [vmem:[%s11942_s14 + $0x210] sm:$0xff] }
  0x74   : > { %10038 = vmatprep.mubr.msk.f32.mxu0 %vm130_vm0, %v123_v21  ;;  %10596 = vmatprep.mubr.msk.f32.mxu1 %vm130_vm0, %v8681_v22  ;;  %v12349_v21 = vld [vmem:[%s11942_s14 + $0x230] sm:$0xff]  ;;  %v12360_v22 = vld [vmem:[%s11942_s14 + $0x240] sm:$0xff] }
  0x75   : > { %14220 = vst [vmem:[#allocation10_spill] sm:$0xff] %v12349_v21 }
  0x77   : > { %10039 = vmatmul.mubr.msk.f32.gmra.mrb[34].mxu0 %vm130_vm0, %v124_v23  ;;  %10597 = vmatmul.mubr.msk.f32.gmra.mrb[34].mxu1 %vm130_vm0, %v8682_v24  ;;  %v12363_v23 = vld [vmem:[%s11942_s14 + $0x260] sm:$0xff]  ;;  %v12366_v24 = vld [vmem:[%s11942_s14 + $0x248] sm:$0xff] }
  0x78   : > { %10049 = vmatprep.mubr.msk.f32.mxu0 %vm130_vm0, %v49_v26  ;;  %10607 = vmatprep.mubr.msk.f32.mxu1 %vm130_vm0, %v12092_v27  ;;  %14221 = vst [vmem:[#allocation11_spill] sm:$0xff] %v12363_v23  ;;  %v12369_v26 = vld [vmem:[%s11942_s14 + $0x268] sm:$0xff] }
  0x79   : > { %14222 = vst [vmem:[#allocation12_spill] sm:$0xff] %v12369_v26 }
  0x7b   : > { %10050 = vmatmul.mubr.msk.f32.vlgmr.msra.gmra.mrb[0].mxu0 %vm130_vm0, %v50_v30  ;;  %10608 = vmatmul.mubr.msk.f32.vlgmr.msra.gmra.mrb[0].mxu1 %vm130_vm0, %v12101_v31  ;;  %v12386_v30 = vld [vmem:[%s11942_s14 + $0x280] sm:$0xff] }
  0x7c   : > { %11114 = vmatpush3.bf16.msra.mxu0 %v11960_v25  ;;  %10052 = vmatprep.mubr.msk.f32.mxu0 %vm130_vm0, %v51_v32  ;;  %14225 = vst [vmem:[#allocation15_spill] sm:$0xff] %v12386_v30  ;;  %v12389_v32 = vld [vmem:[%s11942_s14 + $0x2a0] sm:$0xff] }
  0x7d   : > { %10610 = vmatprep.mubr.msk.f32.mxu1 %vm130_vm0, %v12105_v33  ;;  %11186 = vmatpush3.bf16.msra.mxu1 %v11960_v25  ;;  %v12138_v25 = vld [vmem:[%s11942_s14 + $0x50] sm:$0xff]  ;;  %14226 = vst [vmem:[#allocation16_spill] sm:$0xff] %v12389_v32 }
  0x7e   : > { %11116 = vmatprep.subr.bf16.mxu0 %v11115_v34  ;;  %11188 = vmatprep.subr.bf16.mxu1 %v11115_v34 }
  0x7f   : > { %10053 = vmatmul.mubr.msk.f32.gmra.mrb[2].mxu0 %vm130_vm0, %v12113_v37  ;;  %10611 = vmatmul.mubr.msk.f32.gmra.mrb[2].mxu1 %vm130_vm0, %v12116_v38 }
  0x80   : > { %10055 = vmatprep.mubr.msk.f32.mxu0 %vm130_vm0, %v12121_v39  ;;  %10613 = vmatprep.mubr.msk.f32.mxu1 %vm130_vm0, %v12124_v40 }
  0x81   : > { %11118 = vmatpush3.bf16.msra.mxu0 %v11115_v34  ;;  %11190 = vmatpush3.bf16.msra.mxu1 %v11115_v34  ;;  %v12400_v34 = vld [vmem:[%s11942_s14 + $0x288] sm:$0xff] }
  0x82   : > { %11120 = vmatprep.subr.bf16.mxu0 %v12127_v41  ;;  %11192 = vmatprep.subr.bf16.mxu1 %v12127_v41  ;;  %14227 = vst [vmem:[#allocation17_spill] sm:$0xff] %v12400_v34 }
  0x83   : > { %10056 = vmatmul.mubr.msk.f32.gmra.mrb[4].mxu0 %vm130_vm0, %v12138_v25  ;;  %10614 = vmatmul.mubr.msk.f32.gmra.mrb[4].mxu1 %vm130_vm0, %v12141_v42 }
  0x84   : > { %10058 = vmatprep.mubr.msk.f32.mxu0 %vm130_vm0, %v12144_v43  ;;  %10616 = vmatprep.mubr.msk.f32.mxu1 %vm130_vm0, %v12147_v44 }
  0x87   : > { %10059 = vmatmul.mubr.msk.f32.gmra.mrb[6].mxu0 %vm130_vm0, %v12160_v45  ;;  %10617 = vmatmul.mubr.msk.f32.gmra.mrb[6].mxu1 %vm130_vm0, %v12163_v46 }
  0x88   : > { %10061 = vmatprep.mubr.msk.f32.mxu0 %vm130_vm0, %v12166_v47  ;;  %10619 = vmatprep.mubr.msk.f32.mxu1 %vm130_vm0, %v12169_v48 }
  0x8b   : > { %10062 = vmatmul.mubr.msk.f32.gmra.mrb[8].mxu0 %vm130_vm0, %v12180_v49  ;;  %10620 = vmatmul.mubr.msk.f32.gmra.mrb[8].mxu1 %vm130_vm0, %v12183_v50 }
  0x8c   : > { %10064 = vmatprep.mubr.msk.f32.mxu0 %vm130_vm0, %v12186_v51  ;;  %10622 = vmatprep.mubr.msk.f32.mxu1 %vm130_vm0, %v12189_v52 }
  0x8f   : > { %10065 = vmatmul.mubr.msk.f32.gmra.mrb[10].mxu0 %vm130_vm0, %v12200_v53  ;;  %10623 = vmatmul.mubr.msk.f32.gmra.mrb[10].mxu1 %vm130_vm0, %v12203_v54 }
  0x90   : > { %10067 = vmatprep.mubr.msk.f32.mxu0 %vm130_vm0, %v12206_v55  ;;  %10625 = vmatprep.mubr.msk.f32.mxu1 %vm130_vm0, %v12209_v56 }
  0x93   : > { %10068 = vmatmul.mubr.msk.f32.gmra.mrb[12].mxu0 %vm130_vm0, %v12220_v57  ;;  %10626 = vmatmul.mubr.msk.f32.gmra.mrb[12].mxu1 %vm130_vm0, %v12223_v58 }
  0x94   : > { %10070 = vmatprep.mubr.msk.f32.mxu0 %vm130_vm0, %v12226_v59  ;;  %10628 = vmatprep.mubr.msk.f32.mxu1 %vm130_vm0, %v12229_v60 }
  0x97   : > { %10071 = vmatmul.mubr.msk.f32.gmra.mrb[14].mxu0 %vm130_vm0, %v12240_v61  ;;  %10629 = vmatmul.mubr.msk.f32.gmra.mrb[14].mxu1 %vm130_vm0, %v12243_v62 }
  0x98   : > { %10073 = vmatprep.mubr.msk.f32.mxu0 %vm130_vm0, %v12246_v63  ;;  %10631 = vmatprep.mubr.msk.f32.mxu1 %vm130_vm0, %v12249_v1 }
  0x9b   : > { %10074 = vmatmul.mubr.msk.f32.gmra.mrb[16].mxu0 %vm130_vm0, %v12260_v2  ;;  %10632 = vmatmul.mubr.msk.f32.gmra.mrb[16].mxu1 %vm130_vm0, %v12263_v3 }
  0x9c   : > { %10076 = vmatprep.mubr.msk.f32.mxu0 %vm130_vm0, %v12266_v4  ;;  %10634 = vmatprep.mubr.msk.f32.mxu1 %vm130_vm0, %v12269_v5 }
  0x9f   : > { %10077 = vmatmul.mubr.msk.f32.gmra.mrb[18].mxu0 %vm130_vm0, %v12280_v6  ;;  %10635 = vmatmul.mubr.msk.f32.gmra.mrb[18].mxu1 %vm130_vm0, %v12283_v7 }
  0xa0   : > { %10079 = vmatprep.mubr.msk.f32.mxu0 %vm130_vm0, %v12286_v8  ;;  %10637 = vmatprep.mubr.msk.f32.mxu1 %vm130_vm0, %v12289_v9 }
  0xa3   : > { %10080 = vmatmul.mubr.msk.f32.gmra.mrb[20].mxu0 %vm130_vm0, %v12300_v10  ;;  %10638 = vmatmul.mubr.msk.f32.gmra.mrb[20].mxu1 %vm130_vm0, %v12303_v11 }
  0xa4   : > { %10082 = vmatprep.mubr.msk.f32.mxu0 %vm130_vm0, %v12306_v12  ;;  %10640 = vmatprep.mubr.msk.f32.mxu1 %vm130_vm0, %v12309_v13 }
  0xa7   : > { %10083 = vmatmul.mubr.msk.f32.gmra.mrb[22].mxu0 %vm130_vm0, %v12320_v14  ;;  %10641 = vmatmul.mubr.msk.f32.gmra.mrb[22].mxu1 %vm130_vm0, %v12323_v15 }
  0xa8   : > { %10085 = vmatprep.mubr.msk.f32.mxu0 %vm130_vm0, %v12326_v16  ;;  %10643 = vmatprep.mubr.msk.f32.mxu1 %vm130_vm0, %v12329_v17 }
  0xab   : > { %10086 = vmatmul.mubr.msk.f32.gmra.mrb[24].mxu0 %vm130_vm0, %v12340_v18  ;;  %10644 = vmatmul.mubr.msk.f32.gmra.mrb[24].mxu1 %vm130_vm0, %v12343_v19 }
  0xac   : > { %10088 = vmatprep.mubr.msk.f32.mxu0 %vm130_vm0, %v12346_v20  ;;  %10646 = vmatprep.mubr.msk.f32.mxu1 %vm130_vm0, %v12349_v21  ;;  %v1737_v21 = vld [vmem:[#allocation3 + $0x88] sm:$0xff] }
  0xaf   : > { %10089 = vmatmul.mubr.msk.f32.gmra.mrb[26].mxu0 %vm130_vm0, %v12360_v22  ;;  %10647 = vmatmul.mubr.msk.f32.gmra.mrb[26].mxu1 %vm130_vm0, %v12363_v23  ;;  %v839_v23 = vld [vmem:[%s11942_s14 + $0x12] sm:$0xff] }
  0xb0   : > { %10091 = vmatprep.mubr.msk.f32.mxu0 %vm130_vm0, %v12366_v24  ;;  %10649 = vmatprep.mubr.msk.f32.mxu1 %vm130_vm0, %v12369_v26  ;;  %v12426_v26 = vld [vmem:[%s11942_s14 + $0x2c8] sm:$0xff] }
  0xb1   : > { %14233 = vst [vmem:[#allocation23_spill] sm:$0xff] %v12426_v26 }
  0xb3   : > { %10092 = vmatmul.mubr.msk.f32.gmra.mrb[28].mxu0 %vm130_vm0, %v12380_v28  ;;  %10650 = vmatmul.mubr.msk.f32.gmra.mrb[28].mxu1 %vm130_vm0, %v12383_v29  ;;  %v12423_v29 = vld [vmem:[%s11942_s14 + $0x2e0] sm:$0xff]  ;;  %v12462_v28 = vld [vmem:[%s11942_s14 + $0x32] sm:$0xff] }
  0xb4   : > { %10094 = vmatprep.mubr.msk.f32.mxu0 %vm130_vm0, %v12386_v30  ;;  %10652 = vmatprep.mubr.msk.f32.mxu1 %vm130_vm0, %v12389_v32  ;;  %v12420_v32 = vld [vmem:[%s11942_s14 + $0x2c0] sm:$0xff]  ;;  %14232 = vst [vmem:[#allocation22_spill] sm:$0xff] %v12423_v29  ;;  %v12429_v30 = vld [vmem:[%s11942_s14 + $0x2e8] sm:$0xff]  ;;  %14238 = vst [vmem:[#allocation28_spill] sm:$0xff] %v12462_v28 }
  0xb5   : > { %14231 = vst [vmem:[#allocation21_spill] sm:$0xff] %v12420_v32  ;;  %14234 = vst [vmem:[#allocation24_spill] sm:$0xff] %v12429_v30 }
  0xb7   : > { %10095 = vmatmul.mubr.msk.f32.gmra.mrb[30].mxu0 %vm130_vm0, %v12400_v34  ;;  %10653 = vmatmul.mubr.msk.f32.gmra.mrb[30].mxu1 %vm130_vm0, %v12403_v35  ;;  %v12443_v35 = vld [vmem:[%s11942_s14 + $0x2f0] sm:$0xff]  ;;  %v12447_v34 = vld [vmem:[%s11942_s14 + $0x22] sm:$0xff] }
  0xb8   : > { %10097 = vmatprep.mubr.msk.f32.mxu0 %vm130_vm0, %v12406_v36  ;;  %10655 = vmatprep.mubr.msk.f32.mxu1 %vm130_vm0, %v12409_v0  ;;  %v12440_v0 = vld [vmem:[%s11942_s14 + $0x2d0] sm:$0xff]  ;;  %14236 = vst [vmem:[#allocation26_spill] sm:$0xff] %v12443_v35  ;;  %v837_v36 = vld [vmem:[%s11942_s14 + $0x2] sm:$0xff]  ;;  %14237 = vst [vmem:[#allocation27_spill] sm:$0xff] %v12447_v34 }
  0xb9   : > { %14235 = vst [vmem:[#allocation25_spill] sm:$0xff] %v12440_v0 }
  0xbb   : > { %10098 = vmatmul.mubr.msk.f32.gmra.mrb[32].mxu0 %vm130_vm0, %v12420_v32  ;;  %10656 = vmatmul.mubr.msk.f32.gmra.mrb[32].mxu1 %vm130_vm0, %v12423_v29  ;;  %v1308_v29 = vld [vmem:[#allocation3 + $0x70] sm:$0xff] }
  0xbc   : > { %10100 = vmatprep.mubr.msk.f32.mxu0 %vm130_vm0, %v12426_v26  ;;  %10658 = vmatprep.mubr.msk.f32.mxu1 %vm130_vm0, %v12429_v30  ;;  %v1309_v26 = vld [vmem:[#allocation3 + $0x78] sm:$0xff]  ;;  %v838_v30 = vld [vmem:[%s11942_s14 + $0xa] sm:$0xff] }
  0xbd   : > { %v12458_v32 = vld [vmem:[%s11942_s14 + $0x2a] sm:$0xff] }
  0xbf   : > { %10101 = vmatmul.mubr.msk.f32.gmra.mrb[34].mxu0 %vm130_vm0, %v12440_v0  ;;  %10659 = vmatmul.mubr.msk.f32.gmra.mrb[34].mxu1 %vm130_vm0, %v12443_v35  ;;  %v11123_v0 = vpack.c.bf16 %v1309_v26, %v1308_v29  ;;  %v1736_v35 = vld [vmem:[#allocation3 + $0x80] sm:$0xff]  ;;  %v12478_v26 = vld [vmem:[%s11942_s14 + $0x4a] sm:$0xff] }
  0xc0   : > { %10111 = vmatprep.mubr.msk.f32.mxu0 %vm130_vm0, %v837_v36  ;;  %10669 = vmatprep.mubr.msk.f32.mxu1 %vm130_vm0, %v12447_v34  ;;  %v12470_v36 = vld [vmem:[%s11942_s14 + $0x42] sm:$0xff]  ;;  %v12481_v29 = vld [vmem:[%s11942_s14 + $0x6a] sm:$0xff] }
  0xc1   : > { %v12473_v34 = vld [vmem:[%s11942_s14 + $0x62] sm:$0xff]  ;;  %14240 = vst [vmem:[#allocation30_spill] sm:$0xff] %v12481_v29 }
  0xc2   : > { %14239 = vst [vmem:[#allocation29_spill] sm:$0xff] %v12473_v34 }
  0xc3   : > { %10112 = vmatmul.mubr.msk.f32.vlgmr.msra.gmra.mrb[0].mxu0 %vm130_vm0, %v838_v30  ;;  %10670 = vmatmul.mubr.msk.f32.vlgmr.msra.gmra.mrb[0].mxu1 %vm130_vm0, %v12458_v32  ;;  %v12484_v30 = vpack.c.bf16 %v1737_v21, %v1736_v35  ;;  %v12498_v21 = vld [vmem:[%s11942_s14 + $0x72] sm:$0xff]  ;;  %v12504_v35 = vld [vmem:[%s11942_s14 + $0xa2] sm:$0xff] }
  0xc4   : > { %11122 = vmatpush3.bf16.msra.mxu0 %v12127_v41  ;;  %10114 = vmatprep.mubr.msk.f32.mxu0 %vm130_vm0, %v839_v23  ;;  %14242 = vst [vmem:[#allocation32_spill] sm:$0xff] %v12498_v21  ;;  %v12501_v23 = vld [vmem:[%s11942_s14 + $0x82] sm:$0xff]  ;;  %14244 = vst [vmem:[#allocation34_spill] sm:$0xff] %v12504_v35 }
  0xc5   : > { %10672 = vmatprep.mubr.msk.f32.mxu1 %vm130_vm0, %v12462_v28  ;;  %11194 = vmatpush3.bf16.msra.mxu1 %v12127_v41  ;;  %v12495_v41 = vld [vmem:[%s11942_s14 + $0x52] sm:$0xff]  ;;  %14243 = vst [vmem:[#allocation33_spill] sm:$0xff] %v12501_v23 }
  0xc6   : > { %11124 = vmatprep.subr.bf16.mxu0 %v11123_v0  ;;  %11196 = vmatprep.subr.bf16.mxu1 %v11123_v0  ;;  %14241 = vst [vmem:[#allocation31_spill] sm:$0xff] %v12495_v41  ;;  %v12526_v28 = vld [vmem:[%s11942_s14 + $0xb2] sm:$0xff] }
  0xc7   : > { %10115 = vmatmul.mubr.msk.f32.gmra.mrb[2].mxu0 %vm130_vm0, %v12470_v36  ;;  %10673 = vmatmul.mubr.msk.f32.gmra.mrb[2].mxu1 %vm130_vm0, %v12473_v34  ;;  %v12523_v34 = vld [vmem:[%s11942_s14 + $0x92] sm:$0xff]  ;;  %14248 = vst [vmem:[#allocation38_spill] sm:$0xff] %v12526_v28 }
  0xc8   : > { %10117 = vmatprep.mubr.msk.f32.mxu0 %vm130_vm0, %v12478_v26  ;;  %10675 = vmatprep.mubr.msk.f32.mxu1 %vm130_vm0, %v12481_v29  ;;  %v12520_v29 = vld [vmem:[%s11942_s14 + $0xaa] sm:$0xff]  ;;  %14247 = vst [vmem:[#allocation37_spill] sm:$0xff] %v12523_v34 }
  0xc9   : > { %11126 = vmatpush3.bf16.msra.mxu0 %v11123_v0  ;;  %11198 = vmatpush3.bf16.msra.mxu1 %v11123_v0  ;;  %v12517_v0 = vld [vmem:[%s11942_s14 + $0x8a] sm:$0xff]  ;;  %14246 = vst [vmem:[#allocation36_spill] sm:$0xff] %v12520_v29 }
  0xca   : > { %11128 = vmatprep.subr.bf16.mxu0 %v12484_v30  ;;  %11200 = vmatprep.subr.bf16.mxu1 %v12484_v30  ;;  %14245 = vst [vmem:[#allocation35_spill] sm:$0xff] %v12517_v0 }
  0xcb   : > { %10118 = vmatmul.mubr.msk.f32.gmra.mrb[4].mxu0 %vm130_vm0, %v12495_v41  ;;  %10676 = vmatmul.mubr.msk.f32.gmra.mrb[4].mxu1 %vm130_vm0, %v12498_v21  ;;  %v12540_v21 = vld [vmem:[%s11942_s14 + $0xe2] sm:$0xff]  ;;  %v12546_v41 = vld [vmem:[%s11942_s14 + $0xea] sm:$0xff] }
  0xcc   : > { %10120 = vmatprep.mubr.msk.f32.mxu0 %vm130_vm0, %v12501_v23  ;;  %10678 = vmatprep.mubr.msk.f32.mxu1 %vm130_vm0, %v12504_v35  ;;  %v12537_v35 = vld [vmem:[%s11942_s14 + $0xc2] sm:$0xff]  ;;  %14250 = vst [vmem:[#allocation40_spill] sm:$0xff] %v12540_v21  ;;  %v12543_v23 = vld [vmem:[%s11942_s14 + $0xca] sm:$0xff]  ;;  %14252 = vst [vmem:[#allocation42_spill] sm:$0xff] %v12546_v41 }
  0xcd   : > { %14249 = vst [vmem:[#allocation39_spill] sm:$0xff] %v12537_v35  ;;  %14251 = vst [vmem:[#allocation41_spill] sm:$0xff] %v12543_v23 }
  0xcf   : > { %10121 = vmatmul.mubr.msk.f32.gmra.mrb[6].mxu0 %vm130_vm0, %v12517_v0  ;;  %10679 = vmatmul.mubr.msk.f32.gmra.mrb[6].mxu1 %vm130_vm0, %v12520_v29  ;;  %v12560_v29 = vld [vmem:[%s11942_s14 + $0xf2] sm:$0xff]  ;;  %v12566_v0 = vld [vmem:[%s11942_s14 + $0x122] sm:$0xff] }
  0xd0   : > { %10123 = vmatprep.mubr.msk.f32.mxu0 %vm130_vm0, %v12523_v34  ;;  %10681 = vmatprep.mubr.msk.f32.mxu1 %vm130_vm0, %v12526_v28  ;;  %v12557_v28 = vld [vmem:[%s11942_s14 + $0xd2] sm:$0xff]  ;;  %14254 = vst [vmem:[#allocation44_spill] sm:$0xff] %v12560_v29  ;;  %v12563_v34 = vld [vmem:[%s11942_s14 + $0x102] sm:$0xff]  ;;  %14256 = vst [vmem:[#allocation46_spill] sm:$0xff] %v12566_v0 }
  0xd1   : > { %14253 = vst [vmem:[#allocation43_spill] sm:$0xff] %v12557_v28  ;;  %14255 = vst [vmem:[#allocation45_spill] sm:$0xff] %v12563_v34 }
  0xd3   : > { %10124 = vmatmul.mubr.msk.f32.gmra.mrb[8].mxu0 %vm130_vm0, %v12537_v35  ;;  %10682 = vmatmul.mubr.msk.f32.gmra.mrb[8].mxu1 %vm130_vm0, %v12540_v21  ;;  %v12580_v21 = vld [vmem:[%s11942_s14 + $0x12a] sm:$0xff]  ;;  %v12586_v35 = vld [vmem:[%s11942_s14 + $0x132] sm:$0xff] }
  0xd4   : > { %10126 = vmatprep.mubr.msk.f32.mxu0 %vm130_vm0, %v12543_v23  ;;  %10684 = vmatprep.mubr.msk.f32.mxu1 %vm130_vm0, %v12546_v41  ;;  %v12577_v41 = vld [vmem:[%s11942_s14 + $0x10a] sm:$0xff]  ;;  %14258 = vst [vmem:[#allocation48_spill] sm:$0xff] %v12580_v21  ;;  %v12583_v23 = vld [vmem:[%s11942_s14 + $0x112] sm:$0xff]  ;;  %14260 = vst [vmem:[#allocation50_spill] sm:$0xff] %v12586_v35 }
  0xd5   : > { %14257 = vst [vmem:[#allocation47_spill] sm:$0xff] %v12577_v41  ;;  %14259 = vst [vmem:[#allocation49_spill] sm:$0xff] %v12583_v23 }
  0xd7   : > { %10127 = vmatmul.mubr.msk.f32.gmra.mrb[10].mxu0 %vm130_vm0, %v12557_v28  ;;  %10685 = vmatmul.mubr.msk.f32.gmra.mrb[10].mxu1 %vm130_vm0, %v12560_v29  ;;  %v12600_v29 = vld [vmem:[%s11942_s14 + $0x162] sm:$0xff]  ;;  %v12606_v28 = vld [vmem:[%s11942_s14 + $0x16a] sm:$0xff] }
  0xd8   : > { %10129 = vmatprep.mubr.msk.f32.mxu0 %vm130_vm0, %v12563_v34  ;;  %10687 = vmatprep.mubr.msk.f32.mxu1 %vm130_vm0, %v12566_v0  ;;  %v12597_v0 = vld [vmem:[%s11942_s14 + $0x142] sm:$0xff]  ;;  %14262 = vst [vmem:[#allocation52_spill] sm:$0xff] %v12600_v29  ;;  %v12603_v34 = vld [vmem:[%s11942_s14 + $0x14a] sm:$0xff]  ;;  %14264 = vst [vmem:[#allocation54_spill] sm:$0xff] %v12606_v28 }
  0xd9   : > { %14261 = vst [vmem:[#allocation51_spill] sm:$0xff] %v12597_v0  ;;  %14263 = vst [vmem:[#allocation53_spill] sm:$0xff] %v12603_v34 }
  0xdb   : > { %10130 = vmatmul.mubr.msk.f32.gmra.mrb[12].mxu0 %vm130_vm0, %v12577_v41  ;;  %10688 = vmatmul.mubr.msk.f32.gmra.mrb[12].mxu1 %vm130_vm0, %v12580_v21  ;;  %v12620_v21 = vld [vmem:[%s11942_s14 + $0x172] sm:$0xff]  ;;  %v12626_v41 = vld [vmem:[%s11942_s14 + $0x1a2] sm:$0xff] }
  0xdc   : > { %10132 = vmatprep.mubr.msk.f32.mxu0 %vm130_vm0, %v12583_v23  ;;  %10690 = vmatprep.mubr.msk.f32.mxu1 %vm130_vm0, %v12586_v35  ;;  %v12617_v35 = vld [vmem:[%s11942_s14 + $0x152] sm:$0xff]  ;;  %14266 = vst [vmem:[#allocation56_spill] sm:$0xff] %v12620_v21  ;;  %v12623_v23 = vld [vmem:[%s11942_s14 + $0x182] sm:$0xff]  ;;  %14268 = vst [vmem:[#allocation58_spill] sm:$0xff] %v12626_v41 }
  0xdd   : > { %14265 = vst [vmem:[#allocation55_spill] sm:$0xff] %v12617_v35  ;;  %14267 = vst [vmem:[#allocation57_spill] sm:$0xff] %v12623_v23 }
  0xdf   : > { %10133 = vmatmul.mubr.msk.f32.gmra.mrb[14].mxu0 %vm130_vm0, %v12597_v0  ;;  %10691 = vmatmul.mubr.msk.f32.gmra.mrb[14].mxu1 %vm130_vm0, %v12600_v29  ;;  %v12640_v29 = vld [vmem:[%s11942_s14 + $0x1aa] sm:$0xff]  ;;  %v12646_v0 = vld [vmem:[%s11942_s14 + $0x1b2] sm:$0xff] }
  0xe0   : > { %10135 = vmatprep.mubr.msk.f32.mxu0 %vm130_vm0, %v12603_v34  ;;  %10693 = vmatprep.mubr.msk.f32.mxu1 %vm130_vm0, %v12606_v28  ;;  %v12637_v28 = vld [vmem:[%s11942_s14 + $0x18a] sm:$0xff]  ;;  %14270 = vst [vmem:[#allocation60_spill] sm:$0xff] %v12640_v29  ;;  %v12643_v34 = vld [vmem:[%s11942_s14 + $0x192] sm:$0xff]  ;;  %14272 = vst [vmem:[#allocation62_spill] sm:$0xff] %v12646_v0 }
  0xe1   : > { %14269 = vst [vmem:[#allocation59_spill] sm:$0xff] %v12637_v28  ;;  %14271 = vst [vmem:[#allocation61_spill] sm:$0xff] %v12643_v34 }
  0xe3   : > { %10136 = vmatmul.mubr.msk.f32.gmra.mrb[16].mxu0 %vm130_vm0, %v12617_v35  ;;  %10694 = vmatmul.mubr.msk.f32.gmra.mrb[16].mxu1 %vm130_vm0, %v12620_v21  ;;  %v12660_v21 = vld [vmem:[%s11942_s14 + $0x1e2] sm:$0xff]  ;;  %v12666_v35 = vld [vmem:[%s11942_s14 + $0x1ea] sm:$0xff] }
  0xe4   : > { %10138 = vmatprep.mubr.msk.f32.mxu0 %vm130_vm0, %v12623_v23  ;;  %10696 = vmatprep.mubr.msk.f32.mxu1 %vm130_vm0, %v12626_v41  ;;  %v12657_v41 = vld [vmem:[%s11942_s14 + $0x1c2] sm:$0xff]  ;;  %14274 = vst [vmem:[#allocation64_spill] sm:$0xff] %v12660_v21  ;;  %v12663_v23 = vld [vmem:[%s11942_s14 + $0x1ca] sm:$0xff]  ;;  %14276 = vst [vmem:[#allocation66_spill] sm:$0xff] %v12666_v35 }
  0xe5   : > { %14273 = vst [vmem:[#allocation63_spill] sm:$0xff] %v12657_v41  ;;  %14275 = vst [vmem:[#allocation65_spill] sm:$0xff] %v12663_v23 }
  0xe7   : > { %10139 = vmatmul.mubr.msk.f32.gmra.mrb[18].mxu0 %vm130_vm0, %v12637_v28  ;;  %10697 = vmatmul.mubr.msk.f32.gmra.mrb[18].mxu1 %vm130_vm0, %v12640_v29  ;;  %v12680_v29 = vld [vmem:[%s11942_s14 + $0x1f2] sm:$0xff]  ;;  %v12686_v28 = vld [vmem:[%s11942_s14 + $0x222] sm:$0xff] }
  0xe8   : > { %10141 = vmatprep.mubr.msk.f32.mxu0 %vm130_vm0, %v12643_v34  ;;  %10699 = vmatprep.mubr.msk.f32.mxu1 %vm130_vm0, %v12646_v0  ;;  %v12677_v0 = vld [vmem:[%s11942_s14 + $0x1d2] sm:$0xff]  ;;  %14278 = vst [vmem:[#allocation68_spill] sm:$0xff] %v12680_v29  ;;  %v12683_v34 = vld [vmem:[%s11942_s14 + $0x202] sm:$0xff]  ;;  %14280 = vst [vmem:[#allocation70_spill] sm:$0xff] %v12686_v28 }
  0xe9   : > { %14277 = vst [vmem:[#allocation67_spill] sm:$0xff] %v12677_v0  ;;  %14279 = vst [vmem:[#allocation69_spill] sm:$0xff] %v12683_v34 }
  0xeb   : > { %10142 = vmatmul.mubr.msk.f32.gmra.mrb[20].mxu0 %vm130_vm0, %v12657_v41  ;;  %10700 = vmatmul.mubr.msk.f32.gmra.mrb[20].mxu1 %vm130_vm0, %v12660_v21  ;;  %v12700_v21 = vld [vmem:[%s11942_s14 + $0x22a] sm:$0xff]  ;;  %v12706_v41 = vld [vmem:[%s11942_s14 + $0x232] sm:$0xff] }
  0xec   : > { %10144 = vmatprep.mubr.msk.f32.mxu0 %vm130_vm0, %v12663_v23  ;;  %10702 = vmatprep.mubr.msk.f32.mxu1 %vm130_vm0, %v12666_v35  ;;  %v12697_v35 = vld [vmem:[%s11942_s14 + $0x20a] sm:$0xff]  ;;  %14282 = vst [vmem:[#allocation72_spill] sm:$0xff] %v12700_v21  ;;  %v12703_v23 = vld [vmem:[%s11942_s14 + $0x212] sm:$0xff]  ;;  %14284 = vst [vmem:[#allocation74_spill] sm:$0xff] %v12706_v41 }
  0xed   : > { %14281 = vst [vmem:[#allocation71_spill] sm:$0xff] %v12697_v35  ;;  %14283 = vst [vmem:[#allocation73_spill] sm:$0xff] %v12703_v23 }
  0xef   : > { %10145 = vmatmul.mubr.msk.f32.gmra.mrb[22].mxu0 %vm130_vm0, %v12677_v0  ;;  %10703 = vmatmul.mubr.msk.f32.gmra.mrb[22].mxu1 %vm130_vm0, %v12680_v29  ;;  %v12720_v29 = vld [vmem:[%s11942_s14 + $0x262] sm:$0xff]  ;;  %v12726_v0 = vld [vmem:[%s11942_s14 + $0x26a] sm:$0xff] }
  0xf0   : > { %10147 = vmatprep.mubr.msk.f32.mxu0 %vm130_vm0, %v12683_v34  ;;  %10705 = vmatprep.mubr.msk.f32.mxu1 %vm130_vm0, %v12686_v28  ;;  %v12717_v28 = vld [vmem:[%s11942_s14 + $0x242] sm:$0xff]  ;;  %14286 = vst [vmem:[#allocation76_spill] sm:$0xff] %v12720_v29  ;;  %v12723_v34 = vld [vmem:[%s11942_s14 + $0x24a] sm:$0xff]  ;;  %14288 = vst [vmem:[#allocation78_spill] sm:$0xff] %v12726_v0 }
  0xf1   : > { %14285 = vst [vmem:[#allocation75_spill] sm:$0xff] %v12717_v28  ;;  %14287 = vst [vmem:[#allocation77_spill] sm:$0xff] %v12723_v34 }
  0xf3   : > { %10148 = vmatmul.mubr.msk.f32.gmra.mrb[24].mxu0 %vm130_vm0, %v12697_v35  ;;  %10706 = vmatmul.mubr.msk.f32.gmra.mrb[24].mxu1 %vm130_vm0, %v12700_v21  ;;  %v12740_v21 = vld [vmem:[%s11942_s14 + $0x272] sm:$0xff]  ;;  %v12746_v35 = vld [vmem:[%s11942_s14 + $0x2a2] sm:$0xff] }
  0xf4   : > { %10150 = vmatprep.mubr.msk.f32.mxu0 %vm130_vm0, %v12703_v23  ;;  %10708 = vmatprep.mubr.msk.f32.mxu1 %vm130_vm0, %v12706_v41  ;;  %v12737_v41 = vld [vmem:[%s11942_s14 + $0x252] sm:$0xff]  ;;  %14290 = vst [vmem:[#allocation80_spill] sm:$0xff] %v12740_v21  ;;  %v12743_v23 = vld [vmem:[%s11942_s14 + $0x282] sm:$0xff]  ;;  %14292 = vst [vmem:[#allocation82_spill] sm:$0xff] %v12746_v35 }
  0xf5   : > { %14289 = vst [vmem:[#allocation79_spill] sm:$0xff] %v12737_v41  ;;  %14291 = vst [vmem:[#allocation81_spill] sm:$0xff] %v12743_v23 }
  0xf7   : > { %10151 = vmatmul.mubr.msk.f32.gmra.mrb[26].mxu0 %vm130_vm0, %v12717_v28  ;;  %10709 = vmatmul.mubr.msk.f32.gmra.mrb[26].mxu1 %vm130_vm0, %v12720_v29  ;;  %v12760_v29 = vld [vmem:[%s11942_s14 + $0x2aa] sm:$0xff]  ;;  %v12766_v28 = vld [vmem:[%s11942_s14 + $0x2b2] sm:$0xff] }
  0xf8   : > { %10153 = vmatprep.mubr.msk.f32.mxu0 %vm130_vm0, %v12723_v34  ;;  %10711 = vmatprep.mubr.msk.f32.mxu1 %vm130_vm0, %v12726_v0  ;;  %v12757_v0 = vld [vmem:[%s11942_s14 + $0x28a] sm:$0xff]  ;;  %14293 = vst [vmem:[#allocation83_spill] sm:$0xff] %v12760_v29  ;;  %v12763_v34 = vld [vmem:[%s11942_s14 + $0x292] sm:$0xff]  ;;  %14295 = vst [vmem:[#allocation85_spill] sm:$0xff] %v12766_v28 }
  0xf9   : > { %14294 = vst [vmem:[#allocation84_spill] sm:$0xff] %v12763_v34 }
  0xfb   : > { %10154 = vmatmul.mubr.msk.f32.gmra.mrb[28].mxu0 %vm130_vm0, %v12737_v41  ;;  %10712 = vmatmul.mubr.msk.f32.gmra.mrb[28].mxu1 %vm130_vm0, %v12740_v21  ;;  %v12780_v21 = vld [vmem:[%s11942_s14 + $0x2e2] sm:$0xff]  ;;  %v12786_v41 = vld [vmem:[%s11942_s14 + $0x2ea] sm:$0xff] }
  0xfc   : > { %10156 = vmatprep.mubr.msk.f32.mxu0 %vm130_vm0, %v12743_v23  ;;  %10714 = vmatprep.mubr.msk.f32.mxu1 %vm130_vm0, %v12746_v35  ;;  %v12777_v35 = vld [vmem:[%s11942_s14 + $0x2c2] sm:$0xff]  ;;  %14297 = vst [vmem:[#allocation87_spill] sm:$0xff] %v12780_v21  ;;  %v12783_v23 = vld [vmem:[%s11942_s14 + $0x2ca] sm:$0xff]  ;;  %14298 = vst [vmem:[#allocation88_spill] sm:$0xff] %v12786_v41 }
  0xfd   : > { %14296 = vst [vmem:[#allocation86_spill] sm:$0xff] %v12777_v35 }
  0xff   : > { %10157 = vmatmul.mubr.msk.f32.gmra.mrb[30].mxu0 %vm130_vm0, %v12757_v0  ;;  %10715 = vmatmul.mubr.msk.f32.gmra.mrb[30].mxu1 %vm130_vm0, %v12760_v29  ;;  %v12800_v29 = vld [vmem:[%s11942_s14 + $0x2f2] sm:$0xff] }
 0x100   : > { %10159 = vmatprep.mubr.msk.f32.mxu0 %vm130_vm0, %v12763_v34  ;;  %10717 = vmatprep.mubr.msk.f32.mxu1 %vm130_vm0, %v12766_v28  ;;  %v12797_v28 = vld [vmem:[%s11942_s14 + $0x2d2] sm:$0xff] }
 0x101   : > { %14299 = vst [vmem:[#allocation89_spill] sm:$0xff] %v12797_v28  ;;  %v1739_v34 = vld [vmem:[#allocation3 + $0x98] sm:$0xff] }
 0x103   : > { %10160 = vmatmul.mubr.msk.f32.gmra.mrb[32].mxu0 %vm130_vm0, %v12777_v35  ;;  %10718 = vmatmul.mubr.msk.f32.gmra.mrb[32].mxu1 %vm130_vm0, %v12780_v21  ;;  %v1738_v35 = vld [vmem:[#allocation3 + $0x90] sm:$0xff] }
 0x104   : > { %10162 = vmatprep.mubr.msk.f32.mxu0 %vm130_vm0, %v12783_v23  ;;  %10720 = vmatprep.mubr.msk.f32.mxu1 %vm130_vm0, %v12786_v41  ;;  %v11131_v21 = vpack.c.bf16 %v1739_v34, %v1738_v35  ;;  %v2166_v41 = vld [vmem:[#allocation3 + $0xa0] sm:$0xff]  ;;  %v13093_v34 = vld [vmem:[%s11942_s14 + $0x129] sm:$0xff] }
 0x105   : > { %v13113_v35 = vld [vmem:[%s11942_s14 + $0x161] sm:$0xff] }
 0x107   : > { %10163 = vmatmul.mubr.msk.f32.gmra.mrb[34].mxu0 %vm130_vm0, %v12797_v28  ;;  %10721 = vmatmul.mubr.msk.f32.gmra.mrb[34].mxu1 %vm130_vm0, %v12800_v29  ;;  %v2167_v28 = vld [vmem:[#allocation3 + $0xa8] sm:$0xff] }
 0x108   : > { %10173 = vmatprep.mubr.msk.f32.mxu0 %vm130_vm0, %v12092_v27  ;;  %10731 = vmatprep.mubr.msk.f32.mxu1 %vm130_vm0, %v12113_v37  ;;  %v12820_v27 = vpack.c.bf16 %v2167_v28, %v2166_v41  ;;  %v14302_v37 = vld [vmem:[#allocation11_spill] sm:$0xff]  ;;  %v13082_v28 = vld [vmem:[%s11942_s14 + $0x141] sm:$0xff] }
 0x109   : > { %v13099_v41 = vld [vmem:[%s11942_s14 + $0x131] sm:$0xff] }
 0x10b   : > { %10174 = vmatmul.mubr.msk.f32.vlgmr.msra.gmra.mrb[0].mxu0 %vm130_vm0, %v12101_v31  ;;  %10732 = vmatmul.mubr.msk.f32.vlgmr.msra.gmra.mrb[0].mxu1 %vm130_vm0, %v12121_v39  ;;  %v14300_v31 = vld [vmem:[#allocation10_spill] sm:$0xff]  ;;  %v14304_v39 = vld [vmem:[#allocation12_spill] sm:$0xff] }
 0x10c   : > { %11130 = vmatpush3.bf16.msra.mxu0 %v12484_v30  ;;  %10176 = vmatprep.mubr.msk.f32.mxu0 %vm130_vm0, %v12105_v33  ;;  %v14301_v33 = vld [vmem:[#allocation13_spill] sm:$0xff] }
 0x10d   : > { %10734 = vmatprep.mubr.msk.f32.mxu1 %vm130_vm0, %v12138_v25  ;;  %11202 = vmatpush3.bf16.msra.mxu1 %v12484_v30  ;;  %v14306_v25 = vld [vmem:[#allocation14_spill] sm:$0xff] }
 0x10e   : > { %11132 = vmatprep.subr.bf16.mxu0 %v11131_v21  ;;  %11204 = vmatprep.subr.bf16.mxu1 %v11131_v21  ;;  %v13096_v30 = vld [vmem:[%s11942_s14 + $0x149] sm:$0xff] }
 0x10f   : > { %10177 = vmatmul.mubr.msk.f32.gmra.mrb[2].mxu0 %vm130_vm0, %v12116_v38  ;;  %10735 = vmatmul.mubr.msk.f32.gmra.mrb[2].mxu1 %vm130_vm0, %v12144_v43  ;;  %v14303_v38 = vld [vmem:[#allocation15_spill] sm:$0xff]  ;;  %v14308_v43 = vld [vmem:[#allocation16_spill] sm:$0xff] }
 0x110   : > { %10179 = vmatprep.mubr.msk.f32.mxu0 %vm130_vm0, %v12124_v40  ;;  %10737 = vmatprep.mubr.msk.f32.mxu1 %vm130_vm0, %v12160_v45  ;;  %v14305_v40 = vld [vmem:[#allocation17_spill] sm:$0xff]  ;;  %v14310_v45 = vld [vmem:[#allocation18_spill] sm:$0xff] }
 0x111   : > { %11134 = vmatpush3.bf16.msra.mxu0 %v11131_v21  ;;  %11206 = vmatpush3.bf16.msra.mxu1 %v11131_v21  ;;  %v13102_v21 = vld [vmem:[%s11942_s14 + $0x151] sm:$0xff] }
 0x112   : > { %11136 = vmatprep.subr.bf16.mxu0 %v12820_v27  ;;  %11208 = vmatprep.subr.bf16.mxu1 %v12820_v27 }
 0x113   : > { %10180 = vmatmul.mubr.msk.f32.gmra.mrb[4].mxu0 %vm130_vm0, %v12141_v42  ;;  %10738 = vmatmul.mubr.msk.f32.gmra.mrb[4].mxu1 %vm130_vm0, %v12166_v47  ;;  %v14307_v42 = vld [vmem:[#allocation19_spill] sm:$0xff]  ;;  %v14312_v47 = vld [vmem:[#allocation20_spill] sm:$0xff] }
 0x114   : > { %10182 = vmatprep.mubr.msk.f32.mxu0 %vm130_vm0, %v12147_v44  ;;  %10740 = vmatprep.mubr.msk.f32.mxu1 %vm130_vm0, %v12180_v49  ;;  %v14309_v44 = vld [vmem:[#allocation21_spill] sm:$0xff] }
 0x115   : > { %v12945_v49 = vld [vmem:[%s11942_s14 + $0x300] sm:$0xff] }
 0x117   : > { %10183 = vmatmul.mubr.msk.f32.gmra.mrb[6].mxu0 %vm130_vm0, %v12163_v46  ;;  %10741 = vmatmul.mubr.msk.f32.gmra.mrb[6].mxu1 %vm130_vm0, %v12186_v51  ;;  %v14311_v46 = vld [vmem:[#allocation23_spill] sm:$0xff]  ;;  %v14314_v51 = vld [vmem:[#allocation22_spill] sm:$0xff] }
 0x118   : > { %10185 = vmatprep.mubr.msk.f32.mxu0 %vm130_vm0, %v12169_v48  ;;  %10743 = vmatprep.mubr.msk.f32.mxu1 %vm130_vm0, %v12200_v53  ;;  %v14313_v48 = vld [vmem:[#allocation25_spill] sm:$0xff]  ;;  %v12959_v53 = vld [vmem:[%s11942_s14 + $0x310] sm:$0xff] }
 0x11b   : > { %10186 = vmatmul.mubr.msk.f32.gmra.mrb[8].mxu0 %vm130_vm0, %v12183_v50  ;;  %10744 = vmatmul.mubr.msk.f32.gmra.mrb[8].mxu1 %vm130_vm0, %v12206_v55  ;;  %v12948_v50 = vld [vmem:[%s11942_s14 + $0x308] sm:$0xff] }
 0x11c   : > { %10188 = vmatprep.mubr.msk.f32.mxu0 %vm130_vm0, %v12189_v52  ;;  %10746 = vmatprep.mubr.msk.f32.mxu1 %vm130_vm0, %v12220_v57  ;;  %v14315_v52 = vld [vmem:[#allocation24_spill] sm:$0xff]  ;;  %v2168_v57 = vld [vmem:[#allocation3 + $0xb0] sm:$0xff] }
 0x11d   : > { %v12963_v55 = vld [vmem:[%s11942_s14 + $0x41] sm:$0xff] }
 0x11f   : > { %10189 = vmatmul.mubr.msk.f32.gmra.mrb[10].mxu0 %vm130_vm0, %v12203_v54  ;;  %10747 = vmatmul.mubr.msk.f32.gmra.mrb[10].mxu1 %vm130_vm0, %v12226_v59  ;;  %v8250_v54 = vld [vmem:[%s11942_s14 + $0x21] sm:$0xff]  ;;  %v8251_v59 = vld [vmem:[%s11942_s14 + $0x29] sm:$0xff] }
 0x120   : > { %10191 = vmatprep.mubr.msk.f32.mxu0 %vm130_vm0, %v12209_v56  ;;  %10749 = vmatprep.mubr.msk.f32.mxu1 %vm130_vm0, %v12240_v61  ;;  %v14316_v56 = vld [vmem:[#allocation26_spill] sm:$0xff] }
 0x121   : > { %v8252_v61 = vld [vmem:[%s11942_s14 + $0x31] sm:$0xff] }
 0x123   : > { %10192 = vmatmul.mubr.msk.f32.gmra.mrb[12].mxu0 %vm130_vm0, %v12223_v58  ;;  %10750 = vmatmul.mubr.msk.f32.gmra.mrb[12].mxu1 %vm130_vm0, %v12246_v63  ;;  %v2169_v58 = vld [vmem:[#allocation3 + $0xb8] sm:$0xff] }
 0x124   : > { %10194 = vmatprep.mubr.msk.f32.mxu0 %vm130_vm0, %v12229_v60  ;;  %10752 = vmatprep.mubr.msk.f32.mxu1 %vm130_vm0, %v12260_v2  ;;  %v12974_v60 = vld [vmem:[%s11942_s14 + $0x49] sm:$0xff]  ;;  %v11139_v63 = vpack.c.bf16 %v2169_v58, %v2168_v57 }
 0x125   : > { %v2599_v2 = vld [vmem:[#allocation3 + $0xc8] sm:$0xff] }
 0x126   : > { %v13213_v57 = vld [vmem:[%s11942_s14 + $0x229] sm:$0xff] }
 0x127   : > { %10195 = vmatmul.mubr.msk.f32.gmra.mrb[14].mxu0 %vm130_vm0, %v12243_v62  ;;  %10753 = vmatmul.mubr.msk.f32.gmra.mrb[14].mxu1 %vm130_vm0, %v12266_v4  ;;  %v12978_v62 = vld [vmem:[%s11942_s14 + $0x51] sm:$0xff]  ;;  %v12989_v4 = vld [vmem:[%s11942_s14 + $0x81] sm:$0xff]  ;;  %v13216_v58 = vld [vmem:[%s11942_s14 + $0x249] sm:$0xff] }
 0x128   : > { %10197 = vmatprep.mubr.msk.f32.mxu0 %vm130_vm0, %v12249_v1  ;;  %10755 = vmatprep.mubr.msk.f32.mxu1 %vm130_vm0, %v12280_v6  ;;  %v2598_v1 = vld [vmem:[#allocation3 + $0xc0] sm:$0xff]  ;;  %v12997_v6 = vld [vmem:[%s11942_s14 + $0x89] sm:$0xff]  ;;  %14319 = vst [vmem:[#allocation11_spill] sm:$0xff] %v13216_v58 }
 0x12b   : > { %10198 = vmatmul.mubr.msk.f32.gmra.mrb[16].mxu0 %vm130_vm0, %v12263_v3  ;;  %10756 = vmatmul.mubr.msk.f32.gmra.mrb[16].mxu1 %vm130_vm0, %v12286_v8  ;;  %v12986_v3 = vld [vmem:[%s11942_s14 + $0x61] sm:$0xff]  ;;  %v13011_v8 = vld [vmem:[%s11942_s14 + $0x71] sm:$0xff] }
 0x12c   : > { %10200 = vmatprep.mubr.msk.f32.mxu0 %vm130_vm0, %v12269_v5  ;;  %10758 = vmatprep.mubr.msk.f32.mxu1 %vm130_vm0, %v12300_v10  ;;  %v12994_v5 = vld [vmem:[%s11942_s14 + $0x69] sm:$0xff]  ;;  %v13017_v10 = vld [vmem:[%s11942_s14 + $0xa1] sm:$0xff] }
 0x12f   : > { %10201 = vmatmul.mubr.msk.f32.gmra.mrb[18].mxu0 %vm130_vm0, %v12283_v7  ;;  %10759 = vmatmul.mubr.msk.f32.gmra.mrb[18].mxu1 %vm130_vm0, %v12306_v12  ;;  %v13000_v7 = vpack.c.bf16 %v2599_v2, %v2598_v1  ;;  %v13033_v12 = vld [vmem:[%s11942_s14 + $0xa9] sm:$0xff]  ;;  %v13236_v1 = vld [vmem:[%s11942_s14 + $0x281] sm:$0xff] }
 0x130   : > { %10203 = vmatprep.mubr.msk.f32.mxu0 %vm130_vm0, %v12289_v9  ;;  %10761 = vmatprep.mubr.msk.f32.mxu1 %vm130_vm0, %v12320_v14  ;;  %v13014_v9 = vld [vmem:[%s11942_s14 + $0x91] sm:$0xff]  ;;  %14323 = vst [vmem:[#allocation14_spill] sm:$0xff] %v13236_v1  ;;  %v13239_v2 = vld [vmem:[%s11942_s14 + $0x269] sm:$0xff] }
 0x131   : > { %v13039_v14 = vld [vmem:[%s11942_s14 + $0xb1] sm:$0xff]  ;;  %14324 = vst [vmem:[#allocation19_spill] sm:$0xff] %v13239_v2 }
 0x133   : > { %10204 = vmatmul.mubr.msk.f32.gmra.mrb[20].mxu0 %vm130_vm0, %v12303_v11  ;;  %10762 = vmatmul.mubr.msk.f32.gmra.mrb[20].mxu1 %vm130_vm0, %v12326_v16  ;;  %v13020_v11 = vld [vmem:[%s11942_s14 + $0xc1] sm:$0xff] }
 0x134   : > { %10206 = vmatprep.mubr.msk.f32.mxu0 %vm130_vm0, %v12309_v13  ;;  %10764 = vmatprep.mubr.msk.f32.mxu1 %vm130_vm0, %v12340_v18  ;;  %v13036_v13 = vld [vmem:[%s11942_s14 + $0xc9] sm:$0xff]  ;;  %v13053_v16 = vld [vmem:[%s11942_s14 + $0xe1] sm:$0xff] }
 0x135   : > { %v13059_v18 = vld [vmem:[%s11942_s14 + $0xe9] sm:$0xff] }
 0x137   : > { %10207 = vmatmul.mubr.msk.f32.gmra.mrb[22].mxu0 %vm130_vm0, %v12323_v15  ;;  %10765 = vmatmul.mubr.msk.f32.gmra.mrb[22].mxu1 %vm130_vm0, %v12346_v20  ;;  %v13042_v15 = vld [vmem:[%s11942_s14 + $0xd1] sm:$0xff] }
 0x138   : > { %10209 = vmatprep.mubr.msk.f32.mxu0 %vm130_vm0, %v12329_v17  ;;  %10767 = vmatprep.mubr.msk.f32.mxu1 %vm130_vm0, %v12360_v22  ;;  %v13056_v17 = vld [vmem:[%s11942_s14 + $0x101] sm:$0xff]  ;;  %v13073_v20 = vld [vmem:[%s11942_s14 + $0xf1] sm:$0xff] }
 0x139   : > { %v13076_v22 = vld [vmem:[%s11942_s14 + $0x111] sm:$0xff] }
 0x13b   : > { %10210 = vmatmul.mubr.msk.f32.gmra.mrb[24].mxu0 %vm130_vm0, %v12343_v19  ;;  %10768 = vmatmul.mubr.msk.f32.gmra.mrb[24].mxu1 %vm130_vm0, %v12366_v24  ;;  %v13062_v19 = vld [vmem:[%s11942_s14 + $0x109] sm:$0xff]  ;;  %v13079_v24 = vld [vmem:[%s11942_s14 + $0x121] sm:$0xff] }
 0x13c   : > { %10212 = vmatprep.mubr.msk.f32.mxu0 %vm130_vm0, %v14300_v31  ;;  %10770 = vmatprep.mubr.msk.f32.mxu1 %vm130_vm0, %v14301_v33  ;;  %v13119_v31 = vld [vmem:[%s11942_s14 + $0x169] sm:$0xff] }
 0x13d   : > { %v13122_v33 = vld [vmem:[%s11942_s14 + $0x189] sm:$0xff] }
 0x13f   : > { %10213 = vmatmul.mubr.msk.f32.gmra.mrb[26].mxu0 %vm130_vm0, %v14302_v37  ;;  %10771 = vmatmul.mubr.msk.f32.gmra.mrb[26].mxu1 %vm130_vm0, %v14303_v38  ;;  %v13133_v37 = vld [vmem:[%s11942_s14 + $0x171] sm:$0xff] }
 0x140   : > { %10215 = vmatprep.mubr.msk.f32.mxu0 %vm130_vm0, %v14304_v39  ;;  %10773 = vmatprep.mubr.msk.f32.mxu1 %vm130_vm0, %v14305_v40  ;;  %v13136_v38 = vld [vmem:[%s11942_s14 + $0x191] sm:$0xff]  ;;  %v13139_v39 = vld [vmem:[%s11942_s14 + $0x1a1] sm:$0xff] }
 0x141   : > { %v13142_v40 = vld [vmem:[%s11942_s14 + $0x1c1] sm:$0xff] }
 0x143   : > { %10216 = vmatmul.mubr.msk.f32.gmra.mrb[28].mxu0 %vm130_vm0, %v14306_v25  ;;  %10774 = vmatmul.mubr.msk.f32.gmra.mrb[28].mxu1 %vm130_vm0, %v14307_v42  ;;  %v13153_v25 = vld [vmem:[%s11942_s14 + $0x1a9] sm:$0xff] }
 0x144   : > { %10218 = vmatprep.mubr.msk.f32.mxu0 %vm130_vm0, %v14308_v43  ;;  %10776 = vmatprep.mubr.msk.f32.mxu1 %vm130_vm0, %v14309_v44  ;;  %v13156_v42 = vld [vmem:[%s11942_s14 + $0x1c9] sm:$0xff]  ;;  %v13159_v43 = vld [vmem:[%s11942_s14 + $0x1b1] sm:$0xff] }
 0x145   : > { %v13162_v44 = vld [vmem:[%s11942_s14 + $0x1d1] sm:$0xff] }
 0x147   : > { %10219 = vmatmul.mubr.msk.f32.gmra.mrb[30].mxu0 %vm130_vm0, %v14310_v45  ;;  %10777 = vmatmul.mubr.msk.f32.gmra.mrb[30].mxu1 %vm130_vm0, %v14311_v46  ;;  %v13173_v45 = vld [vmem:[%s11942_s14 + $0x1e1] sm:$0xff] }
 0x148   : > { %10221 = vmatprep.mubr.msk.f32.mxu0 %vm130_vm0, %v14312_v47  ;;  %10779 = vmatprep.mubr.msk.f32.mxu1 %vm130_vm0, %v14313_v48  ;;  %v13176_v46 = vld [vmem:[%s11942_s14 + $0x201] sm:$0xff]  ;;  %v13179_v47 = vld [vmem:[%s11942_s14 + $0x1e9] sm:$0xff] }
 0x149   : > { %v13182_v48 = vld [vmem:[%s11942_s14 + $0x209] sm:$0xff] }
 0x14b   : > { %10222 = vmatmul.mubr.msk.f32.gmra.mrb[32].mxu0 %vm130_vm0, %v14314_v51  ;;  %10780 = vmatmul.mubr.msk.f32.gmra.mrb[32].mxu1 %vm130_vm0, %v12945_v49  ;;  %v13193_v51 = vld [vmem:[%s11942_s14 + $0x1f1] sm:$0xff] }
 0x14c   : > { %10224 = vmatprep.mubr.msk.f32.mxu0 %vm130_vm0, %v14315_v52  ;;  %10782 = vmatprep.mubr.msk.f32.mxu1 %vm130_vm0, %v12948_v50  ;;  %v13196_v52 = vld [vmem:[%s11942_s14 + $0x211] sm:$0xff] }
 0x14d   : > { %14317 = vst [vmem:[#allocation10_spill] sm:$0xff] %v13196_v52 }
 0x14f   : > { %10225 = vmatmul.mubr.msk.f32.gmra.mrb[34].mxu0 %vm130_vm0, %v14316_v56  ;;  %10783 = vmatmul.mubr.msk.f32.gmra.mrb[34].mxu1 %vm130_vm0, %v12959_v53  ;;  %v13202_v56 = vld [vmem:[%s11942_s14 + $0x241] sm:$0xff] }
 0x150   : > { %10235 = vmatprep.mubr.msk.f32.mxu0 %vm130_vm0, %v8250_v54  ;;  %10793 = vmatprep.mubr.msk.f32.mxu1 %vm130_vm0, %v12963_v55  ;;  %v13199_v54 = vld [vmem:[%s11942_s14 + $0x221] sm:$0xff]  ;;  %14318 = vst [vmem:[#allocation13_spill] sm:$0xff] %v13202_v56 }
 0x153   : > { %10236 = vmatmul.mubr.msk.f32.vlgmr.msra.gmra.mrb[0].mxu0 %vm130_vm0, %v8251_v59  ;;  %10794 = vmatmul.mubr.msk.f32.vlgmr.msra.gmra.mrb[0].mxu1 %vm130_vm0, %v12974_v60  ;;  %v13219_v59 = vld [vmem:[%s11942_s14 + $0x231] sm:$0xff] }
 0x154   : > { %11138 = vmatpush3.bf16.msra.mxu0 %v12820_v27  ;;  %10238 = vmatprep.mubr.msk.f32.mxu0 %vm130_vm0, %v8252_v61  ;;  %14320 = vst [vmem:[#allocation15_spill] sm:$0xff] %v13219_v59  ;;  %v13222_v61 = vld [vmem:[%s11942_s14 + $0x251] sm:$0xff] }
 0x155   : > { %10796 = vmatprep.mubr.msk.f32.mxu1 %vm130_vm0, %v12978_v62  ;;  %11210 = vmatpush3.bf16.msra.mxu1 %v12820_v27  ;;  %v13116_v27 = vld [vmem:[%s11942_s14 + $0x181] sm:$0xff]  ;;  %14321 = vst [vmem:[#allocation12_spill] sm:$0xff] %v13222_v61 }
 0x156   : > { %11140 = vmatprep.subr.bf16.mxu0 %v11139_v63  ;;  %11212 = vmatprep.subr.bf16.mxu1 %v11139_v63 }
 0x157   : > { %10239 = vmatmul.mubr.msk.f32.gmra.mrb[2].mxu0 %vm130_vm0, %v12986_v3  ;;  %10797 = vmatmul.mubr.msk.f32.gmra.mrb[2].mxu1 %vm130_vm0, %v12989_v4 }
 0x158   : > { %10241 = vmatprep.mubr.msk.f32.mxu0 %vm130_vm0, %v12994_v5  ;;  %10799 = vmatprep.mubr.msk.f32.mxu1 %vm130_vm0, %v12997_v6 }
 0x159   : > { %11142 = vmatpush3.bf16.msra.mxu0 %v11139_v63  ;;  %11214 = vmatpush3.bf16.msra.mxu1 %v11139_v63  ;;  %v13233_v63 = vld [vmem:[%s11942_s14 + $0x261] sm:$0xff] }
 0x15a   : > { %11144 = vmatprep.subr.bf16.mxu0 %v13000_v7  ;;  %11216 = vmatprep.subr.bf16.mxu1 %v13000_v7  ;;  %14322 = vst [vmem:[#allocation17_spill] sm:$0xff] %v13233_v63 }
 0x15b   : > { %10242 = vmatmul.mubr.msk.f32.gmra.mrb[4].mxu0 %vm130_vm0, %v13011_v8  ;;  %10800 = vmatmul.mubr.msk.f32.gmra.mrb[4].mxu1 %vm130_vm0, %v13014_v9 }
 0x15c   : > { %10244 = vmatprep.mubr.msk.f32.mxu0 %vm130_vm0, %v13017_v10  ;;  %10802 = vmatprep.mubr.msk.f32.mxu1 %vm130_vm0, %v13020_v11 }
 0x15f   : > { %10245 = vmatmul.mubr.msk.f32.gmra.mrb[6].mxu0 %vm130_vm0, %v13033_v12  ;;  %10803 = vmatmul.mubr.msk.f32.gmra.mrb[6].mxu1 %vm130_vm0, %v13036_v13 }
 0x160   : > { %10247 = vmatprep.mubr.msk.f32.mxu0 %vm130_vm0, %v13039_v14  ;;  %10805 = vmatprep.mubr.msk.f32.mxu1 %vm130_vm0, %v13042_v15 }
 0x163   : > { %10248 = vmatmul.mubr.msk.f32.gmra.mrb[8].mxu0 %vm130_vm0, %v13053_v16  ;;  %10806 = vmatmul.mubr.msk.f32.gmra.mrb[8].mxu1 %vm130_vm0, %v13056_v17 }
 0x164   : > { %10250 = vmatprep.mubr.msk.f32.mxu0 %vm130_vm0, %v13059_v18  ;;  %10808 = vmatprep.mubr.msk.f32.mxu1 %vm130_vm0, %v13062_v19 }
 0x167   : > { %10251 = vmatmul.mubr.msk.f32.gmra.mrb[10].mxu0 %vm130_vm0, %v13073_v20  ;;  %10809 = vmatmul.mubr.msk.f32.gmra.mrb[10].mxu1 %vm130_vm0, %v13076_v22 }
 0x168   : > { %10253 = vmatprep.mubr.msk.f32.mxu0 %vm130_vm0, %v13079_v24  ;;  %10811 = vmatprep.mubr.msk.f32.mxu1 %vm130_vm0, %v13082_v28 }
 0x16b   : > { %10254 = vmatmul.mubr.msk.f32.gmra.mrb[12].mxu0 %vm130_vm0, %v13093_v34  ;;  %10812 = vmatmul.mubr.msk.f32.gmra.mrb[12].mxu1 %vm130_vm0, %v13096_v30 }
 0x16c   : > { %10256 = vmatprep.mubr.msk.f32.mxu0 %vm130_vm0, %v13099_v41  ;;  %10814 = vmatprep.mubr.msk.f32.mxu1 %vm130_vm0, %v13102_v21 }
 0x16f   : > { %10257 = vmatmul.mubr.msk.f32.gmra.mrb[14].mxu0 %vm130_vm0, %v13113_v35  ;;  %10815 = vmatmul.mubr.msk.f32.gmra.mrb[14].mxu1 %vm130_vm0, %v13116_v27 }
 0x170   : > { %10259 = vmatprep.mubr.msk.f32.mxu0 %vm130_vm0, %v13119_v31  ;;  %10817 = vmatprep.mubr.msk.f32.mxu1 %vm130_vm0, %v13122_v33 }
 0x173   : > { %10260 = vmatmul.mubr.msk.f32.gmra.mrb[16].mxu0 %vm130_vm0, %v13133_v37  ;;  %10818 = vmatmul.mubr.msk.f32.gmra.mrb[16].mxu1 %vm130_vm0, %v13136_v38 }
 0x174   : > { %10262 = vmatprep.mubr.msk.f32.mxu0 %vm130_vm0, %v13139_v39  ;;  %10820 = vmatprep.mubr.msk.f32.mxu1 %vm130_vm0, %v13142_v40 }
 0x177   : > { %10263 = vmatmul.mubr.msk.f32.gmra.mrb[18].mxu0 %vm130_vm0, %v13153_v25  ;;  %10821 = vmatmul.mubr.msk.f32.gmra.mrb[18].mxu1 %vm130_vm0, %v13156_v42 }
 0x178   : > { %10265 = vmatprep.mubr.msk.f32.mxu0 %vm130_vm0, %v13159_v43  ;;  %10823 = vmatprep.mubr.msk.f32.mxu1 %vm130_vm0, %v13162_v44 }
 0x17b   : > { %10266 = vmatmul.mubr.msk.f32.gmra.mrb[20].mxu0 %vm130_vm0, %v13173_v45  ;;  %10824 = vmatmul.mubr.msk.f32.gmra.mrb[20].mxu1 %vm130_vm0, %v13176_v46 }
 0x17c   : > { %10268 = vmatprep.mubr.msk.f32.mxu0 %vm130_vm0, %v13179_v47  ;;  %10826 = vmatprep.mubr.msk.f32.mxu1 %vm130_vm0, %v13182_v48 }
 0x17f   : > { %10269 = vmatmul.mubr.msk.f32.gmra.mrb[22].mxu0 %vm130_vm0, %v13193_v51  ;;  %10827 = vmatmul.mubr.msk.f32.gmra.mrb[22].mxu1 %vm130_vm0, %v13196_v52  ;;  %v13262_v52 = vld [vmem:[%s11942_s14 + $0x2c1] sm:$0xff] }
 0x180   : > { %10271 = vmatprep.mubr.msk.f32.mxu0 %vm130_vm0, %v13199_v54  ;;  %10829 = vmatprep.mubr.msk.f32.mxu1 %vm130_vm0, %v13202_v56  ;;  %v13242_v56 = vld [vmem:[%s11942_s14 + $0x289] sm:$0xff]  ;;  %14329 = vst [vmem:[#allocation20_spill] sm:$0xff] %v13262_v52 }
 0x181   : > { %14325 = vst [vmem:[#allocation16_spill] sm:$0xff] %v13242_v56 }
 0x183   : > { %10272 = vmatmul.mubr.msk.f32.gmra.mrb[24].mxu0 %vm130_vm0, %v13213_v57  ;;  %10830 = vmatmul.mubr.msk.f32.gmra.mrb[24].mxu1 %vm130_vm0, %v13216_v58  ;;  %v13256_v58 = vld [vmem:[%s11942_s14 + $0x291] sm:$0xff] }
 0x184   : > { %10274 = vmatprep.mubr.msk.f32.mxu0 %vm130_vm0, %v13219_v59  ;;  %10832 = vmatprep.mubr.msk.f32.mxu1 %vm130_vm0, %v13222_v61  ;;  %v13253_v61 = vld [vmem:[%s11942_s14 + $0x271] sm:$0xff]  ;;  %14327 = vst [vmem:[#allocation18_spill] sm:$0xff] %v13256_v58  ;;  %v13259_v59 = vld [vmem:[%s11942_s14 + $0x2a1] sm:$0xff] }
 0x185   : > { %14326 = vst [vmem:[#allocation21_spill] sm:$0xff] %v13253_v61  ;;  %14328 = vst [vmem:[#allocation23_spill] sm:$0xff] %v13259_v59 }
 0x187   : > { %10275 = vmatmul.mubr.msk.f32.gmra.mrb[26].mxu0 %vm130_vm0, %v13233_v63  ;;  %10833 = vmatmul.mubr.msk.f32.gmra.mrb[26].mxu1 %vm130_vm0, %v13236_v1  ;;  %v13276_v1 = vld [vmem:[%s11942_s14 + $0x2c9] sm:$0xff]  ;;  %v13282_v63 = vld [vmem:[%s11942_s14 + $0x2d1] sm:$0xff] }
 0x188   : > { %10277 = vmatprep.mubr.msk.f32.mxu0 %vm130_vm0, %v13239_v2  ;;  %10835 = vmatprep.mubr.msk.f32.mxu1 %vm130_vm0, %v13242_v56  ;;  %v13273_v56 = vld [vmem:[%s11942_s14 + $0x2a9] sm:$0xff]  ;;  %14331 = vst [vmem:[#allocation22_spill] sm:$0xff] %v13276_v1  ;;  %v13279_v2 = vld [vmem:[%s11942_s14 + $0x2b1] sm:$0xff]  ;;  %14333 = vst [vmem:[#allocation26_spill] sm:$0xff] %v13282_v63 }
 0x189   : > { %14330 = vst [vmem:[#allocation25_spill] sm:$0xff] %v13273_v56  ;;  %14332 = vst [vmem:[#allocation24_spill] sm:$0xff] %v13279_v2 }
 0x18b   : > { %10278 = vmatmul.mubr.msk.f32.gmra.mrb[28].mxu0 %vm130_vm0, %v13253_v61  ;;  %10836 = vmatmul.mubr.msk.f32.gmra.mrb[28].mxu1 %vm130_vm0, %v13256_v58  ;;  %v13296_v58 = vld [vmem:[%s11942_s14 + $0x301] sm:$0xff]  ;;  %v13302_v61 = vld [vmem:[%s11942_s14 + $0x309] sm:$0xff] }
 0x18c   : > { %10280 = vmatprep.mubr.msk.f32.mxu0 %vm130_vm0, %v13259_v59  ;;  %10838 = vmatprep.mubr.msk.f32.mxu1 %vm130_vm0, %v13262_v52  ;;  %v13293_v52 = vld [vmem:[%s11942_s14 + $0x2e1] sm:$0xff]  ;;  %14335 = vst [vmem:[#allocation91_spill] sm:$0xff] %v13296_v58  ;;  %v13299_v59 = vld [vmem:[%s11942_s14 + $0x2e9] sm:$0xff]  ;;  %14337 = vst [vmem:[#allocation93_spill] sm:$0xff] %v13302_v61 }
 0x18d   : > { %14334 = vst [vmem:[#allocation90_spill] sm:$0xff] %v13293_v52  ;;  %14336 = vst [vmem:[#allocation92_spill] sm:$0xff] %v13299_v59 }
 0x18f   : > { %10281 = vmatmul.mubr.msk.f32.gmra.mrb[30].mxu0 %vm130_vm0, %v13273_v56  ;;  %10839 = vmatmul.mubr.msk.f32.gmra.mrb[30].mxu1 %vm130_vm0, %v13276_v1  ;;  %v13316_v1 = vld [vmem:[%s11942_s14 + $0x311] sm:$0xff] }
 0x190   : > { %10283 = vmatprep.mubr.msk.f32.mxu0 %vm130_vm0, %v13279_v2  ;;  %10841 = vmatprep.mubr.msk.f32.mxu1 %vm130_vm0, %v13282_v63  ;;  %v13313_v63 = vld [vmem:[%s11942_s14 + $0x2f1] sm:$0xff]  ;;  %14339 = vst [vmem:[#allocation95_spill] sm:$0xff] %v13316_v1 }
 0x191   : > { %14338 = vst [vmem:[#allocation94_spill] sm:$0xff] %v13313_v63  ;;  %v2601_v2 = vld [vmem:[#allocation3 + $0xd8] sm:$0xff] }
 0x192   : > { %v14340_v56 = vld [vmem:[#allocation27_spill] sm:$0xff] }
 0x193   : > { %10284 = vmatmul.mubr.msk.f32.gmra.mrb[32].mxu0 %vm130_vm0, %v13293_v52  ;;  %10842 = vmatmul.mubr.msk.f32.gmra.mrb[32].mxu1 %vm130_vm0, %v13296_v58  ;;  %v2600_v52 = vld [vmem:[#allocation3 + $0xd0] sm:$0xff] }
 0x194   : > { %10286 = vmatprep.mubr.msk.f32.mxu0 %vm130_vm0, %v13299_v59  ;;  %10844 = vmatprep.mubr.msk.f32.mxu1 %vm130_vm0, %v13302_v61  ;;  %v11147_v58 = vpack.c.bf16 %v2601_v2, %v2600_v52  ;;  %v3028_v61 = vld [vmem:[#allocation3 + $0xe0] sm:$0xff]  ;;  %v14342_v59 = vld [vmem:[#allocation31_spill] sm:$0xff]  ;;  %v14345_v52 = vld [vmem:[#allocation30_spill] sm:$0xff] }
 0x195   : > { %v14353_v2 = vld [vmem:[#allocation38_spill] sm:$0xff] }
 0x197   : > { %10287 = vmatmul.mubr.msk.f32.gmra.mrb[34].mxu0 %vm130_vm0, %v13313_v63  ;;  %10845 = vmatmul.mubr.msk.f32.gmra.mrb[34].mxu1 %vm130_vm0, %v13316_v1  ;;  %v3029_v63 = vld [vmem:[#allocation3 + $0xe8] sm:$0xff]  ;;  %v14341_v1 = vld [vmem:[#allocation28_spill] sm:$0xff] }
 0x198   : > { %10297 = vmatprep.mubr.msk.f32.mxu0 %vm130_vm0, %v14340_v56  ;;  %10855 = vmatprep.mubr.msk.f32.mxu1 %vm130_vm0, %v12470_v36  ;;  %v13336_v36 = vpack.c.bf16 %v3029_v63, %v3028_v61  ;;  %v14346_v56 = vld [vmem:[#allocation35_spill] sm:$0xff]  ;;  %v14349_v61 = vld [vmem:[#allocation34_spill] sm:$0xff] }
 0x199   : > { %v14350_v63 = vld [vmem:[#allocation39_spill] sm:$0xff] }
 0x19b   : > { %10298 = vmatmul.mubr.msk.f32.vlgmr.msra.gmra.mrb[0].mxu0 %vm130_vm0, %v12458_v32  ;;  %10856 = vmatmul.mubr.msk.f32.vlgmr.msra.gmra.mrb[0].mxu1 %vm130_vm0, %v12478_v26  ;;  %v14343_v32 = vld [vmem:[#allocation29_spill] sm:$0xff] }
 0x19c   : > { %11146 = vmatpush3.bf16.msra.mxu0 %v13000_v7  ;;  %10300 = vmatprep.mubr.msk.f32.mxu0 %vm130_vm0, %v14341_v1  ;;  %v14344_v26 = vld [vmem:[#allocation33_spill] sm:$0xff]  ;;  %v14351_v1 = vld [vmem:[#allocation36_spill] sm:$0xff] }
 0x19d   : > { %10858 = vmatprep.mubr.msk.f32.mxu1 %vm130_vm0, %v14342_v59  ;;  %11218 = vmatpush3.bf16.msra.mxu1 %v13000_v7  ;;  %v14347_v7 = vld [vmem:[#allocation32_spill] sm:$0xff]  ;;  %v14348_v59 = vld [vmem:[#allocation37_spill] sm:$0xff] }
 0x19e   : > { %11148 = vmatprep.subr.bf16.mxu0 %v11147_v58  ;;  %11220 = vmatprep.subr.bf16.mxu1 %v11147_v58 }
 0x19f   : > { %10301 = vmatmul.mubr.msk.f32.gmra.mrb[2].mxu0 %vm130_vm0, %v14343_v32  ;;  %10859 = vmatmul.mubr.msk.f32.gmra.mrb[2].mxu1 %vm130_vm0, %v14344_v26  ;;  %v14354_v32 = vld [vmem:[#allocation43_spill] sm:$0xff]  ;;  %v14355_v26 = vld [vmem:[#allocation40_spill] sm:$0xff] }
 0x1a0   : > { %10303 = vmatprep.mubr.msk.f32.mxu0 %vm130_vm0, %v14345_v52  ;;  %10861 = vmatprep.mubr.msk.f32.mxu1 %vm130_vm0, %v14346_v56  ;;  %v14356_v52 = vld [vmem:[#allocation45_spill] sm:$0xff]  ;;  %v14357_v56 = vld [vmem:[#allocation42_spill] sm:$0xff] }
 0x1a1   : > { %11150 = vmatpush3.bf16.msra.mxu0 %v11147_v58  ;;  %11222 = vmatpush3.bf16.msra.mxu1 %v11147_v58  ;;  %v14352_v58 = vld [vmem:[#allocation41_spill] sm:$0xff] }
 0x1a2   : > { %11152 = vmatprep.subr.bf16.mxu0 %v13336_v36  ;;  %11224 = vmatprep.subr.bf16.mxu1 %v13336_v36 }
 0x1a3   : > { %10304 = vmatmul.mubr.msk.f32.gmra.mrb[4].mxu0 %vm130_vm0, %v14347_v7  ;;  %10862 = vmatmul.mubr.msk.f32.gmra.mrb[4].mxu1 %vm130_vm0, %v14348_v59  ;;  %v14358_v7 = vld [vmem:[#allocation47_spill] sm:$0xff]  ;;  %v14359_v59 = vld [vmem:[#allocation44_spill] sm:$0xff] }
 0x1a4   : > { %10306 = vmatprep.mubr.msk.f32.mxu0 %vm130_vm0, %v14349_v61  ;;  %10864 = vmatprep.mubr.msk.f32.mxu1 %vm130_vm0, %v14350_v63  ;;  %v14360_v61 = vld [vmem:[#allocation49_spill] sm:$0xff]  ;;  %v14361_v63 = vld [vmem:[#allocation46_spill] sm:$0xff] }
 0x1a7   : > { %10307 = vmatmul.mubr.msk.f32.gmra.mrb[6].mxu0 %vm130_vm0, %v14351_v1  ;;  %10865 = vmatmul.mubr.msk.f32.gmra.mrb[6].mxu1 %vm130_vm0, %v14352_v58  ;;  %v14362_v1 = vld [vmem:[#allocation51_spill] sm:$0xff]  ;;  %v14363_v58 = vld [vmem:[#allocation48_spill] sm:$0xff] }
 0x1a8   : > { %10309 = vmatprep.mubr.msk.f32.mxu0 %vm130_vm0, %v14353_v2  ;;  %10867 = vmatprep.mubr.msk.f32.mxu1 %vm130_vm0, %v14354_v32  ;;  %v14364_v2 = vld [vmem:[#allocation53_spill] sm:$0xff]  ;;  %v14365_v32 = vld [vmem:[#allocation50_spill] sm:$0xff] }
 0x1ab   : > { %10310 = vmatmul.mubr.msk.f32.gmra.mrb[8].mxu0 %vm130_vm0, %v14355_v26  ;;  %10868 = vmatmul.mubr.msk.f32.gmra.mrb[8].mxu1 %vm130_vm0, %v14356_v52  ;;  %v14366_v26 = vld [vmem:[#allocation55_spill] sm:$0xff]  ;;  %v14367_v52 = vld [vmem:[#allocation52_spill] sm:$0xff] }
 0x1ac   : > { %10312 = vmatprep.mubr.msk.f32.mxu0 %vm130_vm0, %v14357_v56  ;;  %10870 = vmatprep.mubr.msk.f32.mxu1 %vm130_vm0, %v14358_v7  ;;  %v14368_v56 = vld [vmem:[#allocation57_spill] sm:$0xff]  ;;  %v14369_v7 = vld [vmem:[#allocation54_spill] sm:$0xff] }
 0x1af   : > { %10313 = vmatmul.mubr.msk.f32.gmra.mrb[10].mxu0 %vm130_vm0, %v14359_v59  ;;  %10871 = vmatmul.mubr.msk.f32.gmra.mrb[10].mxu1 %vm130_vm0, %v14360_v61  ;;  %v14370_v59 = vld [vmem:[#allocation59_spill] sm:$0xff]  ;;  %v14371_v61 = vld [vmem:[#allocation56_spill] sm:$0xff] }
 0x1b0   : > { %10315 = vmatprep.mubr.msk.f32.mxu0 %vm130_vm0, %v14361_v63  ;;  %10873 = vmatprep.mubr.msk.f32.mxu1 %vm130_vm0, %v14362_v1  ;;  %v14372_v63 = vld [vmem:[#allocation61_spill] sm:$0xff]  ;;  %v14373_v1 = vld [vmem:[#allocation58_spill] sm:$0xff] }
 0x1b3   : > { %10316 = vmatmul.mubr.msk.f32.gmra.mrb[12].mxu0 %vm130_vm0, %v14363_v58  ;;  %10874 = vmatmul.mubr.msk.f32.gmra.mrb[12].mxu1 %vm130_vm0, %v14364_v2  ;;  %v14374_v58 = vld [vmem:[#allocation63_spill] sm:$0xff]  ;;  %v14375_v2 = vld [vmem:[#allocation60_spill] sm:$0xff] }
 0x1b4   : > { %10318 = vmatprep.mubr.msk.f32.mxu0 %vm130_vm0, %v14365_v32  ;;  %10876 = vmatprep.mubr.msk.f32.mxu1 %vm130_vm0, %v14366_v26  ;;  %v14376_v32 = vld [vmem:[#allocation65_spill] sm:$0xff]  ;;  %v14377_v26 = vld [vmem:[#allocation62_spill] sm:$0xff] }
 0x1b7   : > { %10319 = vmatmul.mubr.msk.f32.gmra.mrb[14].mxu0 %vm130_vm0, %v14367_v52  ;;  %10877 = vmatmul.mubr.msk.f32.gmra.mrb[14].mxu1 %vm130_vm0, %v14368_v56  ;;  %v14378_v52 = vld [vmem:[#allocation67_spill] sm:$0xff]  ;;  %v14379_v56 = vld [vmem:[#allocation64_spill] sm:$0xff] }
 0x1b8   : > { %10321 = vmatprep.mubr.msk.f32.mxu0 %vm130_vm0, %v14369_v7  ;;  %10879 = vmatprep.mubr.msk.f32.mxu1 %vm130_vm0, %v14370_v59  ;;  %v14380_v7 = vld [vmem:[#allocation69_spill] sm:$0xff]  ;;  %v14381_v59 = vld [vmem:[#allocation66_spill] sm:$0xff] }
 0x1bb   : > { %10322 = vmatmul.mubr.msk.f32.gmra.mrb[16].mxu0 %vm130_vm0, %v14371_v61  ;;  %10880 = vmatmul.mubr.msk.f32.gmra.mrb[16].mxu1 %vm130_vm0, %v14372_v63  ;;  %v14382_v61 = vld [vmem:[#allocation71_spill] sm:$0xff]  ;;  %v14383_v63 = vld [vmem:[#allocation68_spill] sm:$0xff] }
 0x1bc   : > { %10324 = vmatprep.mubr.msk.f32.mxu0 %vm130_vm0, %v14373_v1  ;;  %10882 = vmatprep.mubr.msk.f32.mxu1 %vm130_vm0, %v14374_v58  ;;  %v14384_v1 = vld [vmem:[#allocation73_spill] sm:$0xff]  ;;  %v14385_v58 = vld [vmem:[#allocation70_spill] sm:$0xff] }
 0x1bf   : > { %10325 = vmatmul.mubr.msk.f32.gmra.mrb[18].mxu0 %vm130_vm0, %v14375_v2  ;;  %10883 = vmatmul.mubr.msk.f32.gmra.mrb[18].mxu1 %vm130_vm0, %v14376_v32  ;;  %v14386_v2 = vld [vmem:[#allocation75_spill] sm:$0xff]  ;;  %v14387_v32 = vld [vmem:[#allocation72_spill] sm:$0xff] }
 0x1c0   : > { %10327 = vmatprep.mubr.msk.f32.mxu0 %vm130_vm0, %v14377_v26  ;;  %10885 = vmatprep.mubr.msk.f32.mxu1 %vm130_vm0, %v14378_v52  ;;  %v14388_v26 = vld [vmem:[#allocation77_spill] sm:$0xff]  ;;  %v14389_v52 = vld [vmem:[#allocation74_spill] sm:$0xff] }
 0x1c3   : > { %10328 = vmatmul.mubr.msk.f32.gmra.mrb[20].mxu0 %vm130_vm0, %v14379_v56  ;;  %10886 = vmatmul.mubr.msk.f32.gmra.mrb[20].mxu1 %vm130_vm0, %v14380_v7  ;;  %v14390_v56 = vld [vmem:[#allocation79_spill] sm:$0xff]  ;;  %v14391_v7 = vld [vmem:[#allocation76_spill] sm:$0xff] }
 0x1c4   : > { %10330 = vmatprep.mubr.msk.f32.mxu0 %vm130_vm0, %v14381_v59  ;;  %10888 = vmatprep.mubr.msk.f32.mxu1 %vm130_vm0, %v14382_v61  ;;  %v14392_v59 = vld [vmem:[#allocation81_spill] sm:$0xff]  ;;  %v14393_v61 = vld [vmem:[#allocation78_spill] sm:$0xff] }
 0x1c7   : > { %10331 = vmatmul.mubr.msk.f32.gmra.mrb[22].mxu0 %vm130_vm0, %v14383_v63  ;;  %10889 = vmatmul.mubr.msk.f32.gmra.mrb[22].mxu1 %vm130_vm0, %v14384_v1  ;;  %v14394_v63 = vld [vmem:[#allocation80_spill] sm:$0xff] }
 0x1c8   : > { %10333 = vmatprep.mubr.msk.f32.mxu0 %vm130_vm0, %v14385_v58  ;;  %10891 = vmatprep.mubr.msk.f32.mxu1 %vm130_vm0, %v14386_v2  ;;  %v14395_v1 = vld [vmem:[#allocation84_spill] sm:$0xff]  ;;  %v14396_v58 = vld [vmem:[#allocation82_spill] sm:$0xff] }
 0x1c9   : > { %v14397_v2 = vld [vmem:[#allocation86_spill] sm:$0xff] }
 0x1cb   : > { %10334 = vmatmul.mubr.msk.f32.gmra.mrb[24].mxu0 %vm130_vm0, %v14387_v32  ;;  %10892 = vmatmul.mubr.msk.f32.gmra.mrb[24].mxu1 %vm130_vm0, %v14388_v26  ;;  %v14398_v32 = vld [vmem:[#allocation83_spill] sm:$0xff]  ;;  %v14400_v26 = vld [vmem:[#allocation89_spill] sm:$0xff] }
 0x1cc   : > { %10336 = vmatprep.mubr.msk.f32.mxu0 %vm130_vm0, %v14389_v52  ;;  %10894 = vmatprep.mubr.msk.f32.mxu1 %vm130_vm0, %v14390_v56  ;;  %v13461_v52 = vld [vmem:[%s11942_s14 + $0x302] sm:$0xff]  ;;  %v13464_v56 = vld [vmem:[%s11942_s14 + $0x30a] sm:$0xff] }
 0x1cf   : > { %10337 = vmatmul.mubr.msk.f32.gmra.mrb[26].mxu0 %vm130_vm0, %v14391_v7  ;;  %10895 = vmatmul.mubr.msk.f32.gmra.mrb[26].mxu1 %vm130_vm0, %v14392_v59  ;;  %v14401_v7 = vld [vmem:[#allocation87_spill] sm:$0xff] }
 0x1d0   : > { %10339 = vmatprep.mubr.msk.f32.mxu0 %vm130_vm0, %v14393_v61  ;;  %10897 = vmatprep.mubr.msk.f32.mxu1 %vm130_vm0, %v12757_v0  ;;  %v14399_v0 = vld [vmem:[#allocation85_spill] sm:$0xff]  ;;  %v13475_v59 = vld [vmem:[%s11942_s14 + $0x312] sm:$0xff] }
 0x1d1   : > { %14403 = vst [vmem:[#allocation27_spill] sm:$0xff] %v13475_v59  ;;  %v8394_v61 = vld [vmem:[%s11942_s14 + $0x40] sm:$0xff] }
 0x1d3   : > { %10340 = vmatmul.mubr.msk.f32.gmra.mrb[28].mxu0 %vm130_vm0, %v14394_v63  ;;  %10898 = vmatmul.mubr.msk.f32.gmra.mrb[28].mxu1 %vm130_vm0, %v14395_v1  ;;  %v9043_v63 = vld [vmem:[%s11942_s14 + $0x60] sm:$0xff]  ;;  %v3030_v1 = vld [vmem:[#allocation3 + $0xf0] sm:$0xff] }
 0x1d4   : > { %10342 = vmatprep.mubr.msk.f32.mxu0 %vm130_vm0, %v14396_v58  ;;  %10900 = vmatprep.mubr.msk.f32.mxu1 %vm130_vm0, %v14397_v2  ;;  %v3031_v58 = vld [vmem:[#allocation3 + $0xf8] sm:$0xff]  ;;  %v8395_v2 = vld [vmem:[%s11942_s14 + $0x48] sm:$0xff] }
 0x1d7   : > { %10343 = vmatmul.mubr.msk.f32.gmra.mrb[30].mxu0 %vm130_vm0, %v14398_v32  ;;  %10901 = vmatmul.mubr.msk.f32.gmra.mrb[30].mxu1 %vm130_vm0, %v12783_v23  ;;  %v14402_v23 = vld [vmem:[#allocation88_spill] sm:$0xff]  ;;  %v9044_v32 = vld [vmem:[%s11942_s14 + $0x68] sm:$0xff] }
 0x1d8   : > { %10345 = vmatprep.mubr.msk.f32.mxu0 %vm130_vm0, %v14399_v0  ;;  %10903 = vmatprep.mubr.msk.f32.mxu1 %vm130_vm0, %v14400_v26  ;;  %v8396_v0 = vld [vmem:[%s11942_s14 + $0x50] sm:$0xff] }
 0x1d9   : > { %v9045_v26 = vld [vmem:[%s11942_s14 + $0x70] sm:$0xff] }
 0x1db   : > { %10346 = vmatmul.mubr.msk.f32.gmra.mrb[32].mxu0 %vm130_vm0, %v14401_v7  ;;  %10904 = vmatmul.mubr.msk.f32.gmra.mrb[32].mxu1 %vm130_vm0, %v13461_v52  ;;  %v11155_v7 = vpack.c.bf16 %v3031_v58, %v3030_v1  ;;  %v9047_v1 = vld [vmem:[%s11942_s14 + $0xa8] sm:$0xff] }
 0x1dc   : > { %10348 = vmatprep.mubr.msk.f32.mxu0 %vm130_vm0, %v14402_v23  ;;  %10906 = vmatprep.mubr.msk.f32.mxu1 %vm130_vm0, %v13464_v56  ;;  %v3459_v23 = vld [vmem:[#allocation3 + $0x108] sm:$0xff] }
 0x1df   : > { %10349 = vmatmul.mubr.msk.f32.gmra.mrb[34].mxu0 %vm130_vm0, %v12800_v29  ;;  %10907 = vmatmul.mubr.msk.f32.gmra.mrb[34].mxu1 %vm130_vm0, %v13475_v59  ;;  %v3458_v29 = vld [vmem:[#allocation3 + $0x100] sm:$0xff]  ;;  %v8398_v59 = vld [vmem:[%s11942_s14 + $0x88] sm:$0xff] }
 0x1e0   : > { %10359 = vmatprep.mubr.msk.f32.mxu0 %vm130_vm0, %v8394_v61  ;;  %10917 = vmatprep.mubr.msk.f32.mxu1 %vm130_vm0, %v9043_v63  ;;  %v8397_v61 = vld [vmem:[%s11942_s14 + $0x80] sm:$0xff]  ;;  %v13499_v58 = vpack.c.bf16 %v3459_v23, %v3458_v29  ;;  %v9051_v29 = vld [vmem:[%s11942_s14 + $0xf0] sm:$0xff] }
 0x1e1   : > { %v9046_v63 = vld [vmem:[%s11942_s14 + $0xa0] sm:$0xff] }
 0x1e2   : > { %v8403_v23 = vld [vmem:[%s11942_s14 + $0x100] sm:$0xff] }
 0x1e3   : > { %10360 = vmatmul.mubr.msk.f32.vlgmr.msra.gmra.mrb[0].mxu0 %vm130_vm0, %v8395_v2  ;;  %10918 = vmatmul.mubr.msk.f32.vlgmr.msra.gmra.mrb[0].mxu1 %vm130_vm0, %v9044_v32  ;;  %v8399_v2 = vld [vmem:[%s11942_s14 + $0x90] sm:$0xff] }
 0x1e4   : > { %11154 = vmatpush3.bf16.msra.mxu0 %v13336_v36  ;;  %10362 = vmatprep.mubr.msk.f32.mxu0 %vm130_vm0, %v8396_v0  ;;  %v9048_v32 = vld [vmem:[%s11942_s14 + $0xb0] sm:$0xff]  ;;  %v8400_v0 = vld [vmem:[%s11942_s14 + $0xc0] sm:$0xff] }
 0x1e5   : > { %10920 = vmatprep.mubr.msk.f32.mxu1 %vm130_vm0, %v9045_v26  ;;  %11226 = vmatpush3.bf16.msra.mxu1 %v13336_v36  ;;  %v9049_v36 = vld [vmem:[%s11942_s14 + $0xe0] sm:$0xff]  ;;  %v9050_v26 = vld [vmem:[%s11942_s14 + $0xe8] sm:$0xff] }
 0x1e6   : > { %11156 = vmatprep.subr.bf16.mxu0 %v11155_v7  ;;  %11228 = vmatprep.subr.bf16.mxu1 %v11155_v7 }
 0x1e7   : > { %10363 = vmatmul.mubr.msk.f32.gmra.mrb[2].mxu0 %vm130_vm0, %v8397_v61  ;;  %10921 = vmatmul.mubr.msk.f32.gmra.mrb[2].mxu1 %vm130_vm0, %v9046_v63  ;;  %v9052_v61 = vld [vmem:[%s11942_s14 + $0x120] sm:$0xff]  ;;  %v8404_v63 = vld [vmem:[%s11942_s14 + $0x108] sm:$0xff] }
 0x1e8   : > { %10365 = vmatprep.mubr.msk.f32.mxu0 %vm130_vm0, %v8398_v59  ;;  %10923 = vmatprep.mubr.msk.f32.mxu1 %vm130_vm0, %v9047_v1  ;;  %v8401_v59 = vld [vmem:[%s11942_s14 + $0xc8] sm:$0xff] }
 0x1e9   : > { %11158 = vmatpush3.bf16.msra.mxu0 %v11155_v7  ;;  %11230 = vmatpush3.bf16.msra.mxu1 %v11155_v7  ;;  %v8402_v7 = vld [vmem:[%s11942_s14 + $0xd0] sm:$0xff]  ;;  %v9053_v1 = vld [vmem:[%s11942_s14 + $0x128] sm:$0xff] }
 0x1ea   : > { %11160 = vmatprep.subr.bf16.mxu0 %v13499_v58  ;;  %11232 = vmatprep.subr.bf16.mxu1 %v13499_v58 }
 0x1eb   : > { %10366 = vmatmul.mubr.msk.f32.gmra.mrb[4].mxu0 %vm130_vm0, %v8399_v2  ;;  %10924 = vmatmul.mubr.msk.f32.gmra.mrb[4].mxu1 %vm130_vm0, %v9048_v32  ;;  %v8405_v2 = vld [vmem:[%s11942_s14 + $0x110] sm:$0xff] }
 0x1ec   : > { %10368 = vmatprep.mubr.msk.f32.mxu0 %vm130_vm0, %v8400_v0  ;;  %10926 = vmatprep.mubr.msk.f32.mxu1 %vm130_vm0, %v9049_v36  ;;  %v9054_v32 = vld [vmem:[%s11942_s14 + $0x130] sm:$0xff]  ;;  %v8406_v0 = vld [vmem:[%s11942_s14 + $0x140] sm:$0xff] }
 0x1ed   : > { %v9055_v36 = vld [vmem:[%s11942_s14 + $0x160] sm:$0xff] }
 0x1ef   : > { %10369 = vmatmul.mubr.msk.f32.gmra.mrb[6].mxu0 %vm130_vm0, %v8401_v59  ;;  %10927 = vmatmul.mubr.msk.f32.gmra.mrb[6].mxu1 %vm130_vm0, %v9050_v26  ;;  %v8407_v59 = vld [vmem:[%s11942_s14 + $0x148] sm:$0xff] }
 0x1f0   : > { %10371 = vmatprep.mubr.msk.f32.mxu0 %vm130_vm0, %v8402_v7  ;;  %10929 = vmatprep.mubr.msk.f32.mxu1 %vm130_vm0, %v9051_v29  ;;  %v9056_v26 = vld [vmem:[%s11942_s14 + $0x168] sm:$0xff]  ;;  %v8408_v7 = vld [vmem:[%s11942_s14 + $0x150] sm:$0xff] }
 0x1f1   : > { %v9057_v29 = vld [vmem:[%s11942_s14 + $0x170] sm:$0xff] }
 0x1f3   : > { %10372 = vmatmul.mubr.msk.f32.gmra.mrb[8].mxu0 %vm130_vm0, %v8403_v23  ;;  %10930 = vmatmul.mubr.msk.f32.gmra.mrb[8].mxu1 %vm130_vm0, %v9052_v61  ;;  %v8409_v23 = vld [vmem:[%s11942_s14 + $0x180] sm:$0xff] }
 0x1f4   : > { %10374 = vmatprep.mubr.msk.f32.mxu0 %vm130_vm0, %v8404_v63  ;;  %10932 = vmatprep.mubr.msk.f32.mxu1 %vm130_vm0, %v9053_v1  ;;  %v9058_v61 = vld [vmem:[%s11942_s14 + $0x1a0] sm:$0xff]  ;;  %v8410_v63 = vld [vmem:[%s11942_s14 + $0x188] sm:$0xff] }
 0x1f5   : > { %v9059_v1 = vld [vmem:[%s11942_s14 + $0x1a8] sm:$0xff] }
 0x1f7   : > { %10375 = vmatmul.mubr.msk.f32.gmra.mrb[10].mxu0 %vm130_vm0, %v8405_v2  ;;  %10933 = vmatmul.mubr.msk.f32.gmra.mrb[10].mxu1 %vm130_vm0, %v9054_v32  ;;  %v8411_v2 = vld [vmem:[%s11942_s14 + $0x190] sm:$0xff] }
 0x1f8   : > { %10377 = vmatprep.mubr.msk.f32.mxu0 %vm130_vm0, %v8406_v0  ;;  %10935 = vmatprep.mubr.msk.f32.mxu1 %vm130_vm0, %v9055_v36  ;;  %v9060_v32 = vld [vmem:[%s11942_s14 + $0x1b0] sm:$0xff]  ;;  %v8412_v0 = vld [vmem:[%s11942_s14 + $0x1c0] sm:$0xff] }
 0x1f9   : > { %v9061_v36 = vld [vmem:[%s11942_s14 + $0x1e0] sm:$0xff] }
 0x1fb   : > { %10378 = vmatmul.mubr.msk.f32.gmra.mrb[12].mxu0 %vm130_vm0, %v8407_v59  ;;  %10936 = vmatmul.mubr.msk.f32.gmra.mrb[12].mxu1 %vm130_vm0, %v9056_v26  ;;  %v8413_v59 = vld [vmem:[%s11942_s14 + $0x1c8] sm:$0xff] }
 0x1fc   : > { %10380 = vmatprep.mubr.msk.f32.mxu0 %vm130_vm0, %v8408_v7  ;;  %10938 = vmatprep.mubr.msk.f32.mxu1 %vm130_vm0, %v9057_v29  ;;  %v9062_v26 = vld [vmem:[%s11942_s14 + $0x1e8] sm:$0xff]  ;;  %v8414_v7 = vld [vmem:[%s11942_s14 + $0x1d0] sm:$0xff] }
 0x1fd   : > { %v9063_v29 = vld [vmem:[%s11942_s14 + $0x1f0] sm:$0xff] }
 0x1ff   : > { %10381 = vmatmul.mubr.msk.f32.gmra.mrb[14].mxu0 %vm130_vm0, %v8409_v23  ;;  %10939 = vmatmul.mubr.msk.f32.gmra.mrb[14].mxu1 %vm130_vm0, %v9058_v61  ;;  %v8415_v23 = vld [vmem:[%s11942_s14 + $0x200] sm:$0xff] }
 0x200   : > { %10383 = vmatprep.mubr.msk.f32.mxu0 %vm130_vm0, %v8410_v63  ;;  %10941 = vmatprep.mubr.msk.f32.mxu1 %vm130_vm0, %v9059_v1  ;;  %v9064_v61 = vld [vmem:[%s11942_s14 + $0x220] sm:$0xff]  ;;  %v8416_v63 = vld [vmem:[%s11942_s14 + $0x208] sm:$0xff] }
 0x201   : > { %v9065_v1 = vld [vmem:[%s11942_s14 + $0x228] sm:$0xff] }
 0x203   : > { %10384 = vmatmul.mubr.msk.f32.gmra.mrb[16].mxu0 %vm130_vm0, %v8411_v2  ;;  %10942 = vmatmul.mubr.msk.f32.gmra.mrb[16].mxu1 %vm130_vm0, %v9060_v32  ;;  %v8417_v2 = vld [vmem:[%s11942_s14 + $0x210] sm:$0xff] }
 0x204   : > { %10386 = vmatprep.mubr.msk.f32.mxu0 %vm130_vm0, %v8412_v0  ;;  %10944 = vmatprep.mubr.msk.f32.mxu1 %vm130_vm0, %v9061_v36  ;;  %v9066_v32 = vld [vmem:[%s11942_s14 + $0x230] sm:$0xff]  ;;  %v8418_v0 = vld [vmem:[%s11942_s14 + $0x240] sm:$0xff] }
 0x205   : > { %v9067_v36 = vld [vmem:[%s11942_s14 + $0x260] sm:$0xff] }
 0x207   : > { %10387 = vmatmul.mubr.msk.f32.gmra.mrb[18].mxu0 %vm130_vm0, %v8413_v59  ;;  %10945 = vmatmul.mubr.msk.f32.gmra.mrb[18].mxu1 %vm130_vm0, %v9062_v26  ;;  %v8419_v59 = vld [vmem:[%s11942_s14 + $0x248] sm:$0xff] }
 0x208   : > { %10389 = vmatprep.mubr.msk.f32.mxu0 %vm130_vm0, %v8414_v7  ;;  %10947 = vmatprep.mubr.msk.f32.mxu1 %vm130_vm0, %v9063_v29  ;;  %v9068_v26 = vld [vmem:[%s11942_s14 + $0x268] sm:$0xff]  ;;  %v8420_v7 = vld [vmem:[%s11942_s14 + $0x250] sm:$0xff] }
 0x209   : > { %v9069_v29 = vld [vmem:[%s11942_s14 + $0x270] sm:$0xff] }
 0x20b   : > { %10390 = vmatmul.mubr.msk.f32.gmra.mrb[20].mxu0 %vm130_vm0, %v8415_v23  ;;  %10948 = vmatmul.mubr.msk.f32.gmra.mrb[20].mxu1 %vm130_vm0, %v9064_v61  ;;  %v8421_v23 = vld [vmem:[%s11942_s14 + $0x280] sm:$0xff] }
 0x20c   : > { %10392 = vmatprep.mubr.msk.f32.mxu0 %vm130_vm0, %v8416_v63  ;;  %10950 = vmatprep.mubr.msk.f32.mxu1 %vm130_vm0, %v9065_v1  ;;  %v9070_v61 = vld [vmem:[%s11942_s14 + $0x2a0] sm:$0xff]  ;;  %v8422_v63 = vld [vmem:[%s11942_s14 + $0x288] sm:$0xff] }
 0x20d   : > { %v9071_v1 = vld [vmem:[%s11942_s14 + $0x2a8] sm:$0xff] }
 0x20f   : > { %10393 = vmatmul.mubr.msk.f32.gmra.mrb[22].mxu0 %vm130_vm0, %v8417_v2  ;;  %10951 = vmatmul.mubr.msk.f32.gmra.mrb[22].mxu1 %vm130_vm0, %v9066_v32  ;;  %v8423_v2 = vld [vmem:[%s11942_s14 + $0x290] sm:$0xff] }
 0x210   : > { %10395 = vmatprep.mubr.msk.f32.mxu0 %vm130_vm0, %v8418_v0  ;;  %10953 = vmatprep.mubr.msk.f32.mxu1 %vm130_vm0, %v9067_v36  ;;  %v9072_v32 = vld [vmem:[%s11942_s14 + $0x2b0] sm:$0xff]  ;;  %v8424_v0 = vld [vmem:[%s11942_s14 + $0x2c0] sm:$0xff] }
 0x211   : > { %v9073_v36 = vld [vmem:[%s11942_s14 + $0x2e0] sm:$0xff] }
 0x213   : > { %10396 = vmatmul.mubr.msk.f32.gmra.mrb[24].mxu0 %vm130_vm0, %v8419_v59  ;;  %10954 = vmatmul.mubr.msk.f32.gmra.mrb[24].mxu1 %vm130_vm0, %v9068_v26  ;;  %v8425_v59 = vld [vmem:[%s11942_s14 + $0x2c8] sm:$0xff] }
 0x214   : > { %10398 = vmatprep.mubr.msk.f32.mxu0 %vm130_vm0, %v8420_v7  ;;  %10956 = vmatprep.mubr.msk.f32.mxu1 %vm130_vm0, %v9069_v29  ;;  %v9074_v26 = vld [vmem:[%s11942_s14 + $0x2e8] sm:$0xff]  ;;  %v8426_v7 = vld [vmem:[%s11942_s14 + $0x2d0] sm:$0xff] }
 0x215   : > { %v9075_v29 = vld [vmem:[%s11942_s14 + $0x2f0] sm:$0xff] }
 0x217   : > { %10399 = vmatmul.mubr.msk.f32.gmra.mrb[26].mxu0 %vm130_vm0, %v8421_v23  ;;  %10957 = vmatmul.mubr.msk.f32.gmra.mrb[26].mxu1 %vm130_vm0, %v9070_v61  ;;  %v9076_v23 = vld [vmem:[%s11942_s14 + $0x320] sm:$0xff]  ;;  %v9077_v61 = vld [vmem:[%s11942_s14 + $0x328] sm:$0xff] }
 0x218   : > { %10401 = vmatprep.mubr.msk.f32.mxu0 %vm130_vm0, %v8422_v63  ;;  %10959 = vmatprep.mubr.msk.f32.mxu1 %vm130_vm0, %v9071_v1  ;;  %v9078_v63 = vld [vmem:[%s11942_s14 + $0x330] sm:$0xff] }
 0x219   : > { %v3460_v1 = vld [vmem:[#allocation3 + $0x110] sm:$0xff] }
 0x21b   : > { %10402 = vmatmul.mubr.msk.f32.gmra.mrb[28].mxu0 %vm130_vm0, %v8423_v2  ;;  %10960 = vmatmul.mubr.msk.f32.gmra.mrb[28].mxu1 %vm130_vm0, %v9072_v32  ;;  %v3461_v2 = vld [vmem:[#allocation3 + $0x118] sm:$0xff] }
 0x21c   : > { %10404 = vmatprep.mubr.msk.f32.mxu0 %vm130_vm0, %v8424_v0  ;;  %10962 = vmatprep.mubr.msk.f32.mxu1 %vm130_vm0, %v9073_v36  ;;  %v9198_v32 = vld [vmem:[%s11942_s14 + $0x132] sm:$0xff]  ;;  %v8550_v0 = vld [vmem:[%s11942_s14 + $0x142] sm:$0xff] }
 0x21d   : > { %v9199_v36 = vld [vmem:[%s11942_s14 + $0x162] sm:$0xff] }
 0x21f   : > { %10405 = vmatmul.mubr.msk.f32.gmra.mrb[30].mxu0 %vm130_vm0, %v8425_v59  ;;  %10963 = vmatmul.mubr.msk.f32.gmra.mrb[30].mxu1 %vm130_vm0, %v9074_v26  ;;  %v8551_v59 = vld [vmem:[%s11942_s14 + $0x14a] sm:$0xff] }
 0x220   : > { %10407 = vmatprep.mubr.msk.f32.mxu0 %vm130_vm0, %v8426_v7  ;;  %10965 = vmatprep.mubr.msk.f32.mxu1 %vm130_vm0, %v9075_v29  ;;  %v9200_v26 = vld [vmem:[%s11942_s14 + $0x16a] sm:$0xff]  ;;  %v8552_v7 = vld [vmem:[%s11942_s14 + $0x152] sm:$0xff] }
 0x221   : > { %v9201_v29 = vld [vmem:[%s11942_s14 + $0x172] sm:$0xff] }
 0x223   : > { %10408 = vmatmul.mubr.msk.f32.gmra.mrb[32].mxu0 %vm130_vm0, %v12945_v49  ;;  %10966 = vmatmul.mubr.msk.f32.gmra.mrb[32].mxu1 %vm130_vm0, %v9076_v23  ;;  %v11163_v49 = vpack.c.bf16 %v3461_v2, %v3460_v1  ;;  %v8553_v23 = vld [vmem:[%s11942_s14 + $0x182] sm:$0xff]  ;;  %v9203_v1 = vld [vmem:[%s11942_s14 + $0x1aa] sm:$0xff]  ;;  %v8555_v2 = vld [vmem:[%s11942_s14 + $0x192] sm:$0xff] }
 0x224   : > { %10410 = vmatprep.mubr.msk.f32.mxu0 %vm130_vm0, %v12948_v50  ;;  %10968 = vmatprep.mubr.msk.f32.mxu1 %vm130_vm0, %v9077_v61  ;;  %v14404_v50 = vld [vmem:[#allocation10_spill] sm:$0xff]  ;;  %v9202_v61 = vld [vmem:[%s11942_s14 + $0x1a2] sm:$0xff] }
 0x227   : > { %10411 = vmatmul.mubr.msk.f32.gmra.mrb[34].mxu0 %vm130_vm0, %v12959_v53  ;;  %10969 = vmatmul.mubr.msk.f32.gmra.mrb[34].mxu1 %vm130_vm0, %v9078_v63  ;;  %v14405_v53 = vld [vmem:[#allocation15_spill] sm:$0xff]  ;;  %v8554_v63 = vld [vmem:[%s11942_s14 + $0x18a] sm:$0xff] }
 0x228   : > { %10421 = vmatprep.mubr.msk.f32.mxu0 %vm130_vm0, %v12963_v55  ;;  %10979 = vmatprep.mubr.msk.f32.mxu1 %vm130_vm0, %v12986_v3  ;;  %v14406_v55 = vld [vmem:[#allocation13_spill] sm:$0xff]  ;;  %v14409_v3 = vld [vmem:[#allocation19_spill] sm:$0xff] }
 0x22b   : > { %10422 = vmatmul.mubr.msk.f32.vlgmr.msra.gmra.mrb[0].mxu0 %vm130_vm0, %v12974_v60  ;;  %10980 = vmatmul.mubr.msk.f32.vlgmr.msra.gmra.mrb[0].mxu1 %vm130_vm0, %v12994_v5  ;;  %v14407_v60 = vld [vmem:[#allocation17_spill] sm:$0xff] }
 0x22c   : > { %11162 = vmatpush3.bf16.msra.mxu0 %v13499_v58  ;;  %10424 = vmatprep.mubr.msk.f32.mxu0 %vm130_vm0, %v12978_v62  ;;  %v14408_v62 = vld [vmem:[#allocation11_spill] sm:$0xff]  ;;  %v14411_v5 = vld [vmem:[#allocation21_spill] sm:$0xff] }
 0x22d   : > { %10982 = vmatprep.mubr.msk.f32.mxu1 %vm130_vm0, %v13011_v8  ;;  %11234 = vmatpush3.bf16.msra.mxu1 %v13499_v58  ;;  %v14413_v8 = vld [vmem:[#allocation23_spill] sm:$0xff] }
 0x22e   : > { %11164 = vmatprep.subr.bf16.mxu0 %v11163_v49  ;;  %11236 = vmatprep.subr.bf16.mxu1 %v11163_v49  ;;  %v8549_v58 = vld [vmem:[%s11942_s14 + $0x112] sm:$0xff] }
 0x22f   : > { %10425 = vmatmul.mubr.msk.f32.gmra.mrb[2].mxu0 %vm130_vm0, %v12989_v4  ;;  %10983 = vmatmul.mubr.msk.f32.gmra.mrb[2].mxu1 %vm130_vm0, %v13017_v10  ;;  %v14410_v4 = vld [vmem:[#allocation12_spill] sm:$0xff]  ;;  %v14415_v10 = vld [vmem:[#allocation25_spill] sm:$0xff] }
 0x230   : > { %10427 = vmatprep.mubr.msk.f32.mxu0 %vm130_vm0, %v12997_v6  ;;  %10985 = vmatprep.mubr.msk.f32.mxu1 %vm130_vm0, %v13033_v12  ;;  %v14412_v6 = vld [vmem:[#allocation14_spill] sm:$0xff]  ;;  %v14417_v12 = vld [vmem:[#allocation24_spill] sm:$0xff] }
 0x231   : > { %11166 = vmatpush3.bf16.msra.mxu0 %v11163_v49  ;;  %11238 = vmatpush3.bf16.msra.mxu1 %v11163_v49  ;;  %v9204_v49 = vld [vmem:[%s11942_s14 + $0x1b2] sm:$0xff] }
 0x233   : > { %10428 = vmatmul.mubr.msk.f32.gmra.mrb[4].mxu0 %vm130_vm0, %v13014_v9  ;;  %10986 = vmatmul.mubr.msk.f32.gmra.mrb[4].mxu1 %vm130_vm0, %v13039_v14  ;;  %v14414_v9 = vld [vmem:[#allocation16_spill] sm:$0xff]  ;;  %v14419_v14 = vld [vmem:[#allocation90_spill] sm:$0xff] }
 0x234   : > { %10430 = vmatprep.mubr.msk.f32.mxu0 %vm130_vm0, %v13020_v11  ;;  %10988 = vmatprep.mubr.msk.f32.mxu1 %vm130_vm0, %v13053_v16  ;;  %v14416_v11 = vld [vmem:[#allocation18_spill] sm:$0xff]  ;;  %v14421_v16 = vld [vmem:[#allocation92_spill] sm:$0xff] }
 0x237   : > { %10431 = vmatmul.mubr.msk.f32.gmra.mrb[6].mxu0 %vm130_vm0, %v13036_v13  ;;  %10989 = vmatmul.mubr.msk.f32.gmra.mrb[6].mxu1 %vm130_vm0, %v13059_v18  ;;  %v14418_v13 = vld [vmem:[#allocation20_spill] sm:$0xff]  ;;  %v14423_v18 = vld [vmem:[#allocation94_spill] sm:$0xff] }
 0x238   : > { %10433 = vmatprep.mubr.msk.f32.mxu0 %vm130_vm0, %v13042_v15  ;;  %10991 = vmatprep.mubr.msk.f32.mxu1 %vm130_vm0, %v13073_v20  ;;  %v14420_v15 = vld [vmem:[#allocation22_spill] sm:$0xff] }
 0x239   : > { %v9149_v20 = vld [vmem:[%s11942_s14 + $0x329] sm:$0xff] }
 0x23b   : > { %10434 = vmatmul.mubr.msk.f32.gmra.mrb[8].mxu0 %vm130_vm0, %v13056_v17  ;;  %10992 = vmatmul.mubr.msk.f32.gmra.mrb[8].mxu1 %vm130_vm0, %v13079_v24  ;;  %v14422_v17 = vld [vmem:[#allocation26_spill] sm:$0xff]  ;;  %v14425_v24 = vld [vmem:[#allocation93_spill] sm:$0xff] }
 0x23c   : > { %10436 = vmatprep.mubr.msk.f32.mxu0 %vm130_vm0, %v13062_v19  ;;  %10994 = vmatprep.mubr.msk.f32.mxu1 %vm130_vm0, %v13093_v34  ;;  %v9148_v19 = vld [vmem:[%s11942_s14 + $0x321] sm:$0xff] }
 0x23d   : > { %v8538_v34 = vld [vmem:[%s11942_s14 + $0x42] sm:$0xff] }
 0x23f   : > { %10437 = vmatmul.mubr.msk.f32.gmra.mrb[10].mxu0 %vm130_vm0, %v13076_v22  ;;  %10995 = vmatmul.mubr.msk.f32.gmra.mrb[10].mxu1 %vm130_vm0, %v13099_v41  ;;  %v14424_v22 = vld [vmem:[#allocation91_spill] sm:$0xff] }
 0x240   : > { %10439 = vmatprep.mubr.msk.f32.mxu0 %vm130_vm0, %v13082_v28  ;;  %10997 = vmatprep.mubr.msk.f32.mxu1 %vm130_vm0, %v13113_v35  ;;  %v9150_v28 = vld [vmem:[%s11942_s14 + $0x331] sm:$0xff] }
 0x241   : > { %v14426_v41 = vld [vmem:[#allocation95_spill] sm:$0xff]  ;;  %v9188_v35 = vld [vmem:[%s11942_s14 + $0x6a] sm:$0xff] }
 0x243   : > { %10440 = vmatmul.mubr.msk.f32.gmra.mrb[12].mxu0 %vm130_vm0, %v13096_v30  ;;  %10998 = vmatmul.mubr.msk.f32.gmra.mrb[12].mxu1 %vm130_vm0, %v13119_v31  ;;  %v9187_v30 = vld [vmem:[%s11942_s14 + $0x62] sm:$0xff]  ;;  %v9189_v31 = vld [vmem:[%s11942_s14 + $0x72] sm:$0xff] }
 0x244   : > { %10442 = vmatprep.mubr.msk.f32.mxu0 %vm130_vm0, %v13102_v21  ;;  %11000 = vmatprep.mubr.msk.f32.mxu1 %vm130_vm0, %v13133_v37  ;;  %v8539_v21 = vld [vmem:[%s11942_s14 + $0x4a] sm:$0xff]  ;;  %v9190_v37 = vld [vmem:[%s11942_s14 + $0xa2] sm:$0xff] }
 0x247   : > { %10443 = vmatmul.mubr.msk.f32.gmra.mrb[14].mxu0 %vm130_vm0, %v13116_v27  ;;  %11001 = vmatmul.mubr.msk.f32.gmra.mrb[14].mxu1 %vm130_vm0, %v13139_v39  ;;  %v8540_v27 = vld [vmem:[%s11942_s14 + $0x52] sm:$0xff]  ;;  %v9191_v39 = vld [vmem:[%s11942_s14 + $0xaa] sm:$0xff] }
 0x248   : > { %10445 = vmatprep.mubr.msk.f32.mxu0 %vm130_vm0, %v13122_v33  ;;  %11003 = vmatprep.mubr.msk.f32.mxu1 %vm130_vm0, %v13153_v25  ;;  %v8541_v33 = vld [vmem:[%s11942_s14 + $0x82] sm:$0xff]  ;;  %v9192_v25 = vld [vmem:[%s11942_s14 + $0xb2] sm:$0xff] }
 0x24b   : > { %10446 = vmatmul.mubr.msk.f32.gmra.mrb[16].mxu0 %vm130_vm0, %v13136_v38  ;;  %11004 = vmatmul.mubr.msk.f32.gmra.mrb[16].mxu1 %vm130_vm0, %v13159_v43  ;;  %v8542_v38 = vld [vmem:[%s11942_s14 + $0x8a] sm:$0xff]  ;;  %v9193_v43 = vld [vmem:[%s11942_s14 + $0xe2] sm:$0xff] }
 0x24c   : > { %10448 = vmatprep.mubr.msk.f32.mxu0 %vm130_vm0, %v13142_v40  ;;  %11006 = vmatprep.mubr.msk.f32.mxu1 %vm130_vm0, %v13173_v45  ;;  %v8543_v40 = vld [vmem:[%s11942_s14 + $0x92] sm:$0xff]  ;;  %v9194_v45 = vld [vmem:[%s11942_s14 + $0xea] sm:$0xff] }
 0x24f   : > { %10449 = vmatmul.mubr.msk.f32.gmra.mrb[18].mxu0 %vm130_vm0, %v13156_v42  ;;  %11007 = vmatmul.mubr.msk.f32.gmra.mrb[18].mxu1 %vm130_vm0, %v13179_v47  ;;  %v8544_v42 = vld [vmem:[%s11942_s14 + $0xc2] sm:$0xff]  ;;  %v9195_v47 = vld [vmem:[%s11942_s14 + $0xf2] sm:$0xff] }
 0x250   : > { %10451 = vmatprep.mubr.msk.f32.mxu0 %vm130_vm0, %v13162_v44  ;;  %11009 = vmatprep.mubr.msk.f32.mxu1 %vm130_vm0, %v13193_v51  ;;  %v8545_v44 = vld [vmem:[%s11942_s14 + $0xca] sm:$0xff]  ;;  %v9196_v51 = vld [vmem:[%s11942_s14 + $0x122] sm:$0xff] }
 0x253   : > { %10452 = vmatmul.mubr.msk.f32.gmra.mrb[20].mxu0 %vm130_vm0, %v13176_v46  ;;  %11010 = vmatmul.mubr.msk.f32.gmra.mrb[20].mxu1 %vm130_vm0, %v13199_v54  ;;  %v8546_v46 = vld [vmem:[%s11942_s14 + $0xd2] sm:$0xff]  ;;  %v8548_v54 = vld [vmem:[%s11942_s14 + $0x10a] sm:$0xff] }
 0x254   : > { %10454 = vmatprep.mubr.msk.f32.mxu0 %vm130_vm0, %v13182_v48  ;;  %11012 = vmatprep.mubr.msk.f32.mxu1 %vm130_vm0, %v13213_v57  ;;  %v8547_v48 = vld [vmem:[%s11942_s14 + $0x102] sm:$0xff]  ;;  %v9197_v57 = vld [vmem:[%s11942_s14 + $0x12a] sm:$0xff] }
 0x257   : > { %10455 = vmatmul.mubr.msk.f32.gmra.mrb[22].mxu0 %vm130_vm0, %v14404_v50  ;;  %11013 = vmatmul.mubr.msk.f32.gmra.mrb[22].mxu1 %vm130_vm0, %v14405_v53  ;;  %v8556_v50 = vld [vmem:[%s11942_s14 + $0x1c2] sm:$0xff] }
 0x258   : > { %10457 = vmatprep.mubr.msk.f32.mxu0 %vm130_vm0, %v14406_v55  ;;  %11015 = vmatprep.mubr.msk.f32.mxu1 %vm130_vm0, %v14407_v60  ;;  %v9205_v53 = vld [vmem:[%s11942_s14 + $0x1e2] sm:$0xff]  ;;  %v8557_v55 = vld [vmem:[%s11942_s14 + $0x1ca] sm:$0xff] }
 0x259   : > { %v9206_v60 = vld [vmem:[%s11942_s14 + $0x1ea] sm:$0xff] }
 0x25b   : > { %10458 = vmatmul.mubr.msk.f32.gmra.mrb[24].mxu0 %vm130_vm0, %v14408_v62  ;;  %11016 = vmatmul.mubr.msk.f32.gmra.mrb[24].mxu1 %vm130_vm0, %v14409_v3  ;;  %v8558_v62 = vld [vmem:[%s11942_s14 + $0x1d2] sm:$0xff] }
 0x25c   : > { %10460 = vmatprep.mubr.msk.f32.mxu0 %vm130_vm0, %v14410_v4  ;;  %11018 = vmatprep.mubr.msk.f32.mxu1 %vm130_vm0, %v14411_v5  ;;  %v9207_v3 = vld [vmem:[%s11942_s14 + $0x1f2] sm:$0xff]  ;;  %v8559_v4 = vld [vmem:[%s11942_s14 + $0x202] sm:$0xff] }
 0x25d   : > { %v9208_v5 = vld [vmem:[%s11942_s14 + $0x222] sm:$0xff] }
 0x25f   : > { %10461 = vmatmul.mubr.msk.f32.gmra.mrb[26].mxu0 %vm130_vm0, %v14412_v6  ;;  %11019 = vmatmul.mubr.msk.f32.gmra.mrb[26].mxu1 %vm130_vm0, %v14413_v8  ;;  %v8560_v6 = vld [vmem:[%s11942_s14 + $0x20a] sm:$0xff] }
 0x260   : > { %10463 = vmatprep.mubr.msk.f32.mxu0 %vm130_vm0, %v14414_v9  ;;  %11021 = vmatprep.mubr.msk.f32.mxu1 %vm130_vm0, %v14415_v10  ;;  %v9209_v8 = vld [vmem:[%s11942_s14 + $0x22a] sm:$0xff]  ;;  %v8561_v9 = vld [vmem:[%s11942_s14 + $0x212] sm:$0xff] }
 0x261   : > { %v9210_v10 = vld [vmem:[%s11942_s14 + $0x232] sm:$0xff] }
 0x263   : > { %10464 = vmatmul.mubr.msk.f32.gmra.mrb[28].mxu0 %vm130_vm0, %v14416_v11  ;;  %11022 = vmatmul.mubr.msk.f32.gmra.mrb[28].mxu1 %vm130_vm0, %v14417_v12  ;;  %v8562_v11 = vld [vmem:[%s11942_s14 + $0x242] sm:$0xff] }
 0x264   : > { %10466 = vmatprep.mubr.msk.f32.mxu0 %vm130_vm0, %v14418_v13  ;;  %11024 = vmatprep.mubr.msk.f32.mxu1 %vm130_vm0, %v14419_v14  ;;  %v9211_v12 = vld [vmem:[%s11942_s14 + $0x262] sm:$0xff]  ;;  %v8563_v13 = vld [vmem:[%s11942_s14 + $0x24a] sm:$0xff] }
 0x265   : > { %v9212_v14 = vld [vmem:[%s11942_s14 + $0x26a] sm:$0xff] }
 0x267   : > { %10467 = vmatmul.mubr.msk.f32.gmra.mrb[30].mxu0 %vm130_vm0, %v14420_v15  ;;  %11025 = vmatmul.mubr.msk.f32.gmra.mrb[30].mxu1 %vm130_vm0, %v14421_v16  ;;  %v8564_v15 = vld [vmem:[%s11942_s14 + $0x252] sm:$0xff] }
 0x268   : > { %10469 = vmatprep.mubr.msk.f32.mxu0 %vm130_vm0, %v14422_v17  ;;  %11027 = vmatprep.mubr.msk.f32.mxu1 %vm130_vm0, %v14423_v18  ;;  %v9213_v16 = vld [vmem:[%s11942_s14 + $0x272] sm:$0xff]  ;;  %v8565_v17 = vld [vmem:[%s11942_s14 + $0x282] sm:$0xff] }
 0x269   : > { %v9214_v18 = vld [vmem:[%s11942_s14 + $0x2a2] sm:$0xff] }
 0x26b   : > { %10470 = vmatmul.mubr.msk.f32.gmra.mrb[32].mxu0 %vm130_vm0, %v14424_v22  ;;  %11028 = vmatmul.mubr.msk.f32.gmra.mrb[32].mxu1 %vm130_vm0, %v9148_v19  ;;  %v8566_v19 = vld [vmem:[%s11942_s14 + $0x28a] sm:$0xff]  ;;  %v8567_v22 = vld [vmem:[%s11942_s14 + $0x292] sm:$0xff] }
 0x26c   : > { %10472 = vmatprep.mubr.msk.f32.mxu0 %vm130_vm0, %v14425_v24  ;;  %11030 = vmatprep.mubr.msk.f32.mxu1 %vm130_vm0, %v9149_v20  ;;  %v9215_v20 = vld [vmem:[%s11942_s14 + $0x2aa] sm:$0xff]  ;;  %v9216_v24 = vld [vmem:[%s11942_s14 + $0x2b2] sm:$0xff] }
 0x26f   : > { %10473 = vmatmul.mubr.msk.f32.gmra.mrb[34].mxu0 %vm130_vm0, %v14426_v41  ;;  %11031 = vmatmul.mubr.msk.f32.gmra.mrb[34].mxu1 %vm130_vm0, %v9150_v28  ;;  %v8568_v28 = vld [vmem:[%s11942_s14 + $0x2c2] sm:$0xff]  ;;  %v9218_v41 = vld [vmem:[%s11942_s14 + $0x2ea] sm:$0xff] }
 0x270   : > { %10483 = vmatprep.mubr.msk.f32.mxu0 %vm130_vm0, %v8538_v34  ;;  %11041 = vmatprep.mubr.msk.f32.mxu1 %vm130_vm0, %v9187_v30  ;;  %v9217_v34 = vld [vmem:[%s11942_s14 + $0x2e2] sm:$0xff]  ;;  %v8569_v30 = vld [vmem:[%s11942_s14 + $0x2ca] sm:$0xff] }
 0x273   : > { %10484 = vmatmul.mubr.msk.f32.vlgmr.msra.gmra.mrb[0].mxu0 %vm130_vm0, %v8539_v21  ;;  %11042 = vmatmul.mubr.msk.f32.vlgmr.msra.gmra.mrb[0].mxu1 %vm130_vm0, %v9188_v35  ;;  %v8570_v21 = vld [vmem:[%s11942_s14 + $0x2d2] sm:$0xff] }
 0x274   : > { %10486 = vmatprep.mubr.msk.f32.mxu0 %vm130_vm0, %v8540_v27  ;;  %11044 = vmatprep.mubr.msk.f32.mxu1 %vm130_vm0, %v9189_v31  ;;  %v9219_v35 = vld [vmem:[%s11942_s14 + $0x2f2] sm:$0xff]  ;;  %v9220_v27 = vld [vmem:[%s11942_s14 + $0x322] sm:$0xff]  ;;  %v9221_v31 = vld [vmem:[%s11942_s14 + $0x32a] sm:$0xff] }
 0x277   : > { %10487 = vmatmul.mubr.msk.f32.gmra.mrb[2].mxu0 %vm130_vm0, %v8541_v33  ;;  %11045 = vmatmul.mubr.msk.f32.gmra.mrb[2].mxu1 %vm130_vm0, %v9190_v37  ;;  %v9222_v33 = vld [vmem:[%s11942_s14 + $0x332] sm:$0xff] }
 0x278   : > { %10489 = vmatprep.mubr.msk.f32.mxu0 %vm130_vm0, %v8542_v38  ;;  %11047 = vmatprep.mubr.msk.f32.mxu1 %vm130_vm0, %v9191_v39  ;;  %v14427_v37 = vld [vmem:[#allocation27_spill] sm:$0xff] }
 0x27b   : > { %10490 = vmatmul.mubr.msk.f32.gmra.mrb[4].mxu0 %vm130_vm0, %v8543_v40  ;;  %11048 = vmatmul.mubr.msk.f32.gmra.mrb[4].mxu1 %vm130_vm0, %v9192_v25  ;;  %v14428_v40 = vld [vmem:[#allocation9_spill] sm:$0xff] }
 0x27c   : > { %10492 = vmatprep.mubr.msk.f32.mxu0 %vm130_vm0, %v8544_v42  ;;  %11050 = vmatprep.mubr.msk.f32.mxu1 %vm130_vm0, %v9193_v43 }
 0x27f   : > { %10493 = vmatmul.mubr.msk.f32.gmra.mrb[6].mxu0 %vm130_vm0, %v8545_v44  ;;  %11051 = vmatmul.mubr.msk.f32.gmra.mrb[6].mxu1 %vm130_vm0, %v9194_v45 }
 0x280   : > { %10495 = vmatprep.mubr.msk.f32.mxu0 %vm130_vm0, %v8546_v46  ;;  %11053 = vmatprep.mubr.msk.f32.mxu1 %vm130_vm0, %v9195_v47 }
 0x283   : > { %10496 = vmatmul.mubr.msk.f32.gmra.mrb[8].mxu0 %vm130_vm0, %v8547_v48  ;;  %11054 = vmatmul.mubr.msk.f32.gmra.mrb[8].mxu1 %vm130_vm0, %v9196_v51 }
 0x284   : > { %10498 = vmatprep.mubr.msk.f32.mxu0 %vm130_vm0, %v8548_v54  ;;  %11056 = vmatprep.mubr.msk.f32.mxu1 %vm130_vm0, %v9197_v57 }
 0x287   : > { %10499 = vmatmul.mubr.msk.f32.gmra.mrb[10].mxu0 %vm130_vm0, %v8549_v58  ;;  %11057 = vmatmul.mubr.msk.f32.gmra.mrb[10].mxu1 %vm130_vm0, %v9198_v32 }
 0x288   : > { %10501 = vmatprep.mubr.msk.f32.mxu0 %vm130_vm0, %v8550_v0  ;;  %11059 = vmatprep.mubr.msk.f32.mxu1 %vm130_vm0, %v9199_v36 }
 0x28b   : > { %10502 = vmatmul.mubr.msk.f32.gmra.mrb[12].mxu0 %vm130_vm0, %v8551_v59  ;;  %11060 = vmatmul.mubr.msk.f32.gmra.mrb[12].mxu1 %vm130_vm0, %v9200_v26 }
 0x28c   : > { %10504 = vmatprep.mubr.msk.f32.mxu0 %vm130_vm0, %v8552_v7  ;;  %11062 = vmatprep.mubr.msk.f32.mxu1 %vm130_vm0, %v9201_v29 }
 0x28f   : > { %10505 = vmatmul.mubr.msk.f32.gmra.mrb[14].mxu0 %vm130_vm0, %v8553_v23  ;;  %11063 = vmatmul.mubr.msk.f32.gmra.mrb[14].mxu1 %vm130_vm0, %v9202_v61 }
 0x290   : > { %10507 = vmatprep.mubr.msk.f32.mxu0 %vm130_vm0, %v8554_v63  ;;  %11065 = vmatprep.mubr.msk.f32.mxu1 %vm130_vm0, %v9203_v1 }
 0x293   : > { %10508 = vmatmul.mubr.msk.f32.gmra.mrb[16].mxu0 %vm130_vm0, %v8555_v2  ;;  %11066 = vmatmul.mubr.msk.f32.gmra.mrb[16].mxu1 %vm130_vm0, %v9204_v49 }
 0x294   : > { %10510 = vmatprep.mubr.msk.f32.mxu0 %vm130_vm0, %v8556_v50  ;;  %11068 = vmatprep.mubr.msk.f32.mxu1 %vm130_vm0, %v9205_v53 }
 0x297   : > { %10511 = vmatmul.mubr.msk.f32.gmra.mrb[18].mxu0 %vm130_vm0, %v8557_v55  ;;  %11069 = vmatmul.mubr.msk.f32.gmra.mrb[18].mxu1 %vm130_vm0, %v9206_v60 }
 0x298   : > { %10513 = vmatprep.mubr.msk.f32.mxu0 %vm130_vm0, %v8558_v62  ;;  %11071 = vmatprep.mubr.msk.f32.mxu1 %vm130_vm0, %v9207_v3 }
 0x29b   : > { %10514 = vmatmul.mubr.msk.f32.gmra.mrb[20].mxu0 %vm130_vm0, %v8559_v4  ;;  %11072 = vmatmul.mubr.msk.f32.gmra.mrb[20].mxu1 %vm130_vm0, %v9208_v5 }
 0x29c   : > { %10516 = vmatprep.mubr.msk.f32.mxu0 %vm130_vm0, %v8560_v6  ;;  %11074 = vmatprep.mubr.msk.f32.mxu1 %vm130_vm0, %v9209_v8 }
 0x29f   : > { %10517 = vmatmul.mubr.msk.f32.gmra.mrb[22].mxu0 %vm130_vm0, %v8561_v9  ;;  %11075 = vmatmul.mubr.msk.f32.gmra.mrb[22].mxu1 %vm130_vm0, %v9210_v10 }
 0x2a0   : > { %10519 = vmatprep.mubr.msk.f32.mxu0 %vm130_vm0, %v8562_v11  ;;  %11077 = vmatprep.mubr.msk.f32.mxu1 %vm130_vm0, %v9211_v12 }
 0x2a3   : > { %10520 = vmatmul.mubr.msk.f32.gmra.mrb[24].mxu0 %vm130_vm0, %v8563_v13  ;;  %11078 = vmatmul.mubr.msk.f32.gmra.mrb[24].mxu1 %vm130_vm0, %v9212_v14 }
 0x2a4   : > { %10522 = vmatprep.mubr.msk.f32.mxu0 %vm130_vm0, %v8564_v15  ;;  %11080 = vmatprep.mubr.msk.f32.mxu1 %vm130_vm0, %v9213_v16 }
 0x2a7   : > { %10523 = vmatmul.mubr.msk.f32.gmra.mrb[26].mxu0 %vm130_vm0, %v8565_v17  ;;  %11081 = vmatmul.mubr.msk.f32.gmra.mrb[26].mxu1 %vm130_vm0, %v9214_v18 }
 0x2a8   : > { %10525 = vmatprep.mubr.msk.f32.mxu0 %vm130_vm0, %v8566_v19  ;;  %11083 = vmatprep.mubr.msk.f32.mxu1 %vm130_vm0, %v9215_v20 }
 0x2ab   : > { %10526 = vmatmul.mubr.msk.f32.gmra.mrb[28].mxu0 %vm130_vm0, %v8567_v22  ;;  %11084 = vmatmul.mubr.msk.f32.gmra.mrb[28].mxu1 %vm130_vm0, %v9216_v24 }
 0x2ac   : > { %10528 = vmatprep.mubr.msk.f32.mxu0 %vm130_vm0, %v8568_v28  ;;  %11086 = vmatprep.mubr.msk.f32.mxu1 %vm130_vm0, %v9217_v34 }
 0x2af   : > { %10529 = vmatmul.mubr.msk.f32.gmra.mrb[30].mxu0 %vm130_vm0, %v8569_v30  ;;  %11087 = vmatmul.mubr.msk.f32.gmra.mrb[30].mxu1 %vm130_vm0, %v9218_v41 }
 0x2b0   : > { %10531 = vmatprep.mubr.msk.f32.mxu0 %vm130_vm0, %v8570_v21  ;;  %11089 = vmatprep.mubr.msk.f32.mxu1 %vm130_vm0, %v9219_v35 }
 0x2b3   : > { %10532 = vmatmul.mubr.msk.f32.gmra.mrb[32].mxu0 %vm130_vm0, %v13461_v52  ;;  %11090 = vmatmul.mubr.msk.f32.gmra.mrb[32].mxu1 %vm130_vm0, %v9220_v27 }
 0x2b4   : > { %10534 = vmatprep.mubr.msk.f32.mxu0 %vm130_vm0, %v13464_v56  ;;  %11092 = vmatprep.mubr.msk.f32.mxu1 %vm130_vm0, %v9221_v31 }
 0x2b7   : > { %10535 = vmatmul.mubr.msk.f32.gmra.mrb[34].mxu0 %vm130_vm0, %v14427_v37  ;;  %11093 = vmatmul.mubr.msk.f32.gmra.mrb[34].mxu1 %vm130_vm0, %v9222_v33 }
 0x346   : > { %v10485_v38 = vpop.f32.mrb[0].mxu0  ;;  %v11043_v39 = vpop.f32.mrb[0].mxu1 }
 0x347   : > { %v3858_v25 = vadd.f32 %v10485_v38, %v14428_v40  ;;  %v3636_v42 = vpop.f32.mrb[1].mxu0  ;;  %v7578_v43 = vpop.f32.mrb[1].mxu1  ;;  %v7794_v57 = vadd.f32 %v11043_v39, %v14428_v40 }
 0x348   : > { %v3857_v52 = vadd.f32 %v14428_v40, %v3636_v42  ;;  %v7793_v32 = vadd.f32 %v14428_v40, %v7578_v43 }
 0x349   : > { %v3894_v44 = vmax.f32 %v3858_v25, 0.0  ;;  %v7830_v61 = vmax.f32 %v7794_v57, 0.0 }
 0x34a   : > { %v3893_v45 = vmax.f32 %v3857_v52, 0.0  ;;  %v10488_v56 = vpop.f32.mrb[2].mxu0  ;;  %v11046_v46 = vpop.f32.mrb[2].mxu1  ;;  %v7829_v49 = vmax.f32 %v7793_v32, 0.0 }
 0x34b   : > { %3931 = vst.msk [vmem:[#allocation2 + $0x8] sm:$0xff] %vm3929_vm1, %v3894_v44  ;;  %v3860_v47 = vadd.f32 %v10488_v56, %v14428_v40  ;;  %v3646_v48 = vpop.f32.mrb[3].mxu0  ;;  %v7588_v51 = vpop.f32.mrb[3].mxu1  ;;  %v7796_v63 = vadd.f32 %v11046_v46, %v14428_v40 }
 0x34c   : > { %3930 = vst.msk [vmem:[#allocation2] sm:$0xff] %vm3929_vm1, %v3893_v45  ;;  %v3859_v54 = vadd.f32 %v14428_v40, %v3646_v48  ;;  %v7795_v50 = vadd.f32 %v14428_v40, %v7588_v51 }
 0x34d   : > { %v3896_v58 = vmax.f32 %v3860_v47, 0.0  ;;  %v7832_v10 = vmax.f32 %v7796_v63, 0.0 }
 0x34e   : > { %v3895_v0 = vmax.f32 %v3859_v54, 0.0  ;;  %v10491_v36 = vpop.f32.mrb[4].mxu0  ;;  %v11049_v59 = vpop.f32.mrb[4].mxu1  ;;  %v7831_v14 = vmax.f32 %v7795_v50, 0.0 }
 0x34f   : > { %3933 = vst.msk [vmem:[#allocation2 + $0x18] sm:$0xff] %vm3929_vm1, %v3896_v58  ;;  %v3862_v26 = vadd.f32 %v10491_v36, %v14428_v40  ;;  %v3656_v7 = vpop.f32.mrb[5].mxu0  ;;  %v7598_v29 = vpop.f32.mrb[5].mxu1  ;;  %v7798_v11 = vadd.f32 %v11049_v59, %v14428_v40 }
 0x350   : > { %3932 = vst.msk [vmem:[#allocation2 + $0x10] sm:$0xff] %vm3929_vm1, %v3895_v0  ;;  %v3861_v23 = vadd.f32 %v14428_v40, %v3656_v7  ;;  %v7797_v15 = vadd.f32 %v14428_v40, %v7598_v29 }
 0x351   : > { %v3898_v1 = vmax.f32 %v3862_v26, 0.0  ;;  %v7834_v41 = vmax.f32 %v7798_v11, 0.0 }
 0x352   : > { %v3967_v2 = vld [vmem:[#allocation2 + $0x8] sm:$0xff]  ;;  %v3897_v53 = vmax.f32 %v3861_v23, 0.0  ;;  %v10494_v55 = vpop.f32.mrb[6].mxu0  ;;  %v11052_v60 = vpop.f32.mrb[6].mxu1  ;;  %v7833_v31 = vmax.f32 %v7797_v15, 0.0 }
 0x353   : > { %v7866_v62 = vmax.f32 %v3967_v2, %v7830_v61  ;;  %v3966_v3 = vld [vmem:[#allocation2] sm:$0xff]  ;;  %3935 = vst.msk [vmem:[#allocation2 + $0x28] sm:$0xff] %vm3929_vm1, %v3898_v1  ;;  %v3864_v4 = vadd.f32 %v10494_v55, %v14428_v40  ;;  %v3666_v5 = vpop.f32.mrb[7].mxu0  ;;  %v7608_v6 = vpop.f32.mrb[7].mxu1  ;;  %v7800_v21 = vadd.f32 %v11052_v60, %v14428_v40 }
 0x354   : > { %v7865_v8 = vmax.f32 %v3966_v3, %v7829_v49  ;;  %3934 = vst.msk [vmem:[#allocation2 + $0x20] sm:$0xff] %vm3929_vm1, %v3897_v53  ;;  %v3863_v9 = vadd.f32 %v14428_v40, %v3666_v5  ;;  %v7799_v33 = vadd.f32 %v14428_v40, %v7608_v6 }
 0x355   : > { %7902 = vst.msk [vmem:[#allocation2 + $0x8] sm:$0xff] %vm3929_vm1, %v7866_v62  ;;  %v3900_v12 = vmax.f32 %v3864_v4, 0.0  ;;  %v7836_v48 = vmax.f32 %v7800_v21, 0.0 }
 0x356   : > { %7901 = vst.msk [vmem:[#allocation2] sm:$0xff] %vm3929_vm1, %v7865_v8  ;;  %v3969_v13 = vld [vmem:[#allocation2 + $0x18] sm:$0xff]  ;;  %v3899_v16 = vmax.f32 %v3863_v9, 0.0  ;;  %v10497_v17 = vpop.f32.mrb[8].mxu0  ;;  %v11055_v18 = vpop.f32.mrb[8].mxu1  ;;  %v7835_v32 = vmax.f32 %v7799_v33, 0.0 }
 0x357   : > { %v7868_v19 = vmax.f32 %v3969_v13, %v7832_v10  ;;  %v3968_v20 = vld [vmem:[#allocation2 + $0x10] sm:$0xff]  ;;  %3937 = vst.msk [vmem:[#allocation2 + $0x38] sm:$0xff] %vm3929_vm1, %v3900_v12  ;;  %v3866_v22 = vadd.f32 %v10497_v17, %v14428_v40  ;;  %v3676_v24 = vpop.f32.mrb[9].mxu0  ;;  %v7618_v28 = vpop.f32.mrb[9].mxu1  ;;  %v7802_v51 = vadd.f32 %v11055_v18, %v14428_v40 }
 0x358   : > { %v7867_v34 = vmax.f32 %v3968_v20, %v7831_v14  ;;  %3936 = vst.msk [vmem:[#allocation2 + $0x30] sm:$0xff] %vm3929_vm1, %v3899_v16  ;;  %v3865_v30 = vadd.f32 %v14428_v40, %v3676_v24  ;;  %v7801_v0 = vadd.f32 %v14428_v40, %v7618_v28 }
 0x359   : > { %7904 = vst.msk [vmem:[#allocation2 + $0x18] sm:$0xff] %vm3929_vm1, %v7868_v19  ;;  %v3902_v35 = vmax.f32 %v3866_v22, 0.0  ;;  %v7838_v53 = vmax.f32 %v7802_v51, 0.0 }
 0x35a   : > { %7903 = vst.msk [vmem:[#allocation2 + $0x10] sm:$0xff] %vm3929_vm1, %v7867_v34  ;;  %v3971_v27 = vld [vmem:[#allocation2 + $0x28] sm:$0xff]  ;;  %v3901_v37 = vmax.f32 %v3865_v30, 0.0  ;;  %v10500_v38 = vpop.f32.mrb[10].mxu0  ;;  %v11058_v39 = vpop.f32.mrb[10].mxu1  ;;  %v7837_v4 = vmax.f32 %v7801_v0, 0.0 }
 0x35b   : > { %v7870_v25 = vmax.f32 %v3971_v27, %v7834_v41  ;;  %v3970_v42 = vld [vmem:[#allocation2 + $0x20] sm:$0xff]  ;;  %3939 = vst.msk [vmem:[#allocation2 + $0x48] sm:$0xff] %vm3929_vm1, %v3902_v35  ;;  %v3868_v43 = vadd.f32 %v10500_v38, %v14428_v40  ;;  %v3686_v52 = vpop.f32.mrb[11].mxu0  ;;  %v7628_v44 = vpop.f32.mrb[11].mxu1  ;;  %v7804_v55 = vadd.f32 %v11058_v39, %v14428_v40 }
 0x35c   : > { %v7869_v45 = vmax.f32 %v3970_v42, %v7833_v31  ;;  %3938 = vst.msk [vmem:[#allocation2 + $0x40] sm:$0xff] %vm3929_vm1, %v3901_v37  ;;  %v3867_v56 = vadd.f32 %v14428_v40, %v3686_v52  ;;  %v7803_v5 = vadd.f32 %v14428_v40, %v7628_v44 }
 0x35d   : > { %v7937_v46 = vld [vmem:[#allocation2] ss:$2 sm:$0xff]  ;;  %v7973_v47 = vld [vmem:[#allocation2 + $0x1] ss:$2 sm:$0xff]  ;;  %7906 = vst.msk [vmem:[#allocation2 + $0x28] sm:$0xff] %vm3929_vm1, %v7870_v25  ;;  %v3904_v54 = vmax.f32 %v3868_v43, 0.0 }
 0x35e   : > { %v8008_v57 = vmax.f32 %v7937_v46, %v7973_v47  ;;  %7905 = vst.msk [vmem:[#allocation2 + $0x20] sm:$0xff] %vm3929_vm1, %v7869_v45  ;;  %v3973_v58 = vld [vmem:[#allocation2 + $0x38] sm:$0xff]  ;;  %v3903_v36 = vmax.f32 %v3867_v56, 0.0  ;;  %v10503_v59 = vpop.f32.mrb[12].mxu0  ;;  %v11061_v26 = vpop.f32.mrb[12].mxu1  ;;  %v7840_v19 = vmax.f32 %v7804_v55, 0.0 }
 0x35f   : > { %v7872_v7 = vmax.f32 %v3973_v58, %v7836_v48  ;;  %v3972_v29 = vld [vmem:[#allocation2 + $0x30] sm:$0xff]  ;;  %3941 = vst.msk [vmem:[#allocation2 + $0x58] sm:$0xff] %vm3929_vm1, %v3904_v54  ;;  %v3870_v23 = vadd.f32 %v10503_v59, %v14428_v40  ;;  %v3696_v61 = vpop.f32.mrb[13].mxu0  ;;  %v7638_v63 = vpop.f32.mrb[13].mxu1  ;;  %v7806_v20 = vadd.f32 %v11061_v26, %v14428_v40  ;;  %v7839_v34 = vmax.f32 %v7803_v5, 0.0 }
 0x360   : > { %8028 = vst.msk [vmem:[%s13959_s18] sm:$0xff] %vm3929_vm1, %v8008_v57  ;;  %v7871_v1 = vmax.f32 %v3972_v29, %v7835_v32  ;;  %3940 = vst.msk [vmem:[#allocation2 + $0x50] sm:$0xff] %vm3929_vm1, %v3903_v36  ;;  %v3869_v2 = vadd.f32 %v14428_v40, %v3696_v61  ;;  %v7805_v30 = vadd.f32 %v14428_v40, %v7638_v63 }
 0x361   : > { %v7939_v49 = vld [vmem:[#allocation2 + $0x10] ss:$2 sm:$0xff]  ;;  %v7975_v50 = vld [vmem:[#allocation2 + $0x11] ss:$2 sm:$0xff]  ;;  %7908 = vst.msk [vmem:[#allocation2 + $0x38] sm:$0xff] %vm3929_vm1, %v7872_v7  ;;  %v3906_v60 = vmax.f32 %v3870_v23, 0.0 }
 0x362   : > { %v8009_v62 = vmax.f32 %v7939_v49, %v7975_v50  ;;  %7907 = vst.msk [vmem:[#allocation2 + $0x30] sm:$0xff] %vm3929_vm1, %v7871_v1  ;;  %v3975_v3 = vld [vmem:[#allocation2 + $0x48] sm:$0xff]  ;;  %v3905_v6 = vmax.f32 %v3869_v2, 0.0  ;;  %v10506_v8 = vpop.f32.mrb[14].mxu0  ;;  %v11064_v9 = vpop.f32.mrb[14].mxu1  ;;  %v7842_v52 = vmax.f32 %v7806_v20, 0.0 }
 0x363   : > { %v7874_v10 = vmax.f32 %v3975_v3, %v7838_v53  ;;  %v3974_v11 = vld [vmem:[#allocation2 + $0x40] sm:$0xff]  ;;  %3943 = vst.msk [vmem:[#allocation2 + $0x68] sm:$0xff] %vm3929_vm1, %v3906_v60  ;;  %v3872_v12 = vadd.f32 %v10506_v8, %v14428_v40  ;;  %v3706_v13 = vpop.f32.mrb[15].mxu0  ;;  %v7648_v14 = vpop.f32.mrb[15].mxu1  ;;  %v7808_v44 = vadd.f32 %v11064_v9, %v14428_v40  ;;  %v7841_v47 = vmax.f32 %v7805_v30, 0.0 }
 0x364   : > { %8029 = vst.msk [vmem:[%s13959_s18 + $0x8] sm:$0xff] %vm3929_vm1, %v8009_v62  ;;  %v7873_v15 = vmax.f32 %v3974_v11, %v7837_v4  ;;  %3942 = vst.msk [vmem:[#allocation2 + $0x60] sm:$0xff] %vm3929_vm1, %v3905_v6  ;;  %v3871_v16 = vadd.f32 %v14428_v40, %v3706_v13  ;;  %v7807_v48 = vadd.f32 %v14428_v40, %v7648_v14 }
 0x365   : > { %v7941_v17 = vld [vmem:[#allocation2 + $0x20] ss:$2 sm:$0xff]  ;;  %v7977_v18 = vld [vmem:[#allocation2 + $0x21] ss:$2 sm:$0xff]  ;;  %7910 = vst.msk [vmem:[#allocation2 + $0x48] sm:$0xff] %vm3929_vm1, %v7874_v10  ;;  %v3908_v22 = vmax.f32 %v3872_v12, 0.0 }
 0x366   : > { %v8010_v24 = vmax.f32 %v7941_v17, %v7977_v18  ;;  %7909 = vst.msk [vmem:[#allocation2 + $0x40] sm:$0xff] %vm3929_vm1, %v7873_v15  ;;  %v3977_v28 = vld [vmem:[#allocation2 + $0x58] sm:$0xff]  ;;  %v3907_v41 = vmax.f32 %v3871_v16, 0.0  ;;  %v10509_v21 = vpop.f32.mrb[16].mxu0  ;;  %v11067_v35 = vpop.f32.mrb[16].mxu1  ;;  %v7844_v61 = vmax.f32 %v7808_v44, 0.0 }
 0x367   : > { %v7876_v27 = vmax.f32 %v3977_v28, %v7840_v19  ;;  %v3976_v31 = vld [vmem:[#allocation2 + $0x50] sm:$0xff]  ;;  %3945 = vst.msk [vmem:[#allocation2 + $0x78] sm:$0xff] %vm3929_vm1, %v3908_v22  ;;  %v3874_v33 = vadd.f32 %v10509_v21, %v14428_v40  ;;  %v3716_v37 = vpop.f32.mrb[17].mxu0  ;;  %v7658_v38 = vpop.f32.mrb[17].mxu1  ;;  %v7810_v63 = vadd.f32 %v11067_v35, %v14428_v40  ;;  %v7843_v50 = vmax.f32 %v7807_v48, 0.0 }
 0x368   : > { %8030 = vst.msk [vmem:[%s13959_s18 + $0x10] sm:$0xff] %vm3929_vm1, %v8010_v24  ;;  %v7875_v39 = vmax.f32 %v3976_v31, %v7839_v34  ;;  %3944 = vst.msk [vmem:[#allocation2 + $0x70] sm:$0xff] %vm3929_vm1, %v3907_v41  ;;  %v3873_v25 = vadd.f32 %v14428_v40, %v3716_v37  ;;  %v7809_v53 = vadd.f32 %v14428_v40, %v7658_v38 }
 0x369   : > { %v7943_v42 = vld [vmem:[#allocation2 + $0x30] ss:$2 sm:$0xff]  ;;  %v7979_v43 = vld [vmem:[#allocation2 + $0x31] ss:$2 sm:$0xff]  ;;  %7912 = vst.msk [vmem:[#allocation2 + $0x58] sm:$0xff] %vm3929_vm1, %v7876_v27  ;;  %v3910_v45 = vmax.f32 %v3874_v33, 0.0 }
 0x36a   : > { %v8011_v56 = vmax.f32 %v7943_v42, %v7979_v43  ;;  %7911 = vst.msk [vmem:[#allocation2 + $0x50] sm:$0xff] %vm3929_vm1, %v7875_v39  ;;  %v3979_v46 = vld [vmem:[#allocation2 + $0x68] sm:$0xff]  ;;  %v3909_v51 = vmax.f32 %v3873_v25, 0.0  ;;  %v10512_v54 = vpop.f32.mrb[18].mxu0  ;;  %v11070_v57 = vpop.f32.mrb[18].mxu1  ;;  %v7846_v13 = vmax.f32 %v7810_v63, 0.0 }
 0x36b   : > { %v7878_v58 = vmax.f32 %v3979_v46, %v7842_v52  ;;  %v3978_v32 = vld [vmem:[#allocation2 + $0x60] sm:$0xff]  ;;  %3947 = vst.msk [vmem:[#allocation2 + $0x88] sm:$0xff] %vm3929_vm1, %v3910_v45  ;;  %v3876_v0 = vadd.f32 %v10512_v54, %v14428_v40  ;;  %v3726_v36 = vpop.f32.mrb[19].mxu0  ;;  %v7668_v59 = vpop.f32.mrb[19].mxu1  ;;  %v7812_v14 = vadd.f32 %v11070_v57, %v14428_v40  ;;  %v7845_v18 = vmax.f32 %v7809_v53, 0.0 }
 0x36c   : > { %8031 = vst.msk [vmem:[%s13959_s18 + $0x18] sm:$0xff] %vm3929_vm1, %v8011_v56  ;;  %v7877_v26 = vmax.f32 %v3978_v32, %v7841_v47  ;;  %3946 = vst.msk [vmem:[#allocation2 + $0x80] sm:$0xff] %vm3929_vm1, %v3909_v51  ;;  %v3875_v7 = vadd.f32 %v14428_v40, %v3726_v36  ;;  %v7811_v19 = vadd.f32 %v14428_v40, %v7668_v59 }
 0x36d   : > { %v7945_v29 = vld [vmem:[#allocation2 + $0x40] ss:$2 sm:$0xff]  ;;  %v7981_v23 = vld [vmem:[#allocation2 + $0x41] ss:$2 sm:$0xff]  ;;  %7914 = vst.msk [vmem:[#allocation2 + $0x68] sm:$0xff] %vm3929_vm1, %v7878_v58  ;;  %v3912_v1 = vmax.f32 %v3876_v0, 0.0 }
 0x36e   : > { %v8012_v2 = vmax.f32 %v7945_v29, %v7981_v23  ;;  %7913 = vst.msk [vmem:[#allocation2 + $0x60] sm:$0xff] %vm3929_vm1, %v7877_v26  ;;  %v3981_v49 = vld [vmem:[#allocation2 + $0x78] sm:$0xff]  ;;  %v3911_v55 = vmax.f32 %v3875_v7, 0.0  ;;  %v10515_v60 = vpop.f32.mrb[20].mxu0  ;;  %v11073_v62 = vpop.f32.mrb[20].mxu1  ;;  %v7848_v37 = vmax.f32 %v7812_v14, 0.0 }
 0x36f   : > { %v7880_v3 = vmax.f32 %v3981_v49, %v7844_v61  ;;  %v3980_v4 = vld [vmem:[#allocation2 + $0x70] sm:$0xff]  ;;  %3949 = vst.msk [vmem:[#allocation2 + $0x98] sm:$0xff] %vm3929_vm1, %v3912_v1  ;;  %v3878_v5 = vadd.f32 %v10515_v60, %v14428_v40  ;;  %v3736_v6 = vpop.f32.mrb[21].mxu0  ;;  %v7678_v8 = vpop.f32.mrb[21].mxu1  ;;  %v7814_v38 = vadd.f32 %v11073_v62, %v14428_v40  ;;  %v7847_v43 = vmax.f32 %v7811_v19, 0.0 }
 0x370   : > { %8032 = vst.msk [vmem:[%s13959_s18 + $0x20] sm:$0xff] %vm3929_vm1, %v8012_v2  ;;  %v7879_v9 = vmax.f32 %v3980_v4, %v7843_v50  ;;  %3948 = vst.msk [vmem:[#allocation2 + $0x90] sm:$0xff] %vm3929_vm1, %v3911_v55  ;;  %v3877_v10 = vadd.f32 %v14428_v40, %v3736_v6  ;;  %v7813_v52 = vadd.f32 %v14428_v40, %v7678_v8 }
 0x371   : > { %v7947_v11 = vld [vmem:[#allocation2 + $0x50] ss:$2 sm:$0xff]  ;;  %v7983_v12 = vld [vmem:[#allocation2 + $0x51] ss:$2 sm:$0xff]  ;;  %7916 = vst.msk [vmem:[#allocation2 + $0x78] sm:$0xff] %vm3929_vm1, %v7880_v3  ;;  %v3914_v15 = vmax.f32 %v3878_v5, 0.0 }
 0x372   : > { %v8013_v16 = vmax.f32 %v7947_v11, %v7983_v12  ;;  %7915 = vst.msk [vmem:[#allocation2 + $0x70] sm:$0xff] %vm3929_vm1, %v7879_v9  ;;  %v3983_v17 = vld [vmem:[#allocation2 + $0x88] sm:$0xff]  ;;  %v3913_v20 = vmax.f32 %v3877_v10, 0.0  ;;  %v10518_v22 = vpop.f32.mrb[22].mxu0  ;;  %v11076_v24 = vpop.f32.mrb[22].mxu1  ;;  %v7850_v36 = vmax.f32 %v7814_v38, 0.0 }
 0x373   : > { %v7882_v28 = vmax.f32 %v3983_v17, %v7846_v13  ;;  %v3982_v34 = vld [vmem:[#allocation2 + $0x80] sm:$0xff]  ;;  %3951 = vst.msk [vmem:[#allocation2 + $0xa8] sm:$0xff] %vm3929_vm1, %v3914_v15  ;;  %v3880_v30 = vadd.f32 %v10518_v22, %v14428_v40  ;;  %v3746_v41 = vpop.f32.mrb[23].mxu0  ;;  %v7688_v21 = vpop.f32.mrb[23].mxu1  ;;  %v7816_v59 = vadd.f32 %v11076_v24, %v14428_v40  ;;  %v7849_v23 = vmax.f32 %v7813_v52, 0.0 }
 0x374   : > { %8033 = vst.msk [vmem:[%s13959_s18 + $0x28] sm:$0xff] %vm3929_vm1, %v8013_v16  ;;  %v7881_v35 = vmax.f32 %v3982_v34, %v7845_v18  ;;  %3950 = vst.msk [vmem:[#allocation2 + $0xa0] sm:$0xff] %vm3929_vm1, %v3913_v20  ;;  %v3879_v27 = vadd.f32 %v14428_v40, %v3746_v41  ;;  %v7815_v61 = vadd.f32 %v14428_v40, %v7688_v21 }
 0x375   : > { %v7949_v31 = vld [vmem:[#allocation2 + $0x60] ss:$2 sm:$0xff]  ;;  %v7985_v33 = vld [vmem:[#allocation2 + $0x61] ss:$2 sm:$0xff]  ;;  %7918 = vst.msk [vmem:[#allocation2 + $0x88] sm:$0xff] %vm3929_vm1, %v7882_v28  ;;  %v3916_v39 = vmax.f32 %v3880_v30, 0.0 }
 0x376   : > { %v8014_v25 = vmax.f32 %v7949_v31, %v7985_v33  ;;  %7917 = vst.msk [vmem:[#allocation2 + $0x80] sm:$0xff] %vm3929_vm1, %v7881_v35  ;;  %v3985_v42 = vld [vmem:[#allocation2 + $0x98] sm:$0xff]  ;;  %v3915_v44 = vmax.f32 %v3879_v27, 0.0  ;;  %v10521_v45 = vpop.f32.mrb[24].mxu0  ;;  %v11079_v56 = vpop.f32.mrb[24].mxu1  ;;  %v7852_v6 = vmax.f32 %v7816_v59, 0.0 }
 0x377   : > { %v7884_v46 = vmax.f32 %v3985_v42, %v7848_v37  ;;  %v3984_v47 = vld [vmem:[#allocation2 + $0x90] sm:$0xff]  ;;  %3953 = vst.msk [vmem:[#allocation2 + $0xb8] sm:$0xff] %vm3929_vm1, %v3916_v39  ;;  %v3882_v48 = vadd.f32 %v10521_v45, %v14428_v40  ;;  %v3756_v51 = vpop.f32.mrb[25].mxu0  ;;  %v7698_v54 = vpop.f32.mrb[25].mxu1  ;;  %v7818_v8 = vadd.f32 %v11079_v56, %v14428_v40  ;;  %v7851_v12 = vmax.f32 %v7815_v61, 0.0 }
 0x378   : > { %8034 = vst.msk [vmem:[%s13959_s18 + $0x30] sm:$0xff] %vm3929_vm1, %v8014_v25  ;;  %v7883_v57 = vmax.f32 %v3984_v47, %v7847_v43  ;;  %3952 = vst.msk [vmem:[#allocation2 + $0xb0] sm:$0xff] %vm3929_vm1, %v3915_v44  ;;  %v3881_v58 = vadd.f32 %v14428_v40, %v3756_v51  ;;  %v7817_v13 = vadd.f32 %v14428_v40, %v7698_v54 }
 0x379   : > { %v7951_v32 = vld [vmem:[#allocation2 + $0x70] ss:$2 sm:$0xff]  ;;  %v7987_v0 = vld [vmem:[#allocation2 + $0x71] ss:$2 sm:$0xff]  ;;  %7920 = vst.msk [vmem:[#allocation2 + $0x98] sm:$0xff] %vm3929_vm1, %v7884_v46  ;;  %v3918_v26 = vmax.f32 %v3882_v48, 0.0 }
 0x37a   : > { %v8015_v7 = vmax.f32 %v7951_v32, %v7987_v0  ;;  %7919 = vst.msk [vmem:[#allocation2 + $0x90] sm:$0xff] %vm3929_vm1, %v7883_v57  ;;  %v3987_v29 = vld [vmem:[#allocation2 + $0xa8] sm:$0xff]  ;;  %v3917_v63 = vmax.f32 %v3881_v58, 0.0  ;;  %v10524_v1 = vpop.f32.mrb[26].mxu0  ;;  %v11082_v2 = vpop.f32.mrb[26].mxu1  ;;  %v7854_v41 = vmax.f32 %v7818_v8, 0.0 }
 0x37b   : > { %v7886_v49 = vmax.f32 %v3987_v29, %v7850_v36  ;;  %v3986_v50 = vld [vmem:[#allocation2 + $0xa0] sm:$0xff]  ;;  %3955 = vst.msk [vmem:[#allocation2 + $0xc8] sm:$0xff] %vm3929_vm1, %v3918_v26  ;;  %v3884_v53 = vadd.f32 %v10524_v1, %v14428_v40  ;;  %v3766_v55 = vpop.f32.mrb[27].mxu0  ;;  %v7708_v60 = vpop.f32.mrb[27].mxu1  ;;  %v7820_v21 = vadd.f32 %v11082_v2, %v14428_v40  ;;  %v7853_v33 = vmax.f32 %v7817_v13, 0.0 }
 0x37c   : > { %8035 = vst.msk [vmem:[%s13959_s18 + $0x38] sm:$0xff] %vm3929_vm1, %v8015_v7  ;;  %v7885_v62 = vmax.f32 %v3986_v50, %v7849_v23  ;;  %3954 = vst.msk [vmem:[#allocation2 + $0xc0] sm:$0xff] %vm3929_vm1, %v3917_v63  ;;  %v3883_v3 = vadd.f32 %v14428_v40, %v3766_v55  ;;  %v7819_v37 = vadd.f32 %v14428_v40, %v7708_v60 }
 0x37d   : > { %v7953_v4 = vld [vmem:[#allocation2 + $0x80] ss:$2 sm:$0xff]  ;;  %v7989_v5 = vld [vmem:[#allocation2 + $0x81] ss:$2 sm:$0xff]  ;;  %7922 = vst.msk [vmem:[#allocation2 + $0xa8] sm:$0xff] %vm3929_vm1, %v7886_v49  ;;  %v3920_v9 = vmax.f32 %v3884_v53, 0.0 }
 0x37e   : > { %v8016_v10 = vmax.f32 %v7953_v4, %v7989_v5  ;;  %7921 = vst.msk [vmem:[#allocation2 + $0xa0] sm:$0xff] %vm3929_vm1, %v7885_v62  ;;  %v3989_v11 = vld [vmem:[#allocation2 + $0xb8] sm:$0xff]  ;;  %v3919_v14 = vmax.f32 %v3883_v3, 0.0  ;;  %v10527_v15 = vpop.f32.mrb[28].mxu0  ;;  %v11085_v16 = vpop.f32.mrb[28].mxu1  ;;  %v7856_v51 = vmax.f32 %v7820_v21, 0.0 }
 0x37f   : > { %v7888_v17 = vmax.f32 %v3989_v11, %v7852_v6  ;;  %v3988_v18 = vld [vmem:[#allocation2 + $0xb0] sm:$0xff]  ;;  %3957 = vst.msk [vmem:[#allocation2 + $0xd8] sm:$0xff] %vm3929_vm1, %v3920_v9  ;;  %v3886_v19 = vadd.f32 %v10527_v15, %v14428_v40  ;;  %v3776_v20 = vpop.f32.mrb[29].mxu0  ;;  %v7718_v22 = vpop.f32.mrb[29].mxu1  ;;  %v7822_v54 = vadd.f32 %v11085_v16, %v14428_v40  ;;  %v7855_v0 = vmax.f32 %v7819_v37, 0.0 }
 0x380   : > { %8036 = vst.msk [vmem:[%s13959_s18 + $0x40] sm:$0xff] %vm3929_vm1, %v8016_v10  ;;  %v7887_v24 = vmax.f32 %v3988_v18, %v7851_v12  ;;  %3956 = vst.msk [vmem:[#allocation2 + $0xd0] sm:$0xff] %vm3929_vm1, %v3919_v14  ;;  %v3885_v28 = vadd.f32 %v14428_v40, %v3776_v20  ;;  %v7821_v36 = vadd.f32 %v14428_v40, %v7718_v22 }
 0x381   : > { %v7955_v34 = vld [vmem:[#allocation2 + $0x90] ss:$2 sm:$0xff]  ;;  %v7991_v30 = vld [vmem:[#allocation2 + $0x91] ss:$2 sm:$0xff]  ;;  %7924 = vst.msk [vmem:[#allocation2 + $0xb8] sm:$0xff] %vm3929_vm1, %v7888_v17  ;;  %v3922_v35 = vmax.f32 %v3886_v19, 0.0 }
 0x382   : > { %v8017_v27 = vmax.f32 %v7955_v34, %v7991_v30  ;;  %7923 = vst.msk [vmem:[#allocation2 + $0xb0] sm:$0xff] %vm3929_vm1, %v7887_v24  ;;  %v3991_v31 = vld [vmem:[#allocation2 + $0xc8] sm:$0xff]  ;;  %v3921_v38 = vmax.f32 %v3885_v28, 0.0  ;;  %v10530_v39 = vpop.f32.mrb[30].mxu0  ;;  %v11088_v25 = vpop.f32.mrb[30].mxu1  ;;  %v7858_v55 = vmax.f32 %v7822_v54, 0.0 }
 0x383   : > { %v7890_v42 = vmax.f32 %v3991_v31, %v7854_v41  ;;  %v3990_v43 = vld [vmem:[#allocation2 + $0xc0] sm:$0xff]  ;;  %3959 = vst.msk [vmem:[#allocation2 + $0xe8] sm:$0xff] %vm3929_vm1, %v3922_v35  ;;  %v3888_v52 = vadd.f32 %v10530_v39, %v14428_v40  ;;  %v3786_v44 = vpop.f32.mrb[31].mxu0  ;;  %v7728_v45 = vpop.f32.mrb[31].mxu1  ;;  %v7824_v60 = vadd.f32 %v11088_v25, %v14428_v40  ;;  %v7857_v5 = vmax.f32 %v7821_v36, 0.0 }
 0x384   : > { %8037 = vst.msk [vmem:[%s13959_s18 + $0x48] sm:$0xff] %vm3929_vm1, %v8017_v27  ;;  %v7889_v56 = vmax.f32 %v3990_v43, %v7853_v33  ;;  %3958 = vst.msk [vmem:[#allocation2 + $0xe0] sm:$0xff] %vm3929_vm1, %v3921_v38  ;;  %v3887_v46 = vadd.f32 %v14428_v40, %v3786_v44  ;;  %v7823_v6 = vadd.f32 %v14428_v40, %v7728_v45 }
 0x385   : > { %v7957_v47 = vld [vmem:[#allocation2 + $0xa0] ss:$2 sm:$0xff]  ;;  %v7993_v48 = vld [vmem:[#allocation2 + $0xa1] ss:$2 sm:$0xff]  ;;  %7926 = vst.msk [vmem:[#allocation2 + $0xc8] sm:$0xff] %vm3929_vm1, %v7890_v42  ;;  %v3924_v57 = vmax.f32 %v3888_v52, 0.0 }
 0x386   : > { %v8018_v58 = vmax.f32 %v7957_v47, %v7993_v48  ;;  %7925 = vst.msk [vmem:[#allocation2 + $0xc0] sm:$0xff] %vm3929_vm1, %v7889_v56  ;;  %v3993_v32 = vld [vmem:[#allocation2 + $0xd8] sm:$0xff]  ;;  %v3923_v59 = vmax.f32 %v3887_v46, 0.0  ;;  %v10533_v26 = vpop.f32.mrb[32].mxu0  ;;  %v11091_v7 = vpop.f32.mrb[32].mxu1  ;;  %v7860_v20 = vmax.f32 %v7824_v60, 0.0 }
 0x387   : > { %v7892_v29 = vmax.f32 %v3993_v32, %v7856_v51  ;;  %v3992_v23 = vld [vmem:[#allocation2 + $0xd0] sm:$0xff]  ;;  %3961 = vst.msk [vmem:[#allocation2 + $0xf8] sm:$0xff] %vm3929_vm1, %v3924_v57  ;;  %v3890_v61 = vadd.f32 %v10533_v26, %v14428_v40  ;;  %v3796_v63 = vpop.f32.mrb[33].mxu0  ;;  %v7738_v1 = vpop.f32.mrb[33].mxu1  ;;  %v7826_v22 = vadd.f32 %v11091_v7, %v14428_v40  ;;  %v7859_v30 = vmax.f32 %v7823_v6, 0.0 }
 0x388   : > { %8038 = vst.msk [vmem:[%s13959_s18 + $0x50] sm:$0xff] %vm3929_vm1, %v8018_v58  ;;  %v7891_v2 = vmax.f32 %v3992_v23, %v7855_v0  ;;  %3960 = vst.msk [vmem:[#allocation2 + $0xf0] sm:$0xff] %vm3929_vm1, %v3923_v59  ;;  %v3889_v49 = vadd.f32 %v14428_v40, %v3796_v63  ;;  %v7825_v41 = vadd.f32 %v14428_v40, %v7738_v1 }
 0x389   : > { %v7959_v50 = vld [vmem:[#allocation2 + $0xb0] ss:$2 sm:$0xff]  ;;  %v7995_v53 = vld [vmem:[#allocation2 + $0xb1] ss:$2 sm:$0xff]  ;;  %7928 = vst.msk [vmem:[#allocation2 + $0xd8] sm:$0xff] %vm3929_vm1, %v7892_v29  ;;  %v3926_v62 = vmax.f32 %v3890_v61, 0.0 }
 0x38a   : > { %v8019_v3 = vmax.f32 %v7959_v50, %v7995_v53  ;;  %7927 = vst.msk [vmem:[#allocation2 + $0xd0] sm:$0xff] %vm3929_vm1, %v7891_v2  ;;  %v3995_v4 = vld [vmem:[#allocation2 + $0xe8] sm:$0xff]  ;;  %v3925_v8 = vmax.f32 %v3889_v49, 0.0  ;;  %v10536_v9 = vpop.f32.mrb[34].mxu0  ;;  %v11094_v10 = vpop.f32.mrb[34].mxu1  ;;  %v7862_v38 = vmax.f32 %v7826_v22, 0.0 }
 0x38b   : > { %v7894_v11 = vmax.f32 %v3995_v4, %v7858_v55  ;;  %v3994_v12 = vld [vmem:[#allocation2 + $0xe0] sm:$0xff]  ;;  %3963 = vst.msk [vmem:[#allocation2 + $0x108] sm:$0xff] %vm3929_vm1, %v3926_v62  ;;  %v3892_v13 = vadd.f32 %v10536_v9, %v14428_v40  ;;  %v3806_v14 = vpop.f32.mrb[35].mxu0  ;;  %v7748_v15 = vpop.f32.mrb[35].mxu1  ;;  %v7828_v39 = vadd.f32 %v11094_v10, %v14428_v40  ;;  %v7861_v43 = vmax.f32 %v7825_v41, 0.0 }
 0x38c   : > { %8039 = vst.msk [vmem:[%s13959_s18 + $0x58] sm:$0xff] %vm3929_vm1, %v8019_v3  ;;  %v7893_v16 = vmax.f32 %v3994_v12, %v7857_v5  ;;  %3962 = vst.msk [vmem:[#allocation2 + $0x100] sm:$0xff] %vm3929_vm1, %v3925_v8  ;;  %v3891_v17 = vadd.f32 %v14428_v40, %v3806_v14  ;;  %v7827_v52 = vadd.f32 %v14428_v40, %v7748_v15 }
 0x38d   : > { %v7961_v18 = vld [vmem:[#allocation2 + $0xc0] ss:$2 sm:$0xff]  ;;  %v7997_v19 = vld [vmem:[#allocation2 + $0xc1] ss:$2 sm:$0xff]  ;;  %7930 = vst.msk [vmem:[#allocation2 + $0xe8] sm:$0xff] %vm3929_vm1, %v7894_v11  ;;  %v3928_v24 = vmax.f32 %v3892_v13, 0.0 }
 0x38e   : > { %v8020_v28 = vmax.f32 %v7961_v18, %v7997_v19  ;;  %7929 = vst.msk [vmem:[#allocation2 + $0xe0] sm:$0xff] %vm3929_vm1, %v7893_v16  ;;  %v3997_v34 = vld [vmem:[#allocation2 + $0xf8] sm:$0xff]  ;;  %v3927_v21 = vmax.f32 %v3891_v17, 0.0  ;;  %v7864_v48 = vmax.f32 %v7828_v39, 0.0  ;;  %v7863_v57 = vmax.f32 %v7827_v52, 0.0 }
 0x38f   : > { %v7896_v35 = vmax.f32 %v3997_v34, %v7860_v20  ;;  %v3996_v27 = vld [vmem:[#allocation2 + $0xf0] sm:$0xff]  ;;  %3965 = vst.msk [vmem:[#allocation2 + $0x118] sm:$0xff] %vm3929_vm1, %v3928_v24 }
 0x390   : > { %8040 = vst.msk [vmem:[%s13959_s18 + $0x60] sm:$0xff] %vm3929_vm1, %v8020_v28  ;;  %v7895_v31 = vmax.f32 %v3996_v27, %v7859_v30  ;;  %3964 = vst.msk [vmem:[#allocation2 + $0x110] sm:$0xff] %vm3929_vm1, %v3927_v21 }
 0x391   : > { %v7963_v33 = vld [vmem:[#allocation2 + $0xd0] ss:$2 sm:$0xff]  ;;  %v7999_v37 = vld [vmem:[#allocation2 + $0xd1] ss:$2 sm:$0xff]  ;;  %7932 = vst.msk [vmem:[#allocation2 + $0xf8] sm:$0xff] %vm3929_vm1, %v7896_v35 }
 0x392   : > { %v8021_v25 = vmax.f32 %v7963_v33, %v7999_v37  ;;  %7931 = vst.msk [vmem:[#allocation2 + $0xf0] sm:$0xff] %vm3929_vm1, %v7895_v31  ;;  %v3999_v42 = vld [vmem:[#allocation2 + $0x108] sm:$0xff] }
 0x393   : > { %v7898_v44 = vmax.f32 %v3999_v42, %v7862_v38  ;;  %v3998_v45 = vld [vmem:[#allocation2 + $0x100] sm:$0xff] }
 0x394   : > { %8041 = vst.msk [vmem:[%s13959_s18 + $0x68] sm:$0xff] %vm3929_vm1, %v8021_v25  ;;  %v7897_v56 = vmax.f32 %v3998_v45, %v7861_v43 }
 0x395   : > { %v7965_v46 = vld [vmem:[#allocation2 + $0xe0] ss:$2 sm:$0xff]  ;;  %v8001_v47 = vld [vmem:[#allocation2 + $0xe1] ss:$2 sm:$0xff]  ;;  %7934 = vst.msk [vmem:[#allocation2 + $0x108] sm:$0xff] %vm3929_vm1, %v7898_v44 }
 0x396   : > { %v8022_v51 = vmax.f32 %v7965_v46, %v8001_v47  ;;  %7933 = vst.msk [vmem:[#allocation2 + $0x100] sm:$0xff] %vm3929_vm1, %v7897_v56  ;;  %v4001_v54 = vld [vmem:[#allocation2 + $0x118] sm:$0xff] }
 0x397   : > { %v7900_v58 = vmax.f32 %v4001_v54, %v7864_v48  ;;  %v4000_v32 = vld [vmem:[#allocation2 + $0x110] sm:$0xff] }
 0x398   : > { %8042 = vst.msk [vmem:[%s13959_s18 + $0x70] sm:$0xff] %vm3929_vm1, %v8022_v51  ;;  %v7899_v0 = vmax.f32 %v4000_v32, %v7863_v57 }
 0x399   : > { %v7967_v36 = vld [vmem:[#allocation2 + $0xf0] ss:$2 sm:$0xff]  ;;  %v8003_v59 = vld [vmem:[#allocation2 + $0xf1] ss:$2 sm:$0xff]  ;;  %7936 = vst.msk [vmem:[#allocation2 + $0x118] sm:$0xff] %vm3929_vm1, %v7900_v58 }
 0x39a   : > { %v8023_v26 = vmax.f32 %v7967_v36, %v8003_v59  ;;  %7935 = vst.msk [vmem:[#allocation2 + $0x110] sm:$0xff] %vm3929_vm1, %v7899_v0 }
 0x39c   : > { %8043 = vst.msk [vmem:[%s13959_s18 + $0x78] sm:$0xff] %vm3929_vm1, %v8023_v26 }
 0x39d   : > { %v7969_v7 = vld [vmem:[#allocation2 + $0x100] ss:$2 sm:$0xff]  ;;  %v8005_v29 = vld [vmem:[#allocation2 + $0x101] ss:$2 sm:$0xff] }
 0x39e   : > { %v8024_v23 = vmax.f32 %v7969_v7, %v8005_v29  ;;  %45 = sbr.rel (!%p43_p2) target bundleno = 40 (0x28), region = 95 }
 0x3a0   : > { %8044 = vst.msk [vmem:[%s13959_s18 + $0x80] sm:$0xff] %vm3929_vm1, %v8024_v23 }
 0x3a1   : > { %v7971_v61 = vld [vmem:[#allocation2 + $0x110] ss:$2 sm:$0xff]  ;;  %v8007_v63 = vld [vmem:[#allocation2 + $0x111] ss:$2 sm:$0xff] }
 0x3a2   : > { %v8025_v1 = vmax.f32 %v7971_v61, %v8007_v63 }
 0x3a4   : > { %8045 = vst.msk [vmem:[%s13959_s18 + $0x88] sm:$0xff] %vm3929_vm1, %v8025_v1 }
 0x3a5   :  { %8050 = vsyncpa [#allocation4], 1 }
 0x3a6   :  { %8051 = vsyncpa [#allocation6], 1 }

// kernel: simple_cnn_forward.5
= control target key start
LH: loop header
LB: loop body
LE: loop exit
PB: predicated region body
PF: predicated region fallthrough
CT: control target
= control target key end

     0   :  { %v6761_v47 = vmov 1983009808   ;;  %v1220_v49 = vlaneseq  ;;  %s10610_s0 = inlined_call_operand.vmem [shape: f32[2,9216], index: 0, kind: input, shape index: {}]   ;;  %s10611_s1 = inlined_call_operand.vmem [shape: f32[9216,128], index: 1, kind: input, shape index: {}]   ;;  %s10612_s2 = inlined_call_operand.vmem [shape: f32[1,128], index: 2, kind: input, shape index: {}]   ;;  %s10613_s3 = inlined_call_operand.vmem [shape: f32[128,10], index: 3, kind: input, shape index: {}]   ;;  %s10614_s4 = inlined_call_operand.vmem [shape: f32[1,10], index: 4, kind: input, shape index: {}]   ;;  %s10615_s5 = inlined_call_operand.hbm [shape: f32[2,10], index: 5, kind: output, shape index: {}]  }
   0x1   :  { %v55_v0 = vld [vmem:[%s10611_s1 + $0x80] sm:$0xff]  ;;  %v56_v1 = vld [vmem:[%s10611_s1 + $0x88] sm:$0xff]  ;;  %v57_v11 = vld [vmem:[%s10611_s1 + $0x90] sm:$0xff]  ;;  %v1218_v48 = vunpack.c.l.s4 %v6761_v47 }
   0x2   :  { %v39_v2 = vld [vmem:[%s10611_s1] sm:$0xff]  ;;  %v5538_v3 = vpack.c.bf16 %v56_v1, %v55_v0  ;;  %v40_v4 = vld [vmem:[%s10611_s1 + $0x8] sm:$0xff]  ;;  %v58_v13 = vld [vmem:[%s10611_s1 + $0x98] sm:$0xff]  ;;  %v1221_v0 = vshrl.u32 %v1220_v49, 7 }
   0x3   :  { %v87_v5 = vld [vmem:[%s10611_s1 + $0x180] sm:$0xff]  ;;  %v88_v6 = vld [vmem:[%s10611_s1 + $0x188] sm:$0xff]  ;;  %v5540_v7 = vpack.c.bf16 %v40_v4, %v39_v2  ;;  %v41_v14 = vld [vmem:[%s10611_s1 + $0x10] sm:$0xff]  ;;  %v5542_v16 = vpack.c.bf16 %v58_v13, %v57_v11  ;;  %v1219_v63 = vunpack.c.0.s8 %v1218_v48 }
   0x4   :  { %v5570_v8 = vpack.c.bf16 %v88_v6, %v87_v5  ;;  %v71_v9 = vld [vmem:[%s10611_s1 + $0x100] sm:$0xff]  ;;  %v72_v10 = vld [vmem:[%s10611_s1 + $0x108] sm:$0xff]  ;;  %5539 = vmatprep.subr.bf16.mxu0 %v5538_v3  ;;  %v42_v15 = vld [vmem:[%s10611_s1 + $0x18] sm:$0xff] }
   0x5   :  { %v5572_v12 = vpack.c.bf16 %v72_v10, %v71_v9  ;;  %5541 = vmatpush3.bf16.msra.mxu0 %v5540_v7  ;;  %v5544_v17 = vpack.c.bf16 %v42_v15, %v41_v14  ;;  %v89_v18 = vld [vmem:[%s10611_s1 + $0x190] sm:$0xff]  ;;  %v90_v19 = vld [vmem:[%s10611_s1 + $0x198] sm:$0xff]  ;;  %v59_v23 = vld [vmem:[%s10611_s1 + $0xa0] sm:$0xff]  ;;  %v6946_v13 = vsub.s32 %v1219_v63, %v1221_v0 }
   0x6   :  { %5571 = vmatprep.subr.bf16.mxu1 %v5570_v8  ;;  %v73_v20 = vld [vmem:[%s10611_s1 + $0x110] sm:$0xff]  ;;  %v5574_v21 = vpack.c.bf16 %v90_v19, %v89_v18  ;;  %v74_v22 = vld [vmem:[%s10611_s1 + $0x118] sm:$0xff]  ;;  %v60_v24 = vld [vmem:[%s10611_s1 + $0xa8] sm:$0xff]  ;;  %5543 = vmatprep.subr.bf16.mxu0 %v5542_v16 }
   0x7   :  { %5573 = vmatpush3.bf16.msra.mxu1 %v5572_v12  ;;  %v5576_v25 = vpack.c.bf16 %v74_v22, %v73_v20  ;;  %v5546_v26 = vpack.c.bf16 %v60_v24, %v59_v23  ;;  %v43_v27 = vld [vmem:[%s10611_s1 + $0x20] sm:$0xff]  ;;  %v44_v28 = vld [vmem:[%s10611_s1 + $0x28] sm:$0xff]  ;;  %v61_v35 = vld [vmem:[%s10611_s1 + $0xb0] sm:$0xff] }
   0x8   :  { %v91_v29 = vld [vmem:[%s10611_s1 + $0x1a0] sm:$0xff]  ;;  %5575 = vmatprep.subr.bf16.mxu1 %v5574_v21  ;;  %v92_v30 = vld [vmem:[%s10611_s1 + $0x1a8] sm:$0xff]  ;;  %v5548_v33 = vpack.c.bf16 %v44_v28, %v43_v27  ;;  %v62_v36 = vld [vmem:[%s10611_s1 + $0xb8] sm:$0xff] }
   0x9   :  { %v75_v31 = vld [vmem:[%s10611_s1 + $0x120] sm:$0xff]  ;;  %v76_v32 = vld [vmem:[%s10611_s1 + $0x128] sm:$0xff]  ;;  %5545 = vmatpush3.bf16.msra.mxu0 %v5544_v17  ;;  %v5578_v34 = vpack.c.bf16 %v92_v30, %v91_v29  ;;  %v45_v37 = vld [vmem:[%s10611_s1 + $0x30] sm:$0xff]  ;;  %v5550_v39 = vpack.c.bf16 %v62_v36, %v61_v35 }
   0xa   :  { %5547 = vmatprep.subr.bf16.mxu0 %v5546_v26  ;;  %v5580_v38 = vpack.c.bf16 %v76_v32, %v75_v31  ;;  %v46_v40 = vld [vmem:[%s10611_s1 + $0x38] sm:$0xff]  ;;  %v93_v41 = vld [vmem:[%s10611_s1 + $0x1b0] sm:$0xff]  ;;  %v63_v46 = vld [vmem:[%s10611_s1 + $0xc0] sm:$0xff] }
   0xb   :  { %5577 = vmatpush3.bf16.msra.mxu1 %v5576_v25  ;;  %v94_v42 = vld [vmem:[%s10611_s1 + $0x1b8] sm:$0xff]  ;;  %v77_v44 = vld [vmem:[%s10611_s1 + $0x130] sm:$0xff]  ;;  %v64_v50 = vld [vmem:[%s10611_s1 + $0xc8] sm:$0xff]  ;;  %v5552_v51 = vpack.c.bf16 %v46_v40, %v45_v37 }
   0xc   :  { %5579 = vmatprep.subr.bf16.mxu1 %v5578_v34  ;;  %v5582_v43 = vpack.c.bf16 %v94_v42, %v93_v41  ;;  %v78_v45 = vld [vmem:[%s10611_s1 + $0x138] sm:$0xff]  ;;  %v95_v52 = vld [vmem:[%s10611_s1 + $0x1c0] sm:$0xff]  ;;  %v96_v53 = vld [vmem:[%s10611_s1 + $0x1c8] sm:$0xff]  ;;  %v5554_v55 = vpack.c.bf16 %v64_v50, %v63_v46 }
   0xd   :  { %5549 = vmatpush3.bf16.msra.mxu0 %v5548_v33  ;;  %v5584_v54 = vpack.c.bf16 %v78_v45, %v77_v44  ;;  %v47_v56 = vld [vmem:[%s10611_s1 + $0x40] sm:$0xff]  ;;  %v48_v57 = vld [vmem:[%s10611_s1 + $0x48] sm:$0xff]  ;;  %v5586_v59 = vpack.c.bf16 %v96_v53, %v95_v52  ;;  %v65_v61 = vld [vmem:[%s10611_s1 + $0xd0] sm:$0xff] }
   0xe   :  { %5551 = vmatprep.subr.bf16.mxu0 %v5550_v39  ;;  %v79_v58 = vld [vmem:[%s10611_s1 + $0x140] sm:$0xff]  ;;  %v80_v60 = vld [vmem:[%s10611_s1 + $0x148] sm:$0xff]  ;;  %v66_v62 = vld [vmem:[%s10611_s1 + $0xd8] sm:$0xff]  ;;  %v5556_v3 = vpack.c.bf16 %v48_v57, %v47_v56 }
   0xf   :  { %5581 = vmatpush3.bf16.msra.mxu1 %v5580_v38  ;;  %v97_v1 = vld [vmem:[%s10611_s1 + $0x1d0] sm:$0xff]  ;;  %v98_v2 = vld [vmem:[%s10611_s1 + $0x1d8] sm:$0xff]  ;;  %v5588_v4 = vpack.c.bf16 %v80_v60, %v79_v58  ;;  %v5558_v5 = vpack.c.bf16 %v66_v62, %v65_v61  ;;  %v67_v11 = vld [vmem:[%s10611_s1 + $0xe0] sm:$0xff] }
  0x10   :  { %5583 = vmatprep.subr.bf16.mxu1 %v5582_v43  ;;  %v49_v6 = vld [vmem:[%s10611_s1 + $0x50] sm:$0xff]  ;;  %v50_v7 = vld [vmem:[%s10611_s1 + $0x58] sm:$0xff]  ;;  %v5590_v9 = vpack.c.bf16 %v98_v2, %v97_v1  ;;  %v68_v12 = vld [vmem:[%s10611_s1 + $0xe8] sm:$0xff] }
  0x11   :  { %5553 = vmatpush3.bf16.msra.mxu0 %v5552_v51  ;;  %v81_v8 = vld [vmem:[%s10611_s1 + $0x150] sm:$0xff]  ;;  %v82_v10 = vld [vmem:[%s10611_s1 + $0x158] sm:$0xff]  ;;  %v99_v14 = vld [vmem:[%s10611_s1 + $0x1e0] sm:$0xff]  ;;  %v5560_v16 = vpack.c.bf16 %v50_v7, %v49_v6  ;;  %v5562_v19 = vpack.c.bf16 %v68_v12, %v67_v11 }
  0x12   :  { %5555 = vmatprep.subr.bf16.mxu0 %v5554_v55  ;;  %v100_v15 = vld [vmem:[%s10611_s1 + $0x1e8] sm:$0xff]  ;;  %v51_v17 = vld [vmem:[%s10611_s1 + $0x60] sm:$0xff]  ;;  %v5592_v18 = vpack.c.bf16 %v82_v10, %v81_v8  ;;  %v69_v25 = vld [vmem:[%s10611_s1 + $0xf0] sm:$0xff] }
  0x13   :  { %5585 = vmatpush3.bf16.msra.mxu1 %v5584_v54  ;;  %v52_v20 = vld [vmem:[%s10611_s1 + $0x68] sm:$0xff]  ;;  %v83_v21 = vld [vmem:[%s10611_s1 + $0x160] sm:$0xff]  ;;  %v5594_v23 = vpack.c.bf16 %v100_v15, %v99_v14  ;;  %v70_v26 = vld [vmem:[%s10611_s1 + $0xf8] sm:$0xff] }
  0x14   :  { %5587 = vmatprep.subr.bf16.mxu1 %v5586_v59  ;;  %v21_v22 = vld [vmem:[%s10610_s0] sm:$0xff]  ;;  %v84_v24 = vld [vmem:[%s10611_s1 + $0x168] sm:$0xff]  ;;  %v101_v29 = vld [vmem:[%s10611_s1 + $0x1f0] sm:$0xff]  ;;  %v5564_v31 = vpack.c.bf16 %v52_v20, %v51_v17  ;;  %v5566_v35 = vpack.c.bf16 %v70_v26, %v69_v25 }
  0x15   :  { %5557 = vmatpush3.bf16.msra.mxu0 %v5556_v3  ;;  %v1223_v27 = vrot.slane %v21_v22, %v6946_v13  ;;  %v1216_v28 = vcombine.high %v21_v22, %v21_v22  ;;  %v102_v30 = vld [vmem:[%s10611_s1 + $0x1f8] sm:$0xff]  ;;  %v5596_v34 = vpack.c.bf16 %v84_v24, %v83_v21  ;;  %v53_v36 = vld [vmem:[%s10611_s1 + $0x70] sm:$0xff]  ;;  %v119_v41 = vld [vmem:[%s10611_s1 + $0x280] sm:$0xff] }
  0x16   :  { %5559 = vmatprep.subr.bf16.mxu0 %v5558_v5  ;;  %v54_v37 = vld [vmem:[%s10611_s1 + $0x78] sm:$0xff]  ;;  %v85_v38 = vld [vmem:[%s10611_s1 + $0x170] sm:$0xff]  ;;  %v5598_v39 = vpack.c.bf16 %v102_v30, %v101_v29  ;;  %v120_v42 = vld [vmem:[%s10611_s1 + $0x288] sm:$0xff] }
  0x17   :  { %5589 = vmatpush3.bf16.msra.mxu1 %v5588_v4  ;;  %v1231_v32 = vcombine.high %v1223_v27, %v1223_v27  ;;  %v1230_v33 = vrot.slane %v1216_v28, %v6946_v13  ;;  %v86_v40 = vld [vmem:[%s10611_s1 + $0x178] sm:$0xff]  ;;  %v151_v44 = vld [vmem:[%s10611_s1 + $0x380] sm:$0xff]  ;;  %v152_v45 = vld [vmem:[%s10611_s1 + $0x388] sm:$0xff]  ;;  %v5568_v46 = vpack.c.bf16 %v54_v37, %v53_v36  ;;  %v5602_v48 = vpack.c.bf16 %v120_v42, %v119_v41 }
  0x18   :  { %5591 = vmatprep.subr.bf16.mxu1 %v5590_v9  ;;  %v5600_v47 = vpack.c.bf16 %v86_v40, %v85_v38  ;;  %v103_v49 = vld [vmem:[%s10611_s1 + $0x200] sm:$0xff]  ;;  %v104_v50 = vld [vmem:[%s10611_s1 + $0x208] sm:$0xff]  ;;  %v5634_v52 = vpack.c.bf16 %v152_v45, %v151_v44  ;;  %v121_v54 = vld [vmem:[%s10611_s1 + $0x290] sm:$0xff] }
  0x19   :  { %5561 = vmatpush3.bf16.msra.mxu0 %v5560_v16  ;;  %1658 = vmatprep.mubr.f32.mxu0 %v1231_v32  ;;  %v1232_v43 = vcombine.high %v1230_v33, %v1230_v33  ;;  %v135_v51 = vld [vmem:[%s10611_s1 + $0x300] sm:$0xff]  ;;  %v136_v53 = vld [vmem:[%s10611_s1 + $0x308] sm:$0xff]  ;;  %v122_v55 = vld [vmem:[%s10611_s1 + $0x298] sm:$0xff]  ;;  %v5604_v58 = vpack.c.bf16 %v104_v50, %v103_v49 }
  0x1a   :  { %5563 = vmatprep.subr.bf16.mxu0 %v5562_v19  ;;  %v153_v56 = vld [vmem:[%s10611_s1 + $0x390] sm:$0xff]  ;;  %v154_v57 = vld [vmem:[%s10611_s1 + $0x398] sm:$0xff]  ;;  %v5636_v59 = vpack.c.bf16 %v136_v53, %v135_v51  ;;  %v5606_v60 = vpack.c.bf16 %v122_v55, %v121_v54  ;;  %v123_v2 = vld [vmem:[%s10611_s1 + $0x2a0] sm:$0xff] }
  0x1b   :  { %5593 = vmatpush3.bf16.msra.mxu1 %v5592_v18  ;;  %1728 = vmatprep.mubr.f32.mxu1 %v1232_v43  ;;  %v105_v61 = vld [vmem:[%s10611_s1 + $0x210] sm:$0xff]  ;;  %v106_v62 = vld [vmem:[%s10611_s1 + $0x218] sm:$0xff]  ;;  %v5638_v0 = vpack.c.bf16 %v154_v57, %v153_v56  ;;  %v124_v3 = vld [vmem:[%s10611_s1 + $0x2a8] sm:$0xff] }
  0x1c   :  { %5595 = vmatprep.subr.bf16.mxu1 %v5594_v23  ;;  %v137_v63 = vld [vmem:[%s10611_s1 + $0x310] sm:$0xff]  ;;  %v138_v1 = vld [vmem:[%s10611_s1 + $0x318] sm:$0xff]  ;;  %v155_v4 = vld [vmem:[%s10611_s1 + $0x3a0] sm:$0xff]  ;;  %v5608_v6 = vpack.c.bf16 %v106_v62, %v105_v61  ;;  %v5610_v8 = vpack.c.bf16 %v124_v3, %v123_v2 }
  0x1d   :  { %5565 = vmatpush3.bf16.msra.mxu0 %v5564_v31  ;;  %v156_v5 = vld [vmem:[%s10611_s1 + $0x3a8] sm:$0xff]  ;;  %v5640_v7 = vpack.c.bf16 %v138_v1, %v137_v63  ;;  %v107_v9 = vld [vmem:[%s10611_s1 + $0x220] sm:$0xff]  ;;  %v125_v15 = vld [vmem:[%s10611_s1 + $0x2b0] sm:$0xff] }
  0x1e   :  { %5567 = vmatprep.subr.bf16.mxu0 %v5566_v35  ;;  %v108_v10 = vld [vmem:[%s10611_s1 + $0x228] sm:$0xff]  ;;  %v139_v11 = vld [vmem:[%s10611_s1 + $0x320] sm:$0xff]  ;;  %v5642_v12 = vpack.c.bf16 %v156_v5, %v155_v4  ;;  %v126_v16 = vld [vmem:[%s10611_s1 + $0x2b8] sm:$0xff] }
  0x1f   :  { %5597 = vmatpush3.bf16.msra.mxu1 %v5596_v34  ;;  %v140_v14 = vld [vmem:[%s10611_s1 + $0x328] sm:$0xff]  ;;  %v157_v17 = vld [vmem:[%s10611_s1 + $0x3b0] sm:$0xff]  ;;  %v158_v18 = vld [vmem:[%s10611_s1 + $0x3b8] sm:$0xff]  ;;  %v5612_v19 = vpack.c.bf16 %v108_v10, %v107_v9  ;;  %v5614_v21 = vpack.c.bf16 %v126_v16, %v125_v15 }
  0x20   :  { %5599 = vmatprep.subr.bf16.mxu1 %v5598_v39  ;;  %v5644_v20 = vpack.c.bf16 %v140_v14, %v139_v11  ;;  %v109_v22 = vld [vmem:[%s10611_s1 + $0x230] sm:$0xff]  ;;  %v110_v23 = vld [vmem:[%s10611_s1 + $0x238] sm:$0xff]  ;;  %v5646_v25 = vpack.c.bf16 %v158_v18, %v157_v17  ;;  %v128_v28 = vld [vmem:[%s10611_s1 + $0x2c8] sm:$0xff] }
  0x21   :  { %5569 = vmatpush3.bf16.msra.mxu0 %v5568_v46  ;;  %v141_v24 = vld [vmem:[%s10611_s1 + $0x330] sm:$0xff]  ;;  %v142_v26 = vld [vmem:[%s10611_s1 + $0x338] sm:$0xff]  ;;  %v159_v29 = vld [vmem:[%s10611_s1 + $0x3c0] sm:$0xff]  ;;  %v5616_v32 = vpack.c.bf16 %v110_v23, %v109_v22 }
  0x22   :  { %5603 = vmatprep.subr.bf16.mxu0 %v5602_v48  ;;  %v160_v30 = vld [vmem:[%s10611_s1 + $0x3c8] sm:$0xff]  ;;  %v5648_v35 = vpack.c.bf16 %v142_v26, %v141_v24  ;;  %v111_v37 = vld [vmem:[%s10611_s1 + $0x240] sm:$0xff]  ;;  %v129_v42 = vld [vmem:[%s10611_s1 + $0x2d0] sm:$0xff] }
  0x23   :  { %5601 = vmatpush3.bf16.msra.mxu1 %v5600_v47  ;;  %v22_v31 = vld [vmem:[%s10610_s0 + $0x8] sm:$0xff]  ;;  %v143_v39 = vld [vmem:[%s10611_s1 + $0x340] sm:$0xff]  ;;  %v5650_v40 = vpack.c.bf16 %v160_v30, %v159_v29  ;;  %v130_v43 = vld [vmem:[%s10611_s1 + $0x2d8] sm:$0xff] }
  0x24   :  { %5635 = vmatprep.subr.bf16.mxu1 %v5634_v52  ;;  %1659 = vmatmul.mubr.f32.vlgmr.msra.gmra.mrb[0].mxu0 %v1223_v27  ;;  %v127_v27 = vld [vmem:[%s10611_s1 + $0x2c0] sm:$0xff]  ;;  %v1233_v34 = vcombine.high %v22_v31, %v22_v31  ;;  %v112_v38 = vld [vmem:[%s10611_s1 + $0x248] sm:$0xff]  ;;  %v161_v46 = vld [vmem:[%s10611_s1 + $0x3d0] sm:$0xff]  ;;  %v5622_v51 = vpack.c.bf16 %v130_v43, %v129_v42 }
  0x25   :  { %5605 = vmatpush3.bf16.msra.mxu0 %v5604_v58  ;;  %v5618_v36 = vpack.c.bf16 %v128_v28, %v127_v27  ;;  %v144_v41 = vld [vmem:[%s10611_s1 + $0x348] sm:$0xff]  ;;  %v162_v47 = vld [vmem:[%s10611_s1 + $0x3d8] sm:$0xff]  ;;  %v5620_v48 = vpack.c.bf16 %v112_v38, %v111_v37  ;;  %v113_v52 = vld [vmem:[%s10611_s1 + $0x250] sm:$0xff] }
  0x26   :  { %1729 = vmatmul.mubr.f32.vlgmr.msra.gmra.mrb[0].mxu1 %v1230_v33  ;;  %5607 = vmatprep.subr.bf16.mxu0 %v5606_v60  ;;  %v7107_v33 = vrot.slane %v22_v31, %v6946_v13  ;;  %v7130_v45 = vrot.slane %v1233_v34, %v6946_v13  ;;  %v5652_v50 = vpack.c.bf16 %v144_v41, %v143_v39  ;;  %v114_v53 = vld [vmem:[%s10611_s1 + $0x258] sm:$0xff]  ;;  %v145_v54 = vld [vmem:[%s10611_s1 + $0x350] sm:$0xff]  ;;  %v131_v57 = vld [vmem:[%s10611_s1 + $0x2e0] sm:$0xff] }
  0x27   :  { %5637 = vmatpush3.bf16.msra.mxu1 %v5636_v59  ;;  %v5654_v55 = vpack.c.bf16 %v162_v47, %v161_v46  ;;  %v146_v56 = vld [vmem:[%s10611_s1 + $0x358] sm:$0xff]  ;;  %v132_v58 = vld [vmem:[%s10611_s1 + $0x2e8] sm:$0xff]  ;;  %v163_v59 = vld [vmem:[%s10611_s1 + $0x3e0] sm:$0xff]  ;;  %v5624_v61 = vpack.c.bf16 %v114_v53, %v113_v52 }
  0x28   :  { %5639 = vmatprep.subr.bf16.mxu1 %v5638_v0  ;;  %v1248_v44 = vcombine.high %v7107_v33, %v7107_v33  ;;  %v1249_v49 = vcombine.high %v7130_v45, %v7130_v45  ;;  %v164_v60 = vld [vmem:[%s10611_s1 + $0x3e8] sm:$0xff]  ;;  %v5656_v62 = vpack.c.bf16 %v146_v56, %v145_v54  ;;  %v5626_v63 = vpack.c.bf16 %v132_v58, %v131_v57  ;;  %v115_v0 = vld [vmem:[%s10611_s1 + $0x260] sm:$0xff]  ;;  %v133_v5 = vld [vmem:[%s10611_s1 + $0x2f0] sm:$0xff] }
  0x29   :  { %5609 = vmatpush3.bf16.msra.mxu0 %v5608_v6  ;;  %v116_v1 = vld [vmem:[%s10611_s1 + $0x268] sm:$0xff]  ;;  %v147_v2 = vld [vmem:[%s10611_s1 + $0x360] sm:$0xff]  ;;  %v5658_v3 = vpack.c.bf16 %v164_v60, %v163_v59  ;;  %v134_v6 = vld [vmem:[%s10611_s1 + $0x2f8] sm:$0xff] }
  0x2a   :  { %5611 = vmatprep.subr.bf16.mxu0 %v5610_v8  ;;  %1798 = vmatprep.mubr.f32.mxu0 %v1248_v44  ;;  %v148_v4 = vld [vmem:[%s10611_s1 + $0x368] sm:$0xff]  ;;  %v166_v8 = vld [vmem:[%s10611_s1 + $0x3f8] sm:$0xff]  ;;  %v5628_v9 = vpack.c.bf16 %v116_v1, %v115_v0  ;;  %v5630_v11 = vpack.c.bf16 %v134_v6, %v133_v5  ;;  %v149_v15 = vld [vmem:[%s10611_s1 + $0x370] sm:$0xff] }
  0x2b   :  { %5641 = vmatpush3.bf16.msra.mxu1 %v5640_v7  ;;  %1868 = vmatprep.mubr.f32.mxu1 %v1249_v49  ;;  %v165_v7 = vld [vmem:[%s10611_s1 + $0x3f0] sm:$0xff]  ;;  %v5660_v10 = vpack.c.bf16 %v148_v4, %v147_v2  ;;  %v118_v14 = vld [vmem:[%s10611_s1 + $0x278] sm:$0xff]  ;;  %v183_v18 = vld [vmem:[%s10611_s1 + $0x480] sm:$0xff] }
  0x2c   :  { %5643 = vmatprep.subr.bf16.mxu1 %v5642_v12  ;;  %v117_v12 = vld [vmem:[%s10611_s1 + $0x270] sm:$0xff]  ;;  %v5662_v16 = vpack.c.bf16 %v166_v8, %v165_v7  ;;  %v150_v17 = vld [vmem:[%s10611_s1 + $0x378] sm:$0xff]  ;;  %v167_v23 = vld [vmem:[%s10611_s1 + $0x400] sm:$0xff] }
  0x2d   :  { %5613 = vmatpush3.bf16.msra.mxu0 %v5612_v19  ;;  %v184_v19 = vld [vmem:[%s10611_s1 + $0x488] sm:$0xff]  ;;  %v5632_v22 = vpack.c.bf16 %v118_v14, %v117_v12  ;;  %v5664_v24 = vpack.c.bf16 %v150_v17, %v149_v15  ;;  %v199_v27 = vld [vmem:[%s10611_s1 + $0x500] sm:$0xff]  ;;  %v185_v30 = vld [vmem:[%s10611_s1 + $0x490] sm:$0xff] }
  0x2e   :  { %5615 = vmatprep.subr.bf16.mxu0 %v5614_v21  ;;  %v216_v21 = vld [vmem:[%s10611_s1 + $0x588] sm:$0xff]  ;;  %v186_v31 = vld [vmem:[%s10611_s1 + $0x498] sm:$0xff]  ;;  %v23_v37 = vld [vmem:[%s10610_s0 + $0x10] sm:$0xff] }
  0x2f   :  { %5645 = vmatpush3.bf16.msra.mxu1 %v5644_v20  ;;  %v215_v20 = vld [vmem:[%s10611_s1 + $0x580] sm:$0xff]  ;;  %v168_v26 = vld [vmem:[%s10611_s1 + $0x408] sm:$0xff]  ;;  %v218_v34 = vld [vmem:[%s10611_s1 + $0x598] sm:$0xff]  ;;  %v5670_v38 = vpack.c.bf16 %v186_v31, %v185_v30  ;;  %v7249_v42 = vrot.slane %v23_v37, %v6946_v13  ;;  %v1250_v43 = vcombine.high %v23_v37, %v23_v37 }
  0x30   :  { %5647 = vmatprep.subr.bf16.mxu1 %v5646_v25  ;;  %v5666_v25 = vpack.c.bf16 %v184_v19, %v183_v18  ;;  %v200_v28 = vld [vmem:[%s10611_s1 + $0x508] sm:$0xff]  ;;  %v5698_v29 = vpack.c.bf16 %v216_v21, %v215_v20  ;;  %v169_v39 = vld [vmem:[%s10611_s1 + $0x410] sm:$0xff]  ;;  %v202_v46 = vld [vmem:[%s10611_s1 + $0x518] sm:$0xff] }
  0x31   :  { %5617 = vmatpush3.bf16.msra.mxu0 %v5616_v32  ;;  %v217_v32 = vld [vmem:[%s10611_s1 + $0x590] sm:$0xff]  ;;  %v187_v47 = vld [vmem:[%s10611_s1 + $0x4a0] sm:$0xff]  ;;  %v7270_v52 = vrot.slane %v1250_v43, %v6946_v13  ;;  %v172_v56 = vld [vmem:[%s10611_s1 + $0x428] sm:$0xff] }
  0x32   :  { %5619 = vmatprep.subr.bf16.mxu0 %v5618_v36  ;;  %v5700_v36 = vpack.c.bf16 %v200_v28, %v199_v27  ;;  %v201_v41 = vld [vmem:[%s10611_s1 + $0x510] sm:$0xff]  ;;  %v5702_v44 = vpack.c.bf16 %v218_v34, %v217_v32  ;;  %v219_v49 = vld [vmem:[%s10611_s1 + $0x5a0] sm:$0xff]  ;;  %v204_v59 = vld [vmem:[%s10611_s1 + $0x528] sm:$0xff] }
  0x33   :  { %5649 = vmatpush3.bf16.msra.mxu1 %v5648_v35  ;;  %v5668_v35 = vpack.c.bf16 %v168_v26, %v167_v23  ;;  %v203_v57 = vld [vmem:[%s10611_s1 + $0x520] sm:$0xff]  ;;  %v189_v60 = vld [vmem:[%s10611_s1 + $0x4b0] sm:$0xff]  ;;  %v174_v4 = vld [vmem:[%s10611_s1 + $0x438] sm:$0xff] }
  0x34   :  { %5651 = vmatprep.subr.bf16.mxu1 %v5650_v40  ;;  %v170_v40 = vld [vmem:[%s10611_s1 + $0x418] sm:$0xff]  ;;  %v5708_v1 = vpack.c.bf16 %v204_v59, %v203_v57  ;;  %v205_v5 = vld [vmem:[%s10611_s1 + $0x530] sm:$0xff]  ;;  %v191_v8 = vld [vmem:[%s10611_s1 + $0x4c0] sm:$0xff] }
  0x35   :  { %5621 = vmatpush3.bf16.msra.mxu0 %v5620_v48  ;;  %v188_v48 = vld [vmem:[%s10611_s1 + $0x4a8] sm:$0xff]  ;;  %v5672_v53 = vpack.c.bf16 %v170_v40, %v169_v39  ;;  %v206_v7 = vld [vmem:[%s10611_s1 + $0x538] sm:$0xff]  ;;  %v207_v18 = vld [vmem:[%s10611_s1 + $0x540] sm:$0xff] }
  0x36   :  { %5623 = vmatprep.subr.bf16.mxu0 %v5622_v51  ;;  %v1265_v51 = vcombine.high %v7249_v42, %v7249_v42  ;;  %v5674_v54 = vpack.c.bf16 %v188_v48, %v187_v47  ;;  %v5712_v14 = vpack.c.bf16 %v206_v7, %v205_v5  ;;  %v176_v17 = vld [vmem:[%s10611_s1 + $0x448] sm:$0xff]  ;;  %v193_v21 = vld [vmem:[%s10611_s1 + $0x4d0] sm:$0xff]  ;;  %v210_v32 = vld [vmem:[%s10611_s1 + $0x558] sm:$0xff] }
  0x37   :  { %5653 = vmatpush3.bf16.msra.mxu1 %v5652_v50  ;;  %v220_v50 = vld [vmem:[%s10611_s1 + $0x5a8] sm:$0xff]  ;;  %v225_v23 = vld [vmem:[%s10611_s1 + $0x5d0] sm:$0xff]  ;;  %v195_v34 = vld [vmem:[%s10611_s1 + $0x4e0] sm:$0xff] }
  0x38   :  { %5655 = vmatprep.subr.bf16.mxu1 %v5654_v55  ;;  %v171_v55 = vld [vmem:[%s10611_s1 + $0x420] sm:$0xff]  ;;  %v5706_v58 = vpack.c.bf16 %v220_v50, %v219_v49  ;;  %v208_v20 = vld [vmem:[%s10611_s1 + $0x548] sm:$0xff]  ;;  %v177_v28 = vld [vmem:[%s10611_s1 + $0x450] sm:$0xff] }
  0x39   :  { %5625 = vmatpush3.bf16.msra.mxu0 %v5624_v61  ;;  %v190_v61 = vld [vmem:[%s10611_s1 + $0x4b8] sm:$0xff]  ;;  %v5676_v0 = vpack.c.bf16 %v172_v56, %v171_v55  ;;  %v5716_v26 = vpack.c.bf16 %v208_v20, %v207_v18  ;;  %v209_v30 = vld [vmem:[%s10611_s1 + $0x550] sm:$0xff]  ;;  %v228_v37 = vld [vmem:[%s10611_s1 + $0x5e8] sm:$0xff] }
  0x3a   :  { %5627 = vmatprep.subr.bf16.mxu0 %v5626_v63  ;;  %v222_v63 = vld [vmem:[%s10611_s1 + $0x5b8] sm:$0xff]  ;;  %v5678_v2 = vpack.c.bf16 %v190_v61, %v189_v60  ;;  %v5720_v39 = vpack.c.bf16 %v210_v32, %v209_v30  ;;  %v180_v43 = vld [vmem:[%s10611_s1 + $0x468] sm:$0xff]  ;;  %v197_v48 = vld [vmem:[%s10611_s1 + $0x4f0] sm:$0xff] }
  0x3b   :  { %5657 = vmatpush3.bf16.msra.mxu1 %v5656_v62  ;;  %v221_v62 = vld [vmem:[%s10611_s1 + $0x5b0] sm:$0xff]  ;;  %v212_v47 = vld [vmem:[%s10611_s1 + $0x568] sm:$0xff]  ;;  %v198_v49 = vld [vmem:[%s10611_s1 + $0x4f8] sm:$0xff] }
  0x3c   :  { %5659 = vmatprep.subr.bf16.mxu1 %v5658_v3  ;;  %v173_v3 = vld [vmem:[%s10611_s1 + $0x430] sm:$0xff]  ;;  %v5710_v6 = vpack.c.bf16 %v222_v63, %v221_v62  ;;  %v5694_v55 = vpack.c.bf16 %v198_v49, %v197_v48  ;;  %v182_v57 = vld [vmem:[%s10611_s1 + $0x478] sm:$0xff]  ;;  %v247_v60 = vld [vmem:[%s10611_s1 + $0x680] sm:$0xff] }
  0x3d   :  { %5629 = vmatpush3.bf16.msra.mxu0 %v5628_v9  ;;  %v192_v9 = vld [vmem:[%s10611_s1 + $0x4c8] sm:$0xff]  ;;  %v5680_v12 = vpack.c.bf16 %v174_v4, %v173_v3  ;;  %v229_v50 = vld [vmem:[%s10611_s1 + $0x5f0] sm:$0xff]  ;;  %v214_v59 = vld [vmem:[%s10611_s1 + $0x578] sm:$0xff] }
  0x3e   :  { %5631 = vmatprep.subr.bf16.mxu0 %v5630_v11  ;;  %v224_v11 = vld [vmem:[%s10611_s1 + $0x5c8] sm:$0xff]  ;;  %v5682_v15 = vpack.c.bf16 %v192_v9, %v191_v8  ;;  %v181_v56 = vld [vmem:[%s10611_s1 + $0x470] sm:$0xff]  ;;  %v279_v62 = vld [vmem:[%s10611_s1 + $0x780] sm:$0xff] }
  0x3f   :  { %5661 = vmatpush3.bf16.msra.mxu1 %v5660_v10  ;;  %v223_v10 = vld [vmem:[%s10611_s1 + $0x5c0] sm:$0xff]  ;;  %v248_v61 = vld [vmem:[%s10611_s1 + $0x688] sm:$0xff]  ;;  %v249_v9 = vld [vmem:[%s10611_s1 + $0x690] sm:$0xff] }
  0x40   :  { %5663 = vmatprep.subr.bf16.mxu1 %v5662_v16  ;;  %v175_v16 = vld [vmem:[%s10611_s1 + $0x440] sm:$0xff]  ;;  %v5714_v19 = vpack.c.bf16 %v224_v11, %v223_v10  ;;  %v280_v63 = vld [vmem:[%s10611_s1 + $0x788] sm:$0xff]  ;;  %v5730_v3 = vpack.c.bf16 %v248_v61, %v247_v60  ;;  %v250_v10 = vld [vmem:[%s10611_s1 + $0x698] sm:$0xff] }
  0x41   :  { %5633 = vmatpush3.bf16.msra.mxu0 %v5632_v22  ;;  %v194_v22 = vld [vmem:[%s10611_s1 + $0x4d8] sm:$0xff]  ;;  %v231_v4 = vld [vmem:[%s10611_s1 + $0x600] sm:$0xff]  ;;  %v232_v5 = vld [vmem:[%s10611_s1 + $0x608] sm:$0xff]  ;;  %v5762_v7 = vpack.c.bf16 %v280_v63, %v279_v62  ;;  %v5734_v18 = vpack.c.bf16 %v250_v10, %v249_v9 }
  0x42   :  { %5667 = vmatprep.subr.bf16.mxu0 %v5666_v25  ;;  %v5684_v25 = vpack.c.bf16 %v176_v17, %v175_v16  ;;  %v5686_v27 = vpack.c.bf16 %v194_v22, %v193_v21  ;;  %v264_v8 = vld [vmem:[%s10611_s1 + $0x708] sm:$0xff]  ;;  %v5732_v16 = vpack.c.bf16 %v232_v5, %v231_v4  ;;  %v234_v20 = vld [vmem:[%s10611_s1 + $0x618] sm:$0xff]  ;;  %v265_v21 = vld [vmem:[%s10611_s1 + $0x710] sm:$0xff] }
  0x43   :  { %5665 = vmatpush3.bf16.msra.mxu1 %v5664_v24  ;;  %v226_v24 = vld [vmem:[%s10611_s1 + $0x5d8] sm:$0xff]  ;;  %v269_v48 = vld [vmem:[%s10611_s1 + $0x730] sm:$0xff]  ;;  %v272_v61 = vld [vmem:[%s10611_s1 + $0x748] sm:$0xff] }
  0x44   :  { %5699 = vmatprep.subr.bf16.mxu1 %v5698_v29  ;;  %1799 = vmatmul.mubr.f32.vlgmr.msra.gmra.mrb[2].mxu0 %v7107_v33  ;;  %v5704_v33 = vpack.c.bf16 %v202_v46, %v201_v41  ;;  %v178_v29 = vld [vmem:[%s10611_s1 + $0x458] sm:$0xff]  ;;  %v5718_v31 = vpack.c.bf16 %v226_v24, %v225_v23  ;;  %v179_v41 = vld [vmem:[%s10611_s1 + $0x460] sm:$0xff]  ;;  %v257_v62 = vld [vmem:[%s10611_s1 + $0x6d0] sm:$0xff] }
  0x45   :  { %5669 = vmatpush3.bf16.msra.mxu0 %v5668_v35  ;;  %1938 = vmatprep.mubr.f32.mxu0 %v1265_v51  ;;  %v196_v35 = vld [vmem:[%s10611_s1 + $0x4e8] sm:$0xff]  ;;  %v230_v51 = vld [vmem:[%s10611_s1 + $0x5f8] sm:$0xff]  ;;  %v251_v24 = vld [vmem:[%s10611_s1 + $0x6a0] sm:$0xff] }
  0x46   :  { %1869 = vmatmul.mubr.f32.vlgmr.msra.gmra.mrb[2].mxu1 %v7130_v45  ;;  %5671 = vmatprep.subr.bf16.mxu0 %v5670_v38  ;;  %v1266_v45 = vcombine.high %v7270_v52, %v7270_v52  ;;  %v5688_v38 = vpack.c.bf16 %v178_v29, %v177_v28  ;;  %v5690_v40 = vpack.c.bf16 %v196_v35, %v195_v34  ;;  %v266_v23 = vld [vmem:[%s10611_s1 + $0x718] sm:$0xff]  ;;  %v284_v28 = vld [vmem:[%s10611_s1 + $0x7a8] sm:$0xff]  ;;  %v267_v35 = vld [vmem:[%s10611_s1 + $0x720] sm:$0xff] }
  0x47   :  { %5701 = vmatpush3.bf16.msra.mxu1 %v5700_v36  ;;  %v227_v36 = vld [vmem:[%s10611_s1 + $0x5e0] sm:$0xff]  ;;  %v236_v34 = vld [vmem:[%s10611_s1 + $0x628] sm:$0xff]  ;;  %v258_v63 = vld [vmem:[%s10611_s1 + $0x6d8] sm:$0xff] }
  0x48   :  { %5703 = vmatprep.subr.bf16.mxu1 %v5702_v44  ;;  %2008 = vmatprep.mubr.f32.mxu1 %v1266_v45  ;;  %v211_v44 = vld [vmem:[%s10611_s1 + $0x560] sm:$0xff]  ;;  %v5722_v46 = vpack.c.bf16 %v228_v37, %v227_v36  ;;  %v213_v45 = vld [vmem:[%s10611_s1 + $0x570] sm:$0xff]  ;;  %v5750_v4 = vpack.c.bf16 %v258_v63, %v257_v62  ;;  %v274_v9 = vld [vmem:[%s10611_s1 + $0x758] sm:$0xff] }
  0x49   :  { %5673 = vmatpush3.bf16.msra.mxu0 %v5672_v53  ;;  %v5692_v53 = vpack.c.bf16 %v180_v43, %v179_v41  ;;  %v253_v37 = vld [vmem:[%s10611_s1 + $0x6b0] sm:$0xff]  ;;  %v259_v10 = vld [vmem:[%s10611_s1 + $0x6e0] sm:$0xff] }
  0x4a   :  { %5675 = vmatprep.subr.bf16.mxu0 %v5674_v54  ;;  %v5724_v54 = vpack.c.bf16 %v212_v47, %v211_v44  ;;  %v238_v47 = vld [vmem:[%s10611_s1 + $0x638] sm:$0xff]  ;;  %v241_v5 = vld [vmem:[%s10611_s1 + $0x650] sm:$0xff] }
  0x4b   :  { %5705 = vmatpush3.bf16.msra.mxu1 %v5704_v33  ;;  %v24_v33 = vld [vmem:[%s10610_s0 + $0x18] sm:$0xff]  ;;  %v329_v62 = vld [vmem:[%s10611_s1 + $0x910] sm:$0xff] }
  0x4c   :  { %5707 = vmatprep.subr.bf16.mxu1 %v5706_v58  ;;  %v5726_v58 = vpack.c.bf16 %v230_v51, %v229_v50  ;;  %v7441_v11 = vrot.slane %v24_v33, %v6946_v13  ;;  %v270_v50 = vld [vmem:[%s10611_s1 + $0x738] sm:$0xff]  ;;  %v255_v51 = vld [vmem:[%s10611_s1 + $0x6c0] sm:$0xff] }
  0x4d   :  { %5677 = vmatpush3.bf16.msra.mxu0 %v5676_v0  ;;  %v1267_v0 = vcombine.high %v24_v33, %v24_v33  ;;  %v287_v33 = vld [vmem:[%s10611_s1 + $0x7c0] sm:$0xff] }
  0x4e   :  { %5679 = vmatprep.subr.bf16.mxu0 %v5678_v2  ;;  %v5728_v2 = vpack.c.bf16 %v214_v59, %v213_v45  ;;  %v239_v45 = vld [vmem:[%s10611_s1 + $0x640] sm:$0xff] }
  0x4f   :  { %5709 = vmatpush3.bf16.msra.mxu1 %v5708_v1  ;;  %v5696_v1 = vpack.c.bf16 %v182_v57, %v181_v56  ;;  %v5776_v56 = vpack.c.bf16 %v270_v50, %v269_v48  ;;  %v271_v59 = vld [vmem:[%s10611_s1 + $0x740] sm:$0xff]  ;;  %v296_v48 = vld [vmem:[%s10611_s1 + $0x808] sm:$0xff] }
  0x50   :  { %5711 = vmatprep.subr.bf16.mxu1 %v5710_v6  ;;  %v263_v6 = vld [vmem:[%s10611_s1 + $0x700] sm:$0xff] }
  0x51   :  { %5681 = vmatpush3.bf16.msra.mxu0 %v5680_v12  ;;  %v281_v12 = vld [vmem:[%s10611_s1 + $0x790] sm:$0xff]  ;;  %v5764_v17 = vpack.c.bf16 %v264_v8, %v263_v6  ;;  %v242_v6 = vld [vmem:[%s10611_s1 + $0x658] sm:$0xff] }
  0x52   :  { %5683 = vmatprep.subr.bf16.mxu0 %v5682_v15  ;;  %v7450_v15 = vrot.slane %v1267_v0, %v6946_v13  ;;  %v289_v0 = vld [vmem:[%s10611_s1 + $0x7d0] sm:$0xff] }
  0x53   :  { %5713 = vmatpush3.bf16.msra.mxu1 %v5712_v14  ;;  %v282_v14 = vld [vmem:[%s10611_s1 + $0x798] sm:$0xff] }
  0x54   :  { %5715 = vmatprep.subr.bf16.mxu1 %v5714_v19  ;;  %v233_v19 = vld [vmem:[%s10611_s1 + $0x610] sm:$0xff]  ;;  %v5766_v22 = vpack.c.bf16 %v282_v14, %v281_v12  ;;  %v1283_v29 = vcombine.high %v7450_v15, %v7450_v15  ;;  %v260_v12 = vld [vmem:[%s10611_s1 + $0x6e8] sm:$0xff]  ;;  %v291_v14 = vld [vmem:[%s10611_s1 + $0x7e0] sm:$0xff] }
  0x55   :  { %5685 = vmatpush3.bf16.msra.mxu0 %v5684_v25  ;;  %v252_v25 = vld [vmem:[%s10611_s1 + $0x6a8] sm:$0xff]  ;;  %v5736_v30 = vpack.c.bf16 %v234_v20, %v233_v19  ;;  %v5754_v19 = vpack.c.bf16 %v260_v12, %v259_v10  ;;  %v243_v20 = vld [vmem:[%s10611_s1 + $0x660] sm:$0xff] }
  0x56   :  { %5687 = vmatprep.subr.bf16.mxu0 %v5686_v27  ;;  %v283_v27 = vld [vmem:[%s10611_s1 + $0x7a0] sm:$0xff]  ;;  %v5738_v32 = vpack.c.bf16 %v252_v25, %v251_v24  ;;  %v276_v24 = vld [vmem:[%s10611_s1 + $0x768] sm:$0xff]  ;;  %v261_v25 = vld [vmem:[%s10611_s1 + $0x6f0] sm:$0xff] }
  0x57   :  { %5717 = vmatpush3.bf16.msra.mxu1 %v5716_v26  ;;  %v1282_v26 = vcombine.high %v7441_v11, %v7441_v11  ;;  %v5770_v36 = vpack.c.bf16 %v284_v28, %v283_v27  ;;  %v293_v27 = vld [vmem:[%s10611_s1 + $0x7f0] sm:$0xff]  ;;  %v294_v28 = vld [vmem:[%s10611_s1 + $0x7f8] sm:$0xff]  ;;  %v300_v10 = vld [vmem:[%s10611_s1 + $0x828] sm:$0xff] }
  0x58   :  { %5719 = vmatprep.subr.bf16.mxu1 %v5718_v31  ;;  %v5768_v31 = vpack.c.bf16 %v266_v23, %v265_v21  ;;  %v244_v21 = vld [vmem:[%s10611_s1 + $0x668] sm:$0xff]  ;;  %v331_v12 = vld [vmem:[%s10611_s1 + $0x920] sm:$0xff] }
  0x59   :  { %5689 = vmatpush3.bf16.msra.mxu0 %v5688_v38  ;;  %v254_v38 = vld [vmem:[%s10611_s1 + $0x6b8] sm:$0xff] }
  0x5a   :  { %5691 = vmatprep.subr.bf16.mxu0 %v5690_v40  ;;  %v286_v40 = vld [vmem:[%s10611_s1 + $0x7b8] sm:$0xff]  ;;  %v5742_v44 = vpack.c.bf16 %v254_v38, %v253_v37  ;;  %v311_v37 = vld [vmem:[%s10611_s1 + $0x880] sm:$0xff]  ;;  %v312_v38 = vld [vmem:[%s10611_s1 + $0x888] sm:$0xff] }
  0x5b   :  { %5721 = vmatpush3.bf16.msra.mxu1 %v5720_v39  ;;  %v285_v39 = vld [vmem:[%s10611_s1 + $0x7b0] sm:$0xff] }
  0x5c   :  { %5723 = vmatprep.subr.bf16.mxu1 %v5722_v46  ;;  %v237_v46 = vld [vmem:[%s10611_s1 + $0x630] sm:$0xff]  ;;  %v5774_v49 = vpack.c.bf16 %v286_v40, %v285_v39  ;;  %v343_v39 = vld [vmem:[%s10611_s1 + $0x980] sm:$0xff]  ;;  %v344_v40 = vld [vmem:[%s10611_s1 + $0x988] sm:$0xff] }
  0x5d   :  { %5693 = vmatpush3.bf16.msra.mxu0 %v5692_v53  ;;  %v256_v53 = vld [vmem:[%s10611_s1 + $0x6c8] sm:$0xff]  ;;  %v5826_v50 = vpack.c.bf16 %v344_v40, %v343_v39  ;;  %v321_v39 = vld [vmem:[%s10611_s1 + $0x8d0] sm:$0xff]  ;;  %v322_v40 = vld [vmem:[%s10611_s1 + $0x8d8] sm:$0xff] }
  0x5e   :  { %5695 = vmatprep.subr.bf16.mxu0 %v5694_v55  ;;  %v5744_v55 = vpack.c.bf16 %v238_v47, %v237_v46  ;;  %v5746_v57 = vpack.c.bf16 %v256_v53, %v255_v51  ;;  %v5794_v46 = vpack.c.bf16 %v312_v38, %v311_v37  ;;  %v295_v47 = vld [vmem:[%s10611_s1 + $0x800] sm:$0xff]  ;;  %v328_v51 = vld [vmem:[%s10611_s1 + $0x908] sm:$0xff]  ;;  %v313_v53 = vld [vmem:[%s10611_s1 + $0x890] sm:$0xff] }
  0x5f   :  { %5725 = vmatpush3.bf16.msra.mxu1 %v5724_v54  ;;  %v288_v54 = vld [vmem:[%s10611_s1 + $0x7c8] sm:$0xff] }
  0x60   :  { %5727 = vmatprep.subr.bf16.mxu1 %v5726_v58  ;;  %v240_v58 = vld [vmem:[%s10611_s1 + $0x648] sm:$0xff]  ;;  %v5778_v60 = vpack.c.bf16 %v288_v54, %v287_v33  ;;  %v314_v33 = vld [vmem:[%s10611_s1 + $0x898] sm:$0xff] }
  0x61   :  { %5697 = vmatpush3.bf16.msra.mxu0 %v5696_v1  ;;  %v290_v1 = vld [vmem:[%s10611_s1 + $0x7d8] sm:$0xff]  ;;  %v336_v38 = vld [vmem:[%s10611_s1 + $0x948] sm:$0xff] }
  0x62   :  { %5731 = vmatprep.subr.bf16.mxu0 %v5730_v3  ;;  %v5780_v3 = vpack.c.bf16 %v272_v61, %v271_v59  ;;  %v5782_v8 = vpack.c.bf16 %v290_v1, %v289_v0  ;;  %v5798_v59 = vpack.c.bf16 %v314_v33, %v313_v53  ;;  %v298_v61 = vld [vmem:[%s10611_s1 + $0x818] sm:$0xff]  ;;  %v315_v1 = vld [vmem:[%s10611_s1 + $0x8a0] sm:$0xff] }
  0x63   :  { %5729 = vmatpush3.bf16.msra.mxu1 %v5728_v2  ;;  %v5748_v2 = vpack.c.bf16 %v240_v58, %v239_v45  ;;  %v5796_v45 = vpack.c.bf16 %v296_v48, %v295_v47  ;;  %v330_v0 = vld [vmem:[%s10611_s1 + $0x918] sm:$0xff]  ;;  %v5814_v47 = vpack.c.bf16 %v322_v40, %v321_v39  ;;  %v305_v48 = vld [vmem:[%s10611_s1 + $0x850] sm:$0xff]  ;;  %v323_v33 = vld [vmem:[%s10611_s1 + $0x8e0] sm:$0xff] }
  0x64   :  { %5763 = vmatprep.subr.bf16.mxu1 %v5762_v7  ;;  %1939 = vmatmul.mubr.f32.vlgmr.msra.gmra.mrb[4].mxu0 %v7249_v42  ;;  %v235_v42 = vld [vmem:[%s10611_s1 + $0x620] sm:$0xff]  ;;  %v273_v7 = vld [vmem:[%s10611_s1 + $0x750] sm:$0xff]  ;;  %v338_v53 = vld [vmem:[%s10611_s1 + $0x958] sm:$0xff] }
  0x65   :  { %5733 = vmatpush3.bf16.msra.mxu0 %v5732_v16  ;;  %2078 = vmatprep.mubr.f32.mxu0 %v1282_v26  ;;  %v5740_v41 = vpack.c.bf16 %v236_v34, %v235_v42  ;;  %v292_v16 = vld [vmem:[%s10611_s1 + $0x7e8] sm:$0xff]  ;;  %v262_v26 = vld [vmem:[%s10611_s1 + $0x6f8] sm:$0xff]  ;;  %v245_v42 = vld [vmem:[%s10611_s1 + $0x670] sm:$0xff] }
  0x66   :  { %2009 = vmatmul.mubr.f32.vlgmr.msra.gmra.mrb[4].mxu1 %v7270_v52  ;;  %5735 = vmatprep.subr.bf16.mxu0 %v5734_v18  ;;  %v268_v52 = vld [vmem:[%s10611_s1 + $0x728] sm:$0xff]  ;;  %v5784_v18 = vpack.c.bf16 %v274_v9, %v273_v7  ;;  %v5786_v23 = vpack.c.bf16 %v292_v16, %v291_v14  ;;  %v246_v34 = vld [vmem:[%s10611_s1 + $0x678] sm:$0xff]  ;;  %v317_v16 = vld [vmem:[%s10611_s1 + $0x8b0] sm:$0xff] }
  0x67   :  { %5765 = vmatpush3.bf16.msra.mxu1 %v5764_v17  ;;  %2148 = vmatprep.mubr.f32.mxu1 %v1283_v29  ;;  %v5772_v43 = vpack.c.bf16 %v268_v52, %v267_v35  ;;  %v5752_v17 = vpack.c.bf16 %v242_v6, %v241_v5  ;;  %v5756_v29 = vpack.c.bf16 %v244_v21, %v243_v20  ;;  %v277_v35 = vld [vmem:[%s10611_s1 + $0x770] sm:$0xff]  ;;  %v278_v52 = vld [vmem:[%s10611_s1 + $0x778] sm:$0xff]  ;;  %v348_v5 = vld [vmem:[%s10611_s1 + $0x9a8] sm:$0xff] }
  0x68   :  { %5767 = vmatprep.subr.bf16.mxu1 %v5766_v22  ;;  %v275_v22 = vld [vmem:[%s10611_s1 + $0x760] sm:$0xff]  ;;  %v393_v39 = vld [vmem:[%s10611_s1 + $0xb10] sm:$0xff] }
  0x69   :  { %5737 = vmatpush3.bf16.msra.mxu0 %v5736_v30  ;;  %v25_v30 = vld [vmem:[%s10610_s0 + $0x20] sm:$0xff] }
  0x6a   :  { %5739 = vmatprep.subr.bf16.mxu0 %v5738_v32  ;;  %v5758_v32 = vpack.c.bf16 %v262_v26, %v261_v25  ;;  %v7648_v54 = vrot.slane %v25_v30, %v6946_v13  ;;  %v333_v25 = vld [vmem:[%s10611_s1 + $0x930] sm:$0xff] }
  0x6b   :  { %5769 = vmatpush3.bf16.msra.mxu1 %v5768_v31  ;;  %v5788_v31 = vpack.c.bf16 %v276_v24, %v275_v22  ;;  %v302_v24 = vld [vmem:[%s10611_s1 + $0x838] sm:$0xff] }
  0x6c   :  { %5771 = vmatprep.subr.bf16.mxu1 %v5770_v36  ;;  %v5790_v36 = vpack.c.bf16 %v294_v28, %v293_v27  ;;  %v334_v27 = vld [vmem:[%s10611_s1 + $0x938] sm:$0xff]  ;;  %v319_v28 = vld [vmem:[%s10611_s1 + $0x8c0] sm:$0xff] }
  0x6d   :  { %5741 = vmatpush3.bf16.msra.mxu0 %v5740_v41  ;;  %v1284_v41 = vcombine.high %v25_v30, %v25_v30  ;;  %v351_v30 = vld [vmem:[%s10611_s1 + $0x9c0] sm:$0xff] }
  0x6e   :  { %5743 = vmatprep.subr.bf16.mxu0 %v5742_v44  ;;  %v5792_v44 = vpack.c.bf16 %v278_v52, %v277_v35  ;;  %v303_v35 = vld [vmem:[%s10611_s1 + $0x840] sm:$0xff] }
  0x6f   :  { %5773 = vmatpush3.bf16.msra.mxu1 %v5772_v43  ;;  %v5760_v43 = vpack.c.bf16 %v246_v34, %v245_v42  ;;  %v5840_v42 = vpack.c.bf16 %v334_v27, %v333_v25  ;;  %v335_v52 = vld [vmem:[%s10611_s1 + $0x940] sm:$0xff]  ;;  %v360_v25 = vld [vmem:[%s10611_s1 + $0xa08] sm:$0xff] }
  0x70   :  { %5775 = vmatprep.subr.bf16.mxu1 %v5774_v49  ;;  %v327_v49 = vld [vmem:[%s10611_s1 + $0x900] sm:$0xff] }
  0x71   :  { %5745 = vmatpush3.bf16.msra.mxu0 %v5744_v55  ;;  %v345_v55 = vld [vmem:[%s10611_s1 + $0x990] sm:$0xff]  ;;  %v5828_v58 = vpack.c.bf16 %v328_v51, %v327_v49  ;;  %v306_v49 = vld [vmem:[%s10611_s1 + $0x858] sm:$0xff] }
  0x72   :  { %5747 = vmatprep.subr.bf16.mxu0 %v5746_v57  ;;  %v7657_v57 = vrot.slane %v1284_v41, %v6946_v13  ;;  %v353_v41 = vld [vmem:[%s10611_s1 + $0x9d0] sm:$0xff] }
  0x73   :  { %5777 = vmatpush3.bf16.msra.mxu1 %v5776_v56  ;;  %v346_v56 = vld [vmem:[%s10611_s1 + $0x998] sm:$0xff] }
  0x74   :  { %5779 = vmatprep.subr.bf16.mxu1 %v5778_v60  ;;  %v297_v60 = vld [vmem:[%s10611_s1 + $0x810] sm:$0xff]  ;;  %v5830_v63 = vpack.c.bf16 %v346_v56, %v345_v55  ;;  %v1300_v6 = vcombine.high %v7657_v57, %v7657_v57  ;;  %v324_v55 = vld [vmem:[%s10611_s1 + $0x8e8] sm:$0xff]  ;;  %v355_v56 = vld [vmem:[%s10611_s1 + $0x9e0] sm:$0xff] }
  0x75   :  { %5749 = vmatpush3.bf16.msra.mxu0 %v5748_v2  ;;  %v316_v2 = vld [vmem:[%s10611_s1 + $0x8a8] sm:$0xff]  ;;  %v5800_v7 = vpack.c.bf16 %v298_v61, %v297_v60  ;;  %v5818_v60 = vpack.c.bf16 %v324_v55, %v323_v33  ;;  %v307_v61 = vld [vmem:[%s10611_s1 + $0x860] sm:$0xff] }
  0x76   :  { %5751 = vmatprep.subr.bf16.mxu0 %v5750_v4  ;;  %v347_v4 = vld [vmem:[%s10611_s1 + $0x9a0] sm:$0xff]  ;;  %v5802_v9 = vpack.c.bf16 %v316_v2, %v315_v1  ;;  %v340_v1 = vld [vmem:[%s10611_s1 + $0x968] sm:$0xff]  ;;  %v325_v2 = vld [vmem:[%s10611_s1 + $0x8f0] sm:$0xff] }
  0x77   :  { %5781 = vmatpush3.bf16.msra.mxu1 %v5780_v3  ;;  %v1299_v3 = vcombine.high %v7648_v54, %v7648_v54  ;;  %v5834_v14 = vpack.c.bf16 %v348_v5, %v347_v4  ;;  %v357_v4 = vld [vmem:[%s10611_s1 + $0x9f0] sm:$0xff]  ;;  %v358_v5 = vld [vmem:[%s10611_s1 + $0x9f8] sm:$0xff]  ;;  %v364_v33 = vld [vmem:[%s10611_s1 + $0xa28] sm:$0xff] }
  0x78   :  { %5783 = vmatprep.subr.bf16.mxu1 %v5782_v8  ;;  %v5832_v8 = vpack.c.bf16 %v330_v0, %v329_v62  ;;  %v308_v62 = vld [vmem:[%s10611_s1 + $0x868] sm:$0xff]  ;;  %v395_v55 = vld [vmem:[%s10611_s1 + $0xb20] sm:$0xff] }
  0x79   :  { %5753 = vmatpush3.bf16.msra.mxu0 %v5752_v17  ;;  %v318_v17 = vld [vmem:[%s10611_s1 + $0x8b8] sm:$0xff] }
  0x7a   :  { %5755 = vmatprep.subr.bf16.mxu0 %v5754_v19  ;;  %v350_v19 = vld [vmem:[%s10611_s1 + $0x9b8] sm:$0xff]  ;;  %v5806_v22 = vpack.c.bf16 %v318_v17, %v317_v16  ;;  %v375_v16 = vld [vmem:[%s10611_s1 + $0xa80] sm:$0xff]  ;;  %v376_v17 = vld [vmem:[%s10611_s1 + $0xa88] sm:$0xff] }
  0x7b   :  { %5785 = vmatpush3.bf16.msra.mxu1 %v5784_v18  ;;  %v349_v18 = vld [vmem:[%s10611_s1 + $0x9b0] sm:$0xff] }
  0x7c   :  { %5787 = vmatprep.subr.bf16.mxu1 %v5786_v23  ;;  %v301_v23 = vld [vmem:[%s10611_s1 + $0x830] sm:$0xff]  ;;  %v5838_v26 = vpack.c.bf16 %v350_v19, %v349_v18  ;;  %v407_v18 = vld [vmem:[%s10611_s1 + $0xb80] sm:$0xff]  ;;  %v408_v19 = vld [vmem:[%s10611_s1 + $0xb88] sm:$0xff] }
  0x7d   :  { %5757 = vmatpush3.bf16.msra.mxu0 %v5756_v29  ;;  %v320_v29 = vld [vmem:[%s10611_s1 + $0x8c8] sm:$0xff]  ;;  %v5890_v27 = vpack.c.bf16 %v408_v19, %v407_v18  ;;  %v385_v18 = vld [vmem:[%s10611_s1 + $0xad0] sm:$0xff]  ;;  %v386_v19 = vld [vmem:[%s10611_s1 + $0xad8] sm:$0xff] }
  0x7e   :  { %5759 = vmatprep.subr.bf16.mxu0 %v5758_v32  ;;  %v5808_v32 = vpack.c.bf16 %v302_v24, %v301_v23  ;;  %v5810_v34 = vpack.c.bf16 %v320_v29, %v319_v28  ;;  %v5858_v23 = vpack.c.bf16 %v376_v17, %v375_v16  ;;  %v359_v24 = vld [vmem:[%s10611_s1 + $0xa00] sm:$0xff]  ;;  %v392_v28 = vld [vmem:[%s10611_s1 + $0xb08] sm:$0xff]  ;;  %v377_v29 = vld [vmem:[%s10611_s1 + $0xa90] sm:$0xff] }
  0x7f   :  { %5789 = vmatpush3.bf16.msra.mxu1 %v5788_v31  ;;  %v352_v31 = vld [vmem:[%s10611_s1 + $0x9c8] sm:$0xff] }
  0x80   :  { %5791 = vmatprep.subr.bf16.mxu1 %v5790_v36  ;;  %v304_v36 = vld [vmem:[%s10611_s1 + $0x848] sm:$0xff]  ;;  %v5842_v37 = vpack.c.bf16 %v352_v31, %v351_v30  ;;  %v378_v30 = vld [vmem:[%s10611_s1 + $0xa98] sm:$0xff] }
  0x81   :  { %5761 = vmatpush3.bf16.msra.mxu0 %v5760_v43  ;;  %v354_v43 = vld [vmem:[%s10611_s1 + $0x9d8] sm:$0xff]  ;;  %v400_v17 = vld [vmem:[%s10611_s1 + $0xb48] sm:$0xff] }
  0x82   :  { %5795 = vmatprep.subr.bf16.mxu0 %v5794_v46  ;;  %v5844_v46 = vpack.c.bf16 %v336_v38, %v335_v52  ;;  %v5846_v51 = vpack.c.bf16 %v354_v43, %v353_v41  ;;  %v5862_v52 = vpack.c.bf16 %v378_v30, %v377_v29  ;;  %v362_v38 = vld [vmem:[%s10611_s1 + $0xa18] sm:$0xff]  ;;  %v379_v43 = vld [vmem:[%s10611_s1 + $0xaa0] sm:$0xff] }
  0x83   :  { %5793 = vmatpush3.bf16.msra.mxu1 %v5792_v44  ;;  %v5812_v44 = vpack.c.bf16 %v304_v36, %v303_v35  ;;  %v5860_v35 = vpack.c.bf16 %v360_v25, %v359_v24  ;;  %v394_v41 = vld [vmem:[%s10611_s1 + $0xb18] sm:$0xff]  ;;  %v5878_v24 = vpack.c.bf16 %v386_v19, %v385_v18  ;;  %v369_v25 = vld [vmem:[%s10611_s1 + $0xa50] sm:$0xff]  ;;  %v387_v30 = vld [vmem:[%s10611_s1 + $0xae0] sm:$0xff] }
  0x84   :  { %5827 = vmatprep.subr.bf16.mxu1 %v5826_v50  ;;  %2079 = vmatmul.mubr.f32.vlgmr.msra.gmra.mrb[6].mxu0 %v7441_v11  ;;  %v299_v11 = vld [vmem:[%s10611_s1 + $0x820] sm:$0xff]  ;;  %v337_v50 = vld [vmem:[%s10611_s1 + $0x950] sm:$0xff]  ;;  %v402_v29 = vld [vmem:[%s10611_s1 + $0xb58] sm:$0xff] }
  0x85   :  { %5797 = vmatpush3.bf16.msra.mxu0 %v5796_v45  ;;  %2218 = vmatprep.mubr.f32.mxu0 %v1299_v3  ;;  %v5804_v20 = vpack.c.bf16 %v300_v10, %v299_v11  ;;  %v356_v45 = vld [vmem:[%s10611_s1 + $0x9e8] sm:$0xff]  ;;  %v326_v3 = vld [vmem:[%s10611_s1 + $0x8f8] sm:$0xff]  ;;  %v309_v11 = vld [vmem:[%s10611_s1 + $0x870] sm:$0xff] }
  0x86   :  { %2149 = vmatmul.mubr.f32.vlgmr.msra.gmra.mrb[6].mxu1 %v7450_v15  ;;  %5799 = vmatprep.subr.bf16.mxu0 %v5798_v59  ;;  %v332_v15 = vld [vmem:[%s10611_s1 + $0x928] sm:$0xff]  ;;  %v5848_v59 = vpack.c.bf16 %v338_v53, %v337_v50  ;;  %v5850_v0 = vpack.c.bf16 %v356_v45, %v355_v56  ;;  %v310_v10 = vld [vmem:[%s10611_s1 + $0x878] sm:$0xff]  ;;  %v381_v45 = vld [vmem:[%s10611_s1 + $0xab0] sm:$0xff] }
  0x87   :  { %5829 = vmatpush3.bf16.msra.mxu1 %v5828_v58  ;;  %2288 = vmatprep.mubr.f32.mxu1 %v1300_v6  ;;  %v5836_v21 = vpack.c.bf16 %v332_v15, %v331_v12  ;;  %v5816_v58 = vpack.c.bf16 %v306_v49, %v305_v48  ;;  %v5820_v6 = vpack.c.bf16 %v308_v62, %v307_v61  ;;  %v341_v12 = vld [vmem:[%s10611_s1 + $0x970] sm:$0xff]  ;;  %v342_v15 = vld [vmem:[%s10611_s1 + $0x978] sm:$0xff]  ;;  %v412_v48 = vld [vmem:[%s10611_s1 + $0xba8] sm:$0xff] }
  0x88   :  { %5831 = vmatprep.subr.bf16.mxu1 %v5830_v63  ;;  %v339_v63 = vld [vmem:[%s10611_s1 + $0x960] sm:$0xff]  ;;  %v457_v18 = vld [vmem:[%s10611_s1 + $0xd10] sm:$0xff] }
  0x89   :  { %5801 = vmatpush3.bf16.msra.mxu0 %v5800_v7  ;;  %v26_v7 = vld [vmem:[%s10610_s0 + $0x28] sm:$0xff] }
  0x8a   :  { %5803 = vmatprep.subr.bf16.mxu0 %v5802_v9  ;;  %v5822_v9 = vpack.c.bf16 %v326_v3, %v325_v2  ;;  %v7855_v31 = vrot.slane %v26_v7, %v6946_v13  ;;  %v397_v2 = vld [vmem:[%s10611_s1 + $0xb30] sm:$0xff] }
  0x8b   :  { %5833 = vmatpush3.bf16.msra.mxu1 %v5832_v8  ;;  %v5852_v8 = vpack.c.bf16 %v340_v1, %v339_v63  ;;  %v366_v1 = vld [vmem:[%s10611_s1 + $0xa38] sm:$0xff] }
  0x8c   :  { %5835 = vmatprep.subr.bf16.mxu1 %v5834_v14  ;;  %v5854_v14 = vpack.c.bf16 %v358_v5, %v357_v4  ;;  %v398_v4 = vld [vmem:[%s10611_s1 + $0xb38] sm:$0xff]  ;;  %v383_v5 = vld [vmem:[%s10611_s1 + $0xac0] sm:$0xff] }
  0x8d   :  { %5805 = vmatpush3.bf16.msra.mxu0 %v5804_v20  ;;  %v1301_v20 = vcombine.high %v26_v7, %v26_v7  ;;  %v415_v7 = vld [vmem:[%s10611_s1 + $0xbc0] sm:$0xff] }
  0x8e   :  { %5807 = vmatprep.subr.bf16.mxu0 %v5806_v22  ;;  %v5856_v22 = vpack.c.bf16 %v342_v15, %v341_v12  ;;  %v367_v12 = vld [vmem:[%s10611_s1 + $0xa40] sm:$0xff] }
  0x8f   :  { %5837 = vmatpush3.bf16.msra.mxu1 %v5836_v21  ;;  %v5824_v21 = vpack.c.bf16 %v310_v10, %v309_v11  ;;  %v5904_v11 = vpack.c.bf16 %v398_v4, %v397_v2  ;;  %v399_v15 = vld [vmem:[%s10611_s1 + $0xb40] sm:$0xff]  ;;  %v424_v2 = vld [vmem:[%s10611_s1 + $0xc08] sm:$0xff] }
  0x90   :  { %5839 = vmatprep.subr.bf16.mxu1 %v5838_v26  ;;  %v391_v26 = vld [vmem:[%s10611_s1 + $0xb00] sm:$0xff] }
  0x91   :  { %5809 = vmatpush3.bf16.msra.mxu0 %v5808_v32  ;;  %v409_v32 = vld [vmem:[%s10611_s1 + $0xb90] sm:$0xff]  ;;  %v5892_v36 = vpack.c.bf16 %v392_v28, %v391_v26  ;;  %v370_v26 = vld [vmem:[%s10611_s1 + $0xa58] sm:$0xff] }
  0x92   :  { %5811 = vmatprep.subr.bf16.mxu0 %v5810_v34  ;;  %v7864_v34 = vrot.slane %v1301_v20, %v6946_v13  ;;  %v417_v20 = vld [vmem:[%s10611_s1 + $0xbd0] sm:$0xff] }
  0x93   :  { %5841 = vmatpush3.bf16.msra.mxu1 %v5840_v42  ;;  %v410_v42 = vld [vmem:[%s10611_s1 + $0xb98] sm:$0xff] }
  0x94   :  { %5843 = vmatprep.subr.bf16.mxu1 %v5842_v37  ;;  %v361_v37 = vld [vmem:[%s10611_s1 + $0xa10] sm:$0xff]  ;;  %v5894_v40 = vpack.c.bf16 %v410_v42, %v409_v32  ;;  %v1317_v49 = vcombine.high %v7864_v34, %v7864_v34  ;;  %v388_v32 = vld [vmem:[%s10611_s1 + $0xae8] sm:$0xff]  ;;  %v419_v42 = vld [vmem:[%s10611_s1 + $0xbe0] sm:$0xff] }
  0x95   :  { %5813 = vmatpush3.bf16.msra.mxu0 %v5812_v44  ;;  %v380_v44 = vld [vmem:[%s10611_s1 + $0xaa8] sm:$0xff]  ;;  %v5864_v50 = vpack.c.bf16 %v362_v38, %v361_v37  ;;  %v5882_v37 = vpack.c.bf16 %v388_v32, %v387_v30  ;;  %v371_v38 = vld [vmem:[%s10611_s1 + $0xa60] sm:$0xff] }
  0x96   :  { %5815 = vmatprep.subr.bf16.mxu0 %v5814_v47  ;;  %v411_v47 = vld [vmem:[%s10611_s1 + $0xba0] sm:$0xff]  ;;  %v5866_v53 = vpack.c.bf16 %v380_v44, %v379_v43  ;;  %v404_v43 = vld [vmem:[%s10611_s1 + $0xb68] sm:$0xff]  ;;  %v389_v44 = vld [vmem:[%s10611_s1 + $0xaf0] sm:$0xff] }
  0x97   :  { %5845 = vmatpush3.bf16.msra.mxu1 %v5844_v46  ;;  %v1316_v46 = vcombine.high %v7855_v31, %v7855_v31  ;;  %v5898_v56 = vpack.c.bf16 %v412_v48, %v411_v47  ;;  %v421_v47 = vld [vmem:[%s10611_s1 + $0xbf0] sm:$0xff]  ;;  %v422_v48 = vld [vmem:[%s10611_s1 + $0xbf8] sm:$0xff]  ;;  %v428_v30 = vld [vmem:[%s10611_s1 + $0xc28] sm:$0xff] }
  0x98   :  { %5847 = vmatprep.subr.bf16.mxu1 %v5846_v51  ;;  %v5896_v51 = vpack.c.bf16 %v394_v41, %v393_v39  ;;  %v372_v39 = vld [vmem:[%s10611_s1 + $0xa68] sm:$0xff]  ;;  %v459_v32 = vld [vmem:[%s10611_s1 + $0xd20] sm:$0xff] }
  0x99   :  { %5817 = vmatpush3.bf16.msra.mxu0 %v5816_v58  ;;  %v382_v58 = vld [vmem:[%s10611_s1 + $0xab8] sm:$0xff] }
  0x9a   :  { %5819 = vmatprep.subr.bf16.mxu0 %v5818_v60  ;;  %v414_v60 = vld [vmem:[%s10611_s1 + $0xbb8] sm:$0xff]  ;;  %v5870_v63 = vpack.c.bf16 %v382_v58, %v381_v45  ;;  %v439_v45 = vld [vmem:[%s10611_s1 + $0xc80] sm:$0xff]  ;;  %v440_v58 = vld [vmem:[%s10611_s1 + $0xc88] sm:$0xff] }
  0x9b   :  { %5849 = vmatpush3.bf16.msra.mxu1 %v5848_v59  ;;  %v413_v59 = vld [vmem:[%s10611_s1 + $0xbb0] sm:$0xff] }
  0x9c   :  { %5851 = vmatprep.subr.bf16.mxu1 %v5850_v0  ;;  %v365_v0 = vld [vmem:[%s10611_s1 + $0xa30] sm:$0xff]  ;;  %v5902_v3 = vpack.c.bf16 %v414_v60, %v413_v59  ;;  %v471_v59 = vld [vmem:[%s10611_s1 + $0xd80] sm:$0xff]  ;;  %v472_v60 = vld [vmem:[%s10611_s1 + $0xd88] sm:$0xff] }
  0x9d   :  { %5821 = vmatpush3.bf16.msra.mxu0 %v5820_v6  ;;  %v384_v6 = vld [vmem:[%s10611_s1 + $0xac8] sm:$0xff]  ;;  %v5954_v4 = vpack.c.bf16 %v472_v60, %v471_v59  ;;  %v449_v59 = vld [vmem:[%s10611_s1 + $0xcd0] sm:$0xff]  ;;  %v450_v60 = vld [vmem:[%s10611_s1 + $0xcd8] sm:$0xff] }
  0x9e   :  { %5823 = vmatprep.subr.bf16.mxu0 %v5822_v9  ;;  %v5872_v9 = vpack.c.bf16 %v366_v1, %v365_v0  ;;  %v5874_v10 = vpack.c.bf16 %v384_v6, %v383_v5  ;;  %v5922_v0 = vpack.c.bf16 %v440_v58, %v439_v45  ;;  %v423_v1 = vld [vmem:[%s10611_s1 + $0xc00] sm:$0xff]  ;;  %v456_v5 = vld [vmem:[%s10611_s1 + $0xd08] sm:$0xff]  ;;  %v441_v6 = vld [vmem:[%s10611_s1 + $0xc90] sm:$0xff] }
  0x9f   :  { %5853 = vmatpush3.bf16.msra.mxu1 %v5852_v8  ;;  %v416_v8 = vld [vmem:[%s10611_s1 + $0xbc8] sm:$0xff] }
  0xa0   :  { %5855 = vmatprep.subr.bf16.mxu1 %v5854_v14  ;;  %v368_v14 = vld [vmem:[%s10611_s1 + $0xa48] sm:$0xff]  ;;  %v5906_v16 = vpack.c.bf16 %v416_v8, %v415_v7  ;;  %v442_v7 = vld [vmem:[%s10611_s1 + $0xc98] sm:$0xff] }
  0xa1   :  { %5825 = vmatpush3.bf16.msra.mxu0 %v5824_v21  ;;  %v418_v21 = vld [vmem:[%s10611_s1 + $0xbd8] sm:$0xff]  ;;  %v464_v58 = vld [vmem:[%s10611_s1 + $0xd48] sm:$0xff] }
  0xa2   :  { %5859 = vmatprep.subr.bf16.mxu0 %v5858_v23  ;;  %v5908_v23 = vpack.c.bf16 %v400_v17, %v399_v15  ;;  %v5910_v28 = vpack.c.bf16 %v418_v21, %v417_v20  ;;  %v5926_v15 = vpack.c.bf16 %v442_v7, %v441_v6  ;;  %v426_v17 = vld [vmem:[%s10611_s1 + $0xc18] sm:$0xff]  ;;  %v443_v21 = vld [vmem:[%s10611_s1 + $0xca0] sm:$0xff] }
  0xa3   :  { %5857 = vmatpush3.bf16.msra.mxu1 %v5856_v22  ;;  %v5876_v22 = vpack.c.bf16 %v368_v14, %v367_v12  ;;  %v5924_v12 = vpack.c.bf16 %v424_v2, %v423_v1  ;;  %v458_v20 = vld [vmem:[%s10611_s1 + $0xd18] sm:$0xff]  ;;  %v5942_v1 = vpack.c.bf16 %v450_v60, %v449_v59  ;;  %v433_v2 = vld [vmem:[%s10611_s1 + $0xc50] sm:$0xff]  ;;  %v451_v7 = vld [vmem:[%s10611_s1 + $0xce0] sm:$0xff] }
  0xa4   :  { %5891 = vmatprep.subr.bf16.mxu1 %v5890_v27  ;;  %2219 = vmatmul.mubr.f32.vlgmr.msra.gmra.mrb[8].mxu0 %v7648_v54  ;;  %v363_v54 = vld [vmem:[%s10611_s1 + $0xa20] sm:$0xff]  ;;  %v401_v27 = vld [vmem:[%s10611_s1 + $0xb50] sm:$0xff]  ;;  %v466_v6 = vld [vmem:[%s10611_s1 + $0xd58] sm:$0xff] }
  0xa5   :  { %5861 = vmatpush3.bf16.msra.mxu0 %v5860_v35  ;;  %2358 = vmatprep.mubr.f32.mxu0 %v1316_v46  ;;  %v5868_v61 = vpack.c.bf16 %v364_v33, %v363_v54  ;;  %v420_v35 = vld [vmem:[%s10611_s1 + $0xbe8] sm:$0xff]  ;;  %v390_v46 = vld [vmem:[%s10611_s1 + $0xaf8] sm:$0xff]  ;;  %v373_v54 = vld [vmem:[%s10611_s1 + $0xa70] sm:$0xff] }
  0xa6   :  { %2289 = vmatmul.mubr.f32.vlgmr.msra.gmra.mrb[8].mxu1 %v7657_v57  ;;  %5863 = vmatprep.subr.bf16.mxu0 %v5862_v52  ;;  %v396_v57 = vld [vmem:[%s10611_s1 + $0xb28] sm:$0xff]  ;;  %v5912_v52 = vpack.c.bf16 %v402_v29, %v401_v27  ;;  %v5914_v41 = vpack.c.bf16 %v420_v35, %v419_v42  ;;  %v374_v33 = vld [vmem:[%s10611_s1 + $0xa78] sm:$0xff]  ;;  %v445_v35 = vld [vmem:[%s10611_s1 + $0xcb0] sm:$0xff] }
  0xa7   :  { %5893 = vmatpush3.bf16.msra.mxu1 %v5892_v36  ;;  %2428 = vmatprep.mubr.f32.mxu1 %v1317_v49  ;;  %v5900_v62 = vpack.c.bf16 %v396_v57, %v395_v55  ;;  %v5880_v36 = vpack.c.bf16 %v370_v26, %v369_v25  ;;  %v5884_v49 = vpack.c.bf16 %v372_v39, %v371_v38  ;;  %v405_v55 = vld [vmem:[%s10611_s1 + $0xb70] sm:$0xff]  ;;  %v406_v57 = vld [vmem:[%s10611_s1 + $0xb78] sm:$0xff]  ;;  %v476_v25 = vld [vmem:[%s10611_s1 + $0xda8] sm:$0xff] }
  0xa8   :  { %5895 = vmatprep.subr.bf16.mxu1 %v5894_v40  ;;  %v403_v40 = vld [vmem:[%s10611_s1 + $0xb60] sm:$0xff]  ;;  %v521_v59 = vld [vmem:[%s10611_s1 + $0xf10] sm:$0xff] }
  0xa9   :  { %5865 = vmatpush3.bf16.msra.mxu0 %v5864_v50  ;;  %v27_v50 = vld [vmem:[%s10610_s0 + $0x30] sm:$0xff] }
  0xaa   :  { %5867 = vmatprep.subr.bf16.mxu0 %v5866_v53  ;;  %v5886_v53 = vpack.c.bf16 %v390_v46, %v389_v44  ;;  %v8062_v8 = vrot.slane %v27_v50, %v6946_v13  ;;  %v461_v44 = vld [vmem:[%s10611_s1 + $0xd30] sm:$0xff] }
  0xab   :  { %5897 = vmatpush3.bf16.msra.mxu1 %v5896_v51  ;;  %v5916_v51 = vpack.c.bf16 %v404_v43, %v403_v40  ;;  %v430_v43 = vld [vmem:[%s10611_s1 + $0xc38] sm:$0xff] }
  0xac   :  { %5899 = vmatprep.subr.bf16.mxu1 %v5898_v56  ;;  %v5918_v56 = vpack.c.bf16 %v422_v48, %v421_v47  ;;  %v462_v47 = vld [vmem:[%s10611_s1 + $0xd38] sm:$0xff]  ;;  %v447_v48 = vld [vmem:[%s10611_s1 + $0xcc0] sm:$0xff] }
  0xad   :  { %5869 = vmatpush3.bf16.msra.mxu0 %v5868_v61  ;;  %v1318_v61 = vcombine.high %v27_v50, %v27_v50  ;;  %v479_v50 = vld [vmem:[%s10611_s1 + $0xdc0] sm:$0xff] }
  0xae   :  { %5871 = vmatprep.subr.bf16.mxu0 %v5870_v63  ;;  %v5920_v63 = vpack.c.bf16 %v406_v57, %v405_v55  ;;  %v431_v55 = vld [vmem:[%s10611_s1 + $0xc40] sm:$0xff] }
  0xaf   :  { %5901 = vmatpush3.bf16.msra.mxu1 %v5900_v62  ;;  %v5888_v62 = vpack.c.bf16 %v374_v33, %v373_v54  ;;  %v5968_v54 = vpack.c.bf16 %v462_v47, %v461_v44  ;;  %v463_v57 = vld [vmem:[%s10611_s1 + $0xd40] sm:$0xff]  ;;  %v488_v44 = vld [vmem:[%s10611_s1 + $0xe08] sm:$0xff] }
  0xb0   :  { %5903 = vmatprep.subr.bf16.mxu1 %v5902_v3  ;;  %v455_v3 = vld [vmem:[%s10611_s1 + $0xd00] sm:$0xff] }
  0xb1   :  { %5873 = vmatpush3.bf16.msra.mxu0 %v5872_v9  ;;  %v473_v9 = vld [vmem:[%s10611_s1 + $0xd90] sm:$0xff]  ;;  %v5956_v14 = vpack.c.bf16 %v456_v5, %v455_v3  ;;  %v434_v3 = vld [vmem:[%s10611_s1 + $0xc58] sm:$0xff] }
  0xb2   :  { %5875 = vmatprep.subr.bf16.mxu0 %v5874_v10  ;;  %v8071_v10 = vrot.slane %v1318_v61, %v6946_v13  ;;  %v481_v61 = vld [vmem:[%s10611_s1 + $0xdd0] sm:$0xff] }
  0xb3   :  { %5905 = vmatpush3.bf16.msra.mxu1 %v5904_v11  ;;  %v474_v11 = vld [vmem:[%s10611_s1 + $0xd98] sm:$0xff] }
  0xb4   :  { %5907 = vmatprep.subr.bf16.mxu1 %v5906_v16  ;;  %v425_v16 = vld [vmem:[%s10611_s1 + $0xc10] sm:$0xff]  ;;  %v5958_v19 = vpack.c.bf16 %v474_v11, %v473_v9  ;;  %v1334_v26 = vcombine.high %v8071_v10, %v8071_v10  ;;  %v452_v9 = vld [vmem:[%s10611_s1 + $0xce8] sm:$0xff]  ;;  %v483_v11 = vld [vmem:[%s10611_s1 + $0xde0] sm:$0xff] }
  0xb5   :  { %5877 = vmatpush3.bf16.msra.mxu0 %v5876_v22  ;;  %v444_v22 = vld [vmem:[%s10611_s1 + $0xca8] sm:$0xff]  ;;  %v5928_v27 = vpack.c.bf16 %v426_v17, %v425_v16  ;;  %v5946_v16 = vpack.c.bf16 %v452_v9, %v451_v7  ;;  %v435_v17 = vld [vmem:[%s10611_s1 + $0xc60] sm:$0xff] }
  0xb6   :  { %5879 = vmatprep.subr.bf16.mxu0 %v5878_v24  ;;  %v475_v24 = vld [vmem:[%s10611_s1 + $0xda0] sm:$0xff]  ;;  %v5930_v29 = vpack.c.bf16 %v444_v22, %v443_v21  ;;  %v468_v21 = vld [vmem:[%s10611_s1 + $0xd68] sm:$0xff]  ;;  %v453_v22 = vld [vmem:[%s10611_s1 + $0xcf0] sm:$0xff] }
  0xb7   :  { %5909 = vmatpush3.bf16.msra.mxu1 %v5908_v23  ;;  %v1333_v23 = vcombine.high %v8062_v8, %v8062_v8  ;;  %v5962_v42 = vpack.c.bf16 %v476_v25, %v475_v24  ;;  %v485_v24 = vld [vmem:[%s10611_s1 + $0xdf0] sm:$0xff]  ;;  %v486_v25 = vld [vmem:[%s10611_s1 + $0xdf8] sm:$0xff]  ;;  %v492_v7 = vld [vmem:[%s10611_s1 + $0xe28] sm:$0xff] }
  0xb8   :  { %5911 = vmatprep.subr.bf16.mxu1 %v5910_v28  ;;  %v5960_v28 = vpack.c.bf16 %v458_v20, %v457_v18  ;;  %v436_v18 = vld [vmem:[%s10611_s1 + $0xc68] sm:$0xff]  ;;  %v523_v9 = vld [vmem:[%s10611_s1 + $0xf20] sm:$0xff] }
  0xb9   :  { %5881 = vmatpush3.bf16.msra.mxu0 %v5880_v36  ;;  %v446_v36 = vld [vmem:[%s10611_s1 + $0xcb8] sm:$0xff] }
  0xba   :  { %5883 = vmatprep.subr.bf16.mxu0 %v5882_v37  ;;  %v478_v37 = vld [vmem:[%s10611_s1 + $0xdb8] sm:$0xff]  ;;  %v5934_v40 = vpack.c.bf16 %v446_v36, %v445_v35  ;;  %v503_v35 = vld [vmem:[%s10611_s1 + $0xe80] sm:$0xff]  ;;  %v504_v36 = vld [vmem:[%s10611_s1 + $0xe88] sm:$0xff] }
  0xbb   :  { %5913 = vmatpush3.bf16.msra.mxu1 %v5912_v52  ;;  %v477_v52 = vld [vmem:[%s10611_s1 + $0xdb0] sm:$0xff] }
  0xbc   :  { %5915 = vmatprep.subr.bf16.mxu1 %v5914_v41  ;;  %v429_v41 = vld [vmem:[%s10611_s1 + $0xc30] sm:$0xff]  ;;  %v5966_v46 = vpack.c.bf16 %v478_v37, %v477_v52  ;;  %v535_v52 = vld [vmem:[%s10611_s1 + $0xf80] sm:$0xff]  ;;  %v536_v37 = vld [vmem:[%s10611_s1 + $0xf88] sm:$0xff] }
  0xbd   :  { %5885 = vmatpush3.bf16.msra.mxu0 %v5884_v49  ;;  %v448_v49 = vld [vmem:[%s10611_s1 + $0xcc8] sm:$0xff]  ;;  %v6018_v47 = vpack.c.bf16 %v536_v37, %v535_v52  ;;  %v513_v52 = vld [vmem:[%s10611_s1 + $0xed0] sm:$0xff]  ;;  %v514_v37 = vld [vmem:[%s10611_s1 + $0xed8] sm:$0xff] }
  0xbe   :  { %5887 = vmatprep.subr.bf16.mxu0 %v5886_v53  ;;  %v5936_v53 = vpack.c.bf16 %v430_v43, %v429_v41  ;;  %v5938_v33 = vpack.c.bf16 %v448_v49, %v447_v48  ;;  %v5986_v41 = vpack.c.bf16 %v504_v36, %v503_v35  ;;  %v487_v43 = vld [vmem:[%s10611_s1 + $0xe00] sm:$0xff]  ;;  %v520_v48 = vld [vmem:[%s10611_s1 + $0xf08] sm:$0xff]  ;;  %v505_v49 = vld [vmem:[%s10611_s1 + $0xe90] sm:$0xff] }
  0xbf   :  { %5917 = vmatpush3.bf16.msra.mxu1 %v5916_v51  ;;  %v480_v51 = vld [vmem:[%s10611_s1 + $0xdc8] sm:$0xff] }
  0xc0   :  { %5919 = vmatprep.subr.bf16.mxu1 %v5918_v56  ;;  %v432_v56 = vld [vmem:[%s10611_s1 + $0xc48] sm:$0xff]  ;;  %v5970_v45 = vpack.c.bf16 %v480_v51, %v479_v50  ;;  %v506_v50 = vld [vmem:[%s10611_s1 + $0xe98] sm:$0xff] }
  0xc1   :  { %5889 = vmatpush3.bf16.msra.mxu0 %v5888_v62  ;;  %v482_v62 = vld [vmem:[%s10611_s1 + $0xdd8] sm:$0xff]  ;;  %v528_v36 = vld [vmem:[%s10611_s1 + $0xf48] sm:$0xff] }
  0xc2   :  { %5923 = vmatprep.subr.bf16.mxu0 %v5922_v0  ;;  %v5972_v0 = vpack.c.bf16 %v464_v58, %v463_v57  ;;  %v5974_v5 = vpack.c.bf16 %v482_v62, %v481_v61  ;;  %v5990_v57 = vpack.c.bf16 %v506_v50, %v505_v49  ;;  %v490_v58 = vld [vmem:[%s10611_s1 + $0xe18] sm:$0xff]  ;;  %v507_v62 = vld [vmem:[%s10611_s1 + $0xea0] sm:$0xff] }
  0xc3   :  { %5921 = vmatpush3.bf16.msra.mxu1 %v5920_v63  ;;  %v5940_v63 = vpack.c.bf16 %v432_v56, %v431_v55  ;;  %v5988_v55 = vpack.c.bf16 %v488_v44, %v487_v43  ;;  %v522_v61 = vld [vmem:[%s10611_s1 + $0xf18] sm:$0xff]  ;;  %v6006_v43 = vpack.c.bf16 %v514_v37, %v513_v52  ;;  %v497_v44 = vld [vmem:[%s10611_s1 + $0xe50] sm:$0xff]  ;;  %v515_v50 = vld [vmem:[%s10611_s1 + $0xee0] sm:$0xff] }
  0xc4   :  { %5955 = vmatprep.subr.bf16.mxu1 %v5954_v4  ;;  %2359 = vmatmul.mubr.f32.vlgmr.msra.gmra.mrb[10].mxu0 %v7855_v31  ;;  %v427_v31 = vld [vmem:[%s10611_s1 + $0xc20] sm:$0xff]  ;;  %v465_v4 = vld [vmem:[%s10611_s1 + $0xd50] sm:$0xff]  ;;  %v530_v49 = vld [vmem:[%s10611_s1 + $0xf58] sm:$0xff] }
  0xc5   :  { %5925 = vmatpush3.bf16.msra.mxu0 %v5924_v12  ;;  %2498 = vmatprep.mubr.f32.mxu0 %v1333_v23  ;;  %v5932_v38 = vpack.c.bf16 %v428_v30, %v427_v31  ;;  %v484_v12 = vld [vmem:[%s10611_s1 + $0xde8] sm:$0xff]  ;;  %v454_v23 = vld [vmem:[%s10611_s1 + $0xcf8] sm:$0xff]  ;;  %v437_v31 = vld [vmem:[%s10611_s1 + $0xc70] sm:$0xff] }
  0xc6   :  { %2429 = vmatmul.mubr.f32.vlgmr.msra.gmra.mrb[10].mxu1 %v7864_v34  ;;  %5927 = vmatprep.subr.bf16.mxu0 %v5926_v15  ;;  %v460_v34 = vld [vmem:[%s10611_s1 + $0xd28] sm:$0xff]  ;;  %v5976_v15 = vpack.c.bf16 %v466_v6, %v465_v4  ;;  %v5978_v20 = vpack.c.bf16 %v484_v12, %v483_v11  ;;  %v438_v30 = vld [vmem:[%s10611_s1 + $0xc78] sm:$0xff]  ;;  %v509_v12 = vld [vmem:[%s10611_s1 + $0xeb0] sm:$0xff] }
  0xc7   :  { %5957 = vmatpush3.bf16.msra.mxu1 %v5956_v14  ;;  %2568 = vmatprep.mubr.f32.mxu1 %v1334_v26  ;;  %v5964_v39 = vpack.c.bf16 %v460_v34, %v459_v32  ;;  %v5944_v14 = vpack.c.bf16 %v434_v3, %v433_v2  ;;  %v5948_v26 = vpack.c.bf16 %v436_v18, %v435_v17  ;;  %v469_v32 = vld [vmem:[%s10611_s1 + $0xd70] sm:$0xff]  ;;  %v470_v34 = vld [vmem:[%s10611_s1 + $0xd78] sm:$0xff]  ;;  %v540_v2 = vld [vmem:[%s10611_s1 + $0xfa8] sm:$0xff] }
  0xc8   :  { %5959 = vmatprep.subr.bf16.mxu1 %v5958_v19  ;;  %v467_v19 = vld [vmem:[%s10611_s1 + $0xd60] sm:$0xff]  ;;  %v601_v37 = vld [vmem:[%s10611_s1 + $0x1190] sm:$0xff] }
  0xc9   :  { %5929 = vmatpush3.bf16.msra.mxu0 %v5928_v27  ;;  %v28_v27 = vld [vmem:[%s10610_s0 + $0x38] sm:$0xff] }
  0xca   :  { %5931 = vmatprep.subr.bf16.mxu0 %v5930_v29  ;;  %v5950_v29 = vpack.c.bf16 %v454_v23, %v453_v22  ;;  %v8269_v51 = vrot.slane %v28_v27, %v6946_v13  ;;  %v525_v22 = vld [vmem:[%s10611_s1 + $0xf30] sm:$0xff] }
  0xcb   :  { %5961 = vmatpush3.bf16.msra.mxu1 %v5960_v28  ;;  %v5980_v28 = vpack.c.bf16 %v468_v21, %v467_v19  ;;  %v494_v21 = vld [vmem:[%s10611_s1 + $0xe38] sm:$0xff] }
  0xcc   :  { %5963 = vmatprep.subr.bf16.mxu1 %v5962_v42  ;;  %v5982_v42 = vpack.c.bf16 %v486_v25, %v485_v24  ;;  %v526_v24 = vld [vmem:[%s10611_s1 + $0xf38] sm:$0xff]  ;;  %v511_v25 = vld [vmem:[%s10611_s1 + $0xec0] sm:$0xff] }
  0xcd   :  { %5933 = vmatpush3.bf16.msra.mxu0 %v5932_v38  ;;  %v1335_v38 = vcombine.high %v28_v27, %v28_v27  ;;  %v543_v27 = vld [vmem:[%s10611_s1 + $0xfc0] sm:$0xff] }
  0xce   :  { %5935 = vmatprep.subr.bf16.mxu0 %v5934_v40  ;;  %v5984_v40 = vpack.c.bf16 %v470_v34, %v469_v32  ;;  %v495_v32 = vld [vmem:[%s10611_s1 + $0xe40] sm:$0xff] }
  0xcf   :  { %5965 = vmatpush3.bf16.msra.mxu1 %v5964_v39  ;;  %v5952_v39 = vpack.c.bf16 %v438_v30, %v437_v31  ;;  %v6032_v31 = vpack.c.bf16 %v526_v24, %v525_v22  ;;  %v527_v34 = vld [vmem:[%s10611_s1 + $0xf40] sm:$0xff]  ;;  %v568_v22 = vld [vmem:[%s10611_s1 + $0x1088] sm:$0xff] }
  0xd0   :  { %5967 = vmatprep.subr.bf16.mxu1 %v5966_v46  ;;  %v519_v46 = vld [vmem:[%s10611_s1 + $0xf00] sm:$0xff]  ;;  %v600_v24 = vld [vmem:[%s10611_s1 + $0x1188] sm:$0xff] }
  0xd1   :  { %5937 = vmatpush3.bf16.msra.mxu0 %v5936_v53  ;;  %v537_v53 = vld [vmem:[%s10611_s1 + $0xf90] sm:$0xff]  ;;  %v6020_v56 = vpack.c.bf16 %v520_v48, %v519_v46  ;;  %v498_v46 = vld [vmem:[%s10611_s1 + $0xe58] sm:$0xff] }
  0xd2   :  { %5939 = vmatprep.subr.bf16.mxu0 %v5938_v33  ;;  %v8278_v33 = vrot.slane %v1335_v38, %v6946_v13  ;;  %v545_v38 = vld [vmem:[%s10611_s1 + $0xfd0] sm:$0xff] }
  0xd3   :  { %5969 = vmatpush3.bf16.msra.mxu1 %v5968_v54  ;;  %v538_v54 = vld [vmem:[%s10611_s1 + $0xf98] sm:$0xff] }
  0xd4   :  { %5971 = vmatprep.subr.bf16.mxu1 %v5970_v45  ;;  %v489_v45 = vld [vmem:[%s10611_s1 + $0xe10] sm:$0xff]  ;;  %v6022_v60 = vpack.c.bf16 %v538_v54, %v537_v53  ;;  %v1351_v3 = vcombine.high %v8278_v33, %v8278_v33  ;;  %v516_v53 = vld [vmem:[%s10611_s1 + $0xee8] sm:$0xff]  ;;  %v547_v54 = vld [vmem:[%s10611_s1 + $0xfe0] sm:$0xff] }
  0xd5   :  { %5941 = vmatpush3.bf16.msra.mxu0 %v5940_v63  ;;  %v508_v63 = vld [vmem:[%s10611_s1 + $0xea8] sm:$0xff]  ;;  %v5992_v4 = vpack.c.bf16 %v490_v58, %v489_v45  ;;  %v6010_v45 = vpack.c.bf16 %v516_v53, %v515_v50  ;;  %v499_v58 = vld [vmem:[%s10611_s1 + $0xe60] sm:$0xff] }
  0xd6   :  { %5943 = vmatprep.subr.bf16.mxu0 %v5942_v1  ;;  %v539_v1 = vld [vmem:[%s10611_s1 + $0xfa0] sm:$0xff]  ;;  %v5994_v6 = vpack.c.bf16 %v508_v63, %v507_v62  ;;  %v532_v63 = vld [vmem:[%s10611_s1 + $0xf68] sm:$0xff] }
  0xd7   :  { %5973 = vmatpush3.bf16.msra.mxu1 %v5972_v0  ;;  %v1350_v0 = vcombine.high %v8269_v51, %v8269_v51  ;;  %v6026_v11 = vpack.c.bf16 %v540_v2, %v539_v1  ;;  %v518_v1 = vld [vmem:[%s10611_s1 + $0xef8] sm:$0xff]  ;;  %v4224_v2 = vld [vmem:[%s10612_s2] ss:$0 sm:$0xff]  ;;  %v572_v53 = vld [vmem:[%s10611_s1 + $0x10a8] sm:$0xff] }
  0xd8   :  { %5975 = vmatprep.subr.bf16.mxu1 %v5974_v5  ;;  %v6024_v5 = vpack.c.bf16 %v522_v61, %v521_v59  ;;  %v500_v59 = vld [vmem:[%s10611_s1 + $0xe68] sm:$0xff]  ;;  %v571_v50 = vld [vmem:[%s10611_s1 + $0x10a0] sm:$0xff] }
  0xd9   :  { %5945 = vmatpush3.bf16.msra.mxu0 %v5944_v14  ;;  %v510_v14 = vld [vmem:[%s10611_s1 + $0xeb8] sm:$0xff] }
  0xda   :  { %5947 = vmatprep.subr.bf16.mxu0 %v5946_v16  ;;  %v542_v16 = vld [vmem:[%s10611_s1 + $0xfb8] sm:$0xff]  ;;  %v5998_v19 = vpack.c.bf16 %v510_v14, %v509_v12 }
  0xdb   :  { %5977 = vmatpush3.bf16.msra.mxu1 %v5976_v15  ;;  %v541_v15 = vld [vmem:[%s10611_s1 + $0xfb0] sm:$0xff] }
  0xdc   :  { %5979 = vmatprep.subr.bf16.mxu1 %v5978_v20  ;;  %v493_v20 = vld [vmem:[%s10611_s1 + $0xe30] sm:$0xff]  ;;  %v6030_v23 = vpack.c.bf16 %v542_v16, %v541_v15  ;;  %v502_v16 = vld [vmem:[%s10611_s1 + $0xe78] sm:$0xff] }
  0xdd   :  { %5949 = vmatpush3.bf16.msra.mxu0 %v5948_v26  ;;  %v512_v26 = vld [vmem:[%s10611_s1 + $0xec8] sm:$0xff]  ;;  %v501_v15 = vld [vmem:[%s10611_s1 + $0xe70] sm:$0xff] }
  0xde   :  { %5951 = vmatprep.subr.bf16.mxu0 %v5950_v29  ;;  %v6000_v29 = vpack.c.bf16 %v494_v21, %v493_v20  ;;  %v6002_v30 = vpack.c.bf16 %v512_v26, %v511_v25  ;;  %v534_v20 = vld [vmem:[%s10611_s1 + $0xf78] sm:$0xff]  ;;  %v567_v21 = vld [vmem:[%s10611_s1 + $0x1080] sm:$0xff] }
  0xdf   :  { %5981 = vmatpush3.bf16.msra.mxu1 %v5980_v28  ;;  %v544_v28 = vld [vmem:[%s10611_s1 + $0xfc8] sm:$0xff] }
  0xe0   :  { %5983 = vmatprep.subr.bf16.mxu1 %v5982_v42  ;;  %v496_v42 = vld [vmem:[%s10611_s1 + $0xe48] sm:$0xff]  ;;  %v6034_v35 = vpack.c.bf16 %v544_v28, %v543_v27  ;;  %v6016_v27 = vpack.c.bf16 %v502_v16, %v501_v15 }
  0xe1   :  { %5953 = vmatpush3.bf16.msra.mxu0 %v5952_v39  ;;  %v546_v39 = vld [vmem:[%s10611_s1 + $0xfd8] sm:$0xff]  ;;  %v608_v15 = vld [vmem:[%s10611_s1 + $0x11c8] sm:$0xff] }
  0xe2   :  { %5987 = vmatprep.subr.bf16.mxu0 %v5986_v41  ;;  %v6036_v41 = vpack.c.bf16 %v528_v36, %v527_v34  ;;  %v6038_v48 = vpack.c.bf16 %v546_v39, %v545_v38  ;;  %v584_v34 = vld [vmem:[%s10611_s1 + $0x1108] sm:$0xff]  ;;  %v570_v36 = vld [vmem:[%s10611_s1 + $0x1098] sm:$0xff] }
  0xe3   :  { %5985 = vmatpush3.bf16.msra.mxu1 %v5984_v40  ;;  %v6004_v40 = vpack.c.bf16 %v496_v42, %v495_v32  ;;  %v583_v32 = vld [vmem:[%s10611_s1 + $0x1100] sm:$0xff]  ;;  %v602_v38 = vld [vmem:[%s10611_s1 + $0x1198] sm:$0xff] }
  0xe4   :  { %6019 = vmatprep.subr.bf16.mxu1 %v6018_v47  ;;  %2499 = vmatmul.mubr.f32.vlgmr.msra.gmra.mrb[12].mxu0 %v8062_v8  ;;  %v491_v8 = vld [vmem:[%s10611_s1 + $0xe20] sm:$0xff]  ;;  %v529_v47 = vld [vmem:[%s10611_s1 + $0xf50] sm:$0xff] }
  0xe5   :  { %5989 = vmatpush3.bf16.msra.mxu0 %v5988_v55  ;;  %2638 = vmatprep.mubr.f32.mxu0 %v1350_v0  ;;  %v5996_v17 = vpack.c.bf16 %v492_v7, %v491_v8  ;;  %v548_v55 = vld [vmem:[%s10611_s1 + $0xfe8] sm:$0xff]  ;;  %v517_v0 = vld [vmem:[%s10611_s1 + $0xef0] sm:$0xff] }
  0xe6   :  { %2569 = vmatmul.mubr.f32.vlgmr.msra.gmra.mrb[12].mxu1 %v8071_v10  ;;  %5991 = vmatprep.subr.bf16.mxu0 %v5990_v57  ;;  %v524_v10 = vld [vmem:[%s10611_s1 + $0xf28] sm:$0xff]  ;;  %v6040_v57 = vpack.c.bf16 %v530_v49, %v529_v47  ;;  %v6042_v62 = vpack.c.bf16 %v548_v55, %v547_v54  ;;  %v6014_v14 = vpack.c.bf16 %v518_v1, %v517_v0  ;;  %v585_v47 = vld [vmem:[%s10611_s1 + $0x1110] sm:$0xff]  ;;  %v586_v49 = vld [vmem:[%s10611_s1 + $0x1118] sm:$0xff] }
  0xe7   :  { %6021 = vmatpush3.bf16.msra.mxu1 %v6020_v56  ;;  %2708 = vmatprep.mubr.f32.mxu1 %v1351_v3  ;;  %v6028_v18 = vpack.c.bf16 %v524_v10, %v523_v9  ;;  %v6008_v56 = vpack.c.bf16 %v498_v46, %v497_v44  ;;  %v6012_v9 = vpack.c.bf16 %v500_v59, %v499_v58  ;;  %v553_v44 = vld [vmem:[%s10611_s1 + $0x1010] sm:$0xff]  ;;  %v554_v46 = vld [vmem:[%s10611_s1 + $0x1018] sm:$0xff]  ;;  %v603_v55 = vld [vmem:[%s10611_s1 + $0x11a0] sm:$0xff] }
  0xe8   :  { %6023 = vmatprep.subr.bf16.mxu1 %v6022_v60  ;;  %v531_v60 = vld [vmem:[%s10611_s1 + $0xf60] sm:$0xff]  ;;  %v6088_v58 = vpack.c.bf16 %v586_v49, %v585_v47  ;;  %v6058_v59 = vpack.c.bf16 %v572_v53, %v571_v50  ;;  %v574_v0 = vld [vmem:[%s10611_s1 + $0x10b8] sm:$0xff]  ;;  %v605_v1 = vld [vmem:[%s10611_s1 + $0x11b0] sm:$0xff] }
  0xe9   :  { %5993 = vmatpush3.bf16.msra.mxu0 %v5992_v4  ;;  %v6044_v12 = vpack.c.bf16 %v532_v63, %v531_v60  ;;  %v556_v60 = vld [vmem:[%s10611_s1 + $0x1028] sm:$0xff]  ;;  %v573_v63 = vld [vmem:[%s10611_s1 + $0x10b0] sm:$0xff] }
  0xea   :  { %5995 = vmatprep.subr.bf16.mxu0 %v5994_v6  ;;  %v550_v6 = vld [vmem:[%s10611_s1 + $0xff8] sm:$0xff] }
  0xeb   :  { %6025 = vmatpush3.bf16.msra.mxu1 %v6024_v5  ;;  %v549_v5 = vld [vmem:[%s10611_s1 + $0xff0] sm:$0xff] }
  0xec   :  { %6027 = vmatprep.subr.bf16.mxu1 %v6026_v11  ;;  %v29_v11 = vld [vmem:[%s10610_s0 + $0x40] sm:$0xff] }
  0xed   :  { %5997 = vmatpush3.bf16.msra.mxu0 %v5996_v17  ;;  %v533_v17 = vld [vmem:[%s10611_s1 + $0xf70] sm:$0xff]  ;;  %v1352_v25 = vcombine.high %v29_v11, %v29_v11  ;;  %v8481_v52 = vrot.slane %v29_v11, %v6946_v13  ;;  %v590_v11 = vld [vmem:[%s10611_s1 + $0x1138] sm:$0xff] }
  0xee   :  { %5999 = vmatprep.subr.bf16.mxu0 %v5998_v19  ;;  %v6046_v19 = vpack.c.bf16 %v550_v6, %v549_v5  ;;  %v6048_v28 = vpack.c.bf16 %v534_v20, %v533_v17  ;;  %v6062_v5 = vpack.c.bf16 %v574_v0, %v573_v63  ;;  %v557_v6 = vld [vmem:[%s10611_s1 + $0x1030] sm:$0xff]  ;;  %v560_v20 = vld [vmem:[%s10611_s1 + $0x1048] sm:$0xff] }
  0xef   :  { %6029 = vmatpush3.bf16.msra.mxu1 %v6028_v18  ;;  %v8490_v39 = vrot.slane %v1352_v25, %v6946_v13  ;;  %v1367_v54 = vcombine.high %v8481_v52, %v8481_v52  ;;  %v578_v25 = vld [vmem:[%s10611_s1 + $0x10d8] sm:$0xff] }
  0xf0   :  { %6031 = vmatprep.subr.bf16.mxu1 %v6030_v23  ;;  %v599_v23 = vld [vmem:[%s10611_s1 + $0x1180] sm:$0xff] }
  0xf1   :  { %6001 = vmatpush3.bf16.msra.mxu0 %v6000_v29  ;;  %v6050_v29 = vpack.c.bf16 %v568_v22, %v567_v21  ;;  %v6082_v42 = vpack.c.bf16 %v600_v24, %v599_v23  ;;  %v591_v21 = vld [vmem:[%s10611_s1 + $0x1140] sm:$0xff]  ;;  %v592_v23 = vld [vmem:[%s10611_s1 + $0x1148] sm:$0xff]  ;;  %v577_v24 = vld [vmem:[%s10611_s1 + $0x10d0] sm:$0xff] }
  0xf2   :  { %6003 = vmatprep.subr.bf16.mxu0 %v6002_v30  ;;  %v552_v30 = vld [vmem:[%s10611_s1 + $0x1008] sm:$0xff] }
  0xf3   :  { %6033 = vmatpush3.bf16.msra.mxu1 %v6032_v31  ;;  %v551_v31 = vld [vmem:[%s10611_s1 + $0x1000] sm:$0xff] }
  0xf4   :  { %6035 = vmatprep.subr.bf16.mxu1 %v6034_v35  ;;  %v569_v35 = vld [vmem:[%s10611_s1 + $0x1090] sm:$0xff] }
  0xf5   :  { %6005 = vmatpush3.bf16.msra.mxu0 %v6004_v40  ;;  %v6052_v40 = vpack.c.bf16 %v552_v30, %v551_v31 }
  0xf6   :  { %6007 = vmatprep.subr.bf16.mxu0 %v6006_v43  ;;  %v6054_v43 = vpack.c.bf16 %v570_v36, %v569_v35 }
  0xf7   :  { %6037 = vmatpush3.bf16.msra.mxu1 %v6036_v41  ;;  %v4258_v61 = vpop.f32.mrb[0].mxu0  ;;  %v6084_v41 = vpack.c.bf16 %v584_v34, %v583_v32 }
  0xf8   :  { %6039 = vmatprep.subr.bf16.mxu1 %v6038_v48  ;;  %v4259_v3 = vpop.f32.mrb[1].mxu0  ;;  %v6086_v48 = vpack.c.bf16 %v602_v38, %v601_v37 }
  0xf9   :  { %v4293_v4 = vpop.f32.mrb[0].mxu1  ;;  %v4260_v8 = vadd.f32 %v4259_v3, %v4258_v61  ;;  %6009 = vmatpush3.bf16.msra.mxu0 %v6008_v56  ;;  %v604_v56 = vld [vmem:[%s10611_s1 + $0x11a8] sm:$0xff]  ;;  %v587_v61 = vld [vmem:[%s10611_s1 + $0x1120] sm:$0xff] }
  0xfa   :  { %v4294_v7 = vpop.f32.mrb[1].mxu1  ;;  %6011 = vmatprep.subr.bf16.mxu0 %v6010_v45  ;;  %v6056_v45 = vpack.c.bf16 %v554_v46, %v553_v44 }
  0xfb   :  { %v4295_v10 = vadd.f32 %v4294_v7, %v4293_v4  ;;  %6041 = vmatpush3.bf16.msra.mxu1 %v6040_v57  ;;  %v1661_v18 = vadd.f32 %v4260_v8, %v4224_v2  ;;  %v1368_v57 = vcombine.high %v8490_v39, %v8490_v39  ;;  %v606_v2 = vld [vmem:[%s10611_s1 + $0x11b8] sm:$0xff]  ;;  %v589_v7 = vld [vmem:[%s10611_s1 + $0x1130] sm:$0xff] }
  0xfc   :  { %6043 = vmatprep.subr.bf16.mxu1 %v6042_v62  ;;  %v6090_v62 = vpack.c.bf16 %v604_v56, %v603_v55  ;;  %v558_v8 = vld [vmem:[%s10611_s1 + $0x1038] sm:$0xff]  ;;  %v6096_v17 = vpack.c.bf16 %v590_v11, %v589_v7 }
  0xfd   :  { %v8460_v26 = vadd.f32 %v4295_v10, %v1661_v18  ;;  %6013 = vmatpush3.bf16.msra.mxu0 %v6012_v9  ;;  %v6094_v9 = vpack.c.bf16 %v606_v2, %v605_v1  ;;  %v575_v10 = vld [vmem:[%s10611_s1 + $0x10c0] sm:$0xff]  ;;  %v6064_v16 = vpack.c.bf16 %v558_v8, %v557_v6 }
  0xfe   :  { %6015 = vmatprep.subr.bf16.mxu0 %v6014_v14  ;;  %v607_v14 = vld [vmem:[%s10611_s1 + $0x11c0] sm:$0xff] }
  0xff   :  { %6045 = vmatpush3.bf16.msra.mxu1 %v6044_v12  ;;  %v576_v12 = vld [vmem:[%s10611_s1 + $0x10c8] sm:$0xff]  ;;  %v6098_v22 = vpack.c.bf16 %v608_v15, %v607_v14 }
 0x100   :  { %6047 = vmatprep.subr.bf16.mxu1 %v6046_v19  ;;  %v6066_v18 = vpack.c.bf16 %v576_v12, %v575_v10  ;;  %v559_v19 = vld [vmem:[%s10611_s1 + $0x1040] sm:$0xff] }
 0x101   :  { %6017 = vmatpush3.bf16.msra.mxu0 %v6016_v27  ;;  %v609_v27 = vld [vmem:[%s10611_s1 + $0x11d0] sm:$0xff] }
 0x102   :  { %6051 = vmatprep.subr.bf16.mxu0 %v6050_v29 }
 0x103   :  { %6049 = vmatpush3.bf16.msra.mxu1 %v6048_v28  ;;  %v610_v28 = vld [vmem:[%s10611_s1 + $0x11d8] sm:$0xff] }
 0x104   :  { %6083 = vmatprep.subr.bf16.mxu1 %v6082_v42  ;;  %2639 = vmatmul.mubr.f32.vlgmr.msra.gmra.mrb[14].mxu0 %v8269_v51  ;;  %v555_v51 = vld [vmem:[%s10611_s1 + $0x1020] sm:$0xff] }
 0x105   :  { %6053 = vmatpush3.bf16.msra.mxu0 %v6052_v40  ;;  %2778 = vmatprep.mubr.f32.mxu0 %v1367_v54  ;;  %v6060_v3 = vpack.c.bf16 %v556_v60, %v555_v51 }
 0x106   :  { %2709 = vmatmul.mubr.f32.vlgmr.msra.gmra.mrb[14].mxu1 %v8278_v33  ;;  %6055 = vmatprep.subr.bf16.mxu0 %v6054_v43  ;;  %v588_v33 = vld [vmem:[%s10611_s1 + $0x1128] sm:$0xff] }
 0x107   :  { %6085 = vmatpush3.bf16.msra.mxu1 %v6084_v41  ;;  %2848 = vmatprep.mubr.f32.mxu1 %v1368_v57  ;;  %v6092_v4 = vpack.c.bf16 %v588_v33, %v587_v61 }
 0x108   :  { %6087 = vmatprep.subr.bf16.mxu1 %v6086_v48 }
 0x109   :  { %6057 = vmatpush3.bf16.msra.mxu0 %v6056_v45 }
 0x10a   :  { %6059 = vmatprep.subr.bf16.mxu0 %v6058_v59 }
 0x10b   :  { %6089 = vmatpush3.bf16.msra.mxu1 %v6088_v58 }
 0x10c   :  { %6091 = vmatprep.subr.bf16.mxu1 %v6090_v62 }
 0x10d   :  { %6061 = vmatpush3.bf16.msra.mxu0 %v6060_v3 }
 0x10e   :  { %6063 = vmatprep.subr.bf16.mxu0 %v6062_v5 }
 0x10f   :  { %6093 = vmatpush3.bf16.msra.mxu1 %v6092_v4 }
 0x110   :  { %6095 = vmatprep.subr.bf16.mxu1 %v6094_v9 }
 0x111   :  { %10 = vsyncpa [#allocation3], 0  ;;  %6065 = vmatpush3.bf16.msra.mxu0 %v6064_v16  ;;  %v6068_v29 = vpack.c.bf16 %v560_v20, %v559_v19  ;;  %v6100_v31 = vpack.c.bf16 %v592_v23, %v591_v21  ;;  %v6070_v30 = vpack.c.bf16 %v578_v25, %v577_v24  ;;  %v561_v32 = vld [vmem:[%s10611_s1 + $0x1050] sm:$0xff]  ;;  %v562_v42 = vld [vmem:[%s10611_s1 + $0x1058] sm:$0xff]  ;;  %v6102_v35 = vpack.c.bf16 %v610_v28, %v609_v27  ;;  %s6765_s8 = smov [#allocation2]  }
 0x112   :  { %6067 = vmatprep.subr.bf16.mxu0 %v6066_v18  ;;  %v593_v34 = vld [vmem:[%s10611_s1 + $0x1150] sm:$0xff]  ;;  %v594_v36 = vld [vmem:[%s10611_s1 + $0x1158] sm:$0xff]  ;;  %v579_v37 = vld [vmem:[%s10611_s1 + $0x10e0] sm:$0xff]  ;;  %v6072_v43 = vpack.c.bf16 %v562_v42, %v561_v32  ;;  %vm6763_vm0 = vmmov 0   ;;  %vm4208_vm1 = vcmask 74752  }
 0x113   :  { %6097 = vmatpush3.bf16.msra.mxu1 %v6096_v17  ;;  %v580_v38 = vld [vmem:[%s10611_s1 + $0x10e8] sm:$0xff]  ;;  %v611_v40 = vld [vmem:[%s10611_s1 + $0x11e0] sm:$0xff]  ;;  %v6104_v44 = vpack.c.bf16 %v594_v36, %v593_v34  ;;  %v581_v55 = vld [vmem:[%s10611_s1 + $0x10f0] sm:$0xff] }
 0x114   :  { %6099 = vmatprep.subr.bf16.mxu1 %v6098_v22  ;;  %v612_v41 = vld [vmem:[%s10611_s1 + $0x11e8] sm:$0xff]  ;;  %v6074_v46 = vpack.c.bf16 %v580_v38, %v579_v37  ;;  %v563_v47 = vld [vmem:[%s10611_s1 + $0x1060] sm:$0xff]  ;;  %v582_v56 = vld [vmem:[%s10611_s1 + $0x10f8] sm:$0xff] }
 0x115   :  { %6069 = vmatpush3.bf16.msra.mxu0 %v6068_v29  ;;  %v564_v48 = vld [vmem:[%s10611_s1 + $0x1068] sm:$0xff]  ;;  %v595_v49 = vld [vmem:[%s10611_s1 + $0x1160] sm:$0xff]  ;;  %v6106_v53 = vpack.c.bf16 %v612_v41, %v611_v40  ;;  %v613_v58 = vld [vmem:[%s10611_s1 + $0x11f0] sm:$0xff]  ;;  %v6078_v0 = vpack.c.bf16 %v582_v56, %v581_v55 }
 0x116   :  { %6071 = vmatprep.subr.bf16.mxu0 %v6070_v30  ;;  %v596_v54 = vld [vmem:[%s10611_s1 + $0x1168] sm:$0xff]  ;;  %v614_v59 = vld [vmem:[%s10611_s1 + $0x11f8] sm:$0xff]  ;;  %v6076_v61 = vpack.c.bf16 %v564_v48, %v563_v47  ;;  %v565_v1 = vld [vmem:[%s10611_s1 + $0x1070] sm:$0xff] }
 0x117   :  { %6101 = vmatpush3.bf16.msra.mxu1 %v6100_v31  ;;  %v4328_v50 = vpop.f32.mrb[2].mxu0  ;;  %v30_v62 = vld [vmem:[%s10610_s0 + $0x48] sm:$0xff]  ;;  %v6108_v63 = vpack.c.bf16 %v596_v54, %v595_v49  ;;  %v566_v2 = vld [vmem:[%s10611_s1 + $0x1078] sm:$0xff]  ;;  %v597_v3 = vld [vmem:[%s10611_s1 + $0x1170] sm:$0xff]  ;;  %v6110_v5 = vpack.c.bf16 %v614_v59, %v613_v58 }
 0x118   :  { %6103 = vmatprep.subr.bf16.mxu1 %v6102_v35  ;;  %v4329_v57 = vpop.f32.mrb[3].mxu0  ;;  %v598_v6 = vld [vmem:[%s10611_s1 + $0x1178] sm:$0xff]  ;;  %v631_v8 = vld [vmem:[%s10611_s1 + $0x1280] sm:$0xff]  ;;  %v632_v7 = vld [vmem:[%s10611_s1 + $0x1288] sm:$0xff]  ;;  %v1369_v11 = vcombine.high %v30_v62, %v30_v62  ;;  %v6080_v12 = vpack.c.bf16 %v566_v2, %v565_v1  ;;  %v8691_v23 = vrot.slane %v30_v62, %v6946_v13 }
 0x119   :  { %v4363_v45 = vpop.f32.mrb[2].mxu1  ;;  %v4330_v51 = vadd.f32 %v4329_v57, %v4328_v50  ;;  %6073 = vmatpush3.bf16.msra.mxu0 %v6072_v43  ;;  %v663_v9 = vld [vmem:[%s10611_s1 + $0x1380] sm:$0xff]  ;;  %v6112_v14 = vpack.c.bf16 %v598_v6, %v597_v3  ;;  %v6114_v15 = vpack.c.bf16 %v632_v7, %v631_v8  ;;  %v616_v17 = vld [vmem:[%s10611_s1 + $0x1208] sm:$0xff]  ;;  %v633_v21 = vld [vmem:[%s10611_s1 + $0x1290] sm:$0xff] }
 0x11a   :  { %v4364_v60 = vpop.f32.mrb[3].mxu1  ;;  %6075 = vmatprep.subr.bf16.mxu0 %v6074_v46  ;;  %v615_v16 = vld [vmem:[%s10611_s1 + $0x1200] sm:$0xff]  ;;  %v648_v20 = vld [vmem:[%s10611_s1 + $0x1308] sm:$0xff]  ;;  %v634_v22 = vld [vmem:[%s10611_s1 + $0x1298] sm:$0xff]  ;;  %v8700_v27 = vrot.slane %v1369_v11, %v6946_v13  ;;  %v1384_v38 = vcombine.high %v8691_v23, %v8691_v23 }
 0x11b   :  { %v4365_v33 = vadd.f32 %v4364_v60, %v4363_v45  ;;  %6105 = vmatpush3.bf16.msra.mxu1 %v6104_v44  ;;  %v1801_v4 = vadd.f32 %v4330_v51, %v8460_v26  ;;  %v664_v26 = vld [vmem:[%s10611_s1 + $0x1388] sm:$0xff]  ;;  %v647_v18 = vld [vmem:[%s10611_s1 + $0x1300] sm:$0xff]  ;;  %v665_v24 = vld [vmem:[%s10611_s1 + $0x1390] sm:$0xff]  ;;  %v6116_v28 = vpack.c.bf16 %v616_v17, %v615_v16  ;;  %v6118_v31 = vpack.c.bf16 %v634_v22, %v633_v21 }
 0x11c   :  { %6107 = vmatprep.subr.bf16.mxu1 %v6106_v53  ;;  %v6146_v19 = vpack.c.bf16 %v664_v26, %v663_v9  ;;  %v666_v25 = vld [vmem:[%s10611_s1 + $0x1398] sm:$0xff]  ;;  %v6148_v29 = vpack.c.bf16 %v648_v20, %v647_v18  ;;  %v617_v30 = vld [vmem:[%s10611_s1 + $0x1210] sm:$0xff]  ;;  %v635_v36 = vld [vmem:[%s10611_s1 + $0x12a0] sm:$0xff]  ;;  %v1385_v43 = vcombine.high %v8700_v27, %v8700_v27 }
 0x11d   :  { %v8670_v10 = vadd.f32 %v4365_v33, %v1801_v4  ;;  %6077 = vmatpush3.bf16.msra.mxu0 %v6076_v61  ;;  %v618_v32 = vld [vmem:[%s10611_s1 + $0x1218] sm:$0xff]  ;;  %v649_v42 = vld [vmem:[%s10611_s1 + $0x1310] sm:$0xff]  ;;  %v6150_v34 = vpack.c.bf16 %v666_v25, %v665_v24  ;;  %v636_v37 = vld [vmem:[%s10611_s1 + $0x12a8] sm:$0xff] }
 0x11e   :  { %6079 = vmatprep.subr.bf16.mxu0 %v6078_v0  ;;  %v650_v35 = vld [vmem:[%s10611_s1 + $0x1318] sm:$0xff]  ;;  %v667_v40 = vld [vmem:[%s10611_s1 + $0x13a0] sm:$0xff]  ;;  %v668_v41 = vld [vmem:[%s10611_s1 + $0x13a8] sm:$0xff]  ;;  %v6120_v44 = vpack.c.bf16 %v618_v32, %v617_v30  ;;  %v6122_v47 = vpack.c.bf16 %v636_v37, %v635_v36 }
 0x11f   :  { %6109 = vmatpush3.bf16.msra.mxu1 %v6108_v63  ;;  %v6152_v46 = vpack.c.bf16 %v650_v35, %v649_v42  ;;  %v620_v48 = vld [vmem:[%s10611_s1 + $0x1228] sm:$0xff]  ;;  %v651_v49 = vld [vmem:[%s10611_s1 + $0x1320] sm:$0xff]  ;;  %v6154_v50 = vpack.c.bf16 %v668_v41, %v667_v40  ;;  %v637_v53 = vld [vmem:[%s10611_s1 + $0x12b0] sm:$0xff] }
 0x120   :  { %6111 = vmatprep.subr.bf16.mxu1 %v6110_v5  ;;  %v638_v54 = vld [vmem:[%s10611_s1 + $0x12b8] sm:$0xff]  ;;  %v669_v55 = vld [vmem:[%s10611_s1 + $0x13b0] sm:$0xff]  ;;  %v639_v33 = vld [vmem:[%s10611_s1 + $0x12c0] sm:$0xff] }
 0x121   :  { %6081 = vmatpush3.bf16.msra.mxu0 %v6080_v12  ;;  %v670_v56 = vld [vmem:[%s10611_s1 + $0x13b8] sm:$0xff]  ;;  %v6126_v58 = vpack.c.bf16 %v638_v54, %v637_v53  ;;  %v621_v59 = vld [vmem:[%s10611_s1 + $0x1230] sm:$0xff]  ;;  %v640_v63 = vld [vmem:[%s10611_s1 + $0x12c8] sm:$0xff] }
 0x122   :  { %6115 = vmatprep.subr.bf16.mxu0 %v6114_v15  ;;  %v622_v51 = vld [vmem:[%s10611_s1 + $0x1238] sm:$0xff]  ;;  %v653_v60 = vld [vmem:[%s10611_s1 + $0x1330] sm:$0xff]  ;;  %v6158_v61 = vpack.c.bf16 %v670_v56, %v669_v55  ;;  %v671_v0 = vld [vmem:[%s10611_s1 + $0x13c0] sm:$0xff]  ;;  %v6130_v4 = vpack.c.bf16 %v640_v63, %v639_v33 }
 0x123   :  { %6113 = vmatpush3.bf16.msra.mxu1 %v6112_v14  ;;  %v654_v62 = vld [vmem:[%s10611_s1 + $0x1338] sm:$0xff]  ;;  %v672_v1 = vld [vmem:[%s10611_s1 + $0x13c8] sm:$0xff]  ;;  %v6128_v2 = vpack.c.bf16 %v622_v51, %v621_v59  ;;  %v623_v5 = vld [vmem:[%s10611_s1 + $0x1240] sm:$0xff] }
 0x124   :  { %6147 = vmatprep.subr.bf16.mxu1 %v6146_v19  ;;  %2779 = vmatmul.mubr.f32.vlgmr.msra.gmra.mrb[16].mxu0 %v8481_v52  ;;  %v619_v52 = vld [vmem:[%s10611_s1 + $0x1220] sm:$0xff]  ;;  %v6160_v3 = vpack.c.bf16 %v654_v62, %v653_v60  ;;  %v624_v6 = vld [vmem:[%s10611_s1 + $0x1248] sm:$0xff]  ;;  %v6162_v7 = vpack.c.bf16 %v672_v1, %v671_v0  ;;  %v641_v26 = vld [vmem:[%s10611_s1 + $0x12d0] sm:$0xff] }
 0x125   :  { %6117 = vmatpush3.bf16.msra.mxu0 %v6116_v28  ;;  %2918 = vmatprep.mubr.f32.mxu0 %v1384_v38  ;;  %v6124_v57 = vpack.c.bf16 %v620_v48, %v619_v52  ;;  %v655_v8 = vld [vmem:[%s10611_s1 + $0x1340] sm:$0xff]  ;;  %v656_v9 = vld [vmem:[%s10611_s1 + $0x1348] sm:$0xff]  ;;  %v642_v11 = vld [vmem:[%s10611_s1 + $0x12d8] sm:$0xff]  ;;  %v6132_v15 = vpack.c.bf16 %v624_v6, %v623_v5 }
 0x126   :  { %2849 = vmatmul.mubr.f32.vlgmr.msra.gmra.mrb[16].mxu1 %v8490_v39  ;;  %6119 = vmatprep.subr.bf16.mxu0 %v6118_v31  ;;  %v652_v39 = vld [vmem:[%s10611_s1 + $0x1328] sm:$0xff]  ;;  %v673_v12 = vld [vmem:[%s10611_s1 + $0x13d0] sm:$0xff]  ;;  %v674_v14 = vld [vmem:[%s10611_s1 + $0x13d8] sm:$0xff]  ;;  %v6164_v16 = vpack.c.bf16 %v656_v9, %v655_v8  ;;  %v6134_v17 = vpack.c.bf16 %v642_v11, %v641_v26 }
 0x127   :  { %6149 = vmatpush3.bf16.msra.mxu1 %v6148_v29  ;;  %2988 = vmatprep.mubr.f32.mxu1 %v1385_v43  ;;  %v6156_v45 = vpack.c.bf16 %v652_v39, %v651_v49  ;;  %v625_v18 = vld [vmem:[%s10611_s1 + $0x1250] sm:$0xff]  ;;  %v626_v19 = vld [vmem:[%s10611_s1 + $0x1258] sm:$0xff]  ;;  %v6166_v21 = vpack.c.bf16 %v674_v14, %v673_v12  ;;  %v643_v24 = vld [vmem:[%s10611_s1 + $0x12e0] sm:$0xff] }
 0x128   :  { %6151 = vmatprep.subr.bf16.mxu1 %v6150_v34  ;;  %v657_v20 = vld [vmem:[%s10611_s1 + $0x1350] sm:$0xff]  ;;  %v658_v22 = vld [vmem:[%s10611_s1 + $0x1358] sm:$0xff]  ;;  %v644_v25 = vld [vmem:[%s10611_s1 + $0x12e8] sm:$0xff]  ;;  %v6136_v31 = vpack.c.bf16 %v626_v19, %v625_v18 }
 0x129   :  { %6121 = vmatpush3.bf16.msra.mxu0 %v6120_v44  ;;  %v675_v28 = vld [vmem:[%s10611_s1 + $0x13e0] sm:$0xff]  ;;  %v676_v29 = vld [vmem:[%s10611_s1 + $0x13e8] sm:$0xff]  ;;  %v6168_v30 = vpack.c.bf16 %v658_v22, %v657_v20  ;;  %v6138_v32 = vpack.c.bf16 %v644_v25, %v643_v24  ;;  %v645_v40 = vld [vmem:[%s10611_s1 + $0x12f0] sm:$0xff] }
 0x12a   :  { %6123 = vmatprep.subr.bf16.mxu0 %v6122_v47  ;;  %v627_v42 = vld [vmem:[%s10611_s1 + $0x1260] sm:$0xff]  ;;  %v628_v34 = vld [vmem:[%s10611_s1 + $0x1268] sm:$0xff]  ;;  %v6170_v37 = vpack.c.bf16 %v676_v29, %v675_v28  ;;  %v646_v41 = vld [vmem:[%s10611_s1 + $0x12f8] sm:$0xff] }
 0x12b   :  { %6153 = vmatpush3.bf16.msra.mxu1 %v6152_v46  ;;  %v659_v35 = vld [vmem:[%s10611_s1 + $0x1360] sm:$0xff]  ;;  %v660_v38 = vld [vmem:[%s10611_s1 + $0x1368] sm:$0xff]  ;;  %v677_v46 = vld [vmem:[%s10611_s1 + $0x13f0] sm:$0xff]  ;;  %v6140_v49 = vpack.c.bf16 %v628_v34, %v627_v42  ;;  %v6142_v54 = vpack.c.bf16 %v646_v41, %v645_v40 }
 0x12c   :  { %6155 = vmatprep.subr.bf16.mxu1 %v6154_v50  ;;  %v678_v47 = vld [vmem:[%s10611_s1 + $0x13f8] sm:$0xff]  ;;  %v31_v50 = vld [vmem:[%s10610_s0 + $0x50] sm:$0xff]  ;;  %v6172_v53 = vpack.c.bf16 %v660_v38, %v659_v35  ;;  %v695_v51 = vld [vmem:[%s10611_s1 + $0x1480] sm:$0xff] }
 0x12d   :  { %6125 = vmatpush3.bf16.msra.mxu0 %v6124_v57  ;;  %v629_v55 = vld [vmem:[%s10611_s1 + $0x1270] sm:$0xff]  ;;  %v630_v56 = vld [vmem:[%s10611_s1 + $0x1278] sm:$0xff]  ;;  %v696_v60 = vld [vmem:[%s10611_s1 + $0x1488] sm:$0xff]  ;;  %v1386_v62 = vcombine.high %v31_v50, %v31_v50  ;;  %v8901_v9 = vrot.slane %v31_v50, %v6946_v13 }
 0x12e   :  { %6127 = vmatprep.subr.bf16.mxu0 %v6126_v58  ;;  %v661_v57 = vld [vmem:[%s10611_s1 + $0x1370] sm:$0xff]  ;;  %v6174_v58 = vpack.c.bf16 %v678_v47, %v677_v46  ;;  %v662_v59 = vld [vmem:[%s10611_s1 + $0x1378] sm:$0xff]  ;;  %v6144_v63 = vpack.c.bf16 %v630_v56, %v629_v55  ;;  %v6178_v1 = vpack.c.bf16 %v696_v60, %v695_v51  ;;  %v712_v6 = vld [vmem:[%s10611_s1 + $0x1508] sm:$0xff] }
 0x12f   :  { %6157 = vmatpush3.bf16.msra.mxu1 %v6156_v45  ;;  %v6176_v0 = vpack.c.bf16 %v662_v59, %v661_v57  ;;  %v697_v8 = vld [vmem:[%s10611_s1 + $0x1490] sm:$0xff]  ;;  %v730_v11 = vld [vmem:[%s10611_s1 + $0x1598] sm:$0xff]  ;;  %v8910_v12 = vrot.slane %v1386_v62, %v6946_v13  ;;  %v699_v22 = vld [vmem:[%s10611_s1 + $0x14a0] sm:$0xff]  ;;  %v1401_v25 = vcombine.high %v8901_v9, %v8901_v9 }
 0x130   :  { %6159 = vmatprep.subr.bf16.mxu1 %v6158_v61  ;;  %v727_v61 = vld [vmem:[%s10611_s1 + $0x1580] sm:$0xff]  ;;  %v729_v26 = vld [vmem:[%s10611_s1 + $0x1590] sm:$0xff]  ;;  %v682_v18 = vld [vmem:[%s10611_s1 + $0x1418] sm:$0xff] }
 0x131   :  { %6129 = vmatpush3.bf16.msra.mxu0 %v6128_v2  ;;  %v679_v2 = vld [vmem:[%s10611_s1 + $0x1400] sm:$0xff]  ;;  %v713_v19 = vld [vmem:[%s10611_s1 + $0x1510] sm:$0xff]  ;;  %v6214_v20 = vpack.c.bf16 %v730_v11, %v729_v26  ;;  %v700_v24 = vld [vmem:[%s10611_s1 + $0x14a8] sm:$0xff] }
 0x132   :  { %6131 = vmatprep.subr.bf16.mxu0 %v6130_v4  ;;  %v711_v4 = vld [vmem:[%s10611_s1 + $0x1500] sm:$0xff]  ;;  %v732_v29 = vld [vmem:[%s10611_s1 + $0x15a8] sm:$0xff]  ;;  %v6186_v42 = vpack.c.bf16 %v700_v24, %v699_v22  ;;  %v702_v38 = vld [vmem:[%s10611_s1 + $0x14b8] sm:$0xff] }
 0x133   :  { %6161 = vmatpush3.bf16.msra.mxu1 %v6160_v3  ;;  %v680_v3 = vld [vmem:[%s10611_s1 + $0x1408] sm:$0xff]  ;;  %v731_v28 = vld [vmem:[%s10611_s1 + $0x15a0] sm:$0xff]  ;;  %v733_v40 = vld [vmem:[%s10611_s1 + $0x15b0] sm:$0xff] }
 0x134   :  { %6163 = vmatprep.subr.bf16.mxu1 %v6162_v7  ;;  %v698_v7 = vld [vmem:[%s10611_s1 + $0x1498] sm:$0xff]  ;;  %v6180_v14 = vpack.c.bf16 %v680_v3, %v679_v2  ;;  %v684_v34 = vld [vmem:[%s10611_s1 + $0x1428] sm:$0xff]  ;;  %v715_v35 = vld [vmem:[%s10611_s1 + $0x1520] sm:$0xff] }
 0x135   :  { %6133 = vmatpush3.bf16.msra.mxu0 %v6132_v15  ;;  %v6212_v15 = vpack.c.bf16 %v712_v6, %v711_v4  ;;  %v734_v41 = vld [vmem:[%s10611_s1 + $0x15b8] sm:$0xff]  ;;  %v685_v47 = vld [vmem:[%s10611_s1 + $0x1430] sm:$0xff]  ;;  %v736_v55 = vld [vmem:[%s10611_s1 + $0x15c8] sm:$0xff] }
 0x136   :  { %6135 = vmatprep.subr.bf16.mxu0 %v6134_v17  ;;  %v681_v17 = vld [vmem:[%s10611_s1 + $0x1410] sm:$0xff]  ;;  %v718_v50 = vld [vmem:[%s10611_s1 + $0x1538] sm:$0xff]  ;;  %v688_v59 = vld [vmem:[%s10611_s1 + $0x1448] sm:$0xff] }
 0x137   :  { %6165 = vmatpush3.bf16.msra.mxu1 %v6164_v16  ;;  %v4398_v36 = vpop.f32.mrb[4].mxu0  ;;  %v6182_v16 = vpack.c.bf16 %v698_v7, %v697_v8  ;;  %v719_v51 = vld [vmem:[%s10611_s1 + $0x1540] sm:$0xff]  ;;  %v706_v62 = vld [vmem:[%s10611_s1 + $0x14d8] sm:$0xff]  ;;  %v689_v4 = vld [vmem:[%s10611_s1 + $0x1450] sm:$0xff] }
 0x138   :  { %6167 = vmatprep.subr.bf16.mxu1 %v6166_v21  ;;  %v4399_v43 = vpop.f32.mrb[5].mxu0  ;;  %v714_v21 = vld [vmem:[%s10611_s1 + $0x1518] sm:$0xff]  ;;  %v721_v6 = vld [vmem:[%s10611_s1 + $0x1550] sm:$0xff]  ;;  %v707_v26 = vld [vmem:[%s10611_s1 + $0x14e0] sm:$0xff] }
 0x139   :  { %v4433_v44 = vpop.f32.mrb[4].mxu1  ;;  %v4400_v52 = vadd.f32 %v4399_v43, %v4398_v36  ;;  %6137 = vmatpush3.bf16.msra.mxu0 %v6136_v31  ;;  %v1402_v31 = vcombine.high %v8910_v12, %v8910_v12  ;;  %v6218_v36 = vpack.c.bf16 %v732_v29, %v731_v28  ;;  %v722_v7 = vld [vmem:[%s10611_s1 + $0x1558] sm:$0xff]  ;;  %v708_v11 = vld [vmem:[%s10611_s1 + $0x14e8] sm:$0xff]  ;;  %v709_v28 = vld [vmem:[%s10611_s1 + $0x14f0] sm:$0xff] }
 0x13a   :  { %v4434_v48 = vpop.f32.mrb[5].mxu1  ;;  %6139 = vmatprep.subr.bf16.mxu0 %v6138_v32  ;;  %v6216_v32 = vpack.c.bf16 %v714_v21, %v713_v19  ;;  %v691_v19 = vld [vmem:[%s10611_s1 + $0x1460] sm:$0xff]  ;;  %v710_v29 = vld [vmem:[%s10611_s1 + $0x14f8] sm:$0xff] }
 0x13b   :  { %v4435_v39 = vadd.f32 %v4434_v48, %v4433_v44  ;;  %6169 = vmatpush3.bf16.msra.mxu1 %v6168_v30  ;;  %v1941_v45 = vadd.f32 %v4400_v52, %v8670_v10  ;;  %v728_v10 = vld [vmem:[%s10611_s1 + $0x1588] sm:$0xff]  ;;  %v6184_v30 = vpack.c.bf16 %v682_v18, %v681_v17  ;;  %v686_v52 = vld [vmem:[%s10611_s1 + $0x1438] sm:$0xff]  ;;  %v717_v48 = vld [vmem:[%s10611_s1 + $0x1530] sm:$0xff]  ;;  %v6232_v17 = vpack.c.bf16 %v722_v7, %v721_v6 }
 0x13c   :  { %6171 = vmatprep.subr.bf16.mxu1 %v6170_v37  ;;  %v6210_v5 = vpack.c.bf16 %v728_v10, %v727_v61  ;;  %v701_v37 = vld [vmem:[%s10611_s1 + $0x14b0] sm:$0xff]  ;;  %v6192_v56 = vpack.c.bf16 %v686_v52, %v685_v47  ;;  %v6224_v57 = vpack.c.bf16 %v718_v50, %v717_v48  ;;  %v720_v61 = vld [vmem:[%s10611_s1 + $0x1548] sm:$0xff]  ;;  %v6202_v18 = vpack.c.bf16 %v708_v11, %v707_v26  ;;  %v723_v21 = vld [vmem:[%s10611_s1 + $0x1560] sm:$0xff] }
 0x13d   :  { %v8880_v33 = vadd.f32 %v4435_v39, %v1941_v45  ;;  %6141 = vmatpush3.bf16.msra.mxu0 %v6140_v49  ;;  %v6190_v46 = vpack.c.bf16 %v702_v38, %v701_v37  ;;  %v6222_v49 = vpack.c.bf16 %v734_v41, %v733_v40  ;;  %v703_v39 = vld [vmem:[%s10611_s1 + $0x14c0] sm:$0xff]  ;;  %v705_v10 = vld [vmem:[%s10611_s1 + $0x14d0] sm:$0xff]  ;;  %v6228_v2 = vpack.c.bf16 %v720_v61, %v719_v51  ;;  %v694_v41 = vld [vmem:[%s10611_s1 + $0x1478] sm:$0xff] }
 0x13e   :  { %6143 = vmatprep.subr.bf16.mxu0 %v6142_v54  ;;  %v735_v54 = vld [vmem:[%s10611_s1 + $0x15c0] sm:$0xff]  ;;  %v6198_v3 = vpack.c.bf16 %v706_v62, %v705_v10  ;;  %v6206_v38 = vpack.c.bf16 %v710_v29, %v709_v28  ;;  %v693_v40 = vld [vmem:[%s10611_s1 + $0x1470] sm:$0xff]  ;;  %v726_v47 = vld [vmem:[%s10611_s1 + $0x1578] sm:$0xff] }
 0x13f   :  { %6173 = vmatpush3.bf16.msra.mxu1 %v6172_v53  ;;  %v704_v53 = vld [vmem:[%s10611_s1 + $0x14c8] sm:$0xff]  ;;  %v6226_v60 = vpack.c.bf16 %v736_v55, %v735_v54  ;;  %v759_v52 = vld [vmem:[%s10611_s1 + $0x1680] sm:$0xff]  ;;  %v761_v51 = vld [vmem:[%s10611_s1 + $0x1690] sm:$0xff] }
 0x140   :  { %6175 = vmatprep.subr.bf16.mxu1 %v6174_v58  ;;  %v6194_v45 = vpack.c.bf16 %v704_v53, %v703_v39  ;;  %v687_v58 = vld [vmem:[%s10611_s1 + $0x1440] sm:$0xff]  ;;  %v760_v48 = vld [vmem:[%s10611_s1 + $0x1688] sm:$0xff]  ;;  %v6208_v53 = vpack.c.bf16 %v694_v41, %v693_v40  ;;  %v793_v10 = vld [vmem:[%s10611_s1 + $0x1790] sm:$0xff] }
 0x141   :  { %6145 = vmatpush3.bf16.msra.mxu0 %v6144_v63  ;;  %v737_v63 = vld [vmem:[%s10611_s1 + $0x15d0] sm:$0xff]  ;;  %v6242_v55 = vpack.c.bf16 %v760_v48, %v759_v52  ;;  %v794_v62 = vld [vmem:[%s10611_s1 + $0x1798] sm:$0xff]  ;;  %v763_v7 = vld [vmem:[%s10611_s1 + $0x16a0] sm:$0xff] }
 0x142   :  { %6179 = vmatprep.subr.bf16.mxu0 %v6178_v1  ;;  %v6196_v1 = vpack.c.bf16 %v688_v59, %v687_v58  ;;  %v776_v59 = vld [vmem:[%s10611_s1 + $0x1708] sm:$0xff]  ;;  %v6278_v6 = vpack.c.bf16 %v794_v62, %v793_v10  ;;  %v797_v28 = vld [vmem:[%s10611_s1 + $0x17b0] sm:$0xff]  ;;  %v798_v29 = vld [vmem:[%s10611_s1 + $0x17b8] sm:$0xff] }
 0x143   :  { %6177 = vmatpush3.bf16.msra.mxu1 %v6176_v0  ;;  %v738_v0 = vld [vmem:[%s10611_s1 + $0x15d8] sm:$0xff]  ;;  %v764_v26 = vld [vmem:[%s10611_s1 + $0x16a8] sm:$0xff]  ;;  %v783_v52 = vld [vmem:[%s10611_s1 + $0x1740] sm:$0xff] }
 0x144   :  { %6211 = vmatprep.subr.bf16.mxu1 %v6210_v5  ;;  %2919 = vmatmul.mubr.f32.vlgmr.msra.gmra.mrb[18].mxu0 %v8691_v23  ;;  %v683_v23 = vld [vmem:[%s10611_s1 + $0x1420] sm:$0xff]  ;;  %v690_v5 = vld [vmem:[%s10611_s1 + $0x1458] sm:$0xff]  ;;  %v6230_v8 = vpack.c.bf16 %v738_v0, %v737_v63  ;;  %v800_v40 = vld [vmem:[%s10611_s1 + $0x17c8] sm:$0xff] }
 0x145   :  { %6181 = vmatpush3.bf16.msra.mxu0 %v6180_v14  ;;  %3058 = vmatprep.mubr.f32.mxu0 %v1401_v25  ;;  %v6188_v43 = vpack.c.bf16 %v684_v34, %v683_v23  ;;  %v739_v14 = vld [vmem:[%s10611_s1 + $0x15e0] sm:$0xff]  ;;  %v724_v25 = vld [vmem:[%s10611_s1 + $0x1568] sm:$0xff] }
 0x146   :  { %2989 = vmatmul.mubr.f32.vlgmr.msra.gmra.mrb[18].mxu1 %v8700_v27  ;;  %6183 = vmatprep.subr.bf16.mxu0 %v6182_v16  ;;  %v716_v27 = vld [vmem:[%s10611_s1 + $0x1528] sm:$0xff]  ;;  %v6200_v16 = vpack.c.bf16 %v690_v5, %v689_v4  ;;  %v6236_v37 = vpack.c.bf16 %v724_v25, %v723_v21  ;;  %v746_v4 = vld [vmem:[%s10611_s1 + $0x1618] sm:$0xff]  ;;  %v777_v5 = vld [vmem:[%s10611_s1 + $0x1710] sm:$0xff] }
 0x147   :  { %6213 = vmatpush3.bf16.msra.mxu1 %v6212_v15  ;;  %3128 = vmatprep.mubr.f32.mxu1 %v1402_v31  ;;  %v6220_v44 = vpack.c.bf16 %v716_v27, %v715_v35  ;;  %v740_v15 = vld [vmem:[%s10611_s1 + $0x15e8] sm:$0xff]  ;;  %v779_v21 = vld [vmem:[%s10611_s1 + $0x1720] sm:$0xff]  ;;  %v766_v25 = vld [vmem:[%s10611_s1 + $0x16b8] sm:$0xff] }
 0x148   :  { %6215 = vmatprep.subr.bf16.mxu1 %v6214_v20  ;;  %v692_v20 = vld [vmem:[%s10611_s1 + $0x1468] sm:$0xff]  ;;  %v6234_v24 = vpack.c.bf16 %v740_v15, %v739_v14  ;;  %v795_v14 = vld [vmem:[%s10611_s1 + $0x17a0] sm:$0xff] }
 0x149   :  { %6185 = vmatpush3.bf16.msra.mxu0 %v6184_v30  ;;  %v6204_v35 = vpack.c.bf16 %v692_v20, %v691_v19  ;;  %v796_v15 = vld [vmem:[%s10611_s1 + $0x17a8] sm:$0xff]  ;;  %v6250_v19 = vpack.c.bf16 %v764_v26, %v763_v7  ;;  %v771_v10 = vld [vmem:[%s10611_s1 + $0x16e0] sm:$0xff] }
 0x14a   :  { %6187 = vmatprep.subr.bf16.mxu0 %v6186_v42  ;;  %v742_v42 = vld [vmem:[%s10611_s1 + $0x15f8] sm:$0xff]  ;;  %v748_v20 = vld [vmem:[%s10611_s1 + $0x1628] sm:$0xff] }
 0x14b   :  { %6217 = vmatpush3.bf16.msra.mxu1 %v6216_v32  ;;  %v741_v32 = vld [vmem:[%s10611_s1 + $0x15f0] sm:$0xff]  ;;  %v772_v62 = vld [vmem:[%s10611_s1 + $0x16e8] sm:$0xff] }
 0x14c   :  { %6219 = vmatprep.subr.bf16.mxu1 %v6218_v36  ;;  %v32_v36 = vld [vmem:[%s10610_s0 + $0x58] sm:$0xff] }
 0x14d   :  { %6189 = vmatpush3.bf16.msra.mxu0 %v6188_v43  ;;  %v725_v43 = vld [vmem:[%s10611_s1 + $0x1570] sm:$0xff]  ;;  %v1403_v50 = vcombine.high %v32_v36, %v32_v36  ;;  %v9111_v61 = vrot.slane %v32_v36, %v6946_v13  ;;  %v782_v36 = vld [vmem:[%s10611_s1 + $0x1738] sm:$0xff] }
 0x14e   :  { %6191 = vmatprep.subr.bf16.mxu0 %v6190_v46  ;;  %v6238_v46 = vpack.c.bf16 %v742_v42, %v741_v32  ;;  %v6240_v54 = vpack.c.bf16 %v726_v47, %v725_v43  ;;  %v749_v42 = vld [vmem:[%s10611_s1 + $0x1630] sm:$0xff]  ;;  %v752_v47 = vld [vmem:[%s10611_s1 + $0x1648] sm:$0xff] }
 0x14f   :  { %6221 = vmatpush3.bf16.msra.mxu1 %v6220_v44  ;;  %v9120_v63 = vrot.slane %v1403_v50, %v6946_v13  ;;  %v1418_v11 = vcombine.high %v9111_v61, %v9111_v61  ;;  %v770_v50 = vld [vmem:[%s10611_s1 + $0x16d8] sm:$0xff] }
 0x150   :  { %6223 = vmatprep.subr.bf16.mxu1 %v6222_v49  ;;  %v791_v49 = vld [vmem:[%s10611_s1 + $0x1780] sm:$0xff] }
 0x151   :  { %6193 = vmatpush3.bf16.msra.mxu0 %v6192_v56  ;;  %v743_v56 = vld [vmem:[%s10611_s1 + $0x1600] sm:$0xff] }
 0x152   :  { %6195 = vmatprep.subr.bf16.mxu0 %v6194_v45  ;;  %v775_v45 = vld [vmem:[%s10611_s1 + $0x1700] sm:$0xff] }
 0x153   :  { %6225 = vmatpush3.bf16.msra.mxu1 %v6224_v57  ;;  %v744_v57 = vld [vmem:[%s10611_s1 + $0x1608] sm:$0xff] }
 0x154   :  { %6227 = vmatprep.subr.bf16.mxu1 %v6226_v60  ;;  %v762_v60 = vld [vmem:[%s10611_s1 + $0x1698] sm:$0xff]  ;;  %v6244_v0 = vpack.c.bf16 %v744_v57, %v743_v56 }
 0x155   :  { %6197 = vmatpush3.bf16.msra.mxu0 %v6196_v1  ;;  %v6276_v1 = vpack.c.bf16 %v776_v59, %v775_v45  ;;  %v753_v45 = vld [vmem:[%s10611_s1 + $0x1650] sm:$0xff] }
 0x156   :  { %6199 = vmatprep.subr.bf16.mxu0 %v6198_v3  ;;  %v745_v3 = vld [vmem:[%s10611_s1 + $0x1610] sm:$0xff] }
 0x157   :  { %6229 = vmatpush3.bf16.msra.mxu1 %v6228_v2  ;;  %v4468_v22 = vpop.f32.mrb[6].mxu0  ;;  %v6246_v2 = vpack.c.bf16 %v762_v60, %v761_v51  ;;  %v785_v59 = vld [vmem:[%s10611_s1 + $0x1750] sm:$0xff]  ;;  %v786_v60 = vld [vmem:[%s10611_s1 + $0x1758] sm:$0xff] }
 0x158   :  { %6231 = vmatprep.subr.bf16.mxu1 %v6230_v8  ;;  %v4469_v31 = vpop.f32.mrb[7].mxu0  ;;  %v778_v8 = vld [vmem:[%s10611_s1 + $0x1718] sm:$0xff] }
 0x159   :  { %v4503_v30 = vpop.f32.mrb[6].mxu1  ;;  %v4470_v23 = vadd.f32 %v4469_v31, %v4468_v22  ;;  %6201 = vmatpush3.bf16.msra.mxu0 %v6200_v16  ;;  %v1419_v16 = vcombine.high %v9120_v63, %v9120_v63  ;;  %v6282_v22 = vpack.c.bf16 %v796_v15, %v795_v14  ;;  %v773_v14 = vld [vmem:[%s10611_s1 + $0x16f0] sm:$0xff]  ;;  %v774_v15 = vld [vmem:[%s10611_s1 + $0x16f8] sm:$0xff] }
 0x15a   :  { %v4504_v34 = vpop.f32.mrb[7].mxu1  ;;  %6203 = vmatprep.subr.bf16.mxu0 %v6202_v18  ;;  %v6280_v18 = vpack.c.bf16 %v778_v8, %v777_v5  ;;  %v755_v5 = vld [vmem:[%s10611_s1 + $0x1660] sm:$0xff] }
 0x15b   :  { %v4505_v27 = vadd.f32 %v4504_v34, %v4503_v30  ;;  %6233 = vmatpush3.bf16.msra.mxu1 %v6232_v17  ;;  %v2081_v44 = vadd.f32 %v4470_v23, %v8880_v33  ;;  %v792_v33 = vld [vmem:[%s10611_s1 + $0x1788] sm:$0xff]  ;;  %v6248_v17 = vpack.c.bf16 %v746_v4, %v745_v3  ;;  %v750_v23 = vld [vmem:[%s10611_s1 + $0x1638] sm:$0xff]  ;;  %v781_v34 = vld [vmem:[%s10611_s1 + $0x1730] sm:$0xff]  ;;  %v6296_v3 = vpack.c.bf16 %v786_v60, %v785_v59 }
 0x15c   :  { %6235 = vmatprep.subr.bf16.mxu1 %v6234_v24  ;;  %v6274_v58 = vpack.c.bf16 %v792_v33, %v791_v49  ;;  %v765_v24 = vld [vmem:[%s10611_s1 + $0x16b0] sm:$0xff]  ;;  %v6256_v41 = vpack.c.bf16 %v750_v23, %v749_v42  ;;  %v6288_v43 = vpack.c.bf16 %v782_v36, %v781_v34  ;;  %v784_v49 = vld [vmem:[%s10611_s1 + $0x1748] sm:$0xff]  ;;  %v6266_v4 = vpack.c.bf16 %v772_v62, %v771_v10  ;;  %v787_v8 = vld [vmem:[%s10611_s1 + $0x1760] sm:$0xff] }
 0x15d   :  { %v9090_v39 = vadd.f32 %v4505_v27, %v2081_v44  ;;  %6205 = vmatpush3.bf16.msra.mxu0 %v6204_v35  ;;  %v6254_v32 = vpack.c.bf16 %v766_v25, %v765_v24  ;;  %v6286_v35 = vpack.c.bf16 %v798_v29, %v797_v28  ;;  %v767_v27 = vld [vmem:[%s10611_s1 + $0x16c0] sm:$0xff]  ;;  %v769_v33 = vld [vmem:[%s10611_s1 + $0x16d0] sm:$0xff]  ;;  %v6292_v56 = vpack.c.bf16 %v784_v49, %v783_v52  ;;  %v758_v29 = vld [vmem:[%s10611_s1 + $0x1678] sm:$0xff] }
 0x15e   :  { %6207 = vmatprep.subr.bf16.mxu0 %v6206_v38  ;;  %v799_v38 = vld [vmem:[%s10611_s1 + $0x17c0] sm:$0xff]  ;;  %v6262_v57 = vpack.c.bf16 %v770_v50, %v769_v33  ;;  %v6270_v25 = vpack.c.bf16 %v774_v15, %v773_v14  ;;  %v757_v28 = vld [vmem:[%s10611_s1 + $0x1670] sm:$0xff]  ;;  %v790_v42 = vld [vmem:[%s10611_s1 + $0x1778] sm:$0xff] }
 0x15f   :  { %6237 = vmatpush3.bf16.msra.mxu1 %v6236_v37  ;;  %v768_v37 = vld [vmem:[%s10611_s1 + $0x16c8] sm:$0xff]  ;;  %v6290_v48 = vpack.c.bf16 %v800_v40, %v799_v38  ;;  %v823_v23 = vld [vmem:[%s10611_s1 + $0x1880] sm:$0xff]  ;;  %v825_v52 = vld [vmem:[%s10611_s1 + $0x1890] sm:$0xff] }
 0x160   :  { %6239 = vmatprep.subr.bf16.mxu1 %v6238_v46  ;;  %v6258_v44 = vpack.c.bf16 %v768_v37, %v767_v27  ;;  %v751_v46 = vld [vmem:[%s10611_s1 + $0x1640] sm:$0xff]  ;;  %v824_v34 = vld [vmem:[%s10611_s1 + $0x1888] sm:$0xff]  ;;  %v6272_v37 = vpack.c.bf16 %v758_v29, %v757_v28  ;;  %v857_v33 = vld [vmem:[%s10611_s1 + $0x1990] sm:$0xff] }
 0x161   :  { %6209 = vmatpush3.bf16.msra.mxu0 %v6208_v53  ;;  %v801_v53 = vld [vmem:[%s10611_s1 + $0x17d0] sm:$0xff]  ;;  %v6306_v40 = vpack.c.bf16 %v824_v34, %v823_v23  ;;  %v858_v50 = vld [vmem:[%s10611_s1 + $0x1998] sm:$0xff]  ;;  %v827_v60 = vld [vmem:[%s10611_s1 + $0x18a0] sm:$0xff] }
 0x162   :  { %6243 = vmatprep.subr.bf16.mxu0 %v6242_v55  ;;  %v6260_v55 = vpack.c.bf16 %v752_v47, %v751_v46  ;;  %v840_v47 = vld [vmem:[%s10611_s1 + $0x1908] sm:$0xff]  ;;  %v6342_v59 = vpack.c.bf16 %v858_v50, %v857_v33  ;;  %v861_v14 = vld [vmem:[%s10611_s1 + $0x19b0] sm:$0xff]  ;;  %v862_v15 = vld [vmem:[%s10611_s1 + $0x19b8] sm:$0xff] }
 0x163   :  { %6241 = vmatpush3.bf16.msra.mxu1 %v6240_v54  ;;  %v802_v54 = vld [vmem:[%s10611_s1 + $0x17d8] sm:$0xff]  ;;  %v828_v10 = vld [vmem:[%s10611_s1 + $0x18a8] sm:$0xff]  ;;  %v847_v23 = vld [vmem:[%s10611_s1 + $0x1940] sm:$0xff] }
 0x164   :  { %6275 = vmatprep.subr.bf16.mxu1 %v6274_v58  ;;  %3059 = vmatmul.mubr.f32.vlgmr.msra.gmra.mrb[20].mxu0 %v8901_v9  ;;  %v747_v9 = vld [vmem:[%s10611_s1 + $0x1620] sm:$0xff]  ;;  %v754_v58 = vld [vmem:[%s10611_s1 + $0x1658] sm:$0xff]  ;;  %v6294_v51 = vpack.c.bf16 %v802_v54, %v801_v53  ;;  %v864_v28 = vld [vmem:[%s10611_s1 + $0x19c8] sm:$0xff] }
 0x165   :  { %6245 = vmatpush3.bf16.msra.mxu0 %v6244_v0  ;;  %3198 = vmatprep.mubr.f32.mxu0 %v1418_v11  ;;  %v6252_v31 = vpack.c.bf16 %v748_v20, %v747_v9  ;;  %v803_v0 = vld [vmem:[%s10611_s1 + $0x17e0] sm:$0xff]  ;;  %v788_v11 = vld [vmem:[%s10611_s1 + $0x1768] sm:$0xff] }
 0x166   :  { %3129 = vmatmul.mubr.f32.vlgmr.msra.gmra.mrb[20].mxu1 %v8910_v12  ;;  %6247 = vmatprep.subr.bf16.mxu0 %v6246_v2  ;;  %v780_v12 = vld [vmem:[%s10611_s1 + $0x1728] sm:$0xff]  ;;  %v6264_v2 = vpack.c.bf16 %v754_v58, %v753_v45  ;;  %v6300_v24 = vpack.c.bf16 %v788_v11, %v787_v8  ;;  %v810_v45 = vld [vmem:[%s10611_s1 + $0x1818] sm:$0xff]  ;;  %v841_v58 = vld [vmem:[%s10611_s1 + $0x1910] sm:$0xff] }
 0x167   :  { %6277 = vmatpush3.bf16.msra.mxu1 %v6276_v1  ;;  %3268 = vmatprep.mubr.f32.mxu1 %v1419_v16  ;;  %v6284_v30 = vpack.c.bf16 %v780_v12, %v779_v21  ;;  %v804_v1 = vld [vmem:[%s10611_s1 + $0x17e8] sm:$0xff]  ;;  %v843_v8 = vld [vmem:[%s10611_s1 + $0x1920] sm:$0xff]  ;;  %v830_v11 = vld [vmem:[%s10611_s1 + $0x18b8] sm:$0xff] }
 0x168   :  { %6279 = vmatprep.subr.bf16.mxu1 %v6278_v6  ;;  %v756_v6 = vld [vmem:[%s10611_s1 + $0x1668] sm:$0xff]  ;;  %v6298_v26 = vpack.c.bf16 %v804_v1, %v803_v0  ;;  %v859_v0 = vld [vmem:[%s10611_s1 + $0x19a0] sm:$0xff] }
 0x169   :  { %6249 = vmatpush3.bf16.msra.mxu0 %v6248_v17  ;;  %v6268_v21 = vpack.c.bf16 %v756_v6, %v755_v5  ;;  %v860_v1 = vld [vmem:[%s10611_s1 + $0x19a8] sm:$0xff]  ;;  %v6314_v5 = vpack.c.bf16 %v828_v10, %v827_v60  ;;  %v835_v33 = vld [vmem:[%s10611_s1 + $0x18e0] sm:$0xff] }
 0x16a   :  { %6251 = vmatprep.subr.bf16.mxu0 %v6250_v19  ;;  %v806_v19 = vld [vmem:[%s10611_s1 + $0x17f8] sm:$0xff]  ;;  %v812_v6 = vld [vmem:[%s10611_s1 + $0x1828] sm:$0xff] }
 0x16b   :  { %6281 = vmatpush3.bf16.msra.mxu1 %v6280_v18  ;;  %v805_v18 = vld [vmem:[%s10611_s1 + $0x17f0] sm:$0xff]  ;;  %v836_v50 = vld [vmem:[%s10611_s1 + $0x18e8] sm:$0xff] }
 0x16c   :  { %6283 = vmatprep.subr.bf16.mxu1 %v6282_v22  ;;  %v33_v22 = vld [vmem:[%s10610_s0 + $0x60] sm:$0xff] }
 0x16d   :  { %6253 = vmatpush3.bf16.msra.mxu0 %v6252_v31  ;;  %v789_v31 = vld [vmem:[%s10611_s1 + $0x1770] sm:$0xff]  ;;  %v1420_v36 = vcombine.high %v33_v22, %v33_v22  ;;  %v9321_v49 = vrot.slane %v33_v22, %v6946_v13  ;;  %v846_v22 = vld [vmem:[%s10611_s1 + $0x1938] sm:$0xff] }
 0x16e   :  { %6255 = vmatprep.subr.bf16.mxu0 %v6254_v32  ;;  %v6302_v32 = vpack.c.bf16 %v806_v19, %v805_v18  ;;  %v6304_v38 = vpack.c.bf16 %v790_v42, %v789_v31  ;;  %v813_v19 = vld [vmem:[%s10611_s1 + $0x1830] sm:$0xff]  ;;  %v816_v42 = vld [vmem:[%s10611_s1 + $0x1848] sm:$0xff] }
 0x16f   :  { %6285 = vmatpush3.bf16.msra.mxu1 %v6284_v30  ;;  %v9330_v53 = vrot.slane %v1420_v36, %v6946_v13  ;;  %v1435_v62 = vcombine.high %v9321_v49, %v9321_v49  ;;  %v834_v36 = vld [vmem:[%s10611_s1 + $0x18d8] sm:$0xff] }
 0x170   :  { %6287 = vmatprep.subr.bf16.mxu1 %v6286_v35  ;;  %v855_v35 = vld [vmem:[%s10611_s1 + $0x1980] sm:$0xff] }
 0x171   :  { %6257 = vmatpush3.bf16.msra.mxu0 %v6256_v41  ;;  %v807_v41 = vld [vmem:[%s10611_s1 + $0x1800] sm:$0xff] }
 0x172   :  { %6259 = vmatprep.subr.bf16.mxu0 %v6258_v44  ;;  %v839_v44 = vld [vmem:[%s10611_s1 + $0x1900] sm:$0xff] }
 0x173   :  { %6289 = vmatpush3.bf16.msra.mxu1 %v6288_v43  ;;  %v808_v43 = vld [vmem:[%s10611_s1 + $0x1808] sm:$0xff] }
 0x174   :  { %6291 = vmatprep.subr.bf16.mxu1 %v6290_v48  ;;  %v826_v48 = vld [vmem:[%s10611_s1 + $0x1898] sm:$0xff]  ;;  %v6308_v54 = vpack.c.bf16 %v808_v43, %v807_v41 }
 0x175   :  { %6261 = vmatpush3.bf16.msra.mxu0 %v6260_v55  ;;  %v6340_v55 = vpack.c.bf16 %v840_v47, %v839_v44  ;;  %v817_v44 = vld [vmem:[%s10611_s1 + $0x1850] sm:$0xff] }
 0x176   :  { %6263 = vmatprep.subr.bf16.mxu0 %v6262_v57  ;;  %v809_v57 = vld [vmem:[%s10611_s1 + $0x1810] sm:$0xff] }
 0x177   :  { %6293 = vmatpush3.bf16.msra.mxu1 %v6292_v56  ;;  %v4538_v7 = vpop.f32.mrb[8].mxu0  ;;  %v6310_v56 = vpack.c.bf16 %v826_v48, %v825_v52  ;;  %v849_v47 = vld [vmem:[%s10611_s1 + $0x1950] sm:$0xff]  ;;  %v850_v48 = vld [vmem:[%s10611_s1 + $0x1958] sm:$0xff] }
 0x178   :  { %6295 = vmatprep.subr.bf16.mxu1 %v6294_v51  ;;  %v4539_v16 = vpop.f32.mrb[9].mxu0  ;;  %v842_v51 = vld [vmem:[%s10611_s1 + $0x1918] sm:$0xff] }
 0x179   :  { %v4573_v17 = vpop.f32.mrb[8].mxu1  ;;  %v4540_v9 = vadd.f32 %v4539_v16, %v4538_v7  ;;  %6265 = vmatpush3.bf16.msra.mxu0 %v6264_v2  ;;  %v1436_v2 = vcombine.high %v9330_v53, %v9330_v53  ;;  %v6346_v7 = vpack.c.bf16 %v860_v1, %v859_v0  ;;  %v837_v0 = vld [vmem:[%s10611_s1 + $0x18f0] sm:$0xff]  ;;  %v838_v1 = vld [vmem:[%s10611_s1 + $0x18f8] sm:$0xff] }
 0x17a   :  { %v4574_v20 = vpop.f32.mrb[9].mxu1  ;;  %6267 = vmatprep.subr.bf16.mxu0 %v6266_v4  ;;  %v6344_v4 = vpack.c.bf16 %v842_v51, %v841_v58  ;;  %v819_v58 = vld [vmem:[%s10611_s1 + $0x1860] sm:$0xff] }
 0x17b   :  { %v4575_v12 = vadd.f32 %v4574_v20, %v4573_v17  ;;  %6297 = vmatpush3.bf16.msra.mxu1 %v6296_v3  ;;  %v2221_v30 = vadd.f32 %v4540_v9, %v9090_v39  ;;  %v856_v39 = vld [vmem:[%s10611_s1 + $0x1988] sm:$0xff]  ;;  %v6312_v3 = vpack.c.bf16 %v810_v45, %v809_v57  ;;  %v814_v9 = vld [vmem:[%s10611_s1 + $0x1838] sm:$0xff]  ;;  %v845_v20 = vld [vmem:[%s10611_s1 + $0x1930] sm:$0xff]  ;;  %v6360_v57 = vpack.c.bf16 %v850_v48, %v849_v47 }
 0x17c   :  { %6299 = vmatprep.subr.bf16.mxu1 %v6298_v26  ;;  %v6338_v46 = vpack.c.bf16 %v856_v39, %v855_v35  ;;  %v829_v26 = vld [vmem:[%s10611_s1 + $0x18b0] sm:$0xff]  ;;  %v6320_v29 = vpack.c.bf16 %v814_v9, %v813_v19  ;;  %v6352_v31 = vpack.c.bf16 %v846_v22, %v845_v20  ;;  %v848_v35 = vld [vmem:[%s10611_s1 + $0x1948] sm:$0xff]  ;;  %v6330_v45 = vpack.c.bf16 %v836_v50, %v835_v33  ;;  %v851_v51 = vld [vmem:[%s10611_s1 + $0x1960] sm:$0xff] }
 0x17d   :  { %v9300_v27 = vadd.f32 %v4575_v12, %v2221_v30  ;;  %6269 = vmatpush3.bf16.msra.mxu0 %v6268_v21  ;;  %v6318_v18 = vpack.c.bf16 %v830_v11, %v829_v26  ;;  %v6350_v21 = vpack.c.bf16 %v862_v15, %v861_v14  ;;  %v831_v12 = vld [vmem:[%s10611_s1 + $0x18c0] sm:$0xff]  ;;  %v833_v39 = vld [vmem:[%s10611_s1 + $0x18d0] sm:$0xff]  ;;  %v6356_v41 = vpack.c.bf16 %v848_v35, %v847_v23  ;;  %v822_v15 = vld [vmem:[%s10611_s1 + $0x1878] sm:$0xff] }
 0x17e   :  { %6271 = vmatprep.subr.bf16.mxu0 %v6270_v25  ;;  %v863_v25 = vld [vmem:[%s10611_s1 + $0x19c0] sm:$0xff]  ;;  %v6326_v43 = vpack.c.bf16 %v834_v36, %v833_v39  ;;  %v6334_v11 = vpack.c.bf16 %v838_v1, %v837_v0  ;;  %v821_v14 = vld [vmem:[%s10611_s1 + $0x1870] sm:$0xff]  ;;  %v854_v19 = vld [vmem:[%s10611_s1 + $0x1978] sm:$0xff] }
 0x17f   :  { %6301 = vmatpush3.bf16.msra.mxu1 %v6300_v24  ;;  %v832_v24 = vld [vmem:[%s10611_s1 + $0x18c8] sm:$0xff]  ;;  %v6354_v34 = vpack.c.bf16 %v864_v28, %v863_v25  ;;  %v887_v9 = vld [vmem:[%s10611_s1 + $0x1a80] sm:$0xff]  ;;  %v889_v23 = vld [vmem:[%s10611_s1 + $0x1a90] sm:$0xff] }
 0x180   :  { %6303 = vmatprep.subr.bf16.mxu1 %v6302_v32  ;;  %v6322_v30 = vpack.c.bf16 %v832_v24, %v831_v12  ;;  %v815_v32 = vld [vmem:[%s10611_s1 + $0x1840] sm:$0xff]  ;;  %v888_v20 = vld [vmem:[%s10611_s1 + $0x1a88] sm:$0xff]  ;;  %v6336_v24 = vpack.c.bf16 %v822_v15, %v821_v14  ;;  %v921_v39 = vld [vmem:[%s10611_s1 + $0x1b90] sm:$0xff] }
 0x181   :  { %6273 = vmatpush3.bf16.msra.mxu0 %v6272_v37  ;;  %v865_v37 = vld [vmem:[%s10611_s1 + $0x19d0] sm:$0xff]  ;;  %v6370_v28 = vpack.c.bf16 %v888_v20, %v887_v9  ;;  %v922_v36 = vld [vmem:[%s10611_s1 + $0x1b98] sm:$0xff]  ;;  %v891_v48 = vld [vmem:[%s10611_s1 + $0x1aa0] sm:$0xff] }
 0x182   :  { %6307 = vmatprep.subr.bf16.mxu0 %v6306_v40  ;;  %v6324_v40 = vpack.c.bf16 %v816_v42, %v815_v32  ;;  %v904_v42 = vld [vmem:[%s10611_s1 + $0x1b08] sm:$0xff]  ;;  %v6406_v47 = vpack.c.bf16 %v922_v36, %v921_v39  ;;  %v925_v0 = vld [vmem:[%s10611_s1 + $0x1bb0] sm:$0xff]  ;;  %v926_v1 = vld [vmem:[%s10611_s1 + $0x1bb8] sm:$0xff] }
 0x183   :  { %6305 = vmatpush3.bf16.msra.mxu1 %v6304_v38  ;;  %v866_v38 = vld [vmem:[%s10611_s1 + $0x19d8] sm:$0xff]  ;;  %v892_v33 = vld [vmem:[%s10611_s1 + $0x1aa8] sm:$0xff]  ;;  %v911_v9 = vld [vmem:[%s10611_s1 + $0x1b40] sm:$0xff] }
 0x184   :  { %6339 = vmatprep.subr.bf16.mxu1 %v6338_v46  ;;  %3199 = vmatmul.mubr.f32.vlgmr.msra.gmra.mrb[22].mxu0 %v9111_v61  ;;  %v811_v61 = vld [vmem:[%s10611_s1 + $0x1820] sm:$0xff]  ;;  %v818_v46 = vld [vmem:[%s10611_s1 + $0x1858] sm:$0xff]  ;;  %v6358_v52 = vpack.c.bf16 %v866_v38, %v865_v37  ;;  %v928_v14 = vld [vmem:[%s10611_s1 + $0x1bc8] sm:$0xff] }
 0x185   :  { %6309 = vmatpush3.bf16.msra.mxu0 %v6308_v54  ;;  %3338 = vmatprep.mubr.f32.mxu0 %v1435_v62  ;;  %v6316_v16 = vpack.c.bf16 %v812_v6, %v811_v61  ;;  %v867_v54 = vld [vmem:[%s10611_s1 + $0x19e0] sm:$0xff]  ;;  %v852_v62 = vld [vmem:[%s10611_s1 + $0x1968] sm:$0xff] }
 0x186   :  { %3269 = vmatmul.mubr.f32.vlgmr.msra.gmra.mrb[22].mxu1 %v9120_v63  ;;  %6311 = vmatprep.subr.bf16.mxu0 %v6310_v56  ;;  %v844_v63 = vld [vmem:[%s10611_s1 + $0x1928] sm:$0xff]  ;;  %v6328_v56 = vpack.c.bf16 %v818_v46, %v817_v44  ;;  %v6364_v26 = vpack.c.bf16 %v852_v62, %v851_v51  ;;  %v874_v44 = vld [vmem:[%s10611_s1 + $0x1a18] sm:$0xff]  ;;  %v905_v46 = vld [vmem:[%s10611_s1 + $0x1b10] sm:$0xff] }
 0x187   :  { %6341 = vmatpush3.bf16.msra.mxu1 %v6340_v55  ;;  %3408 = vmatprep.mubr.f32.mxu1 %v1436_v2  ;;  %v6348_v17 = vpack.c.bf16 %v844_v63, %v843_v8  ;;  %v868_v55 = vld [vmem:[%s10611_s1 + $0x19e8] sm:$0xff]  ;;  %v907_v51 = vld [vmem:[%s10611_s1 + $0x1b20] sm:$0xff]  ;;  %v894_v62 = vld [vmem:[%s10611_s1 + $0x1ab8] sm:$0xff] }
 0x188   :  { %6343 = vmatprep.subr.bf16.mxu1 %v6342_v59  ;;  %v820_v59 = vld [vmem:[%s10611_s1 + $0x1868] sm:$0xff]  ;;  %v6362_v10 = vpack.c.bf16 %v868_v55, %v867_v54  ;;  %v923_v54 = vld [vmem:[%s10611_s1 + $0x1ba0] sm:$0xff] }
 0x189   :  { %6313 = vmatpush3.bf16.msra.mxu0 %v6312_v3  ;;  %v6332_v8 = vpack.c.bf16 %v820_v59, %v819_v58  ;;  %v924_v55 = vld [vmem:[%s10611_s1 + $0x1ba8] sm:$0xff]  ;;  %v6378_v58 = vpack.c.bf16 %v892_v33, %v891_v48  ;;  %v899_v39 = vld [vmem:[%s10611_s1 + $0x1ae0] sm:$0xff] }
 0x18a   :  { %6315 = vmatprep.subr.bf16.mxu0 %v6314_v5  ;;  %v870_v5 = vld [vmem:[%s10611_s1 + $0x19f8] sm:$0xff]  ;;  %v876_v59 = vld [vmem:[%s10611_s1 + $0x1a28] sm:$0xff] }
 0x18b   :  { %6345 = vmatpush3.bf16.msra.mxu1 %v6344_v4  ;;  %v869_v4 = vld [vmem:[%s10611_s1 + $0x19f0] sm:$0xff]  ;;  %v900_v36 = vld [vmem:[%s10611_s1 + $0x1ae8] sm:$0xff] }
 0x18c   :  { %6347 = vmatprep.subr.bf16.mxu1 %v6346_v7  ;;  %v34_v7 = vld [vmem:[%s10610_s0 + $0x68] sm:$0xff] }
 0x18d   :  { %6317 = vmatpush3.bf16.msra.mxu0 %v6316_v16  ;;  %v853_v16 = vld [vmem:[%s10611_s1 + $0x1970] sm:$0xff]  ;;  %v1437_v22 = vcombine.high %v34_v7, %v34_v7  ;;  %v9531_v35 = vrot.slane %v34_v7, %v6946_v13  ;;  %v910_v7 = vld [vmem:[%s10611_s1 + $0x1b38] sm:$0xff] }
 0x18e   :  { %6319 = vmatprep.subr.bf16.mxu0 %v6318_v18  ;;  %v6366_v18 = vpack.c.bf16 %v870_v5, %v869_v4  ;;  %v6368_v25 = vpack.c.bf16 %v854_v19, %v853_v16  ;;  %v877_v5 = vld [vmem:[%s10611_s1 + $0x1a30] sm:$0xff]  ;;  %v880_v19 = vld [vmem:[%s10611_s1 + $0x1a48] sm:$0xff] }
 0x18f   :  { %6349 = vmatpush3.bf16.msra.mxu1 %v6348_v17  ;;  %v9540_v37 = vrot.slane %v1437_v22, %v6946_v13  ;;  %v1452_v50 = vcombine.high %v9531_v35, %v9531_v35  ;;  %v898_v22 = vld [vmem:[%s10611_s1 + $0x1ad8] sm:$0xff] }
 0x190   :  { %6351 = vmatprep.subr.bf16.mxu1 %v6350_v21  ;;  %v919_v21 = vld [vmem:[%s10611_s1 + $0x1b80] sm:$0xff] }
 0x191   :  { %6321 = vmatpush3.bf16.msra.mxu0 %v6320_v29  ;;  %v871_v29 = vld [vmem:[%s10611_s1 + $0x1a00] sm:$0xff] }
 0x192   :  { %6323 = vmatprep.subr.bf16.mxu0 %v6322_v30  ;;  %v903_v30 = vld [vmem:[%s10611_s1 + $0x1b00] sm:$0xff] }
 0x193   :  { %6353 = vmatpush3.bf16.msra.mxu1 %v6352_v31  ;;  %v872_v31 = vld [vmem:[%s10611_s1 + $0x1a08] sm:$0xff] }
 0x194   :  { %6355 = vmatprep.subr.bf16.mxu1 %v6354_v34  ;;  %v890_v34 = vld [vmem:[%s10611_s1 + $0x1a98] sm:$0xff]  ;;  %v6372_v38 = vpack.c.bf16 %v872_v31, %v871_v29 }
 0x195   :  { %6325 = vmatpush3.bf16.msra.mxu0 %v6324_v40  ;;  %v6404_v40 = vpack.c.bf16 %v904_v42, %v903_v30  ;;  %v881_v30 = vld [vmem:[%s10611_s1 + $0x1a50] sm:$0xff] }
 0x196   :  { %6327 = vmatprep.subr.bf16.mxu0 %v6326_v43  ;;  %v873_v43 = vld [vmem:[%s10611_s1 + $0x1a10] sm:$0xff] }
 0x197   :  { %6357 = vmatpush3.bf16.msra.mxu1 %v6356_v41  ;;  %v4608_v60 = vpop.f32.mrb[10].mxu0  ;;  %v6374_v41 = vpack.c.bf16 %v890_v34, %v889_v23  ;;  %v913_v42 = vld [vmem:[%s10611_s1 + $0x1b50] sm:$0xff]  ;;  %v914_v34 = vld [vmem:[%s10611_s1 + $0x1b58] sm:$0xff] }
 0x198   :  { %6359 = vmatprep.subr.bf16.mxu1 %v6358_v52  ;;  %v4609_v2 = vpop.f32.mrb[11].mxu0  ;;  %v906_v52 = vld [vmem:[%s10611_s1 + $0x1b18] sm:$0xff] }
 0x199   :  { %v4643_v3 = vpop.f32.mrb[10].mxu1  ;;  %v4610_v61 = vadd.f32 %v4609_v2, %v4608_v60  ;;  %6329 = vmatpush3.bf16.msra.mxu0 %v6328_v56  ;;  %v1453_v56 = vcombine.high %v9540_v37, %v9540_v37  ;;  %v6410_v60 = vpack.c.bf16 %v924_v55, %v923_v54  ;;  %v901_v54 = vld [vmem:[%s10611_s1 + $0x1af0] sm:$0xff]  ;;  %v902_v55 = vld [vmem:[%s10611_s1 + $0x1af8] sm:$0xff] }
 0x19a   :  { %v4644_v6 = vpop.f32.mrb[11].mxu1  ;;  %6331 = vmatprep.subr.bf16.mxu0 %v6330_v45  ;;  %v6408_v45 = vpack.c.bf16 %v906_v52, %v905_v46  ;;  %v883_v46 = vld [vmem:[%s10611_s1 + $0x1a60] sm:$0xff] }
 0x19b   :  { %v4645_v63 = vadd.f32 %v4644_v6, %v4643_v3  ;;  %6361 = vmatpush3.bf16.msra.mxu1 %v6360_v57  ;;  %v2361_v17 = vadd.f32 %v4610_v61, %v9300_v27  ;;  %v920_v27 = vld [vmem:[%s10611_s1 + $0x1b88] sm:$0xff]  ;;  %v6376_v57 = vpack.c.bf16 %v874_v44, %v873_v43  ;;  %v878_v61 = vld [vmem:[%s10611_s1 + $0x1a38] sm:$0xff]  ;;  %v909_v6 = vld [vmem:[%s10611_s1 + $0x1b30] sm:$0xff]  ;;  %v6424_v43 = vpack.c.bf16 %v914_v34, %v913_v42 }
 0x19c   :  { %6363 = vmatprep.subr.bf16.mxu1 %v6362_v10  ;;  %v6402_v32 = vpack.c.bf16 %v920_v27, %v919_v21  ;;  %v893_v10 = vld [vmem:[%s10611_s1 + $0x1ab0] sm:$0xff]  ;;  %v6384_v15 = vpack.c.bf16 %v878_v61, %v877_v5  ;;  %v6416_v16 = vpack.c.bf16 %v910_v7, %v909_v6  ;;  %v912_v21 = vld [vmem:[%s10611_s1 + $0x1b48] sm:$0xff]  ;;  %v6394_v44 = vpack.c.bf16 %v900_v36, %v899_v39  ;;  %v915_v52 = vld [vmem:[%s10611_s1 + $0x1b60] sm:$0xff] }
 0x19d   :  { %v9510_v12 = vadd.f32 %v4645_v63, %v2361_v17  ;;  %6333 = vmatpush3.bf16.msra.mxu0 %v6332_v8  ;;  %v6382_v4 = vpack.c.bf16 %v894_v62, %v893_v10  ;;  %v6414_v8 = vpack.c.bf16 %v926_v1, %v925_v0  ;;  %v895_v63 = vld [vmem:[%s10611_s1 + $0x1ac0] sm:$0xff]  ;;  %v897_v27 = vld [vmem:[%s10611_s1 + $0x1ad0] sm:$0xff]  ;;  %v6420_v29 = vpack.c.bf16 %v912_v21, %v911_v9  ;;  %v886_v1 = vld [vmem:[%s10611_s1 + $0x1a78] sm:$0xff] }
 0x19e   :  { %6335 = vmatprep.subr.bf16.mxu0 %v6334_v11  ;;  %v927_v11 = vld [vmem:[%s10611_s1 + $0x1bc0] sm:$0xff]  ;;  %v6390_v31 = vpack.c.bf16 %v898_v22, %v897_v27  ;;  %v6398_v62 = vpack.c.bf16 %v902_v55, %v901_v54  ;;  %v885_v0 = vld [vmem:[%s10611_s1 + $0x1a70] sm:$0xff]  ;;  %v918_v5 = vld [vmem:[%s10611_s1 + $0x1b78] sm:$0xff] }
 0x19f   :  { %6365 = vmatpush3.bf16.msra.mxu1 %v6364_v26  ;;  %v896_v26 = vld [vmem:[%s10611_s1 + $0x1ac8] sm:$0xff]  ;;  %v6418_v20 = vpack.c.bf16 %v928_v14, %v927_v11  ;;  %v951_v61 = vld [vmem:[%s10611_s1 + $0x1c80] sm:$0xff]  ;;  %v953_v9 = vld [vmem:[%s10611_s1 + $0x1c90] sm:$0xff] }
 0x1a0   :  { %6367 = vmatprep.subr.bf16.mxu1 %v6366_v18  ;;  %v6386_v17 = vpack.c.bf16 %v896_v26, %v895_v63  ;;  %v879_v18 = vld [vmem:[%s10611_s1 + $0x1a40] sm:$0xff]  ;;  %v952_v6 = vld [vmem:[%s10611_s1 + $0x1c88] sm:$0xff]  ;;  %v6400_v26 = vpack.c.bf16 %v886_v1, %v885_v0  ;;  %v985_v27 = vld [vmem:[%s10611_s1 + $0x1d90] sm:$0xff] }
 0x1a1   :  { %6337 = vmatpush3.bf16.msra.mxu0 %v6336_v24  ;;  %v929_v24 = vld [vmem:[%s10611_s1 + $0x1bd0] sm:$0xff]  ;;  %v6434_v14 = vpack.c.bf16 %v952_v6, %v951_v61  ;;  %v986_v22 = vld [vmem:[%s10611_s1 + $0x1d98] sm:$0xff]  ;;  %v955_v34 = vld [vmem:[%s10611_s1 + $0x1ca0] sm:$0xff] }
 0x1a2   :  { %6371 = vmatprep.subr.bf16.mxu0 %v6370_v28  ;;  %v6388_v28 = vpack.c.bf16 %v880_v19, %v879_v18  ;;  %v968_v19 = vld [vmem:[%s10611_s1 + $0x1d08] sm:$0xff]  ;;  %v6470_v42 = vpack.c.bf16 %v986_v22, %v985_v27  ;;  %v989_v54 = vld [vmem:[%s10611_s1 + $0x1db0] sm:$0xff]  ;;  %v990_v55 = vld [vmem:[%s10611_s1 + $0x1db8] sm:$0xff] }
 0x1a3   :  { %6369 = vmatpush3.bf16.msra.mxu1 %v6368_v25  ;;  %v930_v25 = vld [vmem:[%s10611_s1 + $0x1bd8] sm:$0xff]  ;;  %v956_v39 = vld [vmem:[%s10611_s1 + $0x1ca8] sm:$0xff]  ;;  %v975_v61 = vld [vmem:[%s10611_s1 + $0x1d40] sm:$0xff] }
 0x1a4   :  { %6403 = vmatprep.subr.bf16.mxu1 %v6402_v32  ;;  %3339 = vmatmul.mubr.f32.vlgmr.msra.gmra.mrb[24].mxu0 %v9321_v49  ;;  %v875_v49 = vld [vmem:[%s10611_s1 + $0x1a20] sm:$0xff]  ;;  %v882_v32 = vld [vmem:[%s10611_s1 + $0x1a58] sm:$0xff]  ;;  %v6422_v23 = vpack.c.bf16 %v930_v25, %v929_v24  ;;  %v992_v0 = vld [vmem:[%s10611_s1 + $0x1dc8] sm:$0xff] }
 0x1a5   :  { %6373 = vmatpush3.bf16.msra.mxu0 %v6372_v38  ;;  %3478 = vmatprep.mubr.f32.mxu0 %v1452_v50  ;;  %v6380_v2 = vpack.c.bf16 %v876_v59, %v875_v49  ;;  %v931_v38 = vld [vmem:[%s10611_s1 + $0x1be0] sm:$0xff]  ;;  %v916_v50 = vld [vmem:[%s10611_s1 + $0x1b68] sm:$0xff] }
 0x1a6   :  { %3409 = vmatmul.mubr.f32.vlgmr.msra.gmra.mrb[24].mxu1 %v9330_v53  ;;  %6375 = vmatprep.subr.bf16.mxu0 %v6374_v41  ;;  %v908_v53 = vld [vmem:[%s10611_s1 + $0x1b28] sm:$0xff]  ;;  %v6392_v41 = vpack.c.bf16 %v882_v32, %v881_v30  ;;  %v6428_v10 = vpack.c.bf16 %v916_v50, %v915_v52  ;;  %v938_v30 = vld [vmem:[%s10611_s1 + $0x1c18] sm:$0xff]  ;;  %v969_v32 = vld [vmem:[%s10611_s1 + $0x1d10] sm:$0xff] }
 0x1a7   :  { %6405 = vmatpush3.bf16.msra.mxu1 %v6404_v40  ;;  %3548 = vmatprep.mubr.f32.mxu1 %v1453_v56  ;;  %v6412_v3 = vpack.c.bf16 %v908_v53, %v907_v51  ;;  %v932_v40 = vld [vmem:[%s10611_s1 + $0x1be8] sm:$0xff]  ;;  %v971_v52 = vld [vmem:[%s10611_s1 + $0x1d20] sm:$0xff]  ;;  %v958_v50 = vld [vmem:[%s10611_s1 + $0x1cb8] sm:$0xff] }
 0x1a8   :  { %6407 = vmatprep.subr.bf16.mxu1 %v6406_v47  ;;  %v884_v47 = vld [vmem:[%s10611_s1 + $0x1a68] sm:$0xff]  ;;  %v6426_v33 = vpack.c.bf16 %v932_v40, %v931_v38  ;;  %v987_v38 = vld [vmem:[%s10611_s1 + $0x1da0] sm:$0xff] }
 0x1a9   :  { %6377 = vmatpush3.bf16.msra.mxu0 %v6376_v57  ;;  %v6396_v51 = vpack.c.bf16 %v884_v47, %v883_v46  ;;  %v988_v40 = vld [vmem:[%s10611_s1 + $0x1da8] sm:$0xff]  ;;  %v6442_v46 = vpack.c.bf16 %v956_v39, %v955_v34  ;;  %v963_v27 = vld [vmem:[%s10611_s1 + $0x1ce0] sm:$0xff] }
 0x1aa   :  { %6379 = vmatprep.subr.bf16.mxu0 %v6378_v58  ;;  %v934_v58 = vld [vmem:[%s10611_s1 + $0x1bf8] sm:$0xff]  ;;  %v940_v47 = vld [vmem:[%s10611_s1 + $0x1c28] sm:$0xff] }
 0x1ab   :  { %6409 = vmatpush3.bf16.msra.mxu1 %v6408_v45  ;;  %v933_v45 = vld [vmem:[%s10611_s1 + $0x1bf0] sm:$0xff]  ;;  %v964_v22 = vld [vmem:[%s10611_s1 + $0x1ce8] sm:$0xff] }
 0x1ac   :  { %6411 = vmatprep.subr.bf16.mxu1 %v6410_v60  ;;  %v35_v60 = vld [vmem:[%s10610_s0 + $0x70] sm:$0xff] }
 0x1ad   :  { %6381 = vmatpush3.bf16.msra.mxu0 %v6380_v2  ;;  %v917_v2 = vld [vmem:[%s10611_s1 + $0x1b70] sm:$0xff]  ;;  %v1454_v7 = vcombine.high %v35_v60, %v35_v60  ;;  %v9741_v21 = vrot.slane %v35_v60, %v6946_v13  ;;  %v974_v60 = vld [vmem:[%s10611_s1 + $0x1d38] sm:$0xff] }
 0x1ae   :  { %6383 = vmatprep.subr.bf16.mxu0 %v6382_v4  ;;  %v6430_v4 = vpack.c.bf16 %v934_v58, %v933_v45  ;;  %v6432_v11 = vpack.c.bf16 %v918_v5, %v917_v2  ;;  %v941_v58 = vld [vmem:[%s10611_s1 + $0x1c30] sm:$0xff]  ;;  %v944_v5 = vld [vmem:[%s10611_s1 + $0x1c48] sm:$0xff] }
 0x1af   :  { %6413 = vmatpush3.bf16.msra.mxu1 %v6412_v3  ;;  %v9750_v24 = vrot.slane %v1454_v7, %v6946_v13  ;;  %v1469_v36 = vcombine.high %v9741_v21, %v9741_v21  ;;  %v962_v7 = vld [vmem:[%s10611_s1 + $0x1cd8] sm:$0xff] }
 0x1b0   :  { %6415 = vmatprep.subr.bf16.mxu1 %v6414_v8  ;;  %v983_v8 = vld [vmem:[%s10611_s1 + $0x1d80] sm:$0xff] }
 0x1b1   :  { %6385 = vmatpush3.bf16.msra.mxu0 %v6384_v15  ;;  %v935_v15 = vld [vmem:[%s10611_s1 + $0x1c00] sm:$0xff] }
 0x1b2   :  { %6387 = vmatprep.subr.bf16.mxu0 %v6386_v17  ;;  %v967_v17 = vld [vmem:[%s10611_s1 + $0x1d00] sm:$0xff] }
 0x1b3   :  { %6417 = vmatpush3.bf16.msra.mxu1 %v6416_v16  ;;  %v936_v16 = vld [vmem:[%s10611_s1 + $0x1c08] sm:$0xff] }
 0x1b4   :  { %6419 = vmatprep.subr.bf16.mxu1 %v6418_v20  ;;  %v954_v20 = vld [vmem:[%s10611_s1 + $0x1c98] sm:$0xff]  ;;  %v6436_v25 = vpack.c.bf16 %v936_v16, %v935_v15 }
 0x1b5   :  { %6389 = vmatpush3.bf16.msra.mxu0 %v6388_v28  ;;  %v6468_v28 = vpack.c.bf16 %v968_v19, %v967_v17  ;;  %v945_v17 = vld [vmem:[%s10611_s1 + $0x1c50] sm:$0xff] }
 0x1b6   :  { %6391 = vmatprep.subr.bf16.mxu0 %v6390_v31  ;;  %v937_v31 = vld [vmem:[%s10611_s1 + $0x1c10] sm:$0xff] }
 0x1b7   :  { %6421 = vmatpush3.bf16.msra.mxu1 %v6420_v29  ;;  %v4678_v48 = vpop.f32.mrb[12].mxu0  ;;  %v6438_v29 = vpack.c.bf16 %v954_v20, %v953_v9  ;;  %v977_v19 = vld [vmem:[%s10611_s1 + $0x1d50] sm:$0xff]  ;;  %v978_v20 = vld [vmem:[%s10611_s1 + $0x1d58] sm:$0xff] }
 0x1b8   :  { %6423 = vmatprep.subr.bf16.mxu1 %v6422_v23  ;;  %v4679_v56 = vpop.f32.mrb[13].mxu0  ;;  %v970_v23 = vld [vmem:[%s10611_s1 + $0x1d18] sm:$0xff] }
 0x1b9   :  { %v4713_v57 = vpop.f32.mrb[12].mxu1  ;;  %v4680_v49 = vadd.f32 %v4679_v56, %v4678_v48  ;;  %6393 = vmatpush3.bf16.msra.mxu0 %v6392_v41  ;;  %v1470_v41 = vcombine.high %v9750_v24, %v9750_v24  ;;  %v6474_v48 = vpack.c.bf16 %v988_v40, %v987_v38  ;;  %v965_v38 = vld [vmem:[%s10611_s1 + $0x1cf0] sm:$0xff]  ;;  %v966_v40 = vld [vmem:[%s10611_s1 + $0x1cf8] sm:$0xff] }
 0x1ba   :  { %v4714_v59 = vpop.f32.mrb[13].mxu1  ;;  %6395 = vmatprep.subr.bf16.mxu0 %v6394_v44  ;;  %v6472_v44 = vpack.c.bf16 %v970_v23, %v969_v32  ;;  %v947_v32 = vld [vmem:[%s10611_s1 + $0x1c60] sm:$0xff] }
 0x1bb   :  { %v4715_v53 = vadd.f32 %v4714_v59, %v4713_v57  ;;  %6425 = vmatpush3.bf16.msra.mxu1 %v6424_v43  ;;  %v2501_v3 = vadd.f32 %v4680_v49, %v9510_v12  ;;  %v984_v12 = vld [vmem:[%s10611_s1 + $0x1d88] sm:$0xff]  ;;  %v6440_v43 = vpack.c.bf16 %v938_v30, %v937_v31  ;;  %v942_v49 = vld [vmem:[%s10611_s1 + $0x1c38] sm:$0xff]  ;;  %v973_v59 = vld [vmem:[%s10611_s1 + $0x1d30] sm:$0xff]  ;;  %v6488_v31 = vpack.c.bf16 %v978_v20, %v977_v19 }
 0x1bc   :  { %6427 = vmatprep.subr.bf16.mxu1 %v6426_v33  ;;  %v6466_v18 = vpack.c.bf16 %v984_v12, %v983_v8  ;;  %v957_v33 = vld [vmem:[%s10611_s1 + $0x1cb0] sm:$0xff]  ;;  %v6448_v1 = vpack.c.bf16 %v942_v49, %v941_v58  ;;  %v6480_v2 = vpack.c.bf16 %v974_v60, %v973_v59  ;;  %v976_v8 = vld [vmem:[%s10611_s1 + $0x1d48] sm:$0xff]  ;;  %v6458_v30 = vpack.c.bf16 %v964_v22, %v963_v27  ;;  %v979_v23 = vld [vmem:[%s10611_s1 + $0x1d60] sm:$0xff] }
 0x1bd   :  { %v9720_v63 = vadd.f32 %v4715_v53, %v2501_v3  ;;  %6397 = vmatpush3.bf16.msra.mxu0 %v6396_v51  ;;  %v6446_v45 = vpack.c.bf16 %v958_v50, %v957_v33  ;;  %v6478_v51 = vpack.c.bf16 %v990_v55, %v989_v54  ;;  %v959_v53 = vld [vmem:[%s10611_s1 + $0x1cc0] sm:$0xff]  ;;  %v961_v12 = vld [vmem:[%s10611_s1 + $0x1cd0] sm:$0xff]  ;;  %v6484_v15 = vpack.c.bf16 %v976_v8, %v975_v61  ;;  %v950_v55 = vld [vmem:[%s10611_s1 + $0x1c78] sm:$0xff] }
 0x1be   :  { %6399 = vmatprep.subr.bf16.mxu0 %v6398_v62  ;;  %v991_v62 = vld [vmem:[%s10611_s1 + $0x1dc0] sm:$0xff]  ;;  %v6454_v16 = vpack.c.bf16 %v962_v7, %v961_v12  ;;  %v6462_v50 = vpack.c.bf16 %v966_v40, %v965_v38  ;;  %v949_v54 = vld [vmem:[%s10611_s1 + $0x1c70] sm:$0xff]  ;;  %v982_v58 = vld [vmem:[%s10611_s1 + $0x1d78] sm:$0xff] }
 0x1bf   :  { %6429 = vmatpush3.bf16.msra.mxu1 %v6428_v10  ;;  %v960_v10 = vld [vmem:[%s10611_s1 + $0x1cc8] sm:$0xff]  ;;  %v6482_v6 = vpack.c.bf16 %v992_v0, %v991_v62  ;;  %v1015_v49 = vld [vmem:[%s10611_s1 + $0x1e80] sm:$0xff]  ;;  %v1017_v61 = vld [vmem:[%s10611_s1 + $0x1e90] sm:$0xff] }
 0x1c0   :  { %6431 = vmatprep.subr.bf16.mxu1 %v6430_v4  ;;  %v6450_v3 = vpack.c.bf16 %v960_v10, %v959_v53  ;;  %v943_v4 = vld [vmem:[%s10611_s1 + $0x1c40] sm:$0xff]  ;;  %v1016_v59 = vld [vmem:[%s10611_s1 + $0x1e88] sm:$0xff]  ;;  %v6464_v10 = vpack.c.bf16 %v950_v55, %v949_v54  ;;  %v1049_v12 = vld [vmem:[%s10611_s1 + $0x1f90] sm:$0xff] }
 0x1c1   :  { %6401 = vmatpush3.bf16.msra.mxu0 %v6400_v26  ;;  %v993_v26 = vld [vmem:[%s10611_s1 + $0x1dd0] sm:$0xff]  ;;  %v6498_v0 = vpack.c.bf16 %v1016_v59, %v1015_v49  ;;  %v1050_v7 = vld [vmem:[%s10611_s1 + $0x1f98] sm:$0xff]  ;;  %v1019_v20 = vld [vmem:[%s10611_s1 + $0x1ea0] sm:$0xff] }
 0x1c2   :  { %6435 = vmatprep.subr.bf16.mxu0 %v6434_v14  ;;  %v6452_v14 = vpack.c.bf16 %v944_v5, %v943_v4  ;;  %v1032_v5 = vld [vmem:[%s10611_s1 + $0x1f08] sm:$0xff]  ;;  %v6534_v19 = vpack.c.bf16 %v1050_v7, %v1049_v12  ;;  %v1053_v38 = vld [vmem:[%s10611_s1 + $0x1fb0] sm:$0xff]  ;;  %v1054_v40 = vld [vmem:[%s10611_s1 + $0x1fb8] sm:$0xff] }
 0x1c3   :  { %6433 = vmatpush3.bf16.msra.mxu1 %v6432_v11  ;;  %v994_v11 = vld [vmem:[%s10611_s1 + $0x1dd8] sm:$0xff]  ;;  %v1020_v27 = vld [vmem:[%s10611_s1 + $0x1ea8] sm:$0xff]  ;;  %v1039_v49 = vld [vmem:[%s10611_s1 + $0x1f40] sm:$0xff] }
 0x1c4   :  { %6467 = vmatprep.subr.bf16.mxu1 %v6466_v18  ;;  %3479 = vmatmul.mubr.f32.vlgmr.msra.gmra.mrb[26].mxu0 %v9531_v35  ;;  %v939_v35 = vld [vmem:[%s10611_s1 + $0x1c20] sm:$0xff]  ;;  %v946_v18 = vld [vmem:[%s10611_s1 + $0x1c58] sm:$0xff]  ;;  %v6486_v9 = vpack.c.bf16 %v994_v11, %v993_v26  ;;  %v1056_v54 = vld [vmem:[%s10611_s1 + $0x1fc8] sm:$0xff] }
 0x1c5   :  { %6437 = vmatpush3.bf16.msra.mxu0 %v6436_v25  ;;  %3618 = vmatprep.mubr.f32.mxu0 %v1469_v36  ;;  %v6444_v56 = vpack.c.bf16 %v940_v47, %v939_v35  ;;  %v995_v25 = vld [vmem:[%s10611_s1 + $0x1de0] sm:$0xff]  ;;  %v980_v36 = vld [vmem:[%s10611_s1 + $0x1d68] sm:$0xff] }
 0x1c6   :  { %3549 = vmatmul.mubr.f32.vlgmr.msra.gmra.mrb[26].mxu1 %v9540_v37  ;;  %6439 = vmatprep.subr.bf16.mxu0 %v6438_v29  ;;  %v972_v37 = vld [vmem:[%s10611_s1 + $0x1d28] sm:$0xff]  ;;  %v6456_v29 = vpack.c.bf16 %v946_v18, %v945_v17  ;;  %v6492_v33 = vpack.c.bf16 %v980_v36, %v979_v23  ;;  %v1002_v17 = vld [vmem:[%s10611_s1 + $0x1e18] sm:$0xff]  ;;  %v1033_v18 = vld [vmem:[%s10611_s1 + $0x1f10] sm:$0xff] }
 0x1c7   :  { %6469 = vmatpush3.bf16.msra.mxu1 %v6468_v28  ;;  %3688 = vmatprep.mubr.f32.mxu1 %v1470_v41  ;;  %v6476_v57 = vpack.c.bf16 %v972_v37, %v971_v52  ;;  %v996_v28 = vld [vmem:[%s10611_s1 + $0x1de8] sm:$0xff]  ;;  %v1035_v23 = vld [vmem:[%s10611_s1 + $0x1f20] sm:$0xff]  ;;  %v1022_v36 = vld [vmem:[%s10611_s1 + $0x1eb8] sm:$0xff] }
 0x1c8   :  { %6471 = vmatprep.subr.bf16.mxu1 %v6470_v42  ;;  %v948_v42 = vld [vmem:[%s10611_s1 + $0x1c68] sm:$0xff]  ;;  %v6490_v39 = vpack.c.bf16 %v996_v28, %v995_v25  ;;  %v1051_v25 = vld [vmem:[%s10611_s1 + $0x1fa0] sm:$0xff] }
 0x1c9   :  { %6441 = vmatpush3.bf16.msra.mxu0 %v6440_v43  ;;  %v6460_v52 = vpack.c.bf16 %v948_v42, %v947_v32  ;;  %v1052_v28 = vld [vmem:[%s10611_s1 + $0x1fa8] sm:$0xff]  ;;  %v6506_v32 = vpack.c.bf16 %v1020_v27, %v1019_v20  ;;  %v1027_v12 = vld [vmem:[%s10611_s1 + $0x1ee0] sm:$0xff] }
 0x1ca   :  { %6443 = vmatprep.subr.bf16.mxu0 %v6442_v46  ;;  %v998_v46 = vld [vmem:[%s10611_s1 + $0x1df8] sm:$0xff]  ;;  %v1004_v42 = vld [vmem:[%s10611_s1 + $0x1e28] sm:$0xff] }
 0x1cb   :  { %6473 = vmatpush3.bf16.msra.mxu1 %v6472_v44  ;;  %v997_v44 = vld [vmem:[%s10611_s1 + $0x1df0] sm:$0xff]  ;;  %v1028_v7 = vld [vmem:[%s10611_s1 + $0x1ee8] sm:$0xff] }
 0x1cc   :  { %6475 = vmatprep.subr.bf16.mxu1 %v6474_v48  ;;  %v36_v48 = vld [vmem:[%s10610_s0 + $0x78] sm:$0xff] }
 0x1cd   :  { %6445 = vmatpush3.bf16.msra.mxu0 %v6444_v56  ;;  %v981_v56 = vld [vmem:[%s10611_s1 + $0x1d70] sm:$0xff]  ;;  %v1471_v60 = vcombine.high %v36_v48, %v36_v48  ;;  %v9951_v8 = vrot.slane %v36_v48, %v6946_v13  ;;  %v1038_v48 = vld [vmem:[%s10611_s1 + $0x1f38] sm:$0xff] }
 0x1ce   :  { %6447 = vmatprep.subr.bf16.mxu0 %v6446_v45  ;;  %v6494_v45 = vpack.c.bf16 %v998_v46, %v997_v44  ;;  %v6496_v62 = vpack.c.bf16 %v982_v58, %v981_v56  ;;  %v1005_v46 = vld [vmem:[%s10611_s1 + $0x1e30] sm:$0xff]  ;;  %v1008_v58 = vld [vmem:[%s10611_s1 + $0x1e48] sm:$0xff] }
 0x1cf   :  { %6477 = vmatpush3.bf16.msra.mxu1 %v6476_v57  ;;  %v9960_v26 = vrot.slane %v1471_v60, %v6946_v13  ;;  %v1486_v22 = vcombine.high %v9951_v8, %v9951_v8  ;;  %v1026_v60 = vld [vmem:[%s10611_s1 + $0x1ed8] sm:$0xff] }
 0x1d0   :  { %6479 = vmatprep.subr.bf16.mxu1 %v6478_v51  ;;  %v1047_v51 = vld [vmem:[%s10611_s1 + $0x1f80] sm:$0xff] }
 0x1d1   :  { %6449 = vmatpush3.bf16.msra.mxu0 %v6448_v1  ;;  %v999_v1 = vld [vmem:[%s10611_s1 + $0x1e00] sm:$0xff] }
 0x1d2   :  { %6451 = vmatprep.subr.bf16.mxu0 %v6450_v3  ;;  %v1031_v3 = vld [vmem:[%s10611_s1 + $0x1f00] sm:$0xff] }
 0x1d3   :  { %6481 = vmatpush3.bf16.msra.mxu1 %v6480_v2  ;;  %v1000_v2 = vld [vmem:[%s10611_s1 + $0x1e08] sm:$0xff] }
 0x1d4   :  { %6483 = vmatprep.subr.bf16.mxu1 %v6482_v6  ;;  %v1018_v6 = vld [vmem:[%s10611_s1 + $0x1e98] sm:$0xff]  ;;  %v6500_v11 = vpack.c.bf16 %v1000_v2, %v999_v1 }
 0x1d5   :  { %6453 = vmatpush3.bf16.msra.mxu0 %v6452_v14  ;;  %v6532_v14 = vpack.c.bf16 %v1032_v5, %v1031_v3  ;;  %v1009_v3 = vld [vmem:[%s10611_s1 + $0x1e50] sm:$0xff] }
 0x1d6   :  { %6455 = vmatprep.subr.bf16.mxu0 %v6454_v16  ;;  %v1001_v16 = vld [vmem:[%s10611_s1 + $0x1e10] sm:$0xff] }
 0x1d7   :  { %6485 = vmatpush3.bf16.msra.mxu1 %v6484_v15  ;;  %v4748_v34 = vpop.f32.mrb[14].mxu0  ;;  %v6502_v15 = vpack.c.bf16 %v1018_v6, %v1017_v61  ;;  %v1041_v5 = vld [vmem:[%s10611_s1 + $0x1f50] sm:$0xff]  ;;  %v1042_v6 = vld [vmem:[%s10611_s1 + $0x1f58] sm:$0xff] }
 0x1d8   :  { %6487 = vmatprep.subr.bf16.mxu1 %v6486_v9  ;;  %v4749_v41 = vpop.f32.mrb[15].mxu0  ;;  %v1034_v9 = vld [vmem:[%s10611_s1 + $0x1f18] sm:$0xff] }
 0x1d9   :  { %v4783_v43 = vpop.f32.mrb[14].mxu1  ;;  %v4750_v35 = vadd.f32 %v4749_v41, %v4748_v34  ;;  %6457 = vmatpush3.bf16.msra.mxu0 %v6456_v29  ;;  %v1487_v29 = vcombine.high %v9960_v26, %v9960_v26  ;;  %v6538_v34 = vpack.c.bf16 %v1052_v28, %v1051_v25  ;;  %v1029_v25 = vld [vmem:[%s10611_s1 + $0x1ef0] sm:$0xff]  ;;  %v1030_v28 = vld [vmem:[%s10611_s1 + $0x1ef8] sm:$0xff] }
 0x1da   :  { %v4784_v47 = vpop.f32.mrb[15].mxu1  ;;  %6459 = vmatprep.subr.bf16.mxu0 %v6458_v30  ;;  %v6536_v30 = vpack.c.bf16 %v1034_v9, %v1033_v18  ;;  %v1011_v18 = vld [vmem:[%s10611_s1 + $0x1e60] sm:$0xff] }
 0x1db   :  { %v4785_v37 = vadd.f32 %v4784_v47, %v4783_v43  ;;  %6489 = vmatpush3.bf16.msra.mxu1 %v6488_v31  ;;  %v2641_v57 = vadd.f32 %v4750_v35, %v9720_v63  ;;  %v1048_v63 = vld [vmem:[%s10611_s1 + $0x1f88] sm:$0xff]  ;;  %v6504_v31 = vpack.c.bf16 %v1002_v17, %v1001_v16  ;;  %v1006_v35 = vld [vmem:[%s10611_s1 + $0x1e38] sm:$0xff]  ;;  %v1037_v47 = vld [vmem:[%s10611_s1 + $0x1f30] sm:$0xff]  ;;  %v6552_v16 = vpack.c.bf16 %v1042_v6, %v1041_v5 }
 0x1dc   :  { %6491 = vmatprep.subr.bf16.mxu1 %v6490_v39  ;;  %v6530_v4 = vpack.c.bf16 %v1048_v63, %v1047_v51  ;;  %v1021_v39 = vld [vmem:[%s10611_s1 + $0x1eb0] sm:$0xff]  ;;  %v6512_v55 = vpack.c.bf16 %v1006_v35, %v1005_v46  ;;  %v6544_v56 = vpack.c.bf16 %v1038_v48, %v1037_v47  ;;  %v1040_v51 = vld [vmem:[%s10611_s1 + $0x1f48] sm:$0xff]  ;;  %v6522_v17 = vpack.c.bf16 %v1028_v7, %v1027_v12  ;;  %v1043_v9 = vld [vmem:[%s10611_s1 + $0x1f60] sm:$0xff] }
 0x1dd   :  { %v9930_v53 = vadd.f32 %v4785_v37, %v2641_v57  ;;  %6461 = vmatpush3.bf16.msra.mxu0 %v6460_v52  ;;  %v6510_v44 = vpack.c.bf16 %v1022_v36, %v1021_v39  ;;  %v6542_v52 = vpack.c.bf16 %v1054_v40, %v1053_v38  ;;  %v1023_v37 = vld [vmem:[%s10611_s1 + $0x1ec0] sm:$0xff]  ;;  %v1025_v63 = vld [vmem:[%s10611_s1 + $0x1ed0] sm:$0xff]  ;;  %v6548_v1 = vpack.c.bf16 %v1040_v51, %v1039_v49  ;;  %v1014_v40 = vld [vmem:[%s10611_s1 + $0x1e78] sm:$0xff] }
 0x1de   :  { %6463 = vmatprep.subr.bf16.mxu0 %v6462_v50  ;;  %v1055_v50 = vld [vmem:[%s10611_s1 + $0x1fc0] sm:$0xff]  ;;  %v6518_v2 = vpack.c.bf16 %v1026_v60, %v1025_v63  ;;  %v6526_v36 = vpack.c.bf16 %v1030_v28, %v1029_v25  ;;  %v1013_v38 = vld [vmem:[%s10611_s1 + $0x1e70] sm:$0xff]  ;;  %v1046_v46 = vld [vmem:[%s10611_s1 + $0x1f78] sm:$0xff] }
 0x1df   :  { %6493 = vmatpush3.bf16.msra.mxu1 %v6492_v33  ;;  %v1024_v33 = vld [vmem:[%s10611_s1 + $0x1ec8] sm:$0xff]  ;;  %v6546_v59 = vpack.c.bf16 %v1056_v54, %v1055_v50  ;;  %v1079_v35 = vld [vmem:[%s10611_s1 + $0x2080] sm:$0xff]  ;;  %v1081_v49 = vld [vmem:[%s10611_s1 + $0x2090] sm:$0xff] }
 0x1e0   :  { %6495 = vmatprep.subr.bf16.mxu1 %v6494_v45  ;;  %v6514_v57 = vpack.c.bf16 %v1024_v33, %v1023_v37  ;;  %v1007_v45 = vld [vmem:[%s10611_s1 + $0x1e40] sm:$0xff]  ;;  %v1080_v47 = vld [vmem:[%s10611_s1 + $0x2088] sm:$0xff]  ;;  %v6528_v33 = vpack.c.bf16 %v1014_v40, %v1013_v38  ;;  %v1113_v63 = vld [vmem:[%s10611_s1 + $0x2190] sm:$0xff] }
 0x1e1   :  { %6465 = vmatpush3.bf16.msra.mxu0 %v6464_v10  ;;  %v1057_v10 = vld [vmem:[%s10611_s1 + $0x1fd0] sm:$0xff]  ;;  %v6562_v54 = vpack.c.bf16 %v1080_v47, %v1079_v35  ;;  %v1114_v60 = vld [vmem:[%s10611_s1 + $0x2198] sm:$0xff]  ;;  %v1083_v6 = vld [vmem:[%s10611_s1 + $0x20a0] sm:$0xff] }
 0x1e2   :  { %6499 = vmatprep.subr.bf16.mxu0 %v6498_v0  ;;  %v6516_v0 = vpack.c.bf16 %v1008_v58, %v1007_v45  ;;  %v1096_v58 = vld [vmem:[%s10611_s1 + $0x2108] sm:$0xff]  ;;  %v6598_v5 = vpack.c.bf16 %v1114_v60, %v1113_v63  ;;  %v1117_v25 = vld [vmem:[%s10611_s1 + $0x21b0] sm:$0xff]  ;;  %v1118_v28 = vld [vmem:[%s10611_s1 + $0x21b8] sm:$0xff] }
 0x1e3   :  { %6497 = vmatpush3.bf16.msra.mxu1 %v6496_v62  ;;  %v1058_v62 = vld [vmem:[%s10611_s1 + $0x1fd8] sm:$0xff]  ;;  %v1084_v12 = vld [vmem:[%s10611_s1 + $0x20a8] sm:$0xff]  ;;  %v1103_v35 = vld [vmem:[%s10611_s1 + $0x2140] sm:$0xff] }
 0x1e4   :  { %6531 = vmatprep.subr.bf16.mxu1 %v6530_v4  ;;  %3619 = vmatmul.mubr.f32.vlgmr.msra.gmra.mrb[28].mxu0 %v9741_v21  ;;  %v1003_v21 = vld [vmem:[%s10611_s1 + $0x1e20] sm:$0xff]  ;;  %v1010_v4 = vld [vmem:[%s10611_s1 + $0x1e58] sm:$0xff]  ;;  %v6550_v61 = vpack.c.bf16 %v1058_v62, %v1057_v10  ;;  %v1120_v38 = vld [vmem:[%s10611_s1 + $0x21c8] sm:$0xff] }
 0x1e5   :  { %6501 = vmatpush3.bf16.msra.mxu0 %v6500_v11  ;;  %3758 = vmatprep.mubr.f32.mxu0 %v1486_v22  ;;  %v6508_v41 = vpack.c.bf16 %v1004_v42, %v1003_v21  ;;  %v1059_v11 = vld [vmem:[%s10611_s1 + $0x1fe0] sm:$0xff]  ;;  %v1044_v22 = vld [vmem:[%s10611_s1 + $0x1f68] sm:$0xff] }
 0x1e6   :  { %3689 = vmatmul.mubr.f32.vlgmr.msra.gmra.mrb[28].mxu1 %v9750_v24  ;;  %6503 = vmatprep.subr.bf16.mxu0 %v6502_v15  ;;  %v1036_v24 = vld [vmem:[%s10611_s1 + $0x1f28] sm:$0xff]  ;;  %v6520_v15 = vpack.c.bf16 %v1010_v4, %v1009_v3  ;;  %v6556_v39 = vpack.c.bf16 %v1044_v22, %v1043_v9  ;;  %v1066_v3 = vld [vmem:[%s10611_s1 + $0x2018] sm:$0xff]  ;;  %v1097_v4 = vld [vmem:[%s10611_s1 + $0x2110] sm:$0xff] }
 0x1e7   :  { %6533 = vmatpush3.bf16.msra.mxu1 %v6532_v14  ;;  %3828 = vmatprep.mubr.f32.mxu1 %v1487_v29  ;;  %v6540_v43 = vpack.c.bf16 %v1036_v24, %v1035_v23  ;;  %v1060_v14 = vld [vmem:[%s10611_s1 + $0x1fe8] sm:$0xff]  ;;  %v1099_v9 = vld [vmem:[%s10611_s1 + $0x2120] sm:$0xff]  ;;  %v1086_v22 = vld [vmem:[%s10611_s1 + $0x20b8] sm:$0xff] }
 0x1e8   :  { %6535 = vmatprep.subr.bf16.mxu1 %v6534_v19  ;;  %v1012_v19 = vld [vmem:[%s10611_s1 + $0x1e68] sm:$0xff]  ;;  %v6554_v27 = vpack.c.bf16 %v1060_v14, %v1059_v11  ;;  %v1115_v11 = vld [vmem:[%s10611_s1 + $0x21a0] sm:$0xff] }
 0x1e9   :  { %6505 = vmatpush3.bf16.msra.mxu0 %v6504_v31  ;;  %v6524_v23 = vpack.c.bf16 %v1012_v19, %v1011_v18  ;;  %v1116_v14 = vld [vmem:[%s10611_s1 + $0x21a8] sm:$0xff]  ;;  %v6570_v18 = vpack.c.bf16 %v1084_v12, %v1083_v6  ;;  %v1091_v63 = vld [vmem:[%s10611_s1 + $0x20e0] sm:$0xff] }
 0x1ea   :  { %6507 = vmatprep.subr.bf16.mxu0 %v6506_v32  ;;  %v1062_v32 = vld [vmem:[%s10611_s1 + $0x1ff8] sm:$0xff]  ;;  %v1068_v19 = vld [vmem:[%s10611_s1 + $0x2028] sm:$0xff] }
 0x1eb   :  { %6537 = vmatpush3.bf16.msra.mxu1 %v6536_v30  ;;  %v1061_v30 = vld [vmem:[%s10611_s1 + $0x1ff0] sm:$0xff]  ;;  %v1092_v60 = vld [vmem:[%s10611_s1 + $0x20e8] sm:$0xff] }
 0x1ec   :  { %6539 = vmatprep.subr.bf16.mxu1 %v6538_v34  ;;  %v37_v34 = vld [vmem:[%s10610_s0 + $0x80] sm:$0xff] }
 0x1ed   :  { %6509 = vmatpush3.bf16.msra.mxu0 %v6508_v41  ;;  %v1045_v41 = vld [vmem:[%s10611_s1 + $0x1f70] sm:$0xff]  ;;  %v1488_v48 = vcombine.high %v37_v34, %v37_v34  ;;  %v10161_v51 = vrot.slane %v37_v34, %v6946_v13  ;;  %v1102_v34 = vld [vmem:[%s10611_s1 + $0x2138] sm:$0xff] }
 0x1ee   :  { %6511 = vmatprep.subr.bf16.mxu0 %v6510_v44  ;;  %v6558_v44 = vpack.c.bf16 %v1062_v32, %v1061_v30  ;;  %v6560_v50 = vpack.c.bf16 %v1046_v46, %v1045_v41  ;;  %v1069_v32 = vld [vmem:[%s10611_s1 + $0x2030] sm:$0xff]  ;;  %v1072_v46 = vld [vmem:[%s10611_s1 + $0x2048] sm:$0xff] }
 0x1ef   :  { %6541 = vmatpush3.bf16.msra.mxu1 %v6540_v43  ;;  %v10170_v10 = vrot.slane %v1488_v48, %v6946_v13  ;;  %v1503_v7 = vcombine.high %v10161_v51, %v10161_v51  ;;  %v1090_v48 = vld [vmem:[%s10611_s1 + $0x20d8] sm:$0xff] }
 0x1f0   :  { %6543 = vmatprep.subr.bf16.mxu1 %v6542_v52  ;;  %v1111_v52 = vld [vmem:[%s10611_s1 + $0x2180] sm:$0xff] }
 0x1f1   :  { %6513 = vmatpush3.bf16.msra.mxu0 %v6512_v55  ;;  %v1063_v55 = vld [vmem:[%s10611_s1 + $0x2000] sm:$0xff] }
 0x1f2   :  { %6515 = vmatprep.subr.bf16.mxu0 %v6514_v57  ;;  %v1095_v57 = vld [vmem:[%s10611_s1 + $0x2100] sm:$0xff] }
 0x1f3   :  { %6545 = vmatpush3.bf16.msra.mxu1 %v6544_v56  ;;  %v1064_v56 = vld [vmem:[%s10611_s1 + $0x2008] sm:$0xff] }
 0x1f4   :  { %6547 = vmatprep.subr.bf16.mxu1 %v6546_v59  ;;  %v1082_v59 = vld [vmem:[%s10611_s1 + $0x2098] sm:$0xff]  ;;  %v6564_v62 = vpack.c.bf16 %v1064_v56, %v1063_v55 }
 0x1f5   :  { %6517 = vmatpush3.bf16.msra.mxu0 %v6516_v0  ;;  %v6596_v0 = vpack.c.bf16 %v1096_v58, %v1095_v57  ;;  %v1073_v57 = vld [vmem:[%s10611_s1 + $0x2050] sm:$0xff] }
 0x1f6   :  { %6519 = vmatprep.subr.bf16.mxu0 %v6518_v2  ;;  %v1065_v2 = vld [vmem:[%s10611_s1 + $0x2010] sm:$0xff] }
 0x1f7   :  { %6549 = vmatpush3.bf16.msra.mxu1 %v6548_v1  ;;  %v4818_v20 = vpop.f32.mrb[16].mxu0  ;;  %v6566_v1 = vpack.c.bf16 %v1082_v59, %v1081_v49  ;;  %v1105_v58 = vld [vmem:[%s10611_s1 + $0x2150] sm:$0xff]  ;;  %v1106_v59 = vld [vmem:[%s10611_s1 + $0x2158] sm:$0xff] }
 0x1f8   :  { %6551 = vmatprep.subr.bf16.mxu1 %v6550_v61  ;;  %v4819_v29 = vpop.f32.mrb[17].mxu0  ;;  %v1098_v61 = vld [vmem:[%s10611_s1 + $0x2118] sm:$0xff] }
 0x1f9   :  { %v4853_v31 = vpop.f32.mrb[16].mxu1  ;;  %v4820_v21 = vadd.f32 %v4819_v29, %v4818_v20  ;;  %6521 = vmatpush3.bf16.msra.mxu0 %v6520_v15  ;;  %v1504_v15 = vcombine.high %v10170_v10, %v10170_v10  ;;  %v6602_v20 = vpack.c.bf16 %v1116_v14, %v1115_v11  ;;  %v1093_v11 = vld [vmem:[%s10611_s1 + $0x20f0] sm:$0xff]  ;;  %v1094_v14 = vld [vmem:[%s10611_s1 + $0x20f8] sm:$0xff] }
 0x1fa   :  { %v4854_v42 = vpop.f32.mrb[17].mxu1  ;;  %6523 = vmatprep.subr.bf16.mxu0 %v6522_v17  ;;  %v6600_v17 = vpack.c.bf16 %v1098_v61, %v1097_v4  ;;  %v1075_v4 = vld [vmem:[%s10611_s1 + $0x2060] sm:$0xff] }
 0x1fb   :  { %v4855_v24 = vadd.f32 %v4854_v42, %v4853_v31  ;;  %6553 = vmatpush3.bf16.msra.mxu1 %v6552_v16  ;;  %v2781_v43 = vadd.f32 %v4820_v21, %v9930_v53  ;;  %v1112_v53 = vld [vmem:[%s10611_s1 + $0x2188] sm:$0xff]  ;;  %v6568_v16 = vpack.c.bf16 %v1066_v3, %v1065_v2  ;;  %v1070_v21 = vld [vmem:[%s10611_s1 + $0x2038] sm:$0xff]  ;;  %v1101_v42 = vld [vmem:[%s10611_s1 + $0x2130] sm:$0xff]  ;;  %v6616_v2 = vpack.c.bf16 %v1106_v59, %v1105_v58 }
 0x1fc   :  { %6555 = vmatprep.subr.bf16.mxu1 %v6554_v27  ;;  %v6594_v45 = vpack.c.bf16 %v1112_v53, %v1111_v52  ;;  %v1085_v27 = vld [vmem:[%s10611_s1 + $0x20b0] sm:$0xff]  ;;  %v6576_v40 = vpack.c.bf16 %v1070_v21, %v1069_v32  ;;  %v6608_v41 = vpack.c.bf16 %v1102_v34, %v1101_v42  ;;  %v1104_v52 = vld [vmem:[%s10611_s1 + $0x2148] sm:$0xff]  ;;  %v6586_v3 = vpack.c.bf16 %v1092_v60, %v1091_v63  ;;  %v1107_v61 = vld [vmem:[%s10611_s1 + $0x2160] sm:$0xff] }
 0x1fd   :  { %v10140_v37 = vadd.f32 %v4855_v24, %v2781_v43  ;;  %6525 = vmatpush3.bf16.msra.mxu0 %v6524_v23  ;;  %v6574_v30 = vpack.c.bf16 %v1086_v22, %v1085_v27  ;;  %v6606_v23 = vpack.c.bf16 %v1118_v28, %v1117_v25  ;;  %v1087_v24 = vld [vmem:[%s10611_s1 + $0x20c0] sm:$0xff]  ;;  %v1089_v53 = vld [vmem:[%s10611_s1 + $0x20d0] sm:$0xff]  ;;  %v6612_v55 = vpack.c.bf16 %v1104_v52, %v1103_v35  ;;  %v1078_v28 = vld [vmem:[%s10611_s1 + $0x2078] sm:$0xff] }
 0x1fe   :  { %6527 = vmatprep.subr.bf16.mxu0 %v6526_v36  ;;  %v1119_v36 = vld [vmem:[%s10611_s1 + $0x21c0] sm:$0xff]  ;;  %v6582_v56 = vpack.c.bf16 %v1090_v48, %v1089_v53  ;;  %v6590_v22 = vpack.c.bf16 %v1094_v14, %v1093_v11  ;;  %v1077_v25 = vld [vmem:[%s10611_s1 + $0x2070] sm:$0xff]  ;;  %v1110_v32 = vld [vmem:[%s10611_s1 + $0x2178] sm:$0xff] }
 0x1ff   :  { %6557 = vmatpush3.bf16.msra.mxu1 %v6556_v39  ;;  %v1088_v39 = vld [vmem:[%s10611_s1 + $0x20c8] sm:$0xff]  ;;  %v6610_v47 = vpack.c.bf16 %v1120_v38, %v1119_v36  ;;  %v1143_v21 = vld [vmem:[%s10611_s1 + $0x2280] sm:$0xff]  ;;  %v1145_v35 = vld [vmem:[%s10611_s1 + $0x2290] sm:$0xff] }
 0x200   :  { %6559 = vmatprep.subr.bf16.mxu1 %v6558_v44  ;;  %v6578_v43 = vpack.c.bf16 %v1088_v39, %v1087_v24  ;;  %v1071_v44 = vld [vmem:[%s10611_s1 + $0x2040] sm:$0xff]  ;;  %v1144_v42 = vld [vmem:[%s10611_s1 + $0x2288] sm:$0xff]  ;;  %v6592_v39 = vpack.c.bf16 %v1078_v28, %v1077_v25  ;;  %v1177_v53 = vld [vmem:[%s10611_s1 + $0x2390] sm:$0xff] }
 0x201   :  { %6529 = vmatpush3.bf16.msra.mxu0 %v6528_v33  ;;  %v1121_v33 = vld [vmem:[%s10611_s1 + $0x21d0] sm:$0xff]  ;;  %v6626_v38 = vpack.c.bf16 %v1144_v42, %v1143_v21  ;;  %v1178_v48 = vld [vmem:[%s10611_s1 + $0x2398] sm:$0xff]  ;;  %v1148_v59 = vld [vmem:[%s10611_s1 + $0x22a8] sm:$0xff] }
 0x202   :  { %6563 = vmatprep.subr.bf16.mxu0 %v6562_v54  ;;  %v6580_v54 = vpack.c.bf16 %v1072_v46, %v1071_v44  ;;  %v1160_v46 = vld [vmem:[%s10611_s1 + $0x2308] sm:$0xff]  ;;  %v1162_v58 = vld [vmem:[%s10611_s1 + $0x2318] sm:$0xff]  ;;  %v1179_v60 = vld [vmem:[%s10611_s1 + $0x23a0] sm:$0xff] }
 0x203   :  { %6561 = vmatpush3.bf16.msra.mxu1 %v6560_v50  ;;  %v1122_v50 = vld [vmem:[%s10611_s1 + $0x21d8] sm:$0xff]  ;;  %v1168_v42 = vld [vmem:[%s10611_s1 + $0x2348] sm:$0xff] }
 0x204   :  { %6595 = vmatprep.subr.bf16.mxu1 %v6594_v45  ;;  %3759 = vmatmul.mubr.f32.vlgmr.msra.gmra.mrb[30].mxu0 %v9951_v8  ;;  %v1067_v8 = vld [vmem:[%s10611_s1 + $0x2020] sm:$0xff]  ;;  %v1074_v45 = vld [vmem:[%s10611_s1 + $0x2058] sm:$0xff]  ;;  %v6614_v49 = vpack.c.bf16 %v1122_v50, %v1121_v33 }
 0x205   :  { %6565 = vmatpush3.bf16.msra.mxu0 %v6564_v62  ;;  %3898 = vmatprep.mubr.f32.mxu0 %v1503_v7  ;;  %v6572_v29 = vpack.c.bf16 %v1068_v19, %v1067_v8  ;;  %v1123_v62 = vld [vmem:[%s10611_s1 + $0x21e0] sm:$0xff]  ;;  %v1108_v7 = vld [vmem:[%s10611_s1 + $0x2168] sm:$0xff]  ;;  %v1182_v11 = vld [vmem:[%s10611_s1 + $0x23b8] sm:$0xff] }
 0x206   :  { %3829 = vmatmul.mubr.f32.vlgmr.msra.gmra.mrb[30].mxu1 %v9960_v26  ;;  %6567 = vmatprep.subr.bf16.mxu0 %v6566_v1  ;;  %v1100_v26 = vld [vmem:[%s10611_s1 + $0x2128] sm:$0xff]  ;;  %v6584_v1 = vpack.c.bf16 %v1074_v45, %v1073_v57  ;;  %v6620_v27 = vpack.c.bf16 %v1108_v7, %v1107_v61  ;;  %v1130_v57 = vld [vmem:[%s10611_s1 + $0x2218] sm:$0xff]  ;;  %v1161_v45 = vld [vmem:[%s10611_s1 + $0x2310] sm:$0xff] }
 0x207   :  { %6597 = vmatpush3.bf16.msra.mxu1 %v6596_v0  ;;  %3968 = vmatprep.mubr.f32.mxu1 %v1504_v15  ;;  %v6604_v31 = vpack.c.bf16 %v1100_v26, %v1099_v9  ;;  %v1124_v0 = vld [vmem:[%s10611_s1 + $0x21e8] sm:$0xff]  ;;  %v1181_v7 = vld [vmem:[%s10611_s1 + $0x23b0] sm:$0xff] }
 0x208   :  { %6599 = vmatprep.subr.bf16.mxu1 %v6598_v5  ;;  %v1076_v5 = vld [vmem:[%s10611_s1 + $0x2068] sm:$0xff]  ;;  %v6618_v12 = vpack.c.bf16 %v1124_v0, %v1123_v62 }
 0x209   :  { %6569 = vmatpush3.bf16.msra.mxu0 %v6568_v16  ;;  %v6588_v9 = vpack.c.bf16 %v1076_v5, %v1075_v4  ;;  %v1180_v62 = vld [vmem:[%s10611_s1 + $0x23a8] sm:$0xff]  ;;  %v1163_v5 = vld [vmem:[%s10611_s1 + $0x2320] sm:$0xff] }
 0x20a   :  { %6571 = vmatprep.subr.bf16.mxu0 %v6570_v18  ;;  %v1126_v18 = vld [vmem:[%s10611_s1 + $0x21f8] sm:$0xff]  ;;  %v1132_v4 = vld [vmem:[%s10611_s1 + $0x2228] sm:$0xff]  ;;  %v6666_v61 = vpack.c.bf16 %v1180_v62, %v1179_v60 }
 0x20b   :  { %6601 = vmatpush3.bf16.msra.mxu1 %v6600_v17  ;;  %v1125_v17 = vld [vmem:[%s10611_s1 + $0x21f0] sm:$0xff]  ;;  %v1158_v60 = vld [vmem:[%s10611_s1 + $0x22f8] sm:$0xff] }
 0x20c   :  { %6603 = vmatprep.subr.bf16.mxu1 %v6602_v20  ;;  %v38_v20 = vld [vmem:[%s10610_s0 + $0x88] sm:$0xff]  ;;  %s4216_s0 = sshll.u32 %s6765_s8, 4  ;;  %s4217_s0 = int_to_ptr.vmem [resolvable:$true] %s4216_s0 }
 0x20d   :  { %6573 = vmatpush3.bf16.msra.mxu0 %v6572_v29  ;;  %v1109_v29 = vld [vmem:[%s10611_s1 + $0x2170] sm:$0xff]  ;;  %v1505_v34 = vcombine.high %v38_v20, %v38_v20  ;;  %v10371_v52 = vrot.slane %v38_v20, %v6946_v13  ;;  %v1151_v20 = vld [vmem:[%s10611_s1 + $0x22c0] sm:$0xff]  ;;  %s6737_s9 = scalar_lea.vmem %s4217_s0, 32  ;;  %p6742_p1 = scmp.lt.s32.totalorder %s4217_s0, %s4217_s0 }
 0x20e   :  { %6575 = vmatprep.subr.bf16.mxu0 %v6574_v30  ;;  %v6622_v30 = vpack.c.bf16 %v1126_v18, %v1125_v17  ;;  %v6624_v36 = vpack.c.bf16 %v1110_v32, %v1109_v29  ;;  %v1133_v17 = vld [vmem:[%s10611_s1 + $0x2230] sm:$0xff]  ;;  %v1134_v18 = vld [vmem:[%s10611_s1 + $0x2238] sm:$0xff]  ;;  %v1167_v32 = vld [vmem:[%s10611_s1 + $0x2340] sm:$0xff]  ;;  %p6738_p0 = scmp.ne.s32.totalorder %s4217_s0, %s6737_s9  ;;  %p6743_p2 = scmp.lt.s32.totalorder %s6737_s9, %s6737_s9 }
 0x20f   :  { %6605 = vmatpush3.bf16.msra.mxu1 %v6604_v31  ;;  %v10380_v33 = vrot.slane %v1505_v34, %v6946_v13  ;;  %v6662_v13 = vpack.c.bf16 %v1178_v48, %v1177_v53  ;;  %v1520_v63 = vcombine.high %v10371_v52, %v10371_v52  ;;  %v6640_v25 = vpack.c.bf16 %v1134_v18, %v1133_v17  ;;  %v1185_v34 = vld [vmem:[%s10611_s1 + $0x23d0] sm:$0xff]  ;;  %v1156_v53 = vld [vmem:[%s10611_s1 + $0x22e8] sm:$0xff]  ;;  %v1187_v48 = vld [vmem:[%s10611_s1 + $0x23e0] sm:$0xff] }
 0x210   :  { %6607 = vmatprep.subr.bf16.mxu1 %v6606_v23  ;;  %v1175_v23 = vld [vmem:[%s10611_s1 + $0x2380] sm:$0xff]  ;;  %p6744_p3 = por %p6743_p2, %p6742_p1 }
 0x211   :  { %6577 = vmatpush3.bf16.msra.mxu0 %v6576_v40  ;;  %v1127_v40 = vld [vmem:[%s10611_s1 + $0x2200] sm:$0xff]  ;;  %v1521_v0 = vcombine.high %v10380_v33, %v10380_v33 }
 0x212   :  { %6579 = vmatprep.subr.bf16.mxu0 %v6578_v43  ;;  %v1159_v43 = vld [vmem:[%s10611_s1 + $0x2300] sm:$0xff]  ;;  %p6745_p4 = pnand %p6744_p3, %p6738_p0 }
 0x213   :  { %6609 = vmatpush3.bf16.msra.mxu1 %v6608_v41  ;;  %v1128_v41 = vld [vmem:[%s10611_s1 + $0x2208] sm:$0xff] }
 0x214   :  { %6611 = vmatprep.subr.bf16.mxu1 %v6610_v47  ;;  %v1146_v47 = vld [vmem:[%s10611_s1 + $0x2298] sm:$0xff]  ;;  %v6628_v50 = vpack.c.bf16 %v1128_v41, %v1127_v40  ;;  %v1137_v41 = vld [vmem:[%s10611_s1 + $0x2250] sm:$0xff] }
 0x215   :  { %6581 = vmatpush3.bf16.msra.mxu0 %v6580_v54  ;;  %v6660_v54 = vpack.c.bf16 %v1160_v46, %v1159_v43  ;;  %v1138_v43 = vld [vmem:[%s10611_s1 + $0x2258] sm:$0xff] }
 0x216   :  { %6583 = vmatprep.subr.bf16.mxu0 %v6582_v56  ;;  %v1129_v56 = vld [vmem:[%s10611_s1 + $0x2210] sm:$0xff] }
 0x217   :  { %6613 = vmatpush3.bf16.msra.mxu1 %v6612_v55  ;;  %v4888_v6 = vpop.f32.mrb[18].mxu0  ;;  %v6630_v55 = vpack.c.bf16 %v1146_v47, %v1145_v35  ;;  %v1170_v35 = vld [vmem:[%s10611_s1 + $0x2358] sm:$0xff]  ;;  %v1155_v47 = vld [vmem:[%s10611_s1 + $0x22e0] sm:$0xff] }
 0x218   :  { %6615 = vmatprep.subr.bf16.mxu1 %v6614_v49  ;;  %v4889_v15 = vpop.f32.mrb[19].mxu0  ;;  %v1147_v49 = vld [vmem:[%s10611_s1 + $0x22a0] sm:$0xff] }
 0x219   :  { %v4923_v16 = vpop.f32.mrb[18].mxu1  ;;  %v4890_v8 = vadd.f32 %v4889_v15, %v4888_v6  ;;  %6585 = vmatpush3.bf16.msra.mxu0 %v6584_v1  ;;  %v6632_v1 = vpack.c.bf16 %v1130_v57, %v1129_v56  ;;  %v1149_v6 = vld [vmem:[%s10611_s1 + $0x22b0] sm:$0xff]  ;;  %v6650_v56 = vpack.c.bf16 %v1156_v53, %v1155_v47  ;;  %v1139_v57 = vld [vmem:[%s10611_s1 + $0x2260] sm:$0xff]  ;;  %v4124_v47 = vld [vmem:[%s10613_s3 + $0x48] sm:$0xff] }
 0x21a   :  { %v4924_v19 = vpop.f32.mrb[19].mxu1  ;;  %6587 = vmatprep.subr.bf16.mxu0 %v6586_v3  ;;  %v6634_v3 = vpack.c.bf16 %v1148_v59, %v1147_v49  ;;  %v1172_v59 = vld [vmem:[%s10611_s1 + $0x2368] sm:$0xff] }
 0x21b   :  { %v4925_v26 = vadd.f32 %v4924_v19, %v4923_v16  ;;  %6617 = vmatpush3.bf16.msra.mxu1 %v6616_v2  ;;  %v2921_v31 = vadd.f32 %v4890_v8, %v10140_v37  ;;  %v1176_v37 = vld [vmem:[%s10611_s1 + $0x2388] sm:$0xff]  ;;  %v6664_v2 = vpack.c.bf16 %v1162_v58, %v1161_v45  ;;  %v1165_v8 = vld [vmem:[%s10611_s1 + $0x2330] sm:$0xff]  ;;  %v6670_v19 = vpack.c.bf16 %v1182_v11, %v1181_v7 }
 0x21c   :  { %6619 = vmatprep.subr.bf16.mxu1 %v6618_v12  ;;  %v6658_v44 = vpack.c.bf16 %v1176_v37, %v1175_v23  ;;  %v1150_v12 = vld [vmem:[%s10611_s1 + $0x22b8] sm:$0xff]  ;;  %v1153_v23 = vld [vmem:[%s10611_s1 + $0x22d0] sm:$0xff]  ;;  %v1140_v45 = vld [vmem:[%s10611_s1 + $0x2268] sm:$0xff] }
 0x21d   :  { %v10350_v24 = vadd.f32 %v4925_v26, %v2921_v31  ;;  %6589 = vmatpush3.bf16.msra.mxu0 %v6588_v9  ;;  %v6638_v16 = vpack.c.bf16 %v1150_v12, %v1149_v6  ;;  %v1166_v9 = vld [vmem:[%s10611_s1 + $0x2338] sm:$0xff]  ;;  %v1152_v26 = vld [vmem:[%s10611_s1 + $0x22c8] sm:$0xff]  ;;  %v1135_v31 = vld [vmem:[%s10611_s1 + $0x2240] sm:$0xff] }
 0x21e   :  { %6591 = vmatprep.subr.bf16.mxu0 %v6590_v22  ;;  %v1184_v22 = vld [vmem:[%s10611_s1 + $0x23c8] sm:$0xff]  ;;  %v6672_v28 = vpack.c.bf16 %v1166_v9, %v1165_v8  ;;  %v6642_v29 = vpack.c.bf16 %v1152_v26, %v1151_v20  ;;  %v1154_v37 = vld [vmem:[%s10611_s1 + $0x22d8] sm:$0xff]  ;;  %v1141_v6 = vld [vmem:[%s10611_s1 + $0x2270] sm:$0xff] }
 0x21f   :  { %6621 = vmatpush3.bf16.msra.mxu1 %v6620_v27  ;;  %v1183_v27 = vld [vmem:[%s10611_s1 + $0x23c0] sm:$0xff]  ;;  %v6646_v40 = vpack.c.bf16 %v1154_v37, %v1153_v23  ;;  %v1142_v12 = vld [vmem:[%s10611_s1 + $0x2278] sm:$0xff]  ;;  %v4117_v23 = vld [vmem:[%s10613_s3 + $0x10] sm:$0xff]  ;;  %v6762_v37 = vmov 0.0|0.0  }
 0x220   :  { %6623 = vmatprep.subr.bf16.mxu1 %v6622_v30  ;;  %v1136_v30 = vld [vmem:[%s10611_s1 + $0x2248] sm:$0xff]  ;;  %v6674_v21 = vpack.c.bf16 %v1184_v22, %v1183_v27  ;;  %v6656_v17 = vpack.c.bf16 %v1142_v12, %v1141_v6 }
 0x221   :  { %6593 = vmatpush3.bf16.msra.mxu0 %v6592_v39  ;;  %v1186_v39 = vld [vmem:[%s10611_s1 + $0x23d8] sm:$0xff] }
 0x222   :  { %6627 = vmatprep.subr.bf16.mxu0 %v6626_v38  ;;  %v6676_v38 = vpack.c.bf16 %v1168_v42, %v1167_v32  ;;  %v6678_v46 = vpack.c.bf16 %v1186_v39, %v1185_v34  ;;  %v4118_v39 = vld [vmem:[%s10613_s3 + $0x18] sm:$0xff] }
 0x223   :  { %6625 = vmatpush3.bf16.msra.mxu1 %v6624_v36  ;;  %v6644_v36 = vpack.c.bf16 %v1136_v30, %v1135_v31 }
 0x224   :  { %6659 = vmatprep.subr.bf16.mxu1 %v6658_v44  ;;  %3899 = vmatmul.mubr.f32.vlgmr.msra.gmra.mrb[32].mxu0 %v10161_v51  ;;  %v1131_v51 = vld [vmem:[%s10611_s1 + $0x2220] sm:$0xff]  ;;  %v1169_v44 = vld [vmem:[%s10611_s1 + $0x2350] sm:$0xff] }
 0x225   :  { %6629 = vmatpush3.bf16.msra.mxu0 %v6628_v50  ;;  %4038 = vmatprep.mubr.f32.mxu0 %v1520_v63  ;;  %v6636_v14 = vpack.c.bf16 %v1132_v4, %v1131_v51  ;;  %v1188_v50 = vld [vmem:[%s10611_s1 + $0x23e8] sm:$0xff]  ;;  %v1157_v63 = vld [vmem:[%s10611_s1 + $0x22f0] sm:$0xff]  ;;  %v6652_v4 = vpack.c.bf16 %v1140_v45, %v1139_v57 }
 0x226   :  { %3969 = vmatmul.mubr.f32.vlgmr.msra.gmra.mrb[32].mxu1 %v10170_v10  ;;  %6631 = vmatprep.subr.bf16.mxu0 %v6630_v55  ;;  %v1164_v10 = vld [vmem:[%s10611_s1 + $0x2328] sm:$0xff]  ;;  %v6680_v55 = vpack.c.bf16 %v1170_v35, %v1169_v44  ;;  %v6682_v49 = vpack.c.bf16 %v1188_v50, %v1187_v48  ;;  %v4122_v44 = vld [vmem:[%s10613_s3 + $0x38] sm:$0xff]  ;;  %v4123_v35 = vld [vmem:[%s10613_s3 + $0x40] sm:$0xff] }
 0x227   :  { %6661 = vmatpush3.bf16.msra.mxu1 %v6660_v54  ;;  %4108 = vmatprep.mubr.f32.mxu1 %v1521_v0  ;;  %v6668_v15 = vpack.c.bf16 %v1164_v10, %v1163_v5  ;;  %v6648_v54 = vpack.c.bf16 %v1138_v43, %v1137_v41  ;;  %v6654_v10 = vpack.c.bf16 %v1158_v60, %v1157_v63  ;;  %v4121_v43 = vld [vmem:[%s10613_s3 + $0x30] sm:$0xff]  ;;  %v4126_v50 = vld [vmem:[%s10613_s3 + $0x58] sm:$0xff]  ;;  %v4128_v57 = vld [vmem:[%s10613_s3 + $0x68] sm:$0xff] }
 0x228   :  { %6663 = vmatprep.subr.bf16.mxu1 %v6662_v13  ;;  %v1171_v13 = vld [vmem:[%s10611_s1 + $0x2360] sm:$0xff]  ;;  %v6703_v53 = vpack.c.bf16 %v4124_v47, %v4123_v35  ;;  %v4125_v48 = vld [vmem:[%s10613_s3 + $0x50] sm:$0xff] }
 0x229   :  { %6633 = vmatpush3.bf16.msra.mxu0 %v6632_v1  ;;  %v1189_v1 = vld [vmem:[%s10611_s1 + $0x23f0] sm:$0xff] }
 0x22a   :  { %6635 = vmatprep.subr.bf16.mxu0 %v6634_v3 }
 0x22b   :  { %6665 = vmatpush3.bf16.msra.mxu1 %v6664_v2  ;;  %v1190_v2 = vld [vmem:[%s10611_s1 + $0x23f8] sm:$0xff] }
 0x22c   :  { %6667 = vmatprep.subr.bf16.mxu1 %v6666_v61  ;;  %v6684_v61 = vpack.c.bf16 %v1172_v59, %v1171_v13  ;;  %v6686_v11 = vpack.c.bf16 %v1190_v2, %v1189_v1 }
 0x22d   :  { %6637 = vmatpush3.bf16.msra.mxu0 %v6636_v14  ;;  %v1173_v14 = vld [vmem:[%s10611_s1 + $0x2370] sm:$0xff] }
 0x22e   :  { %6639 = vmatprep.subr.bf16.mxu0 %v6638_v16 }
 0x22f   :  { %6669 = vmatpush3.bf16.msra.mxu1 %v6668_v15  ;;  %v1174_v15 = vld [vmem:[%s10611_s1 + $0x2378] sm:$0xff] }
 0x230   :  { %6671 = vmatprep.subr.bf16.mxu1 %v6670_v19  ;;  %v6688_v18 = vpack.c.bf16 %v1174_v15, %v1173_v14 }
 0x231   :  { %6641 = vmatpush3.bf16.msra.mxu0 %v6640_v25 }
 0x232   :  { %6643 = vmatprep.subr.bf16.mxu0 %v6642_v29 }
 0x233   :  { %6673 = vmatpush3.bf16.msra.mxu1 %v6672_v28 }
 0x234   :  { %6675 = vmatprep.subr.bf16.mxu1 %v6674_v21 }
 0x235   :  { %6645 = vmatpush3.bf16.msra.mxu0 %v6644_v36  ;;  %v6694_v36 = vpack.c.bf16 %v4118_v39, %v4117_v23 }
 0x236   :  { %6647 = vmatprep.subr.bf16.mxu0 %v6646_v40  ;;  %v4120_v40 = vld [vmem:[%s10613_s3 + $0x28] sm:$0xff] }
 0x237   :  { %6677 = vmatpush3.bf16.msra.mxu1 %v6676_v38  ;;  %v4958_v58 = vpop.f32.mrb[20].mxu0  ;;  %v4119_v38 = vld [vmem:[%s10613_s3 + $0x20] sm:$0xff] }
 0x238   :  { %6679 = vmatprep.subr.bf16.mxu1 %v6678_v46  ;;  %v4959_v62 = vpop.f32.mrb[21].mxu0  ;;  %v6697_v41 = vpack.c.bf16 %v4120_v40, %v4119_v38  ;;  %v6700_v46 = vpack.c.bf16 %v4122_v44, %v4121_v43 }
 0x239   :  { %v4993_v0 = vpop.f32.mrb[20].mxu1  ;;  %v4960_v3 = vadd.f32 %v4959_v62, %v4958_v58  ;;  %6649 = vmatpush3.bf16.msra.mxu0 %v6648_v54  ;;  %v6706_v54 = vpack.c.bf16 %v4126_v50, %v4125_v48  ;;  %v4129_v62 = vld [vmem:[%s10613_s3 + $0x70] sm:$0xff] }
 0x23a   :  { %v4994_v51 = vpop.f32.mrb[21].mxu1  ;;  %6651 = vmatprep.subr.bf16.mxu0 %v6650_v56  ;;  %v4127_v56 = vld [vmem:[%s10613_s3 + $0x60] sm:$0xff] }
 0x23b   :  { %v4995_v5 = vadd.f32 %v4994_v51, %v4993_v0  ;;  %6681 = vmatpush3.bf16.msra.mxu1 %v6680_v55  ;;  %v3061_v7 = vadd.f32 %v4960_v3, %v10350_v24  ;;  %v6709_v58 = vpack.c.bf16 %v4128_v57, %v4127_v56  ;;  %v4130_v0 = vld [vmem:[%s10613_s3 + $0x78] sm:$0xff]  ;;  %v6764_v3 = vmov 0.0  }
 0x23c   :  { %6683 = vmatprep.subr.bf16.mxu1 %v6682_v49  ;;  %v6712_v1 = vpack.c.bf16 %v4130_v0, %v4129_v62 }
 0x23d   :  { %v3131_v16 = vadd.f32 %v4995_v5, %v3061_v7  ;;  %6653 = vmatpush3.bf16.msra.mxu0 %v6652_v4 }
 0x23e   :  { %6655 = vmatprep.subr.bf16.mxu0 %v6654_v10 }
 0x23f   :  { %6685 = vmatpush3.bf16.msra.mxu1 %v6684_v61 }
 0x240   :  { %6687 = vmatprep.subr.bf16.mxu1 %v6686_v11 }
 0x241   :  { %6657 = vmatpush3.bf16.msra.mxu0 %v6656_v17 }
 0x242   :  { %6690 = vmatprep.subr.bf16.mxu0 %v6762_v37 }
 0x243   :  { %6689 = vmatpush3.bf16.msra.mxu1 %v6688_v18 }
 0x244   :  { %4039 = vmatmul.mubr.f32.vlgmr.msra.gmra.mrb[34].mxu0 %v10371_v52  ;;  %v4115_v52 = vld [vmem:[%s10613_s3] sm:$0xff] }
 0x245   :  { %5535 = vmatprep.mubr.msk.f32.mxu0 %vm6763_vm0, %v6764_v3 }
 0x246   :  { %4109 = vmatmul.mubr.f32.vlgmr.msra.gmra.mrb[34].mxu1 %v10380_v33  ;;  %v4116_v33 = vld [vmem:[%s10613_s3 + $0x8] sm:$0xff] }
 0x247   :  { %v6691_v34 = vpack.c.bf16 %v4116_v33, %v4115_v52 }
 0x249   :  { %6692 = vmatpush3.bf16.msra.mxu0 %v6691_v34 }
 0x24a   :  { %6693 = vmatprep.subr.bf16.mxu0 %v6762_v37 }
 0x24d   :  { %6695 = vmatpush3.bf16.msra.mxu0 %v6694_v36 }
 0x24e   :  { %6696 = vmatprep.subr.bf16.mxu0 %v6762_v37 }
 0x251   :  { %6698 = vmatpush3.bf16.msra.mxu0 %v6697_v41 }
 0x252   :  { %6699 = vmatprep.subr.bf16.mxu0 %v6762_v37 }
 0x255   :  { %6701 = vmatpush3.bf16.msra.mxu0 %v6700_v46 }
 0x256   :  { %6702 = vmatprep.subr.bf16.mxu0 %v6762_v37 }
 0x257   :  { %v5028_v24 = vpop.f32.mrb[22].mxu0 }
 0x258   :  { %v5029_v8 = vpop.f32.mrb[23].mxu0 }
 0x259   :  { %v5063_v19 = vpop.f32.mrb[22].mxu1  ;;  %v5030_v9 = vadd.f32 %v5029_v8, %v5028_v24  ;;  %6704 = vmatpush3.bf16.msra.mxu0 %v6703_v53 }
 0x25a   :  { %v5064_v20 = vpop.f32.mrb[23].mxu1  ;;  %6705 = vmatprep.subr.bf16.mxu0 %v6762_v37 }
 0x25b   :  { %v5065_v26 = vadd.f32 %v5064_v20, %v5063_v19  ;;  %v3201_v27 = vadd.f32 %v5030_v9, %v3131_v16 }
 0x25d   :  { %v3271_v22 = vadd.f32 %v5065_v26, %v3201_v27  ;;  %6707 = vmatpush3.bf16.msra.mxu0 %v6706_v54 }
 0x25e   :  { %6708 = vmatprep.subr.bf16.mxu0 %v6762_v37 }
 0x261   :  { %6710 = vmatpush3.bf16.msra.mxu0 %v6709_v58 }
 0x262   :  { %6711 = vmatprep.subr.bf16.mxu0 %v6762_v37  ;;  %v4225_v37 = vld [vmem:[%s10614_s4] ss:$0 sm:$0xff] }
 0x265   :  { %6713 = vmatpush3.bf16.msra.mxu0 %v6712_v1 }
 0x277   :  { %v5098_v25 = vpop.f32.mrb[24].mxu0 }
 0x278   :  { %v5099_v28 = vpop.f32.mrb[25].mxu0 }
 0x279   :  { %v5133_v29 = vpop.f32.mrb[24].mxu1  ;;  %v5100_v31 = vadd.f32 %v5099_v28, %v5098_v25 }
 0x27a   :  { %v5134_v30 = vpop.f32.mrb[25].mxu1 }
 0x27b   :  { %v5135_v32 = vadd.f32 %v5134_v30, %v5133_v29  ;;  %v3341_v21 = vadd.f32 %v5100_v31, %v3271_v22 }
 0x27d   :  { %v3411_v42 = vadd.f32 %v5135_v32, %v3341_v21 }
 0x297   :  { %v5168_v55 = vpop.f32.mrb[26].mxu0 }
 0x298   :  { %v5169_v45 = vpop.f32.mrb[27].mxu0 }
 0x299   :  { %v5203_v13 = vpop.f32.mrb[26].mxu1  ;;  %v5170_v49 = vadd.f32 %v5169_v45, %v5168_v55 }
 0x29a   :  { %v5204_v59 = vpop.f32.mrb[27].mxu1 }
 0x29b   :  { %v5205_v63 = vadd.f32 %v5204_v59, %v5203_v13  ;;  %v3481_v60 = vadd.f32 %v5170_v49, %v3411_v42 }
 0x29d   :  { %v3551_v2 = vadd.f32 %v5205_v63, %v3481_v60 }
 0x2b7   :  { %v5238_v51 = vpop.f32.mrb[28].mxu0 }
 0x2b8   :  { %v5239_v4 = vpop.f32.mrb[29].mxu0 }
 0x2b9   :  { %v5273_v5 = vpop.f32.mrb[28].mxu1  ;;  %v5240_v61 = vadd.f32 %v5239_v4, %v5238_v51 }
 0x2ba   :  { %v5274_v10 = vpop.f32.mrb[29].mxu1 }
 0x2bb   :  { %v5275_v6 = vadd.f32 %v5274_v10, %v5273_v5  ;;  %v3621_v12 = vadd.f32 %v5240_v61, %v3551_v2 }
 0x2bd   :  { %v3691_v7 = vadd.f32 %v5275_v6, %v3621_v12 }
 0x2d7   :  { %v5308_v11 = vpop.f32.mrb[30].mxu0 }
 0x2d8   :  { %v5309_v14 = vpop.f32.mrb[31].mxu0 }
 0x2d9   :  { %v5343_v15 = vpop.f32.mrb[30].mxu1  ;;  %v5310_v16 = vadd.f32 %v5309_v14, %v5308_v11 }
 0x2da   :  { %v5344_v17 = vpop.f32.mrb[31].mxu1 }
 0x2db   :  { %v5345_v18 = vadd.f32 %v5344_v17, %v5343_v15  ;;  %v3761_v24 = vadd.f32 %v5310_v16, %v3691_v7 }
 0x2dd   :  { %v3831_v8 = vadd.f32 %v5345_v18, %v3761_v24 }
 0x2f7   :  { %v5378_v19 = vpop.f32.mrb[32].mxu0 }
 0x2f8   :  { %v5379_v9 = vpop.f32.mrb[33].mxu0 }
 0x2f9   :  { %v5413_v20 = vpop.f32.mrb[32].mxu1  ;;  %v5380_v26 = vadd.f32 %v5379_v9, %v5378_v19 }
 0x2fa   :  { %v5414_v27 = vpop.f32.mrb[33].mxu1 }
 0x2fb   :  { %v5415_v22 = vadd.f32 %v5414_v27, %v5413_v20  ;;  %v3901_v25 = vadd.f32 %v5380_v26, %v3831_v8 }
 0x2fd   :  { %v3971_v28 = vadd.f32 %v5415_v22, %v3901_v25 }
 0x317   :  { %v5448_v29 = vpop.f32.mrb[34].mxu0 }
 0x318   :  { %v5449_v31 = vpop.f32.mrb[35].mxu0 }
 0x319   :  { %v5483_v30 = vpop.f32.mrb[34].mxu1  ;;  %v5450_v32 = vadd.f32 %v5449_v31, %v5448_v29 }
 0x31a   :  { %v5484_v21 = vpop.f32.mrb[35].mxu1 }
 0x31b   :  { %v5485_v42 = vadd.f32 %v5484_v21, %v5483_v30  ;;  %v4041_v52 = vadd.f32 %v5450_v32, %v3971_v28 }
 0x31d   :  { %v4111_v33 = vadd.f32 %v5485_v42, %v4041_v52 }
 0x31f   :  { %v4114_v23 = vmax.f32 %v4111_v33, 0.0 }
 0x321   :  { %5536 = vmatmul.mubr.f32.vlgmr.msra.gmra.mrb[36].mxu0 %v4114_v23 }
 0x3f4   :  { %v4204_v34 = vpop.f32.mrb[36].mxu0 }
 0x3f5   :  { %v4205_v39 = vadd.f32 %v4225_v37, %v4204_v34  ;;  %v5537_v36 = vpop.f32.mrb[37].mxu0 }
 0x3f7   :  { %4209 = vst.msk [vmem:[#allocation2] sm:$0x3] %vm4208_vm1, %v4205_v39 }
 0x3f8   :  { %6748 = shalt.err (!%p6745_p4)
}
 0x3f9   :  { %s6749_s12 = scalar_lea.hbm %s10615_s5, 32 }
 0x3fa   :  { %p6750_p5 = scmp.ne.s32.totalorder %s10615_s5, %s6749_s12  ;;  %p6753_p6 = scmp.lt.u32.totalorder %s6749_s12, %s10615_s5 }
 0x3fc   :  { %p6755_p7 = pnand %p6753_p6, %p6750_p5 }
 0x3fe   :  { %6758 = shalt.err (!%p6755_p7)
}
 0x3ff   :  { %4219 = dma.vmem_to_hbm [thread:$0]  %s4217_s0, 32, %s10615_s5, [#allocation3]  }
 0x400   :  { %6759 = dma.done.wait [#allocation3], 32  }
 0x401   :  { %6760 = vsyncadd [#allocation3], 4294967264 }
 0x402   :  { %4223 = vsyncpa [#allocation3], 1 }

</bundles_post_ra>
